<compile_context>
chip_gen: v6e
topology: v6e:2x2x1
jax: 0.10.0
libtpu: 0.0.40
codegen_flags: <defaults>
</compile_context>

<pallas_src>
import functools

import jax
import jax.numpy as jnp
from jax.experimental import pallas as pl
from jax.experimental.pallas import tpu as pltpu

# ---- hyperparameters (small but structurally identical to the module) ----
VOCAB_SIZE = 65
N_EMBED = 64
N_HEAD = 4
HEAD_SIZE = N_EMBED // N_HEAD
N_LAYER = 2
BLOCK_SIZE = 16          # max sequence length
FF_HIDDEN = 4 * N_EMBED
EPS = 1e-5               # nn.LayerNorm default eps
V_PAD = 128              # lm-head / token-table vocab dim padded to a full lane width
NEG_BIG = -1e30          # finite masking bias (exp underflows to exactly 0 after max-sub)


def _p2_shift(n):
    """log2 of a power-of-two python int (used for shift/and index math in-kernel)."""
    assert n > 0 and (n & (n - 1)) == 0, f"{n} must be a power of two"
    return n.bit_length() - 1


def _layernorm(x, g, b):
    # PyTorch LayerNorm: biased variance over last dim.
    mu = jnp.mean(x, axis=-1, keepdims=True)
    var = jnp.mean((x - mu) ** 2, axis=-1, keepdims=True)
    return (x - mu) * jax.lax.rsqrt(var + EPS) * g + b


# ----------------------------------------------------------------------------
# One fused kernel for the entire forward pass. No grid: whole batch in one program.
# Row layout everywhere inside the layer loop: r = h*(B*T) + b*T + t  (head-replicated).
# ----------------------------------------------------------------------------
def fused_forward_kernel(idx_ref, tok_ref, pos_ref,
                         ln1_g_ref, ln1_b_ref, wq_ref, wk_ref, wv_ref, wo_ref, bo_ref,
                         ln2_g_ref, ln2_b_ref, w1_ref, b1_ref, w2_ref, b2_ref,
                         lnf_g_ref, lnf_b_ref, wlm_ref, blm_ref,
                         out_ref, *, batch, seq_len):
    B, T = batch, seq_len
    C, H, hs = N_EMBED, N_HEAD, HEAD_SIZE
    BT = B * T
    R = H * BT                      # replicated row count (128 for B=2, T=16, H=4)
    f32 = jnp.float32

    sh_t = _p2_shift(T)             # r >> sh_t  == r // T   (group id = h*B + b)
    sh_bt = _p2_shift(BT)           # r >> sh_bt == r // BT  (head id h)
    sh_hs = _p2_shift(hs)           # c >> sh_hs == c // hs  (head owning lane c)

    # ---- constant index fields: built once, iota/shift/and only (no concats) ----
    row_r = jax.lax.broadcasted_iota(jnp.int32, (R, R), 0)
    col_r = jax.lax.broadcasted_iota(jnp.int32, (R, R), 1)
    same_group = (row_r >> sh_t) == (col_r >> sh_t)          # same (head, batch) block
    causal = (row_r & (T - 1)) >= (col_r & (T - 1))          # t_q >= t_k
    bias_full = jnp.where(same_group & causal, 0.0, NEG_BIG).astype(f32)   # (R, R)
    # collapse-and-replicate: out[r,:] = sum over rows r' with (r' mod BT) == (r mod BT)
    collapse_rep = ((row_r & (BT - 1)) == (col_r & (BT - 1))).astype(f32)  # (R, R)
    # head-column mask: replica block h owns lanes [h*hs, (h+1)*hs)
    row_c = jax.lax.broadcasted_iota(jnp.int32, (R, C), 0)
    col_c = jax.lax.broadcasted_iota(jnp.int32, (R, C), 1)
    headmask = ((row_c >> sh_bt) == (col_c >> sh_hs)).astype(f32)          # (R, C)

    # ---- embeddings: one-hot MXU gathers directly in the replicated layout ----
    vocab_iota = jax.lax.broadcasted_iota(jnp.int32, (R, V_PAD), 1)
    tok_oh = (vocab_iota == idx_ref[...]).astype(f32)                      # (R, 128)
    x = jnp.dot(tok_oh, tok_ref[...], preferred_element_type=f32)          # (R, C)
    pos_row = jax.lax.broadcasted_iota(jnp.int32, (R, BLOCK_SIZE), 0)
    pos_col = jax.lax.broadcasted_iota(jnp.int32, (R, BLOCK_SIZE), 1)
    pos_oh = ((pos_row & (T - 1)) == pos_col).astype(f32)                  # (R, block)
    x = x + jnp.dot(pos_oh, pos_ref[...], preferred_element_type=f32)      # (R, C)

    scale = N_EMBED ** (-0.5)       # matches `C ** -0.5` in PyTorch (C = n_embed)
    qk_dims = (((1,), (1,)), ((), ()))    # q @ k.T without an explicit transpose

    for l in range(N_LAYER):        # static loop over layers
        # ---- pre-LN multi-head causal self-attention (block-diagonal formulation) ----
        xn = _layernorm(x, ln1_g_ref[l], ln1_b_ref[l])
        q = jnp.dot(xn, wq_ref[l], preferred_element_type=f32) * headmask  # head-h lanes only
        k = jnp.dot(xn, wk_ref[l], preferred_element_type=f32)
        v = jnp.dot(xn, wv_ref[l], preferred_element_type=f32)

        scores = jax.lax.dot_general(q, k, qk_dims,
                                     preferred_element_type=f32) * scale + bias_full
        m = jnp.max(scores, axis=-1, keepdims=True)
        e = jnp.exp(scores - m)
        denom = jnp.sum(e, axis=-1, keepdims=True)
        probs = e * pl.reciprocal(denom, approx=True)                      # (R, R)
        # attention dropout: identity in eval mode

        att = jnp.dot(probs, v, preferred_element_type=f32) * headmask     # (R, C)
        proj = jnp.dot(att, wo_ref[l], preferred_element_type=f32)         # per-head partials
        att_out = jnp.dot(collapse_rep, proj, preferred_element_type=f32) + bo_ref[l]
        # projection dropout: identity in eval mode
        x = x + att_out

        # ---- pre-LN feed-forward ----
        xn2 = _layernorm(x, ln2_g_ref[l], ln2_b_ref[l])
        hid = jnp.maximum(
            jnp.dot(xn2, w1_ref[l], preferred_element_type=f32) + b1_ref[l], 0.0)
        ff = jnp.dot(hid, w2_ref[l], preferred_element_type=f32) + b2_ref[l]
        # FFN dropout: identity in eval mode
        x = x + ff

    # ---- final LayerNorm + LM head on one replica (sublane-aligned static slice) ----
    xf = x[:BT, :]
    xn = _layernorm(xf, lnf_g_ref[...], lnf_b_ref[...])
    out_ref[...] = (jnp.dot(xn, wlm_ref[...], preferred_element_type=f32)
                    + blm_ref[...])


# ----------------------------------------------------------------------------
# Full model forward: one pallas_call for everything.
# ----------------------------------------------------------------------------
def bigram_forward(idx, params):
    B, T = idx.shape
    assert T <= BLOCK_SIZE
    for n in (T, B * T, HEAD_SIZE):
        assert n > 0 and (n & (n - 1)) == 0, "power-of-two sizes assumed by index math"

    idx_flat = idx.reshape(B * T, 1).astype(jnp.int32)
    idx_rep = jnp.tile(idx_flat, (N_HEAD, 1))            # (H*B*T, 1), row order (h,b,t)

    # zero-pad vocab dims to a full lane width (padded rows/cols contribute exact zeros)
    tok_pad = jnp.pad(params["tok_table"], ((0, V_PAD - VOCAB_SIZE), (0, 0)))
    w_lm_pad = jnp.pad(params["w_lm"], ((0, 0), (0, V_PAD - VOCAB_SIZE)))
    b_lm_pad = jnp.pad(params["b_lm"], ((0, 0), (0, V_PAD - VOCAB_SIZE)))

    args = (idx_rep, tok_pad, params["pos_table"],
            params["ln1_g"], params["ln1_b"],
            params["wq"], params["wk"], params["wv"], params["wo"], params["bo"],
            params["ln2_g"], params["ln2_b"],
            params["w1"], params["b1"], params["w2"], params["b2"],
            params["lnf_g"], params["lnf_b"], w_lm_pad, b_lm_pad)

    kernel = functools.partial(fused_forward_kernel, batch=B, seq_len=T)
    logits_pad = pl.pallas_call(
        kernel,
        out_shape=jax.ShapeDtypeStruct((B * T, V_PAD), jnp.float32),
        in_specs=[pl.BlockSpec(memory_space=pltpu.MemorySpace.VMEM) for _ in args],
        out_specs=pl.BlockSpec(memory_space=pltpu.MemorySpace.VMEM),
    )(*args)

    logits = logits_pad[:, :VOCAB_SIZE].reshape(B, T, VOCAB_SIZE)
    # targets=None path: loss is None
    # TODO(synk): cross-entropy loss branch (targets != None) not implemented here.
    return logits, None


# ----------------------------------------------------------------------------
# Deterministic parameter init (synthetic, not a checkpoint load).
# Per-layer weights are stacked along a leading layer axis for the fused kernel.
# Q/K/V weight columns are head-major: head h uses columns [h*hs, (h+1)*hs).
# ----------------------------------------------------------------------------
def init_params(key):
    def normal(k, shape, scale=0.02):
        return (scale * jax.random.normal(k, shape)).astype(jnp.float32)

    keys = jax.random.split(key, 3 + N_LAYER)
    params = {
        "tok_table": normal(keys[0], (VOCAB_SIZE, N_EMBED)),
        "pos_table": normal(keys[1], (BLOCK_SIZE, N_EMBED)),
        "lnf_g": jnp.ones((1, N_EMBED), jnp.float32),
        "lnf_b": jnp.zeros((1, N_EMBED), jnp.float32),
        "w_lm": normal(keys[2], (N_EMBED, VOCAB_SIZE)),
        "b_lm": jnp.zeros((1, VOCAB_SIZE), jnp.float32),
    }
    wq, wk, wv, wo, bo, w1, b1, w2, b2 = [], [], [], [], [], [], [], [], []
    ln1_g, ln1_b, ln2_g, ln2_b = [], [], [], []
    for l in range(N_LAYER):
        ks = jax.random.split(keys[3 + l], 6)
        wq.append(normal(ks[0], (N_EMBED, N_EMBED)))
        wk.append(normal(ks[1], (N_EMBED, N_EMBED)))
        wv.append(normal(ks[2], (N_EMBED, N_EMBED)))
        wo.append(normal(ks[3], (N_EMBED, N_EMBED)))
        bo.append(jnp.zeros((1, N_EMBED), jnp.float32))
        w1.append(normal(ks[4], (N_EMBED, FF_HIDDEN)))
        b1.append(jnp.zeros((1, FF_HIDDEN), jnp.float32))
        w2.append(normal(ks[5], (FF_HIDDEN, N_EMBED)))
        b2.append(jnp.zeros((1, N_EMBED), jnp.float32))
        ln1_g.append(jnp.ones((1, N_EMBED), jnp.float32))
        ln1_b.append(jnp.zeros((1, N_EMBED), jnp.float32))
        ln2_g.append(jnp.ones((1, N_EMBED), jnp.float32))
        ln2_b.append(jnp.zeros((1, N_EMBED), jnp.float32))

    stack = lambda xs: jnp.stack(xs, axis=0)
    params.update(
        wq=stack(wq), wk=stack(wk), wv=stack(wv), wo=stack(wo), bo=stack(bo),
        w1=stack(w1), b1=stack(b1), w2=stack(w2), b2=stack(b2),
        ln1_g=stack(ln1_g), ln1_b=stack(ln1_b),
        ln2_g=stack(ln2_g), ln2_b=stack(ln2_b),
    )
    return params


# ----------------------------------------------------------------------------
# Pure-JAX reference (mirrors the PyTorch forward) for the correctness check
# ----------------------------------------------------------------------------
def _ln_ref(x, g, b):
    mu = x.mean(-1, keepdims=True)
    var = ((x - mu) ** 2).mean(-1, keepdims=True)
    return (x - mu) / jnp.sqrt(var + EPS) * g + b


def bigram_forward_ref(idx, params):
    B, T = idx.shape
    x = params["tok_table"][idx] + params["pos_table"][:T]
    mask = jnp.tril(jnp.ones((T, T), bool))
    for l in range(N_LAYER):
        xn = _ln_ref(x, params["ln1_g"][l, 0], params["ln1_b"][l, 0])
        q = xn @ params["wq"][l]
        k = xn @ params["wk"][l]
        v = xn @ params["wv"][l]
        heads = []
        for h in range(N_HEAD):
            sl = slice(h * HEAD_SIZE, (h + 1) * HEAD_SIZE)
            wei = (q[..., sl] @ jnp.swapaxes(k[..., sl], -1, -2)) * (N_EMBED ** -0.5)
            wei = jnp.where(mask, wei, -jnp.inf)
            wei = jax.nn.softmax(wei, axis=-1)
            heads.append(wei @ v[..., sl])
        att = jnp.concatenate(heads, axis=-1) @ params["wo"][l] + params["bo"][l, 0]
        x = x + att
        xn2 = _ln_ref(x, params["ln2_g"][l, 0], params["ln2_b"][l, 0])
        ff = (jnp.maximum(xn2 @ params["w1"][l] + params["b1"][l, 0], 0.0)
              @ params["w2"][l] + params["b2"][l, 0])
        x = x + ff
    xn = _ln_ref(x, params["lnf_g"][0], params["lnf_b"][0])
    logits = xn @ params["w_lm"] + params["b_lm"][0]
    return logits, None


# ----------------------------------------------------------------------------
if __name__ == "__main__":
    key = jax.random.PRNGKey(0)
    k_idx, k_params = jax.random.split(key)

    B, T = 2, BLOCK_SIZE
    idx = jax.random.randint(k_idx, (B, T), 0, VOCAB_SIZE, dtype=jnp.int32)
    params = init_params(k_params)

    logits, loss = bigram_forward(idx, params)
    logits = jax.block_until_ready(logits)

    assert logits.shape == (B, T, VOCAB_SIZE)
    assert loss is None

    ref_logits, _ = bigram_forward_ref(idx, params)
    ref_logits = jax.block_until_ready(ref_logits)
    assert jnp.allclose(logits, ref_logits, atol=5e-3, rtol=5e-3), (
        float(jnp.max(jnp.abs(logits - ref_logits))))

    print("KERNEL_OK")
</pallas_src>

<mosaic_0001>
module attributes {stable_mosaic.version = 11 : i64} {
  func.func @fused_forward_kernel(%arg0: memref<128x1xi32, #tpu.memory_space<vmem>>, %arg1: memref<128x64xf32, #tpu.memory_space<vmem>>, %arg2: memref<16x64xf32, #tpu.memory_space<vmem>>, %arg3: memref<2x1x64xf32, #tpu.memory_space<vmem>>, %arg4: memref<2x1x64xf32, #tpu.memory_space<vmem>>, %arg5: memref<2x64x64xf32, #tpu.memory_space<vmem>>, %arg6: memref<2x64x64xf32, #tpu.memory_space<vmem>>, %arg7: memref<2x64x64xf32, #tpu.memory_space<vmem>>, %arg8: memref<2x64x64xf32, #tpu.memory_space<vmem>>, %arg9: memref<2x1x64xf32, #tpu.memory_space<vmem>>, %arg10: memref<2x1x64xf32, #tpu.memory_space<vmem>>, %arg11: memref<2x1x64xf32, #tpu.memory_space<vmem>>, %arg12: memref<2x64x256xf32, #tpu.memory_space<vmem>>, %arg13: memref<2x1x256xf32, #tpu.memory_space<vmem>>, %arg14: memref<2x256x64xf32, #tpu.memory_space<vmem>>, %arg15: memref<2x1x64xf32, #tpu.memory_space<vmem>>, %arg16: memref<1x64xf32, #tpu.memory_space<vmem>>, %arg17: memref<1x64xf32, #tpu.memory_space<vmem>>, %arg18: memref<64x128xf32, #tpu.memory_space<vmem>>, %arg19: memref<1x128xf32, #tpu.memory_space<vmem>>, %arg20: memref<32x128xf32, #tpu.memory_space<vmem>>) attributes {dimension_semantics = [], scalar_prefetch = 0 : i64, scratch_operands = 0 : i64, tpu.core_type = #tpu.core_type<tc>} {
    %0 = tpu.iota {dimensions = array<i32: 0>} : vector<128x128xi32>
    %1 = tpu.iota {dimensions = array<i32: 1>} : vector<128x128xi32>
    %c4_i32 = arith.constant 4 : i32
    %2 = vector.broadcast %c4_i32 : i32 to vector<128x128xi32>
    %3 = arith.shrsi %0, %2 : vector<128x128xi32>
    %c4_i32_0 = arith.constant 4 : i32
    %4 = vector.broadcast %c4_i32_0 : i32 to vector<128x128xi32>
    %5 = arith.shrsi %1, %4 : vector<128x128xi32>
    %6 = arith.cmpi eq, %3, %5 : vector<128x128xi32>
    %c15_i32 = arith.constant 15 : i32
    %7 = vector.broadcast %c15_i32 : i32 to vector<128x128xi32>
    %8 = arith.andi %0, %7 : vector<128x128xi32>
    %c15_i32_1 = arith.constant 15 : i32
    %9 = vector.broadcast %c15_i32_1 : i32 to vector<128x128xi32>
    %10 = arith.andi %1, %9 : vector<128x128xi32>
    %11 = arith.cmpi sge, %8, %10 : vector<128x128xi32>
    %12 = arith.andi %6, %11 : vector<128x128xi1>
    %cst = arith.constant 0.000000e+00 : f32
    %cst_2 = arith.constant -1.000000e+30 : f32
    %13 = vector.broadcast %cst : f32 to vector<128x128xf32>
    %14 = vector.broadcast %cst_2 : f32 to vector<128x128xf32>
    %15 = arith.select %12, %13, %14 : vector<128x128xi1>, vector<128x128xf32>
    %c31_i32 = arith.constant 31 : i32
    %16 = vector.broadcast %c31_i32 : i32 to vector<128x128xi32>
    %17 = arith.andi %0, %16 : vector<128x128xi32>
    %c31_i32_3 = arith.constant 31 : i32
    %18 = vector.broadcast %c31_i32_3 : i32 to vector<128x128xi32>
    %19 = arith.andi %1, %18 : vector<128x128xi32>
    %20 = arith.cmpi eq, %17, %19 : vector<128x128xi32>
    %21 = arith.extui %20 : vector<128x128xi1> to vector<128x128xi32>
    %22 = arith.sitofp %21 : vector<128x128xi32> to vector<128x128xf32>
    %23 = tpu.iota {dimensions = array<i32: 0>} : vector<128x64xi32>
    %24 = tpu.iota {dimensions = array<i32: 1>} : vector<128x64xi32>
    %c5_i32 = arith.constant 5 : i32
    %25 = vector.broadcast %c5_i32 : i32 to vector<128x64xi32>
    %26 = arith.shrsi %23, %25 : vector<128x64xi32>
    %c4_i32_4 = arith.constant 4 : i32
    %27 = vector.broadcast %c4_i32_4 : i32 to vector<128x64xi32>
    %28 = arith.shrsi %24, %27 : vector<128x64xi32>
    %29 = arith.cmpi eq, %26, %28 : vector<128x64xi32>
    %30 = arith.extui %29 : vector<128x64xi1> to vector<128x64xi32>
    %31 = arith.sitofp %30 : vector<128x64xi32> to vector<128x64xf32>
    %32 = tpu.iota {dimensions = array<i32: 1>} : vector<128x128xi32>
    %c0 = arith.constant 0 : index
    %c0_5 = arith.constant 0 : index
    %33 = vector.load %arg0[%c0, %c0_5] : memref<128x1xi32, #tpu.memory_space<vmem>>, vector<128x1xi32>
    %34 = vector.broadcast %33 : vector<128x1xi32> to vector<128x128xi32>
    %35 = arith.cmpi eq, %32, %34 : vector<128x128xi32>
    %36 = arith.extui %35 : vector<128x128xi1> to vector<128x128xi32>
    %37 = arith.sitofp %36 : vector<128x128xi32> to vector<128x128xf32>
    %c0_6 = arith.constant 0 : index
    %c0_7 = arith.constant 0 : index
    %38 = vector.load %arg1[%c0_6, %c0_7] : memref<128x64xf32, #tpu.memory_space<vmem>>, vector<128x64xf32>
    %cst_8 = arith.constant dense<0.000000e+00> : vector<128x64xf32>
    %39 = tpu.matmul %37, %38, %cst_8 {dimension_numbers = #tpu.dot_dimension_numbers<[1], [0], [0], [1], [0, 0, 1, 1], [], []>} : vector<128x128xf32>, vector<128x64xf32>, vector<128x64xf32> -> vector<128x64xf32>
    %40 = tpu.iota {dimensions = array<i32: 0>} : vector<128x16xi32>
    %41 = tpu.iota {dimensions = array<i32: 1>} : vector<128x16xi32>
    %c15_i32_9 = arith.constant 15 : i32
    %42 = vector.broadcast %c15_i32_9 : i32 to vector<128x16xi32>
    %43 = arith.andi %40, %42 : vector<128x16xi32>
    %44 = arith.cmpi eq, %43, %41 : vector<128x16xi32>
    %45 = arith.extui %44 : vector<128x16xi1> to vector<128x16xi32>
    %46 = arith.sitofp %45 : vector<128x16xi32> to vector<128x16xf32>
    %c0_10 = arith.constant 0 : index
    %c0_11 = arith.constant 0 : index
    %47 = vector.load %arg2[%c0_10, %c0_11] : memref<16x64xf32, #tpu.memory_space<vmem>>, vector<16x64xf32>
    %cst_12 = arith.constant dense<0.000000e+00> : vector<128x64xf32>
    %48 = tpu.matmul %46, %47, %cst_12 {dimension_numbers = #tpu.dot_dimension_numbers<[1], [0], [0], [1], [0, 0, 1, 1], [], []>} : vector<128x16xf32>, vector<16x64xf32>, vector<128x64xf32> -> vector<128x64xf32>
    %49 = arith.addf %39, %48 : vector<128x64xf32>
    %c0_13 = arith.constant 0 : index
    %c0_14 = arith.constant 0 : index
    %c0_15 = arith.constant 0 : index
    %50 = vector.load %arg3[%c0_13, %c0_14, %c0_15] : memref<2x1x64xf32, #tpu.memory_space<vmem>>, vector<1x1x64xf32>
    %51 = vector.shape_cast %50 : vector<1x1x64xf32> to vector<1x64xf32>
    %c0_16 = arith.constant 0 : index
    %c0_17 = arith.constant 0 : index
    %c0_18 = arith.constant 0 : index
    %52 = vector.load %arg4[%c0_16, %c0_17, %c0_18] : memref<2x1x64xf32, #tpu.memory_space<vmem>>, vector<1x1x64xf32>
    %53 = vector.shape_cast %52 : vector<1x1x64xf32> to vector<1x64xf32>
    %cst_19 = arith.constant dense<0.000000e+00> : vector<128xf32>
    %54 = vector.multi_reduction <add>, %49, %cst_19 [1] : vector<128x64xf32> to vector<128xf32>
    %55 = vector.shape_cast %54 : vector<128xf32> to vector<128x1xf32>
    %cst_20 = arith.constant 6.400000e+01 : f32
    %56 = vector.broadcast %cst_20 : f32 to vector<128x1xf32>
    %57 = arith.divf %55, %56 : vector<128x1xf32>
    %58 = vector.broadcast %57 : vector<128x1xf32> to vector<128x64xf32>
    %59 = arith.subf %49, %58 : vector<128x64xf32>
    %60 = arith.mulf %59, %59 : vector<128x64xf32>
    %cst_21 = arith.constant dense<0.000000e+00> : vector<128xf32>
    %61 = vector.multi_reduction <add>, %60, %cst_21 [1] : vector<128x64xf32> to vector<128xf32>
    %62 = vector.shape_cast %61 : vector<128xf32> to vector<128x1xf32>
    %cst_22 = arith.constant 6.400000e+01 : f32
    %63 = vector.broadcast %cst_22 : f32 to vector<128x1xf32>
    %64 = arith.divf %62, %63 : vector<128x1xf32>
    %65 = vector.broadcast %57 : vector<128x1xf32> to vector<128x64xf32>
    %66 = arith.subf %49, %65 : vector<128x64xf32>
    %cst_23 = arith.constant 9.99999974E-6 : f32
    %67 = vector.broadcast %cst_23 : f32 to vector<128x1xf32>
    %68 = arith.addf %64, %67 : vector<128x1xf32>
    %69 = math.rsqrt %68 : vector<128x1xf32>
    %70 = vector.broadcast %69 : vector<128x1xf32> to vector<128x64xf32>
    %71 = arith.mulf %66, %70 : vector<128x64xf32>
    %72 = vector.broadcast %51 : vector<1x64xf32> to vector<128x64xf32>
    %73 = arith.mulf %71, %72 : vector<128x64xf32>
    %74 = vector.broadcast %53 : vector<1x64xf32> to vector<128x64xf32>
    %75 = arith.addf %73, %74 : vector<128x64xf32>
    %c0_24 = arith.constant 0 : index
    %c0_25 = arith.constant 0 : index
    %c0_26 = arith.constant 0 : index
    %76 = vector.load %arg5[%c0_24, %c0_25, %c0_26] : memref<2x64x64xf32, #tpu.memory_space<vmem>>, vector<1x64x64xf32>
    %77 = vector.shape_cast %76 : vector<1x64x64xf32> to vector<64x64xf32>
    %cst_27 = arith.constant dense<0.000000e+00> : vector<128x64xf32>
    %78 = tpu.matmul %75, %77, %cst_27 {dimension_numbers = #tpu.dot_dimension_numbers<[1], [0], [0], [1], [0, 0, 1, 1], [], []>} : vector<128x64xf32>, vector<64x64xf32>, vector<128x64xf32> -> vector<128x64xf32>
    %79 = arith.mulf %78, %31 : vector<128x64xf32>
    %c0_28 = arith.constant 0 : index
    %c0_29 = arith.constant 0 : index
    %c0_30 = arith.constant 0 : index
    %80 = vector.load %arg6[%c0_28, %c0_29, %c0_30] : memref<2x64x64xf32, #tpu.memory_space<vmem>>, vector<1x64x64xf32>
    %81 = vector.shape_cast %80 : vector<1x64x64xf32> to vector<64x64xf32>
    %cst_31 = arith.constant dense<0.000000e+00> : vector<128x64xf32>
    %82 = tpu.matmul %75, %81, %cst_31 {dimension_numbers = #tpu.dot_dimension_numbers<[1], [0], [0], [1], [0, 0, 1, 1], [], []>} : vector<128x64xf32>, vector<64x64xf32>, vector<128x64xf32> -> vector<128x64xf32>
    %c0_32 = arith.constant 0 : index
    %c0_33 = arith.constant 0 : index
    %c0_34 = arith.constant 0 : index
    %83 = vector.load %arg7[%c0_32, %c0_33, %c0_34] : memref<2x64x64xf32, #tpu.memory_space<vmem>>, vector<1x64x64xf32>
    %84 = vector.shape_cast %83 : vector<1x64x64xf32> to vector<64x64xf32>
    %cst_35 = arith.constant dense<0.000000e+00> : vector<128x64xf32>
    %85 = tpu.matmul %75, %84, %cst_35 {dimension_numbers = #tpu.dot_dimension_numbers<[1], [0], [0], [1], [0, 0, 1, 1], [], []>} : vector<128x64xf32>, vector<64x64xf32>, vector<128x64xf32> -> vector<128x64xf32>
    %cst_36 = arith.constant dense<0.000000e+00> : vector<128x128xf32>
    %86 = tpu.matmul %79, %82, %cst_36 {dimension_numbers = #tpu.dot_dimension_numbers<[1], [1], [0], [0], [0, 0, 1, 0], [], []>} : vector<128x64xf32>, vector<128x64xf32>, vector<128x128xf32> -> vector<128x128xf32>
    %cst_37 = arith.constant 1.250000e-01 : f32
    %87 = vector.broadcast %cst_37 : f32 to vector<128x128xf32>
    %88 = arith.mulf %86, %87 : vector<128x128xf32>
    %89 = arith.addf %88, %15 : vector<128x128xf32>
    %cst_38 = arith.constant dense<0xFF800000> : vector<128xf32>
    %90 = vector.multi_reduction <maximumf>, %89, %cst_38 [1] : vector<128x128xf32> to vector<128xf32>
    %91 = vector.shape_cast %90 : vector<128xf32> to vector<128x1xf32>
    %92 = vector.broadcast %91 : vector<128x1xf32> to vector<128x128xf32>
    %93 = arith.subf %89, %92 : vector<128x128xf32>
    %94 = math.exp %93 : vector<128x128xf32>
    %cst_39 = arith.constant dense<0.000000e+00> : vector<128xf32>
    %95 = vector.multi_reduction <add>, %94, %cst_39 [1] : vector<128x128xf32> to vector<128xf32>
    %96 = vector.shape_cast %95 : vector<128xf32> to vector<128x1xf32>
    %97 = tpu.reciprocal %96 {approx = true} : vector<128x1xf32> -> vector<128x1xf32>
    %98 = vector.broadcast %97 : vector<128x1xf32> to vector<128x128xf32>
    %99 = arith.mulf %94, %98 : vector<128x128xf32>
    %cst_40 = arith.constant dense<0.000000e+00> : vector<128x64xf32>
    %100 = tpu.matmul %99, %85, %cst_40 {dimension_numbers = #tpu.dot_dimension_numbers<[1], [0], [0], [1], [0, 0, 1, 1], [], []>} : vector<128x128xf32>, vector<128x64xf32>, vector<128x64xf32> -> vector<128x64xf32>
    %101 = arith.mulf %100, %31 : vector<128x64xf32>
    %c0_41 = arith.constant 0 : index
    %c0_42 = arith.constant 0 : index
    %c0_43 = arith.constant 0 : index
    %102 = vector.load %arg8[%c0_41, %c0_42, %c0_43] : memref<2x64x64xf32, #tpu.memory_space<vmem>>, vector<1x64x64xf32>
    %103 = vector.shape_cast %102 : vector<1x64x64xf32> to vector<64x64xf32>
    %cst_44 = arith.constant dense<0.000000e+00> : vector<128x64xf32>
    %104 = tpu.matmul %101, %103, %cst_44 {dimension_numbers = #tpu.dot_dimension_numbers<[1], [0], [0], [1], [0, 0, 1, 1], [], []>} : vector<128x64xf32>, vector<64x64xf32>, vector<128x64xf32> -> vector<128x64xf32>
    %cst_45 = arith.constant dense<0.000000e+00> : vector<128x64xf32>
    %105 = tpu.matmul %22, %104, %cst_45 {dimension_numbers = #tpu.dot_dimension_numbers<[1], [0], [0], [1], [0, 0, 1, 1], [], []>} : vector<128x128xf32>, vector<128x64xf32>, vector<128x64xf32> -> vector<128x64xf32>
    %c0_46 = arith.constant 0 : index
    %c0_47 = arith.constant 0 : index
    %c0_48 = arith.constant 0 : index
    %106 = vector.load %arg9[%c0_46, %c0_47, %c0_48] : memref<2x1x64xf32, #tpu.memory_space<vmem>>, vector<1x1x64xf32>
    %107 = vector.shape_cast %106 : vector<1x1x64xf32> to vector<1x64xf32>
    %108 = vector.broadcast %107 : vector<1x64xf32> to vector<128x64xf32>
    %109 = arith.addf %105, %108 : vector<128x64xf32>
    %110 = arith.addf %49, %109 : vector<128x64xf32>
    %c0_49 = arith.constant 0 : index
    %c0_50 = arith.constant 0 : index
    %c0_51 = arith.constant 0 : index
    %111 = vector.load %arg10[%c0_49, %c0_50, %c0_51] : memref<2x1x64xf32, #tpu.memory_space<vmem>>, vector<1x1x64xf32>
    %112 = vector.shape_cast %111 : vector<1x1x64xf32> to vector<1x64xf32>
    %c0_52 = arith.constant 0 : index
    %c0_53 = arith.constant 0 : index
    %c0_54 = arith.constant 0 : index
    %113 = vector.load %arg11[%c0_52, %c0_53, %c0_54] : memref<2x1x64xf32, #tpu.memory_space<vmem>>, vector<1x1x64xf32>
    %114 = vector.shape_cast %113 : vector<1x1x64xf32> to vector<1x64xf32>
    %cst_55 = arith.constant dense<0.000000e+00> : vector<128xf32>
    %115 = vector.multi_reduction <add>, %110, %cst_55 [1] : vector<128x64xf32> to vector<128xf32>
    %116 = vector.shape_cast %115 : vector<128xf32> to vector<128x1xf32>
    %cst_56 = arith.constant 6.400000e+01 : f32
    %117 = vector.broadcast %cst_56 : f32 to vector<128x1xf32>
    %118 = arith.divf %116, %117 : vector<128x1xf32>
    %119 = vector.broadcast %118 : vector<128x1xf32> to vector<128x64xf32>
    %120 = arith.subf %110, %119 : vector<128x64xf32>
    %121 = arith.mulf %120, %120 : vector<128x64xf32>
    %cst_57 = arith.constant dense<0.000000e+00> : vector<128xf32>
    %122 = vector.multi_reduction <add>, %121, %cst_57 [1] : vector<128x64xf32> to vector<128xf32>
    %123 = vector.shape_cast %122 : vector<128xf32> to vector<128x1xf32>
    %cst_58 = arith.constant 6.400000e+01 : f32
    %124 = vector.broadcast %cst_58 : f32 to vector<128x1xf32>
    %125 = arith.divf %123, %124 : vector<128x1xf32>
    %126 = vector.broadcast %118 : vector<128x1xf32> to vector<128x64xf32>
    %127 = arith.subf %110, %126 : vector<128x64xf32>
    %cst_59 = arith.constant 9.99999974E-6 : f32
    %128 = vector.broadcast %cst_59 : f32 to vector<128x1xf32>
    %129 = arith.addf %125, %128 : vector<128x1xf32>
    %130 = math.rsqrt %129 : vector<128x1xf32>
    %131 = vector.broadcast %130 : vector<128x1xf32> to vector<128x64xf32>
    %132 = arith.mulf %127, %131 : vector<128x64xf32>
    %133 = vector.broadcast %112 : vector<1x64xf32> to vector<128x64xf32>
    %134 = arith.mulf %132, %133 : vector<128x64xf32>
    %135 = vector.broadcast %114 : vector<1x64xf32> to vector<128x64xf32>
    %136 = arith.addf %134, %135 : vector<128x64xf32>
    %c0_60 = arith.constant 0 : index
    %c0_61 = arith.constant 0 : index
    %c0_62 = arith.constant 0 : index
    %137 = vector.load %arg12[%c0_60, %c0_61, %c0_62] : memref<2x64x256xf32, #tpu.memory_space<vmem>>, vector<1x64x256xf32>
    %138 = vector.shape_cast %137 : vector<1x64x256xf32> to vector<64x256xf32>
    %cst_63 = arith.constant dense<0.000000e+00> : vector<128x256xf32>
    %139 = tpu.matmul %136, %138, %cst_63 {dimension_numbers = #tpu.dot_dimension_numbers<[1], [0], [0], [1], [0, 0, 1, 1], [], []>} : vector<128x64xf32>, vector<64x256xf32>, vector<128x256xf32> -> vector<128x256xf32>
    %c0_64 = arith.constant 0 : index
    %c0_65 = arith.constant 0 : index
    %c0_66 = arith.constant 0 : index
    %140 = vector.load %arg13[%c0_64, %c0_65, %c0_66] : memref<2x1x256xf32, #tpu.memory_space<vmem>>, vector<1x1x256xf32>
    %141 = vector.shape_cast %140 : vector<1x1x256xf32> to vector<1x256xf32>
    %142 = vector.broadcast %141 : vector<1x256xf32> to vector<128x256xf32>
    %143 = arith.addf %139, %142 : vector<128x256xf32>
    %cst_67 = arith.constant 0.000000e+00 : f32
    %144 = vector.broadcast %cst_67 : f32 to vector<128x256xf32>
    %145 = arith.maximumf %143, %144 : vector<128x256xf32>
    %c0_68 = arith.constant 0 : index
    %c0_69 = arith.constant 0 : index
    %c0_70 = arith.constant 0 : index
    %146 = vector.load %arg14[%c0_68, %c0_69, %c0_70] : memref<2x256x64xf32, #tpu.memory_space<vmem>>, vector<1x256x64xf32>
    %147 = vector.shape_cast %146 : vector<1x256x64xf32> to vector<256x64xf32>
    %cst_71 = arith.constant dense<0.000000e+00> : vector<128x64xf32>
    %148 = tpu.matmul %145, %147, %cst_71 {dimension_numbers = #tpu.dot_dimension_numbers<[1], [0], [0], [1], [0, 0, 1, 1], [], []>} : vector<128x256xf32>, vector<256x64xf32>, vector<128x64xf32> -> vector<128x64xf32>
    %c0_72 = arith.constant 0 : index
    %c0_73 = arith.constant 0 : index
    %c0_74 = arith.constant 0 : index
    %149 = vector.load %arg15[%c0_72, %c0_73, %c0_74] : memref<2x1x64xf32, #tpu.memory_space<vmem>>, vector<1x1x64xf32>
    %150 = vector.shape_cast %149 : vector<1x1x64xf32> to vector<1x64xf32>
    %151 = vector.broadcast %150 : vector<1x64xf32> to vector<128x64xf32>
    %152 = arith.addf %148, %151 : vector<128x64xf32>
    %153 = arith.addf %110, %152 : vector<128x64xf32>
    %c1 = arith.constant 1 : index
    %c0_75 = arith.constant 0 : index
    %c0_76 = arith.constant 0 : index
    %154 = vector.load %arg3[%c1, %c0_75, %c0_76] : memref<2x1x64xf32, #tpu.memory_space<vmem>>, vector<1x1x64xf32>
    %155 = vector.shape_cast %154 : vector<1x1x64xf32> to vector<1x64xf32>
    %c1_77 = arith.constant 1 : index
    %c0_78 = arith.constant 0 : index
    %c0_79 = arith.constant 0 : index
    %156 = vector.load %arg4[%c1_77, %c0_78, %c0_79] : memref<2x1x64xf32, #tpu.memory_space<vmem>>, vector<1x1x64xf32>
    %157 = vector.shape_cast %156 : vector<1x1x64xf32> to vector<1x64xf32>
    %cst_80 = arith.constant dense<0.000000e+00> : vector<128xf32>
    %158 = vector.multi_reduction <add>, %153, %cst_80 [1] : vector<128x64xf32> to vector<128xf32>
    %159 = vector.shape_cast %158 : vector<128xf32> to vector<128x1xf32>
    %cst_81 = arith.constant 6.400000e+01 : f32
    %160 = vector.broadcast %cst_81 : f32 to vector<128x1xf32>
    %161 = arith.divf %159, %160 : vector<128x1xf32>
    %162 = vector.broadcast %161 : vector<128x1xf32> to vector<128x64xf32>
    %163 = arith.subf %153, %162 : vector<128x64xf32>
    %164 = arith.mulf %163, %163 : vector<128x64xf32>
    %cst_82 = arith.constant dense<0.000000e+00> : vector<128xf32>
    %165 = vector.multi_reduction <add>, %164, %cst_82 [1] : vector<128x64xf32> to vector<128xf32>
    %166 = vector.shape_cast %165 : vector<128xf32> to vector<128x1xf32>
    %cst_83 = arith.constant 6.400000e+01 : f32
    %167 = vector.broadcast %cst_83 : f32 to vector<128x1xf32>
    %168 = arith.divf %166, %167 : vector<128x1xf32>
    %169 = vector.broadcast %161 : vector<128x1xf32> to vector<128x64xf32>
    %170 = arith.subf %153, %169 : vector<128x64xf32>
    %cst_84 = arith.constant 9.99999974E-6 : f32
    %171 = vector.broadcast %cst_84 : f32 to vector<128x1xf32>
    %172 = arith.addf %168, %171 : vector<128x1xf32>
    %173 = math.rsqrt %172 : vector<128x1xf32>
    %174 = vector.broadcast %173 : vector<128x1xf32> to vector<128x64xf32>
    %175 = arith.mulf %170, %174 : vector<128x64xf32>
    %176 = vector.broadcast %155 : vector<1x64xf32> to vector<128x64xf32>
    %177 = arith.mulf %175, %176 : vector<128x64xf32>
    %178 = vector.broadcast %157 : vector<1x64xf32> to vector<128x64xf32>
    %179 = arith.addf %177, %178 : vector<128x64xf32>
    %c1_85 = arith.constant 1 : index
    %c0_86 = arith.constant 0 : index
    %c0_87 = arith.constant 0 : index
    %180 = vector.load %arg5[%c1_85, %c0_86, %c0_87] : memref<2x64x64xf32, #tpu.memory_space<vmem>>, vector<1x64x64xf32>
    %181 = vector.shape_cast %180 : vector<1x64x64xf32> to vector<64x64xf32>
    %cst_88 = arith.constant dense<0.000000e+00> : vector<128x64xf32>
    %182 = tpu.matmul %179, %181, %cst_88 {dimension_numbers = #tpu.dot_dimension_numbers<[1], [0], [0], [1], [0, 0, 1, 1], [], []>} : vector<128x64xf32>, vector<64x64xf32>, vector<128x64xf32> -> vector<128x64xf32>
    %183 = arith.mulf %182, %31 : vector<128x64xf32>
    %c1_89 = arith.constant 1 : index
    %c0_90 = arith.constant 0 : index
    %c0_91 = arith.constant 0 : index
    %184 = vector.load %arg6[%c1_89, %c0_90, %c0_91] : memref<2x64x64xf32, #tpu.memory_space<vmem>>, vector<1x64x64xf32>
    %185 = vector.shape_cast %184 : vector<1x64x64xf32> to vector<64x64xf32>
    %cst_92 = arith.constant dense<0.000000e+00> : vector<128x64xf32>
    %186 = tpu.matmul %179, %185, %cst_92 {dimension_numbers = #tpu.dot_dimension_numbers<[1], [0], [0], [1], [0, 0, 1, 1], [], []>} : vector<128x64xf32>, vector<64x64xf32>, vector<128x64xf32> -> vector<128x64xf32>
    %c1_93 = arith.constant 1 : index
    %c0_94 = arith.constant 0 : index
    %c0_95 = arith.constant 0 : index
    %187 = vector.load %arg7[%c1_93, %c0_94, %c0_95] : memref<2x64x64xf32, #tpu.memory_space<vmem>>, vector<1x64x64xf32>
    %188 = vector.shape_cast %187 : vector<1x64x64xf32> to vector<64x64xf32>
    %cst_96 = arith.constant dense<0.000000e+00> : vector<128x64xf32>
    %189 = tpu.matmul %179, %188, %cst_96 {dimension_numbers = #tpu.dot_dimension_numbers<[1], [0], [0], [1], [0, 0, 1, 1], [], []>} : vector<128x64xf32>, vector<64x64xf32>, vector<128x64xf32> -> vector<128x64xf32>
    %cst_97 = arith.constant dense<0.000000e+00> : vector<128x128xf32>
    %190 = tpu.matmul %183, %186, %cst_97 {dimension_numbers = #tpu.dot_dimension_numbers<[1], [1], [0], [0], [0, 0, 1, 0], [], []>} : vector<128x64xf32>, vector<128x64xf32>, vector<128x128xf32> -> vector<128x128xf32>
    %cst_98 = arith.constant 1.250000e-01 : f32
    %191 = vector.broadcast %cst_98 : f32 to vector<128x128xf32>
    %192 = arith.mulf %190, %191 : vector<128x128xf32>
    %193 = arith.addf %192, %15 : vector<128x128xf32>
    %cst_99 = arith.constant dense<0xFF800000> : vector<128xf32>
    %194 = vector.multi_reduction <maximumf>, %193, %cst_99 [1] : vector<128x128xf32> to vector<128xf32>
    %195 = vector.shape_cast %194 : vector<128xf32> to vector<128x1xf32>
    %196 = vector.broadcast %195 : vector<128x1xf32> to vector<128x128xf32>
    %197 = arith.subf %193, %196 : vector<128x128xf32>
    %198 = math.exp %197 : vector<128x128xf32>
    %cst_100 = arith.constant dense<0.000000e+00> : vector<128xf32>
    %199 = vector.multi_reduction <add>, %198, %cst_100 [1] : vector<128x128xf32> to vector<128xf32>
    %200 = vector.shape_cast %199 : vector<128xf32> to vector<128x1xf32>
    %201 = tpu.reciprocal %200 {approx = true} : vector<128x1xf32> -> vector<128x1xf32>
    %202 = vector.broadcast %201 : vector<128x1xf32> to vector<128x128xf32>
    %203 = arith.mulf %198, %202 : vector<128x128xf32>
    %cst_101 = arith.constant dense<0.000000e+00> : vector<128x64xf32>
    %204 = tpu.matmul %203, %189, %cst_101 {dimension_numbers = #tpu.dot_dimension_numbers<[1], [0], [0], [1], [0, 0, 1, 1], [], []>} : vector<128x128xf32>, vector<128x64xf32>, vector<128x64xf32> -> vector<128x64xf32>
    %205 = arith.mulf %204, %31 : vector<128x64xf32>
    %c1_102 = arith.constant 1 : index
    %c0_103 = arith.constant 0 : index
    %c0_104 = arith.constant 0 : index
    %206 = vector.load %arg8[%c1_102, %c0_103, %c0_104] : memref<2x64x64xf32, #tpu.memory_space<vmem>>, vector<1x64x64xf32>
    %207 = vector.shape_cast %206 : vector<1x64x64xf32> to vector<64x64xf32>
    %cst_105 = arith.constant dense<0.000000e+00> : vector<128x64xf32>
    %208 = tpu.matmul %205, %207, %cst_105 {dimension_numbers = #tpu.dot_dimension_numbers<[1], [0], [0], [1], [0, 0, 1, 1], [], []>} : vector<128x64xf32>, vector<64x64xf32>, vector<128x64xf32> -> vector<128x64xf32>
    %cst_106 = arith.constant dense<0.000000e+00> : vector<128x64xf32>
    %209 = tpu.matmul %22, %208, %cst_106 {dimension_numbers = #tpu.dot_dimension_numbers<[1], [0], [0], [1], [0, 0, 1, 1], [], []>} : vector<128x128xf32>, vector<128x64xf32>, vector<128x64xf32> -> vector<128x64xf32>
    %c1_107 = arith.constant 1 : index
    %c0_108 = arith.constant 0 : index
    %c0_109 = arith.constant 0 : index
    %210 = vector.load %arg9[%c1_107, %c0_108, %c0_109] : memref<2x1x64xf32, #tpu.memory_space<vmem>>, vector<1x1x64xf32>
    %211 = vector.shape_cast %210 : vector<1x1x64xf32> to vector<1x64xf32>
    %212 = vector.broadcast %211 : vector<1x64xf32> to vector<128x64xf32>
    %213 = arith.addf %209, %212 : vector<128x64xf32>
    %214 = arith.addf %153, %213 : vector<128x64xf32>
    %c1_110 = arith.constant 1 : index
    %c0_111 = arith.constant 0 : index
    %c0_112 = arith.constant 0 : index
    %215 = vector.load %arg10[%c1_110, %c0_111, %c0_112] : memref<2x1x64xf32, #tpu.memory_space<vmem>>, vector<1x1x64xf32>
    %216 = vector.shape_cast %215 : vector<1x1x64xf32> to vector<1x64xf32>
    %c1_113 = arith.constant 1 : index
    %c0_114 = arith.constant 0 : index
    %c0_115 = arith.constant 0 : index
    %217 = vector.load %arg11[%c1_113, %c0_114, %c0_115] : memref<2x1x64xf32, #tpu.memory_space<vmem>>, vector<1x1x64xf32>
    %218 = vector.shape_cast %217 : vector<1x1x64xf32> to vector<1x64xf32>
    %cst_116 = arith.constant dense<0.000000e+00> : vector<128xf32>
    %219 = vector.multi_reduction <add>, %214, %cst_116 [1] : vector<128x64xf32> to vector<128xf32>
    %220 = vector.shape_cast %219 : vector<128xf32> to vector<128x1xf32>
    %cst_117 = arith.constant 6.400000e+01 : f32
    %221 = vector.broadcast %cst_117 : f32 to vector<128x1xf32>
    %222 = arith.divf %220, %221 : vector<128x1xf32>
    %223 = vector.broadcast %222 : vector<128x1xf32> to vector<128x64xf32>
    %224 = arith.subf %214, %223 : vector<128x64xf32>
    %225 = arith.mulf %224, %224 : vector<128x64xf32>
    %cst_118 = arith.constant dense<0.000000e+00> : vector<128xf32>
    %226 = vector.multi_reduction <add>, %225, %cst_118 [1] : vector<128x64xf32> to vector<128xf32>
    %227 = vector.shape_cast %226 : vector<128xf32> to vector<128x1xf32>
    %cst_119 = arith.constant 6.400000e+01 : f32
    %228 = vector.broadcast %cst_119 : f32 to vector<128x1xf32>
    %229 = arith.divf %227, %228 : vector<128x1xf32>
    %230 = vector.broadcast %222 : vector<128x1xf32> to vector<128x64xf32>
    %231 = arith.subf %214, %230 : vector<128x64xf32>
    %cst_120 = arith.constant 9.99999974E-6 : f32
    %232 = vector.broadcast %cst_120 : f32 to vector<128x1xf32>
    %233 = arith.addf %229, %232 : vector<128x1xf32>
    %234 = math.rsqrt %233 : vector<128x1xf32>
    %235 = vector.broadcast %234 : vector<128x1xf32> to vector<128x64xf32>
    %236 = arith.mulf %231, %235 : vector<128x64xf32>
    %237 = vector.broadcast %216 : vector<1x64xf32> to vector<128x64xf32>
    %238 = arith.mulf %236, %237 : vector<128x64xf32>
    %239 = vector.broadcast %218 : vector<1x64xf32> to vector<128x64xf32>
    %240 = arith.addf %238, %239 : vector<128x64xf32>
    %c1_121 = arith.constant 1 : index
    %c0_122 = arith.constant 0 : index
    %c0_123 = arith.constant 0 : index
    %241 = vector.load %arg12[%c1_121, %c0_122, %c0_123] : memref<2x64x256xf32, #tpu.memory_space<vmem>>, vector<1x64x256xf32>
    %242 = vector.shape_cast %241 : vector<1x64x256xf32> to vector<64x256xf32>
    %cst_124 = arith.constant dense<0.000000e+00> : vector<128x256xf32>
    %243 = tpu.matmul %240, %242, %cst_124 {dimension_numbers = #tpu.dot_dimension_numbers<[1], [0], [0], [1], [0, 0, 1, 1], [], []>} : vector<128x64xf32>, vector<64x256xf32>, vector<128x256xf32> -> vector<128x256xf32>
    %c1_125 = arith.constant 1 : index
    %c0_126 = arith.constant 0 : index
    %c0_127 = arith.constant 0 : index
    %244 = vector.load %arg13[%c1_125, %c0_126, %c0_127] : memref<2x1x256xf32, #tpu.memory_space<vmem>>, vector<1x1x256xf32>
    %245 = vector.shape_cast %244 : vector<1x1x256xf32> to vector<1x256xf32>
    %246 = vector.broadcast %245 : vector<1x256xf32> to vector<128x256xf32>
    %247 = arith.addf %243, %246 : vector<128x256xf32>
    %cst_128 = arith.constant 0.000000e+00 : f32
    %248 = vector.broadcast %cst_128 : f32 to vector<128x256xf32>
    %249 = arith.maximumf %247, %248 : vector<128x256xf32>
    %c1_129 = arith.constant 1 : index
    %c0_130 = arith.constant 0 : index
    %c0_131 = arith.constant 0 : index
    %250 = vector.load %arg14[%c1_129, %c0_130, %c0_131] : memref<2x256x64xf32, #tpu.memory_space<vmem>>, vector<1x256x64xf32>
    %251 = vector.shape_cast %250 : vector<1x256x64xf32> to vector<256x64xf32>
    %cst_132 = arith.constant dense<0.000000e+00> : vector<128x64xf32>
    %252 = tpu.matmul %249, %251, %cst_132 {dimension_numbers = #tpu.dot_dimension_numbers<[1], [0], [0], [1], [0, 0, 1, 1], [], []>} : vector<128x256xf32>, vector<256x64xf32>, vector<128x64xf32> -> vector<128x64xf32>
    %c1_133 = arith.constant 1 : index
    %c0_134 = arith.constant 0 : index
    %c0_135 = arith.constant 0 : index
    %253 = vector.load %arg15[%c1_133, %c0_134, %c0_135] : memref<2x1x64xf32, #tpu.memory_space<vmem>>, vector<1x1x64xf32>
    %254 = vector.shape_cast %253 : vector<1x1x64xf32> to vector<1x64xf32>
    %255 = vector.broadcast %254 : vector<1x64xf32> to vector<128x64xf32>
    %256 = arith.addf %252, %255 : vector<128x64xf32>
    %257 = arith.addf %214, %256 : vector<128x64xf32>
    %258 = vector.extract_strided_slice %257 {offsets = [0, 0], sizes = [32, 64], strides = [1, 1]} : vector<128x64xf32> to vector<32x64xf32>
    %c0_136 = arith.constant 0 : index
    %c0_137 = arith.constant 0 : index
    %259 = vector.load %arg16[%c0_136, %c0_137] : memref<1x64xf32, #tpu.memory_space<vmem>>, vector<1x64xf32>
    %c0_138 = arith.constant 0 : index
    %c0_139 = arith.constant 0 : index
    %260 = vector.load %arg17[%c0_138, %c0_139] : memref<1x64xf32, #tpu.memory_space<vmem>>, vector<1x64xf32>
    %cst_140 = arith.constant dense<0.000000e+00> : vector<32xf32>
    %261 = vector.multi_reduction <add>, %258, %cst_140 [1] : vector<32x64xf32> to vector<32xf32>
    %262 = vector.shape_cast %261 : vector<32xf32> to vector<32x1xf32>
    %cst_141 = arith.constant 6.400000e+01 : f32
    %263 = vector.broadcast %cst_141 : f32 to vector<32x1xf32>
    %264 = arith.divf %262, %263 : vector<32x1xf32>
    %265 = vector.broadcast %264 : vector<32x1xf32> to vector<32x64xf32>
    %266 = arith.subf %258, %265 : vector<32x64xf32>
    %267 = arith.mulf %266, %266 : vector<32x64xf32>
    %cst_142 = arith.constant dense<0.000000e+00> : vector<32xf32>
    %268 = vector.multi_reduction <add>, %267, %cst_142 [1] : vector<32x64xf32> to vector<32xf32>
    %269 = vector.shape_cast %268 : vector<32xf32> to vector<32x1xf32>
    %cst_143 = arith.constant 6.400000e+01 : f32
    %270 = vector.broadcast %cst_143 : f32 to vector<32x1xf32>
    %271 = arith.divf %269, %270 : vector<32x1xf32>
    %272 = vector.broadcast %264 : vector<32x1xf32> to vector<32x64xf32>
    %273 = arith.subf %258, %272 : vector<32x64xf32>
    %cst_144 = arith.constant 9.99999974E-6 : f32
    %274 = vector.broadcast %cst_144 : f32 to vector<32x1xf32>
    %275 = arith.addf %271, %274 : vector<32x1xf32>
    %276 = math.rsqrt %275 : vector<32x1xf32>
    %277 = vector.broadcast %276 : vector<32x1xf32> to vector<32x64xf32>
    %278 = arith.mulf %273, %277 : vector<32x64xf32>
    %279 = vector.broadcast %259 : vector<1x64xf32> to vector<32x64xf32>
    %280 = arith.mulf %278, %279 : vector<32x64xf32>
    %281 = vector.broadcast %260 : vector<1x64xf32> to vector<32x64xf32>
    %282 = arith.addf %280, %281 : vector<32x64xf32>
    %c0_145 = arith.constant 0 : index
    %c0_146 = arith.constant 0 : index
    %283 = vector.load %arg18[%c0_145, %c0_146] : memref<64x128xf32, #tpu.memory_space<vmem>>, vector<64x128xf32>
    %cst_147 = arith.constant dense<0.000000e+00> : vector<32x128xf32>
    %284 = tpu.matmul %282, %283, %cst_147 {dimension_numbers = #tpu.dot_dimension_numbers<[1], [0], [0], [1], [0, 0, 1, 1], [], []>} : vector<32x64xf32>, vector<64x128xf32>, vector<32x128xf32> -> vector<32x128xf32>
    %c0_148 = arith.constant 0 : index
    %c0_149 = arith.constant 0 : index
    %285 = vector.load %arg19[%c0_148, %c0_149] : memref<1x128xf32, #tpu.memory_space<vmem>>, vector<1x128xf32>
    %286 = vector.broadcast %285 : vector<1x128xf32> to vector<32x128xf32>
    %287 = arith.addf %284, %286 : vector<32x128xf32>
    %c0_150 = arith.constant 0 : index
    %c0_151 = arith.constant 0 : index
    %288 = vector.load %arg20[%c0_150, %c0_151] : memref<32x128xf32, #tpu.memory_space<vmem>>, vector<32x128xf32>
    tpu.vector_store %arg20[%c0_150, %c0_151], %287 {strides = array<i32>} : memref<32x128xf32, #tpu.memory_space<vmem>>, vector<32x128xf32>,
    return
  }
}

</mosaic_0001>

<bundles_post_ra>
// kernel: tpu_custom_call.1
= control target key start
LH: loop header
LB: loop body
LE: loop exit
PB: predicated region body
PF: predicated region fallthrough
CT: control target
= control target key end

     0   :  { %s11854_s0 = inlined_call_operand.vmem [shape: s32[128,1], index: 0, kind: input, shape index: {}]   ;;  %s11855_s1 = inlined_call_operand.vmem [shape: f32[128,64], index: 1, kind: input, shape index: {}]   ;;  %s11856_s2 = inlined_call_operand.vmem [shape: f32[16,64], index: 2, kind: input, shape index: {}]   ;;  %s11857_s3 = inlined_call_operand.vmem [shape: f32[2,1,64], index: 3, kind: input, shape index: {}]   ;;  %s11858_s4 = inlined_call_operand.vmem [shape: f32[2,1,64], index: 4, kind: input, shape index: {}]   ;;  %s11859_s5 = inlined_call_operand.vmem [shape: f32[2,64,64], index: 5, kind: input, shape index: {}]   ;;  %s11860_s6 = inlined_call_operand.vmem [shape: f32[2,64,64], index: 6, kind: input, shape index: {}]   ;;  %s11861_s7 = inlined_call_operand.vmem [shape: f32[2,64,64], index: 7, kind: input, shape index: {}]   ;;  %s11862_s8 = inlined_call_operand.vmem [shape: f32[2,64,64], index: 8, kind: input, shape index: {}]   ;;  %s11863_s9 = inlined_call_operand.vmem [shape: f32[2,1,64], index: 9, kind: input, shape index: {}]   ;;  %s11864_s10 = inlined_call_operand.hbm [shape: f32[2,1,64], index: 10, kind: input, shape index: {}]   ;;  %s11865_s11 = inlined_call_operand.hbm [shape: f32[2,1,64], index: 11, kind: input, shape index: {}]   ;;  %s11866_s12 = inlined_call_operand.vmem [shape: f32[2,64,256], index: 12, kind: input, shape index: {}]   ;;  %s11867_s13 = inlined_call_operand.vmem [shape: f32[2,1,256], index: 13, kind: input, shape index: {}]   ;;  %s11868_s14 = inlined_call_operand.vmem [shape: f32[2,256,64], index: 14, kind: input, shape index: {}]   ;;  %s11869_s15 = inlined_call_operand.hbm [shape: f32[2,1,64], index: 15, kind: input, shape index: {}]   ;;  %s11870_s16 = inlined_call_operand.hbm [shape: f32[1,64], index: 16, kind: input, shape index: {}]   ;;  %s11871_s17 = inlined_call_operand.hbm [shape: f32[1,64], index: 17, kind: input, shape index: {}]   ;;  %s11872_s18 = inlined_call_operand.vmem [shape: f32[64,128], index: 18, kind: input, shape index: {}]   ;;  %s11873_s19 = inlined_call_operand.hbm [shape: f32[1,128], index: 19, kind: input, shape index: {}]   ;;  %s11874_s20 = inlined_call_operand.hbm [shape: f32[32,128], index: 20, kind: output, shape index: {}]  }
   0x1   :  { %11981 = sst [smem:[#allocation72_spill]] %s11854_s0 }
   0x2   :  { %11982 = sst [smem:[#allocation73_spill]] %s11855_s1 }
   0x3   :  { %11983 = sst [smem:[#allocation74_spill]] %s11856_s2 }
   0x4   :  { %11984 = sst [smem:[#allocation75_spill]] %s11857_s3 }
   0x5   :  { %11985 = sst [smem:[#allocation76_spill]] %s11858_s4 }
   0x6   :  { %25 = vsyncpa [#allocation3], 0 }
   0x7   :  { %26 = vsyncpa [#allocation6], 0 }
   0x8   :  { %27 = vsyncpa [#allocation9], 0 }
   0x9   :  { %28 = vsyncpa [#allocation12], 0 }
   0xa   :  { %29 = vsyncpa [#allocation4], 0  ;;  %s8286_s1 = smov [#allocation5]   ;;  %s8287_s23 = smov [#allocation8]  }
   0xb   :  { %s67_s22 = sshll.u32 %s8286_s1, 4  ;;  %s98_s24 = sshll.u32 %s8287_s23, 4  ;;  %s68_s22 = int_to_ptr.vmem [resolvable:$true] %s67_s22  ;;  %s99_s24 = int_to_ptr.vmem [resolvable:$true] %s98_s24 }
   0xc   :  { %s8144_s2 = scalar_lea.vmem %s68_s22, 32  ;;  %p8149_p1 = scmp.lt.s32.totalorder %s68_s22, %s68_s22 }
   0xd   :  { %p8145_p0 = scmp.ne.s32.totalorder %s68_s22, %s8144_s2  ;;  %p8150_p2 = scmp.lt.s32.totalorder %s8144_s2, %s8144_s2 }
   0xf   :  { %p8151_p3 = por %p8150_p2, %p8149_p1 }
  0x11   :  { %p8152_p4 = pnand %p8151_p3, %p8145_p0 }
  0x13   :  { %8155 = shalt.err (!%p8152_p4)
}
  0x14   :  { %s8288_s25 = smov 16   ;;  %s8289_s3 = smov 1  }
  0x15   :  { %73 = dma.hbm_to_vmem [thread:$0]  %s11865_s11, 32, %s68_s22, [#allocation6], %s8288_s25, %s8288_s25, %s8289_s3  }
  0x16   :  { %s8164_s28 = scalar_lea.vmem %s99_s24, 16  ;;  %s8168_s4 = scalar_lea.vmem %s99_s24, 32 }
  0x17   :  { %p8165_p5 = scmp.ne.s32.totalorder %s99_s24, %s8164_s28  ;;  %p8169_p6 = scmp.lt.s32.totalorder %s99_s24, %s99_s24 }
  0x18   :  { %p8170_p7 = scmp.lt.s32.totalorder %s8168_s4, %s8164_s28 }
  0x1a   :  { %p8171_p8 = por %p8170_p7, %p8169_p6 }
  0x1c   :  { %p8172_p9 = pnand %p8171_p8, %p8165_p5 }
  0x1e   :  { %8175 = shalt.err (!%p8172_p9)
}
  0x1f   :  { %101 = dma.hbm_to_vmem [thread:$0]  %s11870_s16, 16, %s99_s24, [#allocation9]  }
  0x20   :  { %s8290_s0 = smov [#allocation2]   ;;  %s8291_s1 = smov [#allocation7]  }
  0x21   :  { %s55_s21 = sshll.u32 %s8290_s0, 4  ;;  %s85_s23 = sshll.u32 %s8291_s1, 4  ;;  %s56_s21 = int_to_ptr.vmem [resolvable:$true] %s55_s21  ;;  %s86_s23 = int_to_ptr.vmem [resolvable:$true] %s85_s23 }
  0x22   :  { %s8184_s2 = scalar_lea.vmem %s56_s21, 32  ;;  %p8189_p11 = scmp.lt.s32.totalorder %s56_s21, %s56_s21 }
  0x23   :  { %p8185_p10 = scmp.ne.s32.totalorder %s56_s21, %s8184_s2  ;;  %p8190_p12 = scmp.lt.s32.totalorder %s8184_s2, %s8184_s2 }
  0x25   :  { %p8191_p13 = por %p8190_p12, %p8189_p11 }
  0x27   :  { %p8192_p0 = pnand %p8191_p13, %p8185_p10 }
  0x29   :  { %8195 = shalt.err (!%p8192_p0)
}
  0x2a   :  { %61 = dma.hbm_to_vmem [thread:$0]  %s11864_s10, 32, %s56_s21, [#allocation3], %s8288_s25, %s8288_s25, %s8289_s3  }
  0x2b   :  { %s8204_s16 = scalar_lea.vmem %s86_s23, 32  ;;  %p8209_p2 = scmp.lt.s32.totalorder %s86_s23, %s86_s23 }
  0x2c   :  { %p8205_p1 = scmp.ne.s32.totalorder %s86_s23, %s8204_s16  ;;  %p8210_p3 = scmp.lt.s32.totalorder %s8204_s16, %s8204_s16 }
  0x2e   :  { %p8211_p4 = por %p8210_p3, %p8209_p2 }
  0x30   :  { %p8212_p5 = pnand %p8211_p4, %p8205_p1 }
  0x32   :  { %8215 = shalt.err (!%p8212_p5)
}
  0x33   :  { %91 = dma.hbm_to_vmem [thread:$0]  %s11869_s15, 32, %s86_s23, [#allocation6], %s8288_s25, %s8288_s25, %s8289_s3  }
  0x34   :  { %s8292_s27 = smov [#allocation10]   ;;  %s8293_s4 = smov [#allocation11]  }
  0x35   :  { %s108_s28 = sshll.u32 %s8292_s27, 4  ;;  %s120_s29 = sshll.u32 %s8293_s4, 4  ;;  %s109_s28 = int_to_ptr.vmem [resolvable:$true] %s108_s28  ;;  %s121_s29 = int_to_ptr.vmem [resolvable:$true] %s120_s29 }
  0x36   :  { %s8224_s10 = scalar_lea.vmem %s109_s28, 16  ;;  %s8228_s30 = scalar_lea.vmem %s109_s28, 32 }
  0x37   :  { %p8225_p6 = scmp.ne.s32.totalorder %s109_s28, %s8224_s10  ;;  %p8229_p7 = scmp.lt.s32.totalorder %s109_s28, %s109_s28 }
  0x38   :  { %p8230_p8 = scmp.lt.s32.totalorder %s8228_s30, %s8224_s10 }
  0x3a   :  { %p8231_p9 = por %p8230_p8, %p8229_p7 }
  0x3c   :  { %p8232_p10 = pnand %p8231_p9, %p8225_p6 }
  0x3e   :  { %8235 = shalt.err (!%p8232_p10)
}
  0x3f   :  { %111 = dma.hbm_to_vmem [thread:$0]  %s11871_s17, 16, %s109_s28, [#allocation9]  }
  0x40   :  { %s8244_s1 = scalar_lea.vmem %s121_s29, 16  ;;  %s8248_s15 = scalar_lea.vmem %s121_s29, 32 }
  0x41   :  { %p8245_p11 = scmp.ne.s32.totalorder %s121_s29, %s8244_s1  ;;  %p8249_p12 = scmp.lt.s32.totalorder %s121_s29, %s121_s29 }
  0x42   :  { %p8250_p13 = scmp.lt.s32.totalorder %s8248_s15, %s8244_s1 }
  0x44   :  { %p8251_p0 = por %p8250_p13, %p8249_p12 }
  0x46   :  { %p8252_p1 = pnand %p8251_p0, %p8245_p11 }
  0x48   :  { %8255 = shalt.err (!%p8252_p1)
}
  0x49   :  { %123 = dma.hbm_to_vmem [thread:$0]  %s11873_s19, 16, %s121_s29, [#allocation12]  }
  0x4a   :  { %8276 = dma.done.wait [#allocation3], 32  }
  0x4b   :  { %8277 = vsyncadd [#allocation3], 4294967264 }
  0x4c   :  { %8278 = dma.done.wait [#allocation6], 64  }
  0x4d   :  { %8279 = vsyncadd [#allocation6], 4294967232 }
  0x4e   :  { %8280 = dma.done.wait [#allocation9], 32  }
  0x4f   :  { %8281 = vsyncadd [#allocation9], 4294967264 }
  0x50   :  { %8282 = dma.done.wait [#allocation12], 16  }
  0x51   :  { %8283 = vsyncadd [#allocation12], 4294967280  ;;  %v142_v0 = vlaneseq  ;;  %v8294_v1 = vmov 0   ;;  %vm566_vm1 = vcmask 130048   ;;  %s11987_s23 = sld [smem:[#allocation72_spill]]  ;;  %v11898_v7 = vmov 0.0  }
  0x52   :  { %7871 = vset.pattern.permute.xlu1 %v8294_v1  ;;  %7870 = vset.pattern.permute.xlu0 %v8294_v1  ;;  %s11988_s4 = sld [smem:[#allocation73_spill]] }
  0x53   :  { %v8433_v2 = vshrl.u32 %v142_v0, 7  ;;  %v8435_v3 = vand.u32 127, %v142_v0  ;;  %s11989_s3 = sld [smem:[#allocation74_spill]] }
  0x54   :  { %s12006_s16 = sld [smem:[#allocation75_spill]] }
  0x55   :  { %11986 = vst [vmem:[#allocation19_spill] sm:$0xff] %v8433_v2  ;;  %v11896_v4 = vand.u32 15, %v8433_v2  ;;  %v8449_v9 = vadd.s32 8, %v8433_v2  ;;  %v8466_v15 = vadd.s32 16, %v8433_v2  ;;  %v8489_v21 = vadd.s32 24, %v8433_v2  ;;  %s12007_s27 = sld [smem:[#allocation76_spill]] }
  0x56   :  { %v8516_v29 = vadd.s32 32, %v8433_v2  ;;  %v8538_v34 = vadd.s32 40, %v8433_v2  ;;  %v8559_v41 = vadd.s32 48, %v8433_v2  ;;  %v8578_v45 = vadd.s32 56, %v8433_v2 }
  0x57   :  { %vm516_vm0 = vcmp.eq.s32.totalorder %v11896_v4, %v8435_v3  ;;  %v390_v5 = vld [vmem:[%s11987_s23 + $0x10] sm:$0xff]  ;;  %v388_v6 = vld [vmem:[%s11987_s23] sm:$0xff]  ;;  %v391_v10 = vld [vmem:[%s11987_s23 + $0x18] sm:$0xff]  ;;  %v11897_v12 = vand.u32 15, %v8449_v9  ;;  %v11894_v22 = vand.u32 15, %v8466_v15  ;;  %v11895_v27 = vand.u32 15, %v8489_v21 }
  0x58   :  { %v6048_v8 = vsel %vm516_vm0, 1.0, %v11898_v7  ;;  %411 = vperm.xlu1 %7871, %v390_v5   ;;  %405 = vperm.xlu0 %7870, %v388_v6   ;;  %v389_v11 = vld [vmem:[%s11987_s23 + $0x8] sm:$0xff]  ;;  %v515_v13 = vld [vmem:[%s11988_s4 + $0x78] sm:$0xff]  ;;  %v514_v14 = vld [vmem:[%s11988_s4 + $0x70] sm:$0xff]  ;;  %v11892_v35 = vand.u32 15, %v8516_v29  ;;  %v11893_v40 = vand.u32 15, %v8538_v34 }
  0x59   :  { %7065 = vmatprep.mubr.msk.f32.mxu1 %vm566_vm1, %v6048_v8  ;;  %v393_v16 = vld [vmem:[%s11987_s23 + $0x28] sm:$0xff]  ;;  %v392_v17 = vld [vmem:[%s11987_s23 + $0x20] sm:$0xff]  ;;  %7089 = vmatprep.subr.mxu0 %v515_v13  ;;  %vm517_vm2 = vcmp.eq.s32.totalorder %v11897_v12, %v8435_v3  ;;  %v395_v23 = vld [vmem:[%s11987_s23 + $0x38] sm:$0xff]  ;;  %vm518_vm3 = vcmp.eq.s32.totalorder %v11894_v22, %v8435_v3  ;;  %vm519_vm4 = vcmp.eq.s32.totalorder %v11895_v27, %v8435_v3  ;;  %v11890_v48 = vand.u32 15, %v8559_v41 }
  0x5a   :  { %7090 = vmatpush3.msra.mxu0 %v515_v13  ;;  %v565_v18 = vld [vmem:[%s11989_s3 + $0x8] sm:$0xff]  ;;  %v564_v20 = vld [vmem:[%s11989_s3] sm:$0xff]  ;;  %v394_v24 = vld [vmem:[%s11987_s23 + $0x30] sm:$0xff]  ;;  %v6049_v26 = vsel %vm517_vm2, 1.0, %v11898_v7  ;;  %v6050_v33 = vsel %vm518_vm3, 1.0, %v11898_v7  ;;  %v6051_v39 = vsel %vm519_vm4, 1.0, %v11898_v7  ;;  %vm520_vm5 = vcmp.eq.s32.totalorder %v11892_v35, %v8435_v3 }
  0x5b   :  { %7091 = vmatprep.subr.mxu0 %v514_v14  ;;  %v8480_v19 = vld [vmem:[%s11988_s4 + $0x68] sm:$0xff]  ;;  %7061 = vmatprep.subr.mxu1 %v565_v18  ;;  %v8502_v25 = vld [vmem:[%s11988_s4 + $0x60] sm:$0xff]  ;;  %v8510_v28 = vld [vmem:[%s11988_s4 + $0x58] sm:$0xff]  ;;  %v6052_v47 = vsel %vm520_vm5, 1.0, %v11898_v7  ;;  %vm521_vm6 = vcmp.eq.s32.totalorder %v11893_v40, %v8435_v3  ;;  %v11891_v51 = vand.u32 15, %v8578_v45  ;;  %v8604_v52 = vadd.s32 64, %v8433_v2 }
  0x5c   :  { %414 = vperm.xlu1 %7871, %v391_v10   ;;  %408 = vperm.xlu0 %7870, %v389_v11   ;;  %v397_v30 = vld [vmem:[%s11987_s23 + $0x48] sm:$0xff]  ;;  %v396_v31 = vld [vmem:[%s11987_s23 + $0x40] sm:$0xff]  ;;  %v8531_v32 = vld [vmem:[%s11988_s4 + $0x50] sm:$0xff]  ;;  %v6053_v54 = vsel %vm521_vm6, 1.0, %v11898_v7  ;;  %v8615_v55 = vadd.s32 72, %v8433_v2  ;;  %vm522_vm7 = vcmp.eq.s32.totalorder %v11890_v48, %v8435_v3  ;;  %v8643_v61 = vadd.s32 80, %v8433_v2 }
  0x5d   :  { %7092 = vmatpush3.msra.mxu0 %v514_v14  ;;  %7062 = vmatpush3.msra.mxu1 %v565_v18  ;;  %v399_v36 = vld [vmem:[%s11987_s23 + $0x58] sm:$0xff]  ;;  %v398_v37 = vld [vmem:[%s11987_s23 + $0x50] sm:$0xff]  ;;  %v8552_v38 = vld [vmem:[%s11988_s4 + $0x48] sm:$0xff]  ;;  %vm523_vm8 = vcmp.eq.s32.totalorder %v11891_v51, %v8435_v3  ;;  %v11888_v57 = vand.u32 15, %v8604_v52  ;;  %v6054_v59 = vsel %vm522_vm7, 1.0, %v11898_v7  ;;  %v8648_v62 = vadd.s32 88, %v8433_v2 }
  0x5e   :  { %7093 = vmatprep.subr.mxu0 %v8480_v19  ;;  %7063 = vmatprep.subr.mxu1 %v564_v20  ;;  %v8564_v42 = vld [vmem:[%s11988_s4 + $0x40] sm:$0xff]  ;;  %v401_v43 = vld [vmem:[%s11987_s23 + $0x68] sm:$0xff]  ;;  %v8586_v46 = vld [vmem:[%s11988_s4 + $0x38] sm:$0xff]  ;;  %v11889_v60 = vand.u32 15, %v8615_v55  ;;  %v6055_v0 = vsel %vm523_vm8, 1.0, %v11898_v7  ;;  %v8657_v1 = vadd.s32 96, %v8433_v2 }
  0x5f   :  { %7094 = vmatpush3.msra.mxu0 %v8480_v19  ;;  %7064 = vmatpush3.msra.mxu1 %v564_v20  ;;  %v400_v44 = vld [vmem:[%s11987_s23 + $0x60] sm:$0xff]  ;;  %v403_v49 = vld [vmem:[%s11987_s23 + $0x78] sm:$0xff]  ;;  %v402_v50 = vld [vmem:[%s11987_s23 + $0x70] sm:$0xff]  ;;  %vm524_vm9 = vcmp.eq.s32.totalorder %v11888_v57, %v8435_v3  ;;  %v11886_v6 = vand.u32 15, %v8643_v61  ;;  %v11887_v8 = vand.u32 15, %v8648_v62  ;;  %v8676_v10 = vadd.s32 104, %v8433_v2 }
  0x60   :  { %420 = vperm.xlu1 %7871, %v393_v16   ;;  %417 = vperm.xlu0 %7870, %v392_v17   ;;  %v8610_v53 = vld [vmem:[%s11988_s4 + $0x30] sm:$0xff]  ;;  %v8625_v56 = vld [vmem:[%s11988_s4 + $0x28] sm:$0xff]  ;;  %v8638_v58 = vld [vmem:[%s11988_s4 + $0x20] sm:$0xff]  ;;  %vm525_vm10 = vcmp.eq.s32.totalorder %v11889_v60, %v8435_v3  ;;  %v6056_v11 = vsel %vm524_vm9, 1.0, %v11898_v7  ;;  %v8703_v20 = vadd.s32 120, %v8433_v2 }
  0x61   :  { %7095 = vmatprep.subr.mxu0 %v8502_v25  ;;  %7066 = vmatmul.mubr.msk.f32.vlgmr.msra.gmra.mxu1 %vm566_vm1, %v6049_v26  ;;  %v503_v63 = vld [vmem:[%s11988_s4 + $0x18] sm:$0xff]  ;;  %v502_v5 = vld [vmem:[%s11988_s4 + $0x10] sm:$0xff]  ;;  %v501_v16 = vld [vmem:[%s11988_s4 + $0x8] sm:$0xff]  ;;  %v6057_v17 = vsel %vm525_vm10, 1.0, %v11898_v7  ;;  %vm526_vm11 = vcmp.eq.s32.totalorder %v11886_v6, %v8435_v3  ;;  %vm527_vm12 = vcmp.eq.s32.totalorder %v11887_v8, %v8435_v3 }
  0x62   :  { %7096 = vmatpush3.msra.mxu0 %v8502_v25  ;;  %7823 = vmatprep.subr.mxu1 %v515_v13  ;;  %v500_v18 = vld [vmem:[%s11988_s4] sm:$0xff]  ;;  %v1166_v40 = vld [vmem:[%s11859_s5 + $0x28] sm:$0xff] }
  0x63   :  { %7097 = vmatprep.subr.mxu0 %v8510_v28  ;;  %7839 = vmatpush3.msra.mxu1 %v515_v13  ;;  %v11884_v13 = vand.u32 15, %v8657_v1 }
  0x64   :  { %426 = vperm.xlu1 %7871, %v395_v23   ;;  %423 = vperm.xlu0 %7870, %v394_v24   ;;  %v6058_v24 = vsel %vm526_vm11, 1.0, %v11898_v7 }
  0x65   :  { %7098 = vmatpush3.msra.mxu0 %v8510_v28  ;;  %7824 = vmatprep.subr.mxu1 %v514_v14  ;;  %vm528_vm13 = vcmp.eq.s32.totalorder %v11884_v13, %v8435_v3 }
  0x66   :  { %7099 = vmatprep.subr.mxu0 %v8531_v32  ;;  %7068 = vmatprep.mubr.msk.f32.mxu1 %vm566_vm1, %v6050_v33  ;;  %v6060_v26 = vsel %vm528_vm13, 1.0, %v11898_v7 }
  0x67   :  { %7100 = vmatpush3.msra.mxu0 %v8531_v32  ;;  %7840 = vmatpush3.msra.mxu1 %v514_v14  ;;  %v8682_v14 = vadd.s32 112, %v8433_v2 }
  0x68   :  { %432 = vperm.xlu1 %7871, %v397_v30   ;;  %429 = vperm.xlu0 %7870, %v396_v31  }
  0x69   :  { %7101 = vmatprep.subr.mxu0 %v8552_v38  ;;  %7069 = vmatmul.mubr.msk.f32.gmra.mxu1 %vm566_vm1, %v6051_v39  ;;  %v11882_v23 = vand.u32 15, %v8682_v14 }
  0x6a   :  { %7102 = vmatpush3.msra.mxu0 %v8552_v38  ;;  %7825 = vmatprep.subr.mxu1 %v8480_v19 }
  0x6b   :  { %7103 = vmatprep.subr.mxu0 %v8564_v42  ;;  %7841 = vmatpush3.msra.mxu1 %v8480_v19  ;;  %v11885_v19 = vand.u32 15, %v8676_v10  ;;  %vm530_vm15 = vcmp.eq.s32.totalorder %v11882_v23, %v8435_v3 }
  0x6c   :  { %438 = vperm.xlu1 %7871, %v399_v36   ;;  %435 = vperm.xlu0 %7870, %v398_v37   ;;  %v6062_v31 = vsel %vm530_vm15, 1.0, %v11898_v7  ;;  %v11880_v37 = vmov 1.0  }
  0x6d   :  { %7104 = vmatpush3.msra.mxu0 %v8564_v42  ;;  %7826 = vmatprep.subr.mxu1 %v8502_v25  ;;  %vm529_vm14 = vcmp.eq.s32.totalorder %v11885_v19, %v8435_v3 }
  0x6e   :  { %7105 = vmatprep.subr.mxu0 %v8586_v46  ;;  %7071 = vmatprep.mubr.msk.f32.mxu1 %vm566_vm1, %v6052_v47  ;;  %v6061_v30 = vsel %vm529_vm14, 1.0, %v11898_v7 }
  0x6f   :  { %7106 = vmatpush3.msra.mxu0 %v8586_v46  ;;  %7842 = vmatpush3.msra.mxu1 %v8502_v25  ;;  %v6059_v25 = vsel %vm527_vm12, 1.0, %v11898_v7 }
  0x70   :  { %444 = vperm.xlu1 %7871, %v401_v43   ;;  %441 = vperm.xlu0 %7870, %v400_v44  }
  0x71   :  { %7107 = vmatprep.subr.mxu0 %v8610_v53  ;;  %7072 = vmatmul.mubr.msk.f32.gmra.mxu1 %vm566_vm1, %v6053_v54 }
  0x72   :  { %7108 = vmatpush3.msra.mxu0 %v8610_v53  ;;  %7827 = vmatprep.subr.mxu1 %v8510_v28 }
  0x73   :  { %7109 = vmatprep.subr.mxu0 %v8625_v56  ;;  %7843 = vmatpush3.msra.mxu1 %v8510_v28  ;;  %v11883_v28 = vand.u32 15, %v8703_v20 }
  0x74   :  { %450 = vperm.xlu1 %7871, %v403_v49   ;;  %447 = vperm.xlu0 %7870, %v402_v50  }
  0x75   :  { %7110 = vmatpush3.msra.mxu0 %v8625_v56  ;;  %7828 = vmatprep.subr.mxu1 %v8531_v32  ;;  %vm531_vm0 = vcmp.eq.s32.totalorder %v11883_v28, %v8435_v3 }
  0x76   :  { %7111 = vmatprep.subr.mxu0 %v8638_v58  ;;  %7074 = vmatprep.mubr.msk.f32.mxu1 %vm566_vm1, %v6054_v59 }
  0x77   :  { %7112 = vmatpush3.msra.mxu0 %v8638_v58  ;;  %7844 = vmatpush3.msra.mxu1 %v8531_v32  ;;  %v6063_v32 = vsel %vm531_vm0, 1.0, %v11898_v7 }
  0x78   :  { %7113 = vmatprep.subr.mxu0 %v503_v63  ;;  %7075 = vmatmul.mubr.msk.f32.gmra.mxu1 %vm566_vm1, %v6055_v0 }
  0x79   :  { %7829 = vmatprep.subr.mxu1 %v8552_v38  ;;  %7114 = vmatpush3.msra.mxu0 %v503_v63 }
  0x7a   :  { %7845 = vmatpush3.msra.mxu1 %v8552_v38  ;;  %7115 = vmatprep.subr.mxu0 %v502_v5 }
  0x7b   :  { %7830 = vmatprep.subr.mxu1 %v8564_v42  ;;  %7116 = vmatpush3.msra.mxu0 %v502_v5 }
  0x7c   :  { %7077 = vmatprep.mubr.msk.f32.mxu1 %vm566_vm1, %v6056_v11  ;;  %7846 = vmatpush3.msra.mxu1 %v8564_v42 }
  0x7d   :  { %7117 = vmatprep.subr.mxu0 %v501_v16  ;;  %7078 = vmatmul.mubr.msk.f32.gmra.mxu1 %vm566_vm1, %v6057_v17 }
  0x7e   :  { %7831 = vmatprep.subr.mxu1 %v8586_v46  ;;  %7118 = vmatpush3.msra.mxu0 %v501_v16 }
  0x7f   :  { %7847 = vmatpush3.msra.mxu1 %v8586_v46  ;;  %7119 = vmatprep.subr.mxu0 %v500_v18 }
  0x80   :  { %7832 = vmatprep.subr.mxu1 %v8610_v53  ;;  %7120 = vmatpush3.msra.mxu0 %v500_v18 }
  0x81   :  { %7080 = vmatprep.mubr.msk.f32.mxu1 %vm566_vm1, %v6058_v24  ;;  %7848 = vmatpush3.msra.mxu1 %v8610_v53 }
  0x82   :  { %7081 = vmatmul.mubr.msk.f32.gmra.mxu1 %vm566_vm1, %v6059_v25  ;;  %7833 = vmatprep.subr.mxu1 %v8625_v56 }
  0x83   :  { %7849 = vmatpush3.msra.mxu1 %v8625_v56  ;;  %7083 = vmatprep.mubr.msk.f32.mxu1 %vm566_vm1, %v6060_v26 }
  0x84   :  { %7834 = vmatprep.subr.mxu1 %v8638_v58 }
  0x85   :  { %7850 = vmatpush3.msra.mxu1 %v8638_v58 }
  0x86   :  { %7084 = vmatmul.mubr.msk.f32.gmra.mxu1 %vm566_vm1, %v6061_v30  ;;  %7835 = vmatprep.subr.mxu1 %v503_v63 }
  0x87   :  { %7851 = vmatpush3.msra.mxu1 %v503_v63  ;;  %7086 = vmatprep.mubr.msk.f32.mxu1 %vm566_vm1, %v6062_v31 }
  0x88   :  { %7836 = vmatprep.subr.mxu1 %v502_v5 }
  0x89   :  { %7852 = vmatpush3.msra.mxu1 %v502_v5 }
  0x8a   :  { %7087 = vmatmul.mubr.msk.f32.gmra.mxu1 %vm566_vm1, %v6063_v32  ;;  %7837 = vmatprep.subr.mxu1 %v501_v16 }
  0x8b   :  { %7853 = vmatpush3.msra.mxu1 %v501_v16 }
  0x8c   :  { %7838 = vmatprep.subr.mxu1 %v500_v18 }
  0x8d   :  { %7854 = vmatpush3.msra.mxu1 %v500_v18 }
  0xd3   :  { %v412_v33 = vpop.permute.xlu1 %411  ;;  %v406_v36 = vpop.permute.xlu0 %405 }
  0xd4   :  { %vm452_vm2 = vcmp.eq.s32.totalorder %v8435_v3, %v406_v36  ;;  %vm454_vm3 = vcmp.eq.s32.totalorder %v8435_v3, %v412_v33 }
  0xd5   :  { %7121 = vmatprep.mubr.msk.f32.mxu0 %vm452_vm2, %v11880_v37  ;;  %vm11934_vm2 = vcmask 523264  }
  0xd7   :  { %v415_v38 = vpop.permute.xlu1 %414  ;;  %v409_v39 = vpop.permute.xlu0 %408 }
  0xd8   :  { %vm453_vm4 = vcmp.eq.s32.totalorder %v8435_v3, %v409_v39  ;;  %vm455_vm1 = vcmp.eq.s32.totalorder %v8435_v3, %v415_v38 }
  0xd9   :  { %7122 = vmatmul.mubr.msk.f32.vlgmr.msra.gmra.mxu0 %vm453_vm4, %v11880_v37 }
  0xda   :  { %7124 = vmatprep.mubr.msk.f32.mxu0 %vm454_vm3, %v11880_v37 }
  0xdb   :  { %v421_v42 = vpop.permute.xlu1 %420  ;;  %v418_v43 = vpop.permute.xlu0 %417 }
  0xdc   :  { %vm456_vm5 = vcmp.eq.s32.totalorder %v8435_v3, %v418_v43  ;;  %vm457_vm6 = vcmp.eq.s32.totalorder %v8435_v3, %v421_v42 }
  0xdd   :  { %7125 = vmatmul.mubr.msk.f32.gmra.mxu0 %vm455_vm1, %v11880_v37 }
  0xde   :  { %7127 = vmatprep.mubr.msk.f32.mxu0 %vm456_vm5, %v11880_v37 }
  0xdf   :  { %v427_v44 = vpop.permute.xlu1 %426  ;;  %v424_v46 = vpop.permute.xlu0 %423 }
  0xe0   :  { %vm458_vm7 = vcmp.eq.s32.totalorder %v8435_v3, %v424_v46  ;;  %vm459_vm8 = vcmp.eq.s32.totalorder %v8435_v3, %v427_v44 }
  0xe1   :  { %7128 = vmatmul.mubr.msk.f32.gmra.mxu0 %vm457_vm6, %v11880_v37 }
  0xe2   :  { %7130 = vmatprep.mubr.msk.f32.mxu0 %vm458_vm7, %v11880_v37 }
  0xe3   :  { %v433_v47 = vpop.permute.xlu1 %432  ;;  %v430_v49 = vpop.permute.xlu0 %429 }
  0xe4   :  { %vm461_vm9 = vcmp.eq.s32.totalorder %v8435_v3, %v433_v47  ;;  %vm460_vm10 = vcmp.eq.s32.totalorder %v8435_v3, %v430_v49 }
  0xe5   :  { %7131 = vmatmul.mubr.msk.f32.gmra.mxu0 %vm459_vm8, %v11880_v37  ;;  %7133 = vmatprep.mubr.msk.f32.mxu1 %vm460_vm10, %v11880_v37 }
  0xe6   :  { %7134 = vmatmul.mubr.msk.f32.vlgmr.msra.gmra.mxu1 %vm461_vm9, %v11880_v37 }
  0xe7   :  { %v439_v50 = vpop.permute.xlu1 %438  ;;  %v436_v53 = vpop.permute.xlu0 %435 }
  0xe8   :  { %vm463_vm11 = vcmp.eq.s32.totalorder %v8435_v3, %v439_v50  ;;  %vm462_vm12 = vcmp.eq.s32.totalorder %v8435_v3, %v436_v53 }
  0xe9   :  { %7136 = vmatprep.mubr.msk.f32.mxu1 %vm462_vm12, %v11880_v37 }
  0xea   :  { %7137 = vmatmul.mubr.msk.f32.gmra.mxu1 %vm463_vm11, %v11880_v37 }
  0xeb   :  { %v445_v54 = vpop.permute.xlu1 %444  ;;  %v442_v56 = vpop.permute.xlu0 %441 }
  0xec   :  { %vm465_vm13 = vcmp.eq.s32.totalorder %v8435_v3, %v445_v54  ;;  %vm464_vm14 = vcmp.eq.s32.totalorder %v8435_v3, %v442_v56 }
  0xed   :  { %7139 = vmatprep.mubr.msk.f32.mxu1 %vm464_vm14, %v11880_v37 }
  0xee   :  { %7140 = vmatmul.mubr.msk.f32.gmra.mxu1 %vm465_vm13, %v11880_v37 }
  0xef   :  { %v451_v58 = vpop.permute.xlu1 %450  ;;  %v448_v59 = vpop.permute.xlu0 %447 }
  0xf0   :  { %vm467_vm15 = vcmp.eq.s32.totalorder %v8435_v3, %v451_v58  ;;  %vm466_vm0 = vcmp.eq.s32.totalorder %v8435_v3, %v448_v59 }
  0xf1   :  { %7142 = vmatprep.mubr.msk.f32.mxu1 %vm466_vm0, %v11880_v37 }
  0xf2   :  { %7143 = vmatmul.mubr.msk.f32.gmra.mxu1 %vm467_vm15, %v11880_v37 }
 0x121   :  { %v7067_v63 = vpop.f32.mrf.mxu1 }
 0x123   :  { %v681_v0 = vpop.f32.mrf.mxu1 }
 0x129   :  { %v7070_v5 = vpop.f32.mrf.mxu1 }
 0x12b   :  { %v691_v11 = vpop.f32.mrf.mxu1 }
 0x131   :  { %v7073_v16 = vpop.f32.mrf.mxu1 }
 0x133   :  { %v701_v17 = vpop.f32.mrf.mxu1 }
 0x138   :  { %v7076_v18 = vpop.f32.mrf.mxu1 }
 0x13a   :  { %v711_v24 = vpop.f32.mrf.mxu1 }
 0x13d   :  { %v7079_v25 = vpop.f32.mrf.mxu1 }
 0x13f   :  { %v721_v26 = vpop.f32.mrf.mxu1 }
 0x142   :  { %v7082_v30 = vpop.f32.mrf.mxu1 }
 0x144   :  { %v731_v31 = vpop.f32.mrf.mxu1 }
 0x146   :  { %v7085_v32 = vpop.f32.mrf.mxu1 }
 0x148   :  { %v741_v38 = vpop.f32.mrf.mxu1 }
 0x14a   :  { %v7088_v47 = vpop.f32.mrf.mxu1 }
 0x14c   :  { %v751_v58 = vpop.f32.mrf.mxu1 }
 0x199   :  { %v7123_v33 = vpop.f32.mrf.mxu0 }
 0x19a   :  { %v8772_v36 = vadd.f32 %v7123_v33, %v7067_v63 }
 0x19b   :  { %v826_v39 = vpop.f32.mrf.mxu0 }
 0x19c   :  { %11990 = vst [vmem:[#allocation20_spill] sm:$0xff] %v8772_v36  ;;  %v8774_v42 = vadd.f32 %v826_v39, %v681_v0  ;;  %v911_v43 = vsel %vm11934_vm2, %v8772_v36, 0.0 }
 0x19d   :  { %912 = vadd.xlane.f32.xlu1 %v911_v43  ;;  %v7126_v44 = vpop.f32.mrf.mxu0 }
 0x19e   :  { %11991 = vst [vmem:[#allocation21_spill] sm:$0xff] %v8774_v42  ;;  %v908_v46 = vsel %vm11934_vm2, %v8774_v42, 0.0  ;;  %v8782_v54 = vadd.f32 %v7126_v44, %v7070_v5 }
 0x19f   :  { %v836_v49 = vpop.f32.mrf.mxu0  ;;  %909 = vadd.xlane.f32.xlu0 %v908_v46 }
 0x1a0   :  { %v8780_v50 = vadd.f32 %v836_v49, %v691_v11  ;;  %11993 = vst [vmem:[#allocation23_spill] sm:$0xff] %v8782_v54  ;;  %v917_v43 = vsel %vm11934_vm2, %v8782_v54, 0.0 }
 0x1a1   :  { %v7129_v53 = vpop.f32.mrf.mxu0 }
 0x1a2   :  { %11992 = vst [vmem:[#allocation22_spill] sm:$0xff] %v8780_v50  ;;  %v914_v56 = vsel %vm11934_vm2, %v8780_v50, 0.0  ;;  %v8788_v33 = vadd.f32 %v7129_v53, %v7073_v16 }
 0x1a3   :  { %915 = vadd.xlane.f32.xlu0 %v914_v56  ;;  %v846_v59 = vpop.f32.mrf.mxu0 }
 0x1a4   :  { %v8786_v63 = vadd.f32 %v846_v59, %v701_v17  ;;  %11995 = vst [vmem:[#allocation25_spill] sm:$0xff] %v8788_v33  ;;  %v923_v16 = vsel %vm11934_vm2, %v8788_v33, 0.0 }
 0x1a5   :  { %v7132_v0 = vpop.f32.mrf.mxu0 }
 0x1a6   :  { %11994 = vst [vmem:[#allocation24_spill] sm:$0xff] %v8786_v63  ;;  %v7135_v39 = vpop.f32.mrf.mxu1  ;;  %v920_v11 = vsel %vm11934_vm2, %v8786_v63, 0.0  ;;  %v8796_v49 = vadd.f32 %v7132_v0, %v7076_v18 }
 0x1a7   :  { %918 = vadd.xlane.f32.xlu0 %v917_v43  ;;  %921 = vadd.xlane.f32.xlu1 %v920_v11  ;;  %v856_v5 = vpop.f32.mrf.mxu0  ;;  %v8804_v43 = vadd.f32 %v7135_v39, %v7079_v25 }
 0x1a8   :  { %v8794_v44 = vadd.f32 %v856_v5, %v711_v24  ;;  %v866_v46 = vpop.f32.mrf.mxu1  ;;  %11997 = vst [vmem:[#allocation27_spill] sm:$0xff] %v8796_v49  ;;  %v929_v18 = vsel %vm11934_vm2, %v8796_v49, 0.0 }
 0x1a9   :  { %v8798_v17 = vadd.f32 %v866_v46, %v721_v26  ;;  %11999 = vst [vmem:[#allocation29_spill] sm:$0xff] %v8804_v43  ;;  %v935_v25 = vsel %vm11934_vm2, %v8804_v43, 0.0 }
 0x1aa   :  { %11996 = vst [vmem:[#allocation26_spill] sm:$0xff] %v8794_v44  ;;  %v7138_v56 = vpop.f32.mrf.mxu1  ;;  %v926_v53 = vsel %vm11934_vm2, %v8794_v44, 0.0 }
 0x1ab   :  { %11998 = vst [vmem:[#allocation28_spill] sm:$0xff] %v8798_v17  ;;  %924 = vadd.xlane.f32.xlu0 %v923_v16  ;;  %927 = vadd.xlane.f32.xlu1 %v926_v53  ;;  %v932_v26 = vsel %vm11934_vm2, %v8798_v17, 0.0  ;;  %v8812_v5 = vadd.f32 %v7138_v56, %v7082_v30 }
 0x1ac   :  { %v876_v59 = vpop.f32.mrf.mxu1 }
 0x1ad   :  { %v8806_v11 = vadd.f32 %v876_v59, %v731_v31  ;;  %12001 = vst [vmem:[#allocation31_spill] sm:$0xff] %v8812_v5  ;;  %v941_v30 = vsel %vm11934_vm2, %v8812_v5, 0.0 }
 0x1ae   :  { %v7141_v24 = vpop.f32.mrf.mxu1 }
 0x1af   :  { %12000 = vst [vmem:[#allocation30_spill] sm:$0xff] %v8806_v11  ;;  %930 = vadd.xlane.f32.xlu0 %v929_v18  ;;  %933 = vadd.xlane.f32.xlu1 %v932_v26  ;;  %v938_v31 = vsel %vm11934_vm2, %v8806_v11, 0.0  ;;  %v8820_v53 = vadd.f32 %v7141_v24, %v7085_v32 }
 0x1b0   :  { %v886_v0 = vpop.f32.mrf.mxu1 }
 0x1b1   :  { %v8814_v46 = vadd.f32 %v886_v0, %v741_v38  ;;  %12003 = vst [vmem:[#allocation33_spill] sm:$0xff] %v8820_v53  ;;  %v947_v18 = vsel %vm11934_vm2, %v8820_v53, 0.0 }
 0x1b2   :  { %v7144_v16 = vpop.f32.mrf.mxu1 }
 0x1b3   :  { %12002 = vst [vmem:[#allocation32_spill] sm:$0xff] %v8814_v46  ;;  %936 = vadd.xlane.f32.xlu0 %v935_v25  ;;  %939 = vadd.xlane.f32.xlu1 %v938_v31  ;;  %v944_v38 = vsel %vm11934_vm2, %v8814_v46, 0.0  ;;  %v8828_v56 = vadd.f32 %v7144_v16, %v7088_v47 }
 0x1b4   :  { %v896_v39 = vpop.f32.mrf.mxu1 }
 0x1b5   :  { %v8822_v59 = vadd.f32 %v896_v39, %v751_v58  ;;  %12005 = vst [vmem:[#allocation35_spill] sm:$0xff] %v8828_v56  ;;  %v953_v32 = vsel %vm11934_vm2, %v8828_v56, 0.0 }
 0x1b7   :  { %12004 = vst [vmem:[#allocation34_spill] sm:$0xff] %v8822_v59  ;;  %942 = vadd.xlane.f32.xlu0 %v941_v30  ;;  %945 = vadd.xlane.f32.xlu1 %v944_v38  ;;  %v950_v26 = vsel %vm11934_vm2, %v8822_v59, 0.0 }
 0x1bb   :  { %948 = vadd.xlane.f32.xlu0 %v947_v18  ;;  %951 = vadd.xlane.f32.xlu1 %v950_v26 }
 0x1bf   :  { %954 = vadd.xlane.f32.xlu0 %v953_v32 }
 0x226   :  { %v913_v58 = vpop.xlane.xlu1 %912 }
 0x227   :  { %v958_v24 = vmul.f32 0.015625, %v913_v58 }
 0x228   :  { %v910_v0 = vpop.xlane.xlu0 %909 }
 0x229   :  { %v8837_v25 = vsub.f32 %v8772_v36, %v958_v24  ;;  %v957_v47 = vmul.f32 0.015625, %v910_v0 }
 0x22b   :  { %v8840_v16 = vsub.f32 %v8774_v42, %v957_v47  ;;  %v990_v31 = vmul.f32 %v8837_v25, %v8837_v25 }
 0x22c   :  { %v916_v39 = vpop.xlane.xlu0 %915 }
 0x22d   :  { %v959_v30 = vmul.f32 0.015625, %v916_v39  ;;  %v1008_v38 = vsel %vm11934_vm2, %v990_v31, 0.0  ;;  %v989_v18 = vmul.f32 %v8840_v16, %v8840_v16 }
 0x22e   :  { %1009 = vadd.xlane.f32.xlu0 %v1008_v38 }
 0x22f   :  { %v8848_v26 = vsub.f32 %v8780_v50, %v959_v30  ;;  %v1005_v32 = vsel %vm11934_vm2, %v989_v18, 0.0 }
 0x230   :  { %v922_v58 = vpop.xlane.xlu1 %921  ;;  %1006 = vadd.xlane.f32.xlu1 %v1005_v32  ;;  %v919_v24 = vpop.xlane.xlu0 %918 }
 0x231   :  { %v961_v0 = vmul.f32 0.015625, %v922_v58  ;;  %v960_v47 = vmul.f32 0.015625, %v919_v24  ;;  %v991_v37 = vmul.f32 %v8848_v26, %v8848_v26 }
 0x233   :  { %v8854_v39 = vsub.f32 %v8786_v63, %v961_v0  ;;  %v8857_v31 = vsub.f32 %v8782_v54, %v960_v47  ;;  %v1011_v38 = vsel %vm11934_vm2, %v991_v37, 0.0 }
 0x234   :  { %v928_v30 = vpop.xlane.xlu1 %927  ;;  %1012 = vadd.xlane.f32.xlu1 %v1011_v38  ;;  %v925_v23 = vpop.xlane.xlu0 %924 }
 0x235   :  { %v963_v18 = vmul.f32 0.015625, %v928_v30  ;;  %v962_v28 = vmul.f32 0.015625, %v925_v23  ;;  %v993_v32 = vmul.f32 %v8854_v39, %v8854_v39  ;;  %v992_v58 = vmul.f32 %v8857_v31, %v8857_v31 }
 0x237   :  { %v8865_v24 = vsub.f32 %v8794_v44, %v963_v18  ;;  %v8868_v0 = vsub.f32 %v8788_v33, %v962_v28  ;;  %v1017_v47 = vsel %vm11934_vm2, %v993_v32, 0.0  ;;  %v1014_v37 = vsel %vm11934_vm2, %v992_v58, 0.0 }
 0x238   :  { %v934_v38 = vpop.xlane.xlu1 %933  ;;  %1018 = vadd.xlane.f32.xlu1 %v1017_v47  ;;  %1015 = vadd.xlane.f32.xlu0 %v1014_v37  ;;  %v931_v23 = vpop.xlane.xlu0 %930 }
 0x239   :  { %v965_v30 = vmul.f32 0.015625, %v934_v38  ;;  %v964_v13 = vmul.f32 0.015625, %v931_v23  ;;  %v995_v19 = vmul.f32 %v8865_v24, %v8865_v24  ;;  %v994_v18 = vmul.f32 %v8868_v0, %v8868_v0 }
 0x23b   :  { %v8877_v6 = vsub.f32 %v8798_v17, %v965_v30  ;;  %v8880_v28 = vsub.f32 %v8796_v49, %v964_v13  ;;  %v1023_v32 = vsel %vm11934_vm2, %v995_v19, 0.0  ;;  %v1020_v58 = vsel %vm11934_vm2, %v994_v18, 0.0 }
 0x23c   :  { %v940_v47 = vpop.xlane.xlu1 %939  ;;  %1024 = vadd.xlane.f32.xlu1 %v1023_v32  ;;  %1021 = vadd.xlane.f32.xlu0 %v1020_v58  ;;  %v937_v37 = vpop.xlane.xlu0 %936 }
 0x23d   :  { %v967_v38 = vmul.f32 0.015625, %v940_v47  ;;  %v966_v23 = vmul.f32 0.015625, %v937_v37  ;;  %v997_v8 = vmul.f32 %v8877_v6, %v8877_v6  ;;  %v996_v30 = vmul.f32 %v8880_v28, %v8880_v28 }
 0x23f   :  { %v8889_v57 = vsub.f32 %v8806_v11, %v967_v38  ;;  %v8892_v13 = vsub.f32 %v8804_v43, %v966_v23  ;;  %v1029_v19 = vsel %vm11934_vm2, %v997_v8, 0.0  ;;  %v1026_v18 = vsel %vm11934_vm2, %v996_v30, 0.0 }
 0x240   :  { %v946_v32 = vpop.xlane.xlu1 %945  ;;  %1030 = vadd.xlane.f32.xlu1 %v1029_v19  ;;  %1027 = vadd.xlane.f32.xlu0 %v1026_v18  ;;  %v943_v58 = vpop.xlane.xlu0 %942  ;;  %v1168_v19 = vld [vmem:[%s11859_s5 + $0x38] sm:$0xff] }
 0x241   :  { %v969_v47 = vmul.f32 0.015625, %v946_v32  ;;  %v968_v37 = vmul.f32 0.015625, %v943_v58  ;;  %v999_v60 = vmul.f32 %v8889_v57, %v8889_v57  ;;  %v998_v38 = vmul.f32 %v8892_v13, %v8892_v13  ;;  %v1385_v18 = vld [vmem:[%s11860_s6 + $0x38] sm:$0xff]  ;;  %7145 = vmatprep.subr.mxu0 %v1168_v19 }
 0x242   :  { %7185 = vmatprep.subr.mxu1 %v1385_v18  ;;  %7146 = vmatpush3.msra.mxu0 %v1168_v19  ;;  %v1383_v19 = vld [vmem:[%s11860_s6 + $0x28] sm:$0xff] }
 0x243   :  { %v8901_v48 = vsub.f32 %v8814_v46, %v969_v47  ;;  %v8904_v23 = vsub.f32 %v8812_v5, %v968_v37  ;;  %v1035_v8 = vsel %vm11934_vm2, %v999_v60, 0.0  ;;  %v1032_v30 = vsel %vm11934_vm2, %v998_v38, 0.0  ;;  %v1167_v38 = vld [vmem:[%s11859_s5 + $0x30] sm:$0xff]  ;;  %7186 = vmatpush3.msra.mxu1 %v1385_v18 }
 0x244   :  { %v952_v32 = vpop.xlane.xlu1 %951  ;;  %1036 = vadd.xlane.f32.xlu1 %v1035_v8  ;;  %1033 = vadd.xlane.f32.xlu0 %v1032_v30  ;;  %v949_v58 = vpop.xlane.xlu0 %948  ;;  %v1384_v8 = vld [vmem:[%s11860_s6 + $0x30] sm:$0xff] }
 0x245   :  { %v971_v47 = vmul.f32 0.015625, %v952_v32  ;;  %v970_v51 = vmul.f32 0.015625, %v949_v58  ;;  %v1001_v37 = vmul.f32 %v8901_v48, %v8901_v48  ;;  %v1000_v60 = vmul.f32 %v8904_v23, %v8904_v23  ;;  %7147 = vmatprep.subr.mxu0 %v1167_v38  ;;  %7187 = vmatprep.subr.mxu1 %v1384_v8 }
 0x246   :  { %7148 = vmatpush3.msra.mxu0 %v1167_v38  ;;  %7188 = vmatpush3.msra.mxu1 %v1384_v8  ;;  %v1164_v38 = vld [vmem:[%s11859_s5 + $0x18] sm:$0xff] }
 0x247   :  { %v8925_v30 = vsub.f32 %v8822_v59, %v971_v47  ;;  %v8928_v32 = vsub.f32 %v8820_v53, %v970_v51  ;;  %v1041_v58 = vsel %vm11934_vm2, %v1001_v37, 0.0  ;;  %v1038_v35 = vsel %vm11934_vm2, %v1000_v60, 0.0  ;;  %7149 = vmatprep.subr.mxu0 %v1166_v40  ;;  %7189 = vmatprep.subr.mxu1 %v1383_v19  ;;  %v1165_v60 = vld [vmem:[%s11859_s5 + $0x20] sm:$0xff]  ;;  %v1381_v8 = vld [vmem:[%s11860_s6 + $0x18] sm:$0xff] }
 0x248   :  { %1042 = vadd.xlane.f32.xlu1 %v1041_v58  ;;  %1039 = vadd.xlane.f32.xlu0 %v1038_v35  ;;  %v955_v18 = vpop.xlane.xlu0 %954  ;;  %v1382_v35 = vld [vmem:[%s11860_s6 + $0x20] sm:$0xff] }
 0x249   :  { %v972_v47 = vmul.f32 0.015625, %v955_v18  ;;  %v1003_v51 = vmul.f32 %v8925_v30, %v8925_v30  ;;  %v1002_v37 = vmul.f32 %v8928_v32, %v8928_v32  ;;  %7150 = vmatpush3.msra.mxu0 %v1166_v40  ;;  %7190 = vmatpush3.msra.mxu1 %v1383_v19  ;;  %v1163_v40 = vld [vmem:[%s11859_s5 + $0x10] sm:$0xff] }
 0x24a   :  { %7151 = vmatprep.subr.mxu0 %v1165_v60  ;;  %7191 = vmatprep.subr.mxu1 %v1382_v35  ;;  %v1380_v19 = vld [vmem:[%s11860_s6 + $0x10] sm:$0xff] }
 0x24b   :  { %v8949_v58 = vsub.f32 %v8828_v56, %v972_v47  ;;  %v1047_v18 = vsel %vm11934_vm2, %v1003_v51, 0.0  ;;  %v1044_v22 = vsel %vm11934_vm2, %v1002_v37, 0.0  ;;  %7152 = vmatpush3.msra.mxu0 %v1165_v60  ;;  %7192 = vmatpush3.msra.mxu1 %v1382_v35  ;;  %v1162_v51 = vld [vmem:[%s11859_s5 + $0x8] sm:$0xff]  ;;  %v1161_v60 = vld [vmem:[%s11859_s5] sm:$0xff] }
 0x24c   :  { %1048 = vadd.xlane.f32.xlu1 %v1047_v18  ;;  %1045 = vadd.xlane.f32.xlu0 %v1044_v22  ;;  %v1379_v37 = vld [vmem:[%s11860_s6 + $0x8] sm:$0xff]  ;;  %v1378_v35 = vld [vmem:[%s11860_s6] sm:$0xff]  ;;  %v8983_v18 = vld [vmem:[%s11861_s7 + $0x38] sm:$0xff] }
 0x24d   :  { %v1004_v47 = vmul.f32 %v8949_v58, %v8949_v58  ;;  %7153 = vmatprep.subr.mxu0 %v1164_v38  ;;  %7193 = vmatprep.subr.mxu1 %v1381_v8 }
 0x24e   :  { %7154 = vmatpush3.msra.mxu0 %v1164_v38  ;;  %7194 = vmatpush3.msra.mxu1 %v1381_v8 }
 0x24f   :  { %v1050_v22 = vsel %vm11934_vm2, %v1004_v47, 0.0  ;;  %7155 = vmatprep.subr.mxu0 %v1163_v40  ;;  %7195 = vmatprep.subr.mxu1 %v1380_v19 }
 0x250   :  { %1051 = vadd.xlane.f32.xlu0 %v1050_v22  ;;  %7156 = vmatpush3.msra.mxu0 %v1163_v40 }
 0x251   :  { %7196 = vmatpush3.msra.mxu1 %v1380_v19  ;;  %7157 = vmatprep.subr.mxu0 %v1162_v51 }
 0x252   :  { %7197 = vmatprep.subr.mxu1 %v1379_v37  ;;  %7158 = vmatpush3.msra.mxu0 %v1162_v51 }
 0x253   :  { %7198 = vmatpush3.msra.mxu1 %v1379_v37  ;;  %7159 = vmatprep.subr.mxu0 %v1161_v60 }
 0x254   :  { %7199 = vmatprep.subr.mxu1 %v1378_v35  ;;  %7160 = vmatpush3.msra.mxu0 %v1161_v60 }
 0x255   :  { %7200 = vmatpush3.msra.mxu1 %v1378_v35  ;;  %7225 = vmatprep.subr.mxu0 %v8983_v18 }
 0x2b7   :  { %v1010_v38 = vpop.xlane.xlu0 %1009 }
 0x2b8   :  { %v1054_v8 = vmul.f32 0.015625, %v1010_v38 }
 0x2b9   :  { %v1007_v47 = vpop.xlane.xlu1 %1006 }
 0x2ba   :  { %v1070_v40 = vadd.f32 1e-05, %v1054_v8  ;;  %v1053_v22 = vmul.f32 0.015625, %v1007_v47 }
 0x2bc   :  { %7872 = vrsqrt.f32 %v1070_v40  ;;  %v1069_v19 = vadd.f32 1e-05, %v1053_v22 }
 0x2bd   :  { %v1013_v51 = vpop.xlane.xlu1 %1012 }
 0x2be   :  { %7874 = vrsqrt.f32 %v1069_v19  ;;  %v1055_v37 = vmul.f32 0.015625, %v1013_v51  ;;  %v8989_v51 = vld [vmem:[%s12006_s16] ss:$0 sm:$0xff] }
 0x2c0   :  { %v1071_v27 = vadd.f32 1e-05, %v1055_v37 }
 0x2c1   :  { %v1019_v60 = vpop.xlane.xlu1 %1018  ;;  %v1016_v35 = vpop.xlane.xlu0 %1015 }
 0x2c2   :  { %7876 = vrsqrt.f32 %v1071_v27  ;;  %v1057_v4 = vmul.f32 0.015625, %v1019_v60  ;;  %v1056_v12 = vmul.f32 0.015625, %v1016_v35 }
 0x2c4   :  { %v1073_v7 = vadd.f32 1e-05, %v1057_v4  ;;  %v1072_v59 = vadd.f32 1e-05, %v1056_v12 }
 0x2c5   :  { %v1025_v56 = vpop.xlane.xlu1 %1024  ;;  %v1022_v46 = vpop.xlane.xlu0 %1021 }
 0x2c6   :  { %7878 = vrsqrt.f32 %v1073_v7  ;;  %v1059_v38 = vmul.f32 0.015625, %v1025_v56  ;;  %v1058_v53 = vmul.f32 0.015625, %v1022_v46 }
 0x2c7   :  { %7880 = vrsqrt.f32 %v1072_v59 }
 0x2c8   :  { %v1075_v8 = vadd.f32 1e-05, %v1059_v38  ;;  %v1074_v47 = vadd.f32 1e-05, %v1058_v53 }
 0x2c9   :  { %v7873_v40 = vpop.eup %7872  ;;  %v1031_v22 = vpop.xlane.xlu1 %1030 }
 0x2ca   :  { %v1028_v19 = vpop.xlane.xlu0 %1027  ;;  %v1102_v27 = vmul.f32 %v7873_v40, %v8837_v25  ;;  %7882 = vrsqrt.f32 %v1075_v8  ;;  %v1061_v4 = vmul.f32 0.015625, %v1031_v22  ;;  %v8997_v25 = vld [vmem:[%s12007_s27] ss:$0 sm:$0xff] }
 0x2cb   :  { %v1060_v12 = vmul.f32 0.015625, %v1028_v19  ;;  %v7875_v37 = vpop.eup %7874  ;;  %7884 = vrsqrt.f32 %v1074_v47 }
 0x2cc   :  { %v1077_v7 = vadd.f32 1e-05, %v1061_v4  ;;  %v1101_v59 = vmul.f32 %v7875_v37, %v8840_v16  ;;  %v1124_v53 = vmul.f32 %v8989_v51, %v1102_v27 }
 0x2cd   :  { %v1076_v46 = vadd.f32 1e-05, %v1060_v12  ;;  %v1037_v56 = vpop.xlane.xlu1 %1036 }
 0x2ce   :  { %v1034_v60 = vpop.xlane.xlu0 %1033  ;;  %7886 = vrsqrt.f32 %v1077_v7  ;;  %v1063_v35 = vmul.f32 0.015625, %v1037_v56  ;;  %v1123_v8 = vmul.f32 %v8989_v51, %v1101_v59  ;;  %v9005_v12 = vadd.f32 %v8997_v25, %v1124_v53 }
 0x2cf   :  { %v1062_v38 = vmul.f32 0.015625, %v1034_v60  ;;  %v7877_v40 = vpop.eup %7876  ;;  %7888 = vrsqrt.f32 %v1076_v46 }
 0x2d0   :  { %v1079_v47 = vadd.f32 1e-05, %v1063_v35  ;;  %v9001_v16 = vadd.f32 %v8997_v25, %v1123_v8  ;;  %v1103_v19 = vmul.f32 %v7877_v40, %v8848_v26  ;;  %v1537_v26 = vld [vmem:[%s11861_s7 + $0x30] sm:$0xff] }
 0x2d1   :  { %v1078_v22 = vadd.f32 1e-05, %v1062_v38  ;;  %v1043_v27 = vpop.xlane.xlu1 %1042 }
 0x2d2   :  { %v1040_v4 = vpop.xlane.xlu0 %1039  ;;  %7890 = vrsqrt.f32 %v1079_v47  ;;  %v1065_v37 = vmul.f32 0.015625, %v1043_v27  ;;  %7161 = vmatprep.mubr.msk.f32.mxu0 %vm11934_vm2, %v9001_v16  ;;  %7201 = vmatprep.mubr.msk.f32.mxu1 %vm11934_vm2, %v9001_v16  ;;  %v1125_v46 = vmul.f32 %v8989_v51, %v1103_v19 }
 0x2d3   :  { %v1064_v7 = vmul.f32 0.015625, %v1040_v4  ;;  %v7879_v59 = vpop.eup %7878  ;;  %7892 = vrsqrt.f32 %v1078_v22  ;;  %7162 = vmatmul.mubr.msk.f32.vlgmr.msra.gmra.mxu0 %vm11934_vm2, %v9005_v12  ;;  %7202 = vmatmul.mubr.msk.f32.vlgmr.msra.gmra.mxu1 %vm11934_vm2, %v9005_v12  ;;  %v1536_v22 = vld [vmem:[%s11861_s7 + $0x28] sm:$0xff]  ;;  %v1535_v4 = vld [vmem:[%s11861_s7 + $0x20] sm:$0xff] }
 0x2d4   :  { %v7881_v53 = vpop.eup %7880  ;;  %v1081_v56 = vadd.f32 1e-05, %v1065_v37  ;;  %v9020_v35 = vadd.f32 %v8997_v25, %v1125_v46  ;;  %v1105_v38 = vmul.f32 %v7879_v59, %v8854_v39  ;;  %7226 = vmatpush3.msra.mxu0 %v8983_v18 }
 0x2d5   :  { %v1080_v60 = vadd.f32 1e-05, %v1064_v7  ;;  %v1049_v8 = vpop.xlane.xlu1 %1048  ;;  %v1104_v47 = vmul.f32 %v7881_v53, %v8857_v31  ;;  %7227 = vmatprep.subr.mxu0 %v1537_v26 }
 0x2d6   :  { %v1046_v40 = vpop.xlane.xlu0 %1045  ;;  %7894 = vrsqrt.f32 %v1081_v56  ;;  %v1067_v19 = vmul.f32 0.015625, %v1049_v8  ;;  %7164 = vmatprep.mubr.msk.f32.mxu0 %vm11934_vm2, %v9020_v35  ;;  %7204 = vmatprep.mubr.msk.f32.mxu1 %vm11934_vm2, %v9020_v35  ;;  %v1127_v39 = vmul.f32 %v8989_v51, %v1105_v38 }
 0x2d7   :  { %v1066_v27 = vmul.f32 0.015625, %v1046_v40  ;;  %v7883_v18 = vpop.eup %7882  ;;  %7896 = vrsqrt.f32 %v1080_v60  ;;  %v1126_v31 = vmul.f32 %v8989_v51, %v1104_v47  ;;  %7228 = vmatpush3.msra.mxu0 %v1537_v26 }
 0x2d8   :  { %v7885_v37 = vpop.eup %7884  ;;  %v1083_v7 = vadd.f32 1e-05, %v1067_v19  ;;  %v9038_v59 = vadd.f32 %v8997_v25, %v1127_v39  ;;  %v1107_v53 = vmul.f32 %v7883_v18, %v8865_v24  ;;  %7229 = vmatprep.subr.mxu0 %v1536_v22 }
 0x2d9   :  { %v1082_v46 = vadd.f32 1e-05, %v1066_v27  ;;  %v9042_v38 = vadd.f32 %v8997_v25, %v1126_v31  ;;  %v1106_v60 = vmul.f32 %v7885_v37, %v8868_v0  ;;  %7230 = vmatpush3.msra.mxu0 %v1536_v22  ;;  %v1534_v0 = vld [vmem:[%s11861_s7 + $0x18] sm:$0xff] }
 0x2da   :  { %v1052_v56 = vpop.xlane.xlu0 %1051  ;;  %7898 = vrsqrt.f32 %v1083_v7  ;;  %v1129_v8 = vmul.f32 %v8989_v51, %v1107_v53  ;;  %7231 = vmatprep.subr.mxu0 %v1535_v4 }
 0x2db   :  { %v1068_v26 = vmul.f32 0.015625, %v1052_v56  ;;  %v7887_v40 = vpop.eup %7886  ;;  %7900 = vrsqrt.f32 %v1082_v46  ;;  %7165 = vmatmul.mubr.msk.f32.gmra.mxu0 %vm11934_vm2, %v9042_v38  ;;  %7205 = vmatmul.mubr.msk.f32.gmra.mxu1 %vm11934_vm2, %v9042_v38  ;;  %v1128_v24 = vmul.f32 %v8989_v51, %v1106_v60 }
 0x2dc   :  { %v7889_v47 = vpop.eup %7888  ;;  %7167 = vmatprep.mubr.msk.f32.mxu0 %vm11934_vm2, %v9038_v59  ;;  %7207 = vmatprep.mubr.msk.f32.mxu1 %vm11934_vm2, %v9038_v59  ;;  %v9059_v19 = vadd.f32 %v8997_v25, %v1129_v8  ;;  %v1109_v27 = vmul.f32 %v7887_v40, %v8877_v6  ;;  %v1533_v6 = vld [vmem:[%s11861_s7 + $0x10] sm:$0xff]  ;;  %v1532_v40 = vld [vmem:[%s11861_s7 + $0x8] sm:$0xff] }
 0x2dd   :  { %v1084_v22 = vadd.f32 1e-05, %v1068_v26  ;;  %v9063_v39 = vadd.f32 %v8997_v25, %v1128_v24  ;;  %v1108_v18 = vmul.f32 %v7889_v47, %v8880_v28  ;;  %7232 = vmatpush3.msra.mxu0 %v1535_v4 }
 0x2de   :  { %v1131_v31 = vmul.f32 %v8989_v51, %v1109_v27  ;;  %7233 = vmatprep.subr.mxu0 %v1534_v0 }
 0x2df   :  { %7902 = vrsqrt.f32 %v1084_v22  ;;  %v7891_v37 = vpop.eup %7890  ;;  %7168 = vmatmul.mubr.msk.f32.gmra.mxu0 %vm11934_vm2, %v9063_v39  ;;  %7208 = vmatmul.mubr.msk.f32.gmra.mxu1 %vm11934_vm2, %v9063_v39  ;;  %v1130_v7 = vmul.f32 %v8989_v51, %v1108_v18 }
 0x2e0   :  { %v7893_v46 = vpop.eup %7892  ;;  %7170 = vmatprep.mubr.msk.f32.mxu0 %vm11934_vm2, %v9059_v19  ;;  %7210 = vmatprep.mubr.msk.f32.mxu1 %vm11934_vm2, %v9059_v19  ;;  %v9080_v28 = vadd.f32 %v8997_v25, %v1131_v31  ;;  %v1111_v4 = vmul.f32 %v7891_v37, %v8889_v57  ;;  %v1531_v31 = vld [vmem:[%s11861_s7] sm:$0xff] }
 0x2e1   :  { %v1152_v53 = vadd.f32 %v8997_v25, %v1130_v7  ;;  %v1110_v56 = vmul.f32 %v7893_v46, %v8892_v13  ;;  %7234 = vmatpush3.msra.mxu0 %v1534_v0 }
 0x2e2   :  { %v1133_v60 = vmul.f32 %v8989_v51, %v1111_v4  ;;  %7235 = vmatprep.subr.mxu0 %v1533_v6 }
 0x2e3   :  { %v7895_v26 = vpop.eup %7894  ;;  %7171 = vmatmul.mubr.msk.f32.gmra.mxu0 %vm11934_vm2, %v1152_v53  ;;  %7211 = vmatmul.mubr.msk.f32.gmra.mxu1 %vm11934_vm2, %v1152_v53  ;;  %v1132_v8 = vmul.f32 %v8989_v51, %v1110_v56 }
 0x2e4   :  { %v7897_v57 = vpop.eup %7896  ;;  %7173 = vmatprep.mubr.msk.f32.mxu0 %vm11934_vm2, %v9080_v28  ;;  %7213 = vmatprep.mubr.msk.f32.mxu1 %vm11934_vm2, %v9080_v28  ;;  %v1155_v13 = vadd.f32 %v8997_v25, %v1133_v60  ;;  %v1113_v24 = vmul.f32 %v7895_v26, %v8901_v48 }
 0x2e5   :  { %v1154_v0 = vadd.f32 %v8997_v25, %v1132_v8  ;;  %v1112_v47 = vmul.f32 %v7897_v57, %v8904_v23  ;;  %7236 = vmatpush3.msra.mxu0 %v1533_v6 }
 0x2e6   :  { %v1135_v22 = vmul.f32 %v8989_v51, %v1113_v24  ;;  %7237 = vmatprep.subr.mxu0 %v1532_v40 }
 0x2e7   :  { %v7899_v27 = vpop.eup %7898  ;;  %7174 = vmatmul.mubr.msk.f32.gmra.mxu0 %vm11934_vm2, %v1154_v0  ;;  %7214 = vmatmul.mubr.msk.f32.gmra.mxu1 %vm11934_vm2, %v1154_v0  ;;  %v1134_v18 = vmul.f32 %v8989_v51, %v1112_v47 }
 0x2e8   :  { %v7901_v48 = vpop.eup %7900  ;;  %7176 = vmatprep.mubr.msk.f32.mxu0 %vm11934_vm2, %v1155_v13  ;;  %7216 = vmatprep.mubr.msk.f32.mxu1 %vm11934_vm2, %v1155_v13  ;;  %v1157_v23 = vadd.f32 %v8997_v25, %v1135_v22  ;;  %v1115_v37 = vmul.f32 %v7899_v27, %v8925_v30 }
 0x2e9   :  { %v1156_v7 = vadd.f32 %v8997_v25, %v1134_v18  ;;  %v1114_v6 = vmul.f32 %v7901_v48, %v8928_v32  ;;  %7238 = vmatpush3.msra.mxu0 %v1532_v40 }
 0x2ea   :  { %v1137_v46 = vmul.f32 %v8989_v51, %v1115_v37  ;;  %7239 = vmatprep.subr.mxu0 %v1531_v31 }
 0x2eb   :  { %7177 = vmatmul.mubr.msk.f32.gmra.mxu0 %vm11934_vm2, %v1156_v7  ;;  %7217 = vmatmul.mubr.msk.f32.gmra.mxu1 %vm11934_vm2, %v1156_v7  ;;  %v1136_v56 = vmul.f32 %v8989_v51, %v1114_v6 }
 0x2ec   :  { %v7903_v4 = vpop.eup %7902  ;;  %7179 = vmatprep.mubr.msk.f32.mxu0 %vm11934_vm2, %v1157_v23  ;;  %7219 = vmatprep.mubr.msk.f32.mxu1 %vm11934_vm2, %v1157_v23  ;;  %v1159_v30 = vadd.f32 %v8997_v25, %v1137_v46 }
 0x2ed   :  { %v1116_v60 = vmul.f32 %v7903_v4, %v8949_v58  ;;  %v1158_v32 = vadd.f32 %v8997_v25, %v1136_v56  ;;  %7240 = vmatpush3.msra.mxu0 %v1531_v31  ;;  %v324_v58 = vshra.s32 %v8433_v2, 5 }
 0x2ef   :  { %v1138_v26 = vmul.f32 %v8989_v51, %v1116_v60  ;;  %7180 = vmatmul.mubr.msk.f32.gmra.mxu0 %vm11934_vm2, %v1158_v32  ;;  %7220 = vmatmul.mubr.msk.f32.gmra.mxu1 %vm11934_vm2, %v1158_v32  ;;  %v9156_v51 = vshra.s32 %v8435_v3, 4 }
 0x2f0   :  { %7182 = vmatprep.mubr.msk.f32.mxu0 %vm11934_vm2, %v1159_v30  ;;  %7222 = vmatprep.mubr.msk.f32.mxu1 %vm11934_vm2, %v1159_v30 }
 0x2f1   :  { %v1160_v8 = vadd.f32 %v8997_v25, %v1138_v26  ;;  %vm340_vm3 = vcmp.eq.s32.totalorder %v324_v58, %v9156_v51 }
 0x2f3   :  { %7183 = vmatmul.mubr.msk.f32.gmra.mxu0 %vm11934_vm2, %v1160_v8  ;;  %7223 = vmatmul.mubr.msk.f32.gmra.mxu1 %vm11934_vm2, %v1160_v8 }
 0x2f4   :  { %7241 = vmatprep.mubr.msk.f32.mxu0 %vm11934_vm2, %v9001_v16  ;;  %v12008_v16 = vmov 0.0  }
 0x2f7   :  { %7242 = vmatmul.mubr.msk.f32.vlgmr.msra.gmra.mxu0 %vm11934_vm2, %v9005_v12  ;;  %v9162_v12 = vsel %vm340_vm3, 1.0, %v12008_v16 }
 0x2f8   :  { %7244 = vmatprep.mubr.msk.f32.mxu0 %vm11934_vm2, %v9020_v35 }
 0x2fb   :  { %7245 = vmatmul.mubr.msk.f32.gmra.mxu0 %vm11934_vm2, %v9042_v38 }
 0x2fc   :  { %7247 = vmatprep.mubr.msk.f32.mxu0 %vm11934_vm2, %v9038_v59 }
 0x2ff   :  { %7248 = vmatmul.mubr.msk.f32.gmra.mxu0 %vm11934_vm2, %v9063_v39 }
 0x300   :  { %7250 = vmatprep.mubr.msk.f32.mxu0 %vm11934_vm2, %v9059_v19 }
 0x303   :  { %7251 = vmatmul.mubr.msk.f32.gmra.mxu0 %vm11934_vm2, %v1152_v53 }
 0x304   :  { %7253 = vmatprep.mubr.msk.f32.mxu0 %vm11934_vm2, %v9080_v28 }
 0x307   :  { %7254 = vmatmul.mubr.msk.f32.gmra.mxu0 %vm11934_vm2, %v1154_v0 }
 0x308   :  { %7256 = vmatprep.mubr.msk.f32.mxu0 %vm11934_vm2, %v1155_v13 }
 0x30b   :  { %7257 = vmatmul.mubr.msk.f32.gmra.mxu0 %vm11934_vm2, %v1156_v7 }
 0x30c   :  { %7259 = vmatprep.mubr.msk.f32.mxu0 %vm11934_vm2, %v1157_v23 }
 0x30f   :  { %7260 = vmatmul.mubr.msk.f32.gmra.mxu0 %vm11934_vm2, %v1158_v32 }
 0x310   :  { %7262 = vmatprep.mubr.msk.f32.mxu0 %vm11934_vm2, %v1159_v30 }
 0x313   :  { %7263 = vmatmul.mubr.msk.f32.gmra.mxu0 %vm11934_vm2, %v1160_v8 }
 0x393   :  { %v9159_v25 = vpop.f32.mrf.mxu0  ;;  %v9164_v35 = vpop.f32.mrf.mxu1 }
 0x395   :  { %v1283_v59 = vpop.f32.mrf.mxu0  ;;  %v9168_v19 = vpop.f32.mrf.mxu1 }
 0x396   :  { %v1362_v38 = vmul.f32 %v9162_v12, %v1283_v59 }
 0x398   :  { %7297 = vmatprep.mubr.msk.f32.mxu1 %vm11934_vm2, %v1362_v38 }
 0x39b   :  { %v9170_v39 = vpop.f32.mrf.mxu0  ;;  %v9172_v28 = vpop.f32.mrf.mxu1 }
 0x39d   :  { %v9174_v53 = vpop.f32.mrf.mxu0  ;;  %v9176_v40 = vpop.f32.mrf.mxu1 }
 0x39f   :  { %v9178_v57 = vpop.f32.mrf.mxu0  ;;  %v9180_v13 = vpop.f32.mrf.mxu1 }
 0x3a1   :  { %v9182_v24 = vpop.f32.mrf.mxu0  ;;  %v9184_v0 = vpop.f32.mrf.mxu1 }
 0x3a3   :  { %v9186_v47 = vpop.f32.mrf.mxu0  ;;  %v7212_v22 = vpop.f32.mrf.mxu1 }
 0x3a5   :  { %v9188_v27 = vpop.f32.mrf.mxu0  ;;  %v1482_v18 = vpop.f32.mrf.mxu1 }
 0x3a7   :  { %v9190_v31 = vpop.f32.mrf.mxu0  ;;  %v7215_v48 = vpop.f32.mrf.mxu1 }
 0x3a9   :  { %v9192_v23 = vpop.f32.mrf.mxu0  ;;  %v1492_v37 = vpop.f32.mrf.mxu1 }
 0x3ab   :  { %v9194_v7 = vpop.f32.mrf.mxu0  ;;  %v7218_v6 = vpop.f32.mrf.mxu1 }
 0x3ad   :  { %v9196_v46 = vpop.f32.mrf.mxu0  ;;  %v1502_v4 = vpop.f32.mrf.mxu1 }
 0x3af   :  { %v9198_v56 = vpop.f32.mrf.mxu0  ;;  %v7221_v30 = vpop.f32.mrf.mxu1 }
 0x3b1   :  { %v9200_v60 = vpop.f32.mrf.mxu0  ;;  %v1512_v32 = vpop.f32.mrf.mxu1 }
 0x3b3   :  { %v9202_v26 = vpop.f32.mrf.mxu0  ;;  %v7224_v8 = vpop.f32.mrf.mxu1 }
 0x3b4   :  { %7265 = vmatprep.subr.msk.mxu1 %vm11934_vm2, %v7224_v8 }
 0x3b5   :  { %v9205_v58 = vpop.f32.mrf.mxu0  ;;  %v1522_v59 = vpop.f32.mrf.mxu1  ;;  %7266 = vmatpush3.xpose.msk.msra.mxu1 %vm11934_vm2, %v7224_v8 }
 0x3b6   :  { %7267 = vmatprep.subr.msk.mxu1 %vm11934_vm2, %v1522_v59 }
 0x3b7   :  { %v9209_v38 = vpop.f32.mrf.mxu0 }
 0x3b9   :  { %v9211_v11 = vpop.f32.mrf.mxu0  ;;  %7268 = vmatpush3.xpose.msk.msra.mxu1 %vm11934_vm2, %v1522_v59 }
 0x3ba   :  { %7269 = vmatprep.subr.msk.mxu1 %vm11934_vm2, %v7221_v30 }
 0x3bb   :  { %v9215_v5 = vpop.f32.mrf.mxu0 }
 0x3bd   :  { %v9217_v17 = vpop.f32.mrf.mxu0  ;;  %7270 = vmatpush3.xpose.msk.msra.mxu1 %vm11934_vm2, %v7221_v30 }
 0x3be   :  { %7271 = vmatprep.subr.msk.mxu1 %vm11934_vm2, %v1512_v32 }
 0x3bf   :  { %v7249_v43 = vpop.f32.mrf.mxu0 }
 0x3c1   :  { %v1625_v8 = vpop.f32.mrf.mxu0  ;;  %7272 = vmatpush3.xpose.msk.msra.mxu1 %vm11934_vm2, %v1512_v32 }
 0x3c2   :  { %7273 = vmatprep.subr.msk.mxu1 %vm11934_vm2, %v7218_v6 }
 0x3c3   :  { %v7252_v44 = vpop.f32.mrf.mxu0 }
 0x3c5   :  { %v1635_v49 = vpop.f32.mrf.mxu0  ;;  %7274 = vmatpush3.xpose.msk.msra.mxu1 %vm11934_vm2, %v7218_v6 }
 0x3c6   :  { %7275 = vmatprep.subr.msk.mxu1 %vm11934_vm2, %v1502_v4 }
 0x3c7   :  { %v7255_v59 = vpop.f32.mrf.mxu0 }
 0x3c9   :  { %v1645_v63 = vpop.f32.mrf.mxu0  ;;  %7276 = vmatpush3.xpose.msk.msra.mxu1 %vm11934_vm2, %v1502_v4  ;;  %v335_v4 = vshra.s32 %v8648_v62, 5 }
 0x3ca   :  { %7277 = vmatprep.subr.msk.mxu1 %vm11934_vm2, %v7215_v48 }
 0x3cb   :  { %v7258_v30 = vpop.f32.mrf.mxu0  ;;  %vm351_vm13 = vcmp.eq.s32.totalorder %v335_v4, %v9156_v51 }
 0x3cd   :  { %v1655_v33 = vpop.f32.mrf.mxu0  ;;  %7278 = vmatpush3.xpose.msk.msra.mxu1 %vm11934_vm2, %v7215_v48 }
 0x3ce   :  { %7279 = vmatprep.subr.msk.mxu1 %vm11934_vm2, %v1492_v37 }
 0x3cf   :  { %v7261_v32 = vpop.f32.mrf.mxu0 }
 0x3d1   :  { %v1665_v50 = vpop.f32.mrf.mxu0  ;;  %7280 = vmatpush3.xpose.msk.msra.mxu1 %vm11934_vm2, %v1492_v37 }
 0x3d2   :  { %7281 = vmatprep.subr.msk.mxu1 %vm11934_vm2, %v7212_v22 }
 0x3d3   :  { %v7264_v6 = vpop.f32.mrf.mxu0 }
 0x3d4   :  { %7321 = vmatprep.subr.mxu0 %v7264_v6 }
 0x3d5   :  { %v1675_v54 = vpop.f32.mrf.mxu0  ;;  %7282 = vmatpush3.xpose.msk.msra.mxu1 %vm11934_vm2, %v7212_v22  ;;  %7322 = vmatpush3.msra.mxu0 %v7264_v6  ;;  %v333_v22 = vshra.s32 %v8615_v55, 5 }
 0x3d6   :  { %7283 = vmatprep.subr.msk.mxu1 %vm11934_vm2, %v1482_v18  ;;  %7323 = vmatprep.subr.mxu0 %v1675_v54 }
 0x3d7   :  { %7324 = vmatpush3.msra.mxu0 %v1675_v54  ;;  %v326_v54 = vshra.s32 %v8466_v15, 5  ;;  %vm349_vm11 = vcmp.eq.s32.totalorder %v333_v22, %v9156_v51 }
 0x3d8   :  { %7325 = vmatprep.subr.mxu0 %v7261_v32 }
 0x3d9   :  { %7284 = vmatpush3.xpose.msk.msra.mxu1 %vm11934_vm2, %v1482_v18  ;;  %7326 = vmatpush3.msra.mxu0 %v7261_v32  ;;  %vm342_vm1 = vcmp.eq.s32.totalorder %v326_v54, %v9156_v51  ;;  %v334_v18 = vshra.s32 %v8643_v61, 5  ;;  %v338_v32 = vshra.s32 %v8682_v14, 5  ;;  %v339_v54 = vshra.s32 %v8703_v20, 5 }
 0x3da   :  { %7285 = vmatprep.subr.msk.mxu1 %vm11934_vm2, %v9180_v13  ;;  %7327 = vmatprep.subr.mxu0 %v1665_v50 }
 0x3db   :  { %7328 = vmatpush3.msra.mxu0 %v1665_v50  ;;  %v325_v50 = vshra.s32 %v8449_v9, 5  ;;  %vm350_vm12 = vcmp.eq.s32.totalorder %v334_v18, %v9156_v51  ;;  %vm354_vm0 = vcmp.eq.s32.totalorder %v338_v32, %v9156_v51  ;;  %vm355_vm3 = vcmp.eq.s32.totalorder %v339_v54, %v9156_v51 }
 0x3dc   :  { %7329 = vmatprep.subr.mxu0 %v7258_v30  ;;  %v12021_v18 = vand.u32 15, %v8489_v21  ;;  %v170_v32 = vshra.s32 %v8615_v55, 4 }
 0x3dd   :  { %7286 = vmatpush3.xpose.msk.msra.mxu1 %vm11934_vm2, %v9180_v13  ;;  %7330 = vmatpush3.msra.mxu0 %v7258_v30  ;;  %vm341_vm4 = vcmp.eq.s32.totalorder %v325_v50, %v9156_v51  ;;  %v337_v30 = vshra.s32 %v8676_v10, 5 }
 0x3de   :  { %7287 = vmatprep.subr.msk.mxu1 %vm11934_vm2, %v9184_v0  ;;  %7331 = vmatprep.subr.mxu0 %v1655_v33 }
 0x3df   :  { %7332 = vmatpush3.msra.mxu0 %v1655_v33  ;;  %v328_v33 = vshra.s32 %v8516_v29, 5  ;;  %vm353_vm15 = vcmp.eq.s32.totalorder %v337_v30, %v9156_v51  ;;  %v12027_v30 = vand.u32 15, %v8466_v15 }
 0x3e0   :  { %7333 = vmatprep.subr.mxu0 %v7255_v59 }
 0x3e1   :  { %7288 = vmatpush3.xpose.msk.msra.mxu1 %vm11934_vm2, %v9184_v0  ;;  %7334 = vmatpush3.msra.mxu0 %v7255_v59  ;;  %vm344_vm6 = vcmp.eq.s32.totalorder %v328_v33, %v9156_v51  ;;  %v9339_v59 = vsel %vm350_vm12, 1.0, %v12008_v16  ;;  %v9370_v33 = vsel %vm354_vm0, 1.0, %v12008_v16 }
 0x3e2   :  { %7289 = vmatprep.subr.msk.mxu1 %vm11934_vm2, %v9172_v28  ;;  %7335 = vmatprep.subr.mxu0 %v1645_v63  ;;  %v1372_v6 = vmul.f32 %v9339_v59, %v9196_v46  ;;  %12011 = vst [vmem:[#allocation38_spill] sm:$0xff] %v9370_v33 }
 0x3e3   :  { %7336 = vmatpush3.msra.mxu0 %v1645_v63  ;;  %v327_v63 = vshra.s32 %v8489_v21, 5 }
 0x3e4   :  { %7337 = vmatprep.subr.mxu0 %v7252_v44 }
 0x3e5   :  { %7290 = vmatpush3.xpose.msk.msra.mxu1 %vm11934_vm2, %v9172_v28  ;;  %7338 = vmatpush3.msra.mxu0 %v7252_v44  ;;  %v9266_v44 = vsel %vm341_vm4, 1.0, %v12008_v16  ;;  %vm343_vm5 = vcmp.eq.s32.totalorder %v327_v63, %v9156_v51  ;;  %v9364_v63 = vsel %vm353_vm15, 1.0, %v12008_v16 }
 0x3e6   :  { %7291 = vmatprep.subr.msk.mxu1 %vm11934_vm2, %v9176_v40  ;;  %7339 = vmatprep.subr.mxu0 %v1635_v49  ;;  %12010 = vst [vmem:[#allocation37_spill] sm:$0xff] %v9364_v63 }
 0x3e7   :  { %7340 = vmatpush3.msra.mxu0 %v1635_v49  ;;  %v9271_v49 = vsel %vm342_vm1, 1.0, %v12008_v16 }
 0x3e8   :  { %7341 = vmatprep.subr.mxu0 %v7249_v43  ;;  %v1364_v28 = vmul.f32 %v9271_v49, %v9174_v53 }
 0x3e9   :  { %7292 = vmatpush3.xpose.msk.msra.mxu1 %vm11934_vm2, %v9176_v40  ;;  %7342 = vmatpush3.msra.mxu0 %v7249_v43  ;;  %v329_v43 = vshra.s32 %v8538_v34, 5  ;;  %v9291_v40 = vsel %vm344_vm6, 1.0, %v12008_v16 }
 0x3ea   :  { %7293 = vmatprep.subr.msk.mxu1 %vm11934_vm2, %v9164_v35  ;;  %7343 = vmatprep.subr.mxu0 %v1625_v8  ;;  %v1366_v13 = vmul.f32 %v9291_v40, %v9182_v24 }
 0x3eb   :  { %7344 = vmatpush3.msra.mxu0 %v1625_v8  ;;  %vm345_vm7 = vcmp.eq.s32.totalorder %v329_v43, %v9156_v51  ;;  %v1375_v43 = vmul.f32 %v9198_v56, %v9364_v63  ;;  %v161_v56 = vshra.s32 %v8433_v2, 4 }
 0x3ec   :  { %7345 = vmatprep.subr.mxu0 %v9215_v5 }
 0x3ed   :  { %7294 = vmatpush3.xpose.msk.msra.mxu1 %vm11934_vm2, %v9164_v35  ;;  %7346 = vmatpush3.msra.mxu0 %v9215_v5  ;;  %v330_v5 = vshra.s32 %v8559_v41, 5  ;;  %v9284_v35 = vsel %vm343_vm5, 1.0, %v12008_v16  ;;  %vm9397_vm5 = vcmp.eq.s32.totalorder %v161_v56, %v9156_v51 }
 0x3ee   :  { %7295 = vmatprep.subr.msk.mxu1 %vm11934_vm2, %v9168_v19  ;;  %7347 = vmatprep.subr.mxu0 %v9217_v17  ;;  %v1365_v53 = vmul.f32 %v9170_v39, %v9284_v35 }
 0x3ef   :  { %7348 = vmatpush3.msra.mxu0 %v9217_v17  ;;  %v1363_v17 = vmul.f32 %v9159_v25, %v9266_v44  ;;  %vm346_vm8 = vcmp.eq.s32.totalorder %v330_v5, %v9156_v51  ;;  %v332_v25 = vshra.s32 %v8604_v52, 5  ;;  %v1376_v5 = vmul.f32 %v9370_v33, %v9205_v58 }
 0x3f0   :  { %7349 = vmatprep.subr.mxu0 %v9209_v38  ;;  %v9307_v0 = vsel %vm346_vm8, 1.0, %v12008_v16  ;;  %v12013_v58 = vand.u32 15, %v8449_v9 }
 0x3f1   :  { %7296 = vmatpush3.xpose.msk.msra.mxu1 %vm11934_vm2, %v9168_v19  ;;  %7350 = vmatpush3.msra.mxu0 %v9209_v38  ;;  %v331_v19 = vshra.s32 %v8578_v45, 5  ;;  %vm348_vm10 = vcmp.eq.s32.totalorder %v332_v25, %v9156_v51  ;;  %v1368_v48 = vmul.f32 %v9307_v0, %v9188_v27  ;;  %v336_v38 = vshra.s32 %v8657_v1, 5 }
 0x3f2   :  { %7351 = vmatprep.subr.mxu0 %v9211_v11  ;;  %v9323_v37 = vsel %vm348_vm10, 1.0, %v12008_v16  ;;  %v9333_v27 = vsel %vm349_vm11, 1.0, %v12008_v16  ;;  %v12016_v25 = vand.u32 15, %v8433_v2 }
 0x3f3   :  { %7352 = vmatpush3.msra.mxu0 %v9211_v11  ;;  %v9301_v11 = vsel %vm345_vm7, 1.0, %v12008_v16  ;;  %vm347_vm9 = vcmp.eq.s32.totalorder %v331_v19, %v9156_v51  ;;  %v1370_v8 = vmul.f32 %v9323_v37, %v9192_v23  ;;  %vm352_vm14 = vcmp.eq.s32.totalorder %v336_v38, %v9156_v51 }
 0x3f4   :  { %7298 = vmatmul.mubr.msk.f32.vlgmr.msra.gmra.mxu1 %vm11934_vm2, %v1363_v17  ;;  %v1367_v39 = vmul.f32 %v9178_v57, %v9301_v11  ;;  %v9317_v24 = vsel %vm347_vm9, 1.0, %v12008_v16  ;;  %v9349_v23 = vsel %vm351_vm13, 1.0, %v12008_v16  ;;  %v9355_v50 = vsel %vm352_vm14, 1.0, %v12008_v16 }
 0x3f5   :  { %7300 = vmatprep.mubr.msk.f32.mxu1 %vm11934_vm2, %v1364_v28  ;;  %v1369_v57 = vmul.f32 %v9186_v47, %v9317_v24  ;;  %v1371_v47 = vmul.f32 %v9190_v31, %v9333_v27  ;;  %12009 = vst [vmem:[#allocation36_spill] sm:$0xff] %v9355_v50  ;;  %v1373_v31 = vmul.f32 %v9194_v7, %v9349_v23  ;;  %v9377_v7 = vsel %vm355_vm3, 1.0, %v12008_v16 }
 0x3f6   :  { %v1374_v46 = vmul.f32 %v9355_v50, %v9200_v60  ;;  %12012 = vst [vmem:[#allocation39_spill] sm:$0xff] %v9377_v7  ;;  %v1377_v60 = vmul.f32 %v9202_v26, %v9377_v7  ;;  %v162_v17 = vshra.s32 %v8449_v9, 4  ;;  %v9388_v28 = vand.u32 15, %v8435_v3 }
 0x3f7   :  { %v164_v19 = vshra.s32 %v8489_v21, 4  ;;  %v11914_v38 = vmov -1e+30  }
 0x3f8   :  { %7301 = vmatmul.mubr.msk.f32.gmra.mxu1 %vm11934_vm2, %v1365_v53  ;;  %vm179_vm4 = vcmp.eq.s32.totalorder %v162_v17, %v9156_v51  ;;  %vm212_vm1 = vcmp.ge.s32.totalorder %v12013_v58, %v9388_v28  ;;  %vm9404_vm6 = vcmp.ge.s32.totalorder %v12016_v25, %v9388_v28  ;;  %vm9417_vm9 = vcmp.ge.s32.totalorder %v12021_v18, %v9388_v28 }
 0x3f9   :  { %7303 = vmatprep.mubr.msk.f32.mxu1 %vm11934_vm2, %v1366_v13  ;;  %v163_v13 = vshra.s32 %v8466_v15, 4  ;;  %vm228_vm7 = vmand %vm179_vm4, %vm212_vm1  ;;  %vm9410_vm8 = vcmp.eq.s32.totalorder %v164_v19, %v9156_v51  ;;  %vm9437_vm12 = vcmp.ge.s32.totalorder %v12027_v30, %v9388_v28  ;;  %v12039_v25 = vand.u32 15, %v8516_v29 }
 0x3fa   :  { %vm227_vm10 = vmand %vm9397_vm5, %vm9404_vm6 }
 0x3fb   :  { %vm9430_vm11 = vcmp.eq.s32.totalorder %v163_v13, %v9156_v51  ;;  %vm230_vm13 = vmand %vm9410_vm8, %vm9417_vm9  ;;  %vm9480_vm4 = vcmp.ge.s32.totalorder %v12039_v25, %v9388_v28  ;;  %v167_v13 = vshra.s32 %v8559_v41, 4 }
 0x3fc   :  { %7304 = vmatmul.mubr.msk.f32.gmra.mxu1 %vm11934_vm2, %v1367_v39  ;;  %vm229_vm0 = vmand %vm9430_vm11, %vm9437_vm12  ;;  %v9470_v19 = vsel %vm230_vm13, 0.0, %v11914_v38  ;;  %vm9545_vm11 = vcmp.eq.s32.totalorder %v170_v32, %v9156_v51 }
 0x3fd   :  { %7306 = vmatprep.mubr.msk.f32.mxu1 %vm11934_vm2, %v1368_v48  ;;  %v166_v48 = vshra.s32 %v8538_v34, 4  ;;  %12036 = vst [vmem:[#allocation42_spill] sm:$0xff] %v9470_v19  ;;  %vm9521_vm8 = vcmp.eq.s32.totalorder %v167_v13, %v9156_v51 }
 0x3ff   :  { %vm9450_vm14 = vcmp.eq.s32.totalorder %v166_v48, %v9156_v51  ;;  %v9494_v48 = vsel %vm229_vm0, 0.0, %v11914_v38 }
 0x400   :  { %7307 = vmatmul.mubr.msk.f32.gmra.mxu1 %vm11934_vm2, %v1369_v57  ;;  %v9427_v57 = vsel %vm228_vm7, 0.0, %v11914_v38  ;;  %12042 = vst [vmem:[#allocation43_spill] sm:$0xff] %v9494_v48 }
 0x401   :  { %7309 = vmatprep.mubr.msk.f32.mxu1 %vm11934_vm2, %v1370_v8  ;;  %12024 = vst [vmem:[#allocation40_spill] sm:$0xff] %v9427_v57  ;;  %v12045_v8 = vand.u32 15, %v8578_v45 }
 0x403   :  { %vm9504_vm6 = vcmp.ge.s32.totalorder %v12045_v8, %v9388_v28  ;;  %v172_v8 = vshra.s32 %v8648_v62, 4 }
 0x404   :  { %7310 = vmatmul.mubr.msk.f32.gmra.mxu1 %vm11934_vm2, %v1371_v47  ;;  %v165_v47 = vshra.s32 %v8516_v29, 4 }
 0x405   :  { %7312 = vmatprep.mubr.msk.f32.mxu1 %vm11934_vm2, %v1372_v6 }
 0x406   :  { %vm9473_vm3 = vcmp.eq.s32.totalorder %v165_v47, %v9156_v51 }
 0x407   :  { %vm231_vm7 = vmand %vm9473_vm3, %vm9480_vm4  ;;  %vm9593_vm3 = vcmp.eq.s32.totalorder %v172_v8, %v9156_v51 }
 0x408   :  { %7313 = vmatmul.mubr.msk.f32.gmra.mxu1 %vm11934_vm2, %v1373_v31  ;;  %v9447_v31 = vsel %vm227_vm10, 0.0, %v11914_v38  ;;  %v9542_v53 = vsel %vm231_vm7, 0.0, %v11914_v38 }
 0x409   :  { %7315 = vmatprep.mubr.msk.f32.mxu1 %vm11934_vm2, %v1374_v46  ;;  %12030 = vst [vmem:[#allocation41_spill] sm:$0xff] %v9447_v31  ;;  %12054 = vst [vmem:[#allocation45_spill] sm:$0xff] %v9542_v53 }
 0x40c   :  { %7316 = vmatmul.mubr.msk.f32.gmra.mxu1 %vm11934_vm2, %v1375_v43  ;;  %v12033_v43 = vand.u32 15, %v8538_v34 }
 0x40d   :  { %7318 = vmatprep.mubr.msk.f32.mxu1 %vm11934_vm2, %v1376_v5  ;;  %v12051_v5 = vand.u32 15, %v8559_v41 }
 0x40e   :  { %vm9457_vm15 = vcmp.ge.s32.totalorder %v12033_v43, %v9388_v28 }
 0x40f   :  { %vm232_vm1 = vmand %vm9450_vm14, %vm9457_vm15  ;;  %vm9528_vm9 = vcmp.ge.s32.totalorder %v12051_v5, %v9388_v28  ;;  %v12063_v5 = vand.u32 15, %v8604_v52 }
 0x410   :  { %7319 = vmatmul.mubr.msk.f32.gmra.mxu1 %vm11934_vm2, %v1377_v60  ;;  %v168_v60 = vshra.s32 %v8578_v45, 4  ;;  %v9518_v46 = vsel %vm232_vm1, 0.0, %v11914_v38  ;;  %vm233_vm13 = vmand %vm9521_vm8, %vm9528_vm9 }
 0x411   :  { %12048 = vst [vmem:[#allocation44_spill] sm:$0xff] %v9518_v46  ;;  %vm9576_vm15 = vcmp.ge.s32.totalorder %v12063_v5, %v9388_v28 }
 0x412   :  { %vm9497_vm5 = vcmp.eq.s32.totalorder %v168_v60, %v9156_v51  ;;  %v171_v60 = vshra.s32 %v8643_v61, 4 }
 0x413   :  { %vm234_vm10 = vmand %vm9497_vm5, %vm9504_vm6 }
 0x414   :  { %vm9617_vm5 = vcmp.eq.s32.totalorder %v171_v60, %v9156_v51 }
 0x4b4   :  { %v7299_v4 = vpop.f32.mrf.mxu1 }
 0x4b5   :  { %v1926_v6 = vmul.f32 0.125, %v7299_v4 }
 0x4b6   :  { %v1846_v54 = vpop.f32.mrf.mxu1 }
 0x4b7   :  { %v1925_v17 = vmul.f32 0.125, %v1846_v54  ;;  %v9463_v56 = vadd.f32 %v1926_v6, %v9427_v57 }
 0x4b8   :  { %v7302_v58 = vpop.f32.mrf.mxu1 }
 0x4b9   :  { %v1928_v22 = vmul.f32 0.125, %v7302_v58  ;;  %1959 = vmax.xlane.f32.xlu0 %v9463_v56  ;;  %v9487_v18 = vadd.f32 %v1925_v17, %v9447_v31  ;;  %v169_v17 = vshra.s32 %v8604_v52, 4 }
 0x4ba   :  { %v1856_v39 = vpop.f32.mrf.mxu1 }
 0x4bb   :  { %v1927_v47 = vmul.f32 0.125, %v1856_v39  ;;  %1957 = vmax.xlane.f32.xlu1 %v9487_v18  ;;  %v9511_v6 = vadd.f32 %v1928_v22, %v9470_v19  ;;  %v12057_v22 = vand.u32 15, %v8615_v55  ;;  %vm9569_vm14 = vcmp.eq.s32.totalorder %v169_v17, %v9156_v51 }
 0x4bc   :  { %v7305_v54 = vpop.f32.mrf.mxu1  ;;  %v174_v39 = vshra.s32 %v8676_v10, 4  ;;  %vm235_vm1 = vmand %vm9569_vm14, %vm9576_vm15 }
 0x4bd   :  { %v1930_v58 = vmul.f32 0.125, %v7305_v54  ;;  %1963 = vmax.xlane.f32.xlu0 %v9511_v6  ;;  %v9535_v26 = vadd.f32 %v1927_v47, %v9494_v48  ;;  %vm9552_vm12 = vcmp.ge.s32.totalorder %v12057_v22, %v9388_v28  ;;  %v9566_v47 = vsel %vm234_vm10, 0.0, %v11914_v38 }
 0x4be   :  { %v1866_v25 = vpop.f32.mrf.mxu1  ;;  %12060 = vst [vmem:[#allocation46_spill] sm:$0xff] %v9566_v47  ;;  %vm236_vm0 = vmand %vm9545_vm11, %vm9552_vm12  ;;  %v9590_v22 = vsel %vm233_vm13, 0.0, %v11914_v38  ;;  %vm9641_vm8 = vcmp.eq.s32.totalorder %v174_v39, %v9156_v51 }
 0x4bf   :  { %v1929_v4 = vmul.f32 0.125, %v1866_v25  ;;  %1961 = vmax.xlane.f32.xlu1 %v9535_v26  ;;  %v9559_v30 = vadd.f32 %v1930_v58, %v9518_v46  ;;  %12066 = vst [vmem:[#allocation47_spill] sm:$0xff] %v9590_v22  ;;  %v173_v58 = vshra.s32 %v8657_v1, 4 }
 0x4c0   :  { %v7308_v32 = vpop.f32.mrf.mxu1 }
 0x4c1   :  { %v1932_v43 = vmul.f32 0.125, %v7308_v32  ;;  %1967 = vmax.xlane.f32.xlu0 %v9559_v30  ;;  %v9583_v25 = vadd.f32 %v1929_v4, %v9542_v53  ;;  %v12069_v32 = vand.u32 15, %v8648_v62  ;;  %v12072_v53 = vmov -1e+30  }
 0x4c2   :  { %v1876_v17 = vpop.f32.mrf.mxu1  ;;  %v9614_v46 = vsel %vm236_vm0, 0.0, %v12072_v53  ;;  %v9638_v48 = vsel %vm235_vm1, 0.0, %v12072_v53  ;;  %v176_v4 = vshra.s32 %v8703_v20, 4  ;;  %vm9665_vm11 = vcmp.eq.s32.totalorder %v173_v58, %v9156_v51 }
 0x4c3   :  { %vm9600_vm4 = vcmp.ge.s32.totalorder %v12069_v32, %v9388_v28  ;;  %v1931_v13 = vmul.f32 0.125, %v1876_v17  ;;  %1965 = vmax.xlane.f32.xlu1 %v9583_v25  ;;  %v9607_v38 = vadd.f32 %v1932_v43, %v9566_v47  ;;  %12073 = vst [vmem:[#allocation48_spill] sm:$0xff] %v9614_v46  ;;  %v12076_v17 = vand.u32 15, %v8643_v61  ;;  %12079 = vst [vmem:[#allocation49_spill] sm:$0xff] %v9638_v48 }
 0x4c4   :  { %v7311_v8 = vpop.f32.mrf.mxu1  ;;  %vm238_vm7 = vmand %vm9593_vm3, %vm9600_vm4  ;;  %v175_v43 = vshra.s32 %v8682_v14, 4  ;;  %vm9689_vm14 = vcmp.eq.s32.totalorder %v176_v4, %v9156_v51 }
 0x4c5   :  { %vm9624_vm6 = vcmp.ge.s32.totalorder %v12076_v17, %v9388_v28  ;;  %v1934_v54 = vmul.f32 0.125, %v7311_v8  ;;  %1971 = vmax.xlane.f32.xlu0 %v9607_v38  ;;  %v9631_v47 = vadd.f32 %v1931_v13, %v9590_v22  ;;  %v12082_v8 = vand.u32 15, %v8676_v10 }
 0x4c6   :  { %v1886_v60 = vpop.f32.mrf.mxu1  ;;  %vm237_vm10 = vmand %vm9617_vm5, %vm9624_vm6  ;;  %v9662_v19 = vsel %vm238_vm7, 0.0, %v12072_v53  ;;  %vm9712_vm3 = vcmp.eq.s32.totalorder %v175_v43, %v9156_v51 }
 0x4c7   :  { %vm9648_vm9 = vcmp.ge.s32.totalorder %v12082_v8, %v9388_v28  ;;  %v1933_v5 = vmul.f32 0.125, %v1886_v60  ;;  %1969 = vmax.xlane.f32.xlu1 %v9631_v47  ;;  %v9655_v22 = vadd.f32 %v1934_v54, %v9614_v46  ;;  %12085 = vst [vmem:[#allocation50_spill] sm:$0xff] %v9662_v19  ;;  %v12088_v60 = vand.u32 15, %v8657_v1 }
 0x4c8   :  { %v7314_v39 = vpop.f32.mrf.mxu1  ;;  %vm240_vm13 = vmand %vm9641_vm8, %vm9648_vm9  ;;  %v9686_v31 = vsel %vm237_vm10, 0.0, %v12072_v53 }
 0x4c9   :  { %vm9672_vm12 = vcmp.ge.s32.totalorder %v12088_v60, %v9388_v28  ;;  %v1936_v32 = vmul.f32 0.125, %v7314_v39  ;;  %1975 = vmax.xlane.f32.xlu0 %v9655_v22  ;;  %v9679_v46 = vadd.f32 %v1933_v5, %v9638_v48  ;;  %12091 = vst [vmem:[#allocation51_spill] sm:$0xff] %v9686_v31  ;;  %v12094_v39 = vand.u32 15, %v8703_v20 }
 0x4ca   :  { %v1896_v58 = vpop.f32.mrf.mxu1  ;;  %vm239_vm0 = vmand %vm9665_vm11, %vm9672_vm12  ;;  %v9709_v48 = vsel %vm240_vm13, 0.0, %v12072_v53 }
 0x4cb   :  { %vm9696_vm15 = vcmp.ge.s32.totalorder %v12094_v39, %v9388_v28  ;;  %v1935_v13 = vmul.f32 0.125, %v1896_v58  ;;  %1973 = vmax.xlane.f32.xlu1 %v9679_v46  ;;  %v9702_v17 = vadd.f32 %v1936_v32, %v9662_v19  ;;  %12097 = vst [vmem:[#allocation52_spill] sm:$0xff] %v9709_v48  ;;  %v12100_v58 = vand.u32 15, %v8682_v14 }
 0x4cc   :  { %v7317_v4 = vpop.f32.mrf.mxu1  ;;  %vm242_vm1 = vmand %vm9689_vm14, %vm9696_vm15  ;;  %v9732_v43 = vsel %vm239_vm0, 0.0, %v12072_v53 }
 0x4cd   :  { %vm9719_vm4 = vcmp.ge.s32.totalorder %v12100_v58, %v9388_v28  ;;  %v1938_v54 = vmul.f32 0.125, %v7317_v4  ;;  %1979 = vmax.xlane.f32.xlu0 %v9702_v17  ;;  %v9725_v8 = vadd.f32 %v1935_v13, %v9686_v31  ;;  %12103 = vst [vmem:[#allocation53_spill] sm:$0xff] %v9732_v43  ;;  %v9743_v5 = vsel %vm242_vm1, 0.0, %v12072_v53 }
 0x4ce   :  { %v1906_v51 = vpop.f32.mrf.mxu1  ;;  %vm241_vm5 = vmand %vm9712_vm3, %vm9719_vm4  ;;  %12104 = vst [vmem:[#allocation54_spill] sm:$0xff] %v9743_v5 }
 0x4cf   :  { %v1937_v19 = vmul.f32 0.125, %v1906_v51  ;;  %1977 = vmax.xlane.f32.xlu1 %v9725_v8  ;;  %v9736_v28 = vadd.f32 %v1938_v54, %v9709_v48  ;;  %v9750_v51 = vsel %vm241_vm5, 0.0, %v12072_v53 }
 0x4d0   :  { %v7320_v13 = vpop.f32.mrf.mxu1  ;;  %12105 = vst [vmem:[#allocation55_spill] sm:$0xff] %v9750_v51 }
 0x4d1   :  { %v1940_v60 = vmul.f32 0.125, %v7320_v13  ;;  %1983 = vmax.xlane.f32.xlu0 %v9736_v28  ;;  %v9747_v4 = vadd.f32 %v1937_v19, %v9732_v43 }
 0x4d2   :  { %v1916_v58 = vpop.f32.mrf.mxu1 }
 0x4d3   :  { %v1939_v54 = vmul.f32 0.125, %v1916_v58  ;;  %1981 = vmax.xlane.f32.xlu1 %v9747_v4  ;;  %v9754_v39 = vadd.f32 %v1940_v60, %v9743_v5 }
 0x4d5   :  { %1987 = vmax.xlane.f32.xlu0 %v9754_v39  ;;  %v9758_v32 = vadd.f32 %v1939_v54, %v9750_v51 }
 0x4d7   :  { %1985 = vmax.xlane.f32.xlu1 %v9758_v32 }
 0x542   :  { %v1960_v13 = vpop.xlane.xlu0 %1959 }
 0x543   :  { %v1990_v19 = vsub.f32 %v9463_v56, %v1960_v13 }
 0x544   :  { %v1958_v43 = vpop.xlane.xlu1 %1957 }
 0x545   :  { %v2007_v48 = vmul.f32 1.442695, %v1990_v19  ;;  %v1989_v53 = vsub.f32 %v9487_v18, %v1958_v43 }
 0x546   :  { %v1964_v58 = vpop.xlane.xlu0 %1963 }
 0x547   :  { %7904 = vpow2.f32 %v2007_v48  ;;  %v2005_v31 = vmul.f32 1.442695, %v1989_v53  ;;  %v1992_v60 = vsub.f32 %v9511_v6, %v1964_v58 }
 0x548   :  { %v1962_v5 = vpop.xlane.xlu1 %1961 }
 0x549   :  { %7906 = vpow2.f32 %v2005_v31  ;;  %v2011_v57 = vmul.f32 1.442695, %v1992_v60  ;;  %v1991_v54 = vsub.f32 %v9535_v26, %v1962_v5 }
 0x54a   :  { %v1968_v51 = vpop.xlane.xlu0 %1967 }
 0x54b   :  { %7908 = vpow2.f32 %v2011_v57  ;;  %v2009_v42 = vmul.f32 1.442695, %v1991_v54  ;;  %v1994_v36 = vsub.f32 %v9559_v30, %v1968_v51 }
 0x54c   :  { %v1966_v56 = vpop.xlane.xlu1 %1965 }
 0x54d   :  { %7910 = vpow2.f32 %v2009_v42  ;;  %v2015_v13 = vmul.f32 1.442695, %v1994_v36  ;;  %v1993_v18 = vsub.f32 %v9583_v25, %v1966_v56 }
 0x54e   :  { %v1972_v43 = vpop.xlane.xlu0 %1971 }
 0x54f   :  { %7912 = vpow2.f32 %v2015_v13  ;;  %v2013_v48 = vmul.f32 1.442695, %v1993_v18  ;;  %v1996_v6 = vsub.f32 %v9607_v38, %v1972_v43 }
 0x550   :  { %v1970_v19 = vpop.xlane.xlu1 %1969 }
 0x551   :  { %7914 = vpow2.f32 %v2013_v48  ;;  %v2019_v31 = vmul.f32 1.442695, %v1996_v6  ;;  %v1995_v26 = vsub.f32 %v9631_v47, %v1970_v19 }
 0x552   :  { %v1976_v5 = vpop.xlane.xlu0 %1975 }
 0x553   :  { %7916 = vpow2.f32 %v2019_v31  ;;  %v2017_v57 = vmul.f32 1.442695, %v1995_v26  ;;  %v1998_v30 = vsub.f32 %v9655_v22, %v1976_v5 }
 0x554   :  { %v9770_v51 = vpop.eup %7904  ;;  %v1974_v36 = vpop.xlane.xlu1 %1973 }
 0x555   :  { %7918 = vpow2.f32 %v2017_v57  ;;  %v2023_v42 = vmul.f32 1.442695, %v1998_v30  ;;  %v1997_v25 = vsub.f32 %v9679_v46, %v1974_v36  ;;  %2039 = vadd.xlane.f32.xlu0 %v9770_v51 }
 0x556   :  { %v9774_v38 = vpop.eup %7906  ;;  %v1980_v53 = vpop.xlane.xlu0 %1979 }
 0x557   :  { %7920 = vpow2.f32 %v2023_v42  ;;  %v2021_v58 = vmul.f32 1.442695, %v1997_v25  ;;  %v2000_v47 = vsub.f32 %v9702_v17, %v1980_v53  ;;  %2037 = vadd.xlane.f32.xlu1 %v9774_v38 }
 0x558   :  { %v9778_v60 = vpop.eup %7908  ;;  %v1978_v22 = vpop.xlane.xlu1 %1977 }
 0x559   :  { %7922 = vpow2.f32 %v2021_v58  ;;  %v2027_v54 = vmul.f32 1.442695, %v2000_v47  ;;  %v1999_v56 = vsub.f32 %v9725_v8, %v1978_v22  ;;  %2043 = vadd.xlane.f32.xlu0 %v9778_v60 }
 0x55a   :  { %v9782_v46 = vpop.eup %7910  ;;  %v1984_v13 = vpop.xlane.xlu0 %1983 }
 0x55b   :  { %7924 = vpow2.f32 %v2027_v54  ;;  %v2025_v18 = vmul.f32 1.442695, %v1999_v56  ;;  %v2002_v43 = vsub.f32 %v9736_v28, %v1984_v13  ;;  %2041 = vadd.xlane.f32.xlu1 %v9782_v46  ;;  %v2269_v56 = vld [vmem:[%s11862_s8 + $0x38] sm:$0xff] }
 0x55c   :  { %v9786_v17 = vpop.eup %7912  ;;  %v1982_v48 = vpop.xlane.xlu1 %1981  ;;  %7377 = vmatprep.subr.mxu0 %v2269_v56 }
 0x55d   :  { %7926 = vpow2.f32 %v2025_v18  ;;  %v2031_v6 = vmul.f32 1.442695, %v2002_v43  ;;  %v2001_v19 = vsub.f32 %v9747_v4, %v1982_v48  ;;  %2047 = vadd.xlane.f32.xlu0 %v9786_v17 }
 0x55e   :  { %v9790_v8 = vpop.eup %7914  ;;  %v1988_v31 = vpop.xlane.xlu0 %1987 }
 0x55f   :  { %7928 = vpow2.f32 %v2031_v6  ;;  %v2029_v26 = vmul.f32 1.442695, %v2001_v19  ;;  %v2004_v5 = vsub.f32 %v9754_v39, %v1988_v31  ;;  %2045 = vadd.xlane.f32.xlu1 %v9790_v8 }
 0x560   :  { %v9794_v28 = vpop.eup %7916  ;;  %v1986_v57 = vpop.xlane.xlu1 %1985 }
 0x561   :  { %7930 = vpow2.f32 %v2029_v26  ;;  %v2035_v30 = vmul.f32 1.442695, %v2004_v5  ;;  %v2003_v36 = vsub.f32 %v9758_v32, %v1986_v57  ;;  %2051 = vadd.xlane.f32.xlu0 %v9794_v28 }
 0x562   :  { %v9798_v4 = vpop.eup %7918 }
 0x563   :  { %7932 = vpow2.f32 %v2035_v30  ;;  %v2033_v42 = vmul.f32 1.442695, %v2003_v36  ;;  %2049 = vadd.xlane.f32.xlu1 %v9798_v4 }
 0x564   :  { %v9801_v25 = vpop.eup %7920 }
 0x565   :  { %7934 = vpow2.f32 %v2033_v42  ;;  %2055 = vadd.xlane.f32.xlu0 %v9801_v25 }
 0x566   :  { %v9804_v39 = vpop.eup %7922 }
 0x567   :  { %2053 = vadd.xlane.f32.xlu1 %v9804_v39 }
 0x568   :  { %v9807_v53 = vpop.eup %7924 }
 0x569   :  { %2059 = vadd.xlane.f32.xlu0 %v9807_v53 }
 0x56a   :  { %v9810_v32 = vpop.eup %7926 }
 0x56b   :  { %2057 = vadd.xlane.f32.xlu1 %v9810_v32 }
 0x56c   :  { %v9813_v58 = vpop.eup %7928 }
 0x56d   :  { %2063 = vadd.xlane.f32.xlu0 %v9813_v58 }
 0x56e   :  { %v9816_v47 = vpop.eup %7930 }
 0x56f   :  { %2061 = vadd.xlane.f32.xlu1 %v9816_v47 }
 0x570   :  { %v9819_v22 = vpop.eup %7932 }
 0x571   :  { %2067 = vadd.xlane.f32.xlu0 %v9819_v22 }
 0x572   :  { %v9822_v54 = vpop.eup %7934 }
 0x573   :  { %2065 = vadd.xlane.f32.xlu1 %v9822_v54 }
 0x5de   :  { %v2040_v13 = vpop.xlane.xlu0 %2039 }
 0x5df   :  { %7936 = vrcp.f32 %v2040_v13 }
 0x5e0   :  { %v2038_v18 = vpop.xlane.xlu1 %2037 }
 0x5e1   :  { %7938 = vrcp.f32 %v2038_v18 }
 0x5e2   :  { %v2044_v43 = vpop.xlane.xlu0 %2043 }
 0x5e3   :  { %7940 = vrcp.f32 %v2044_v43  ;;  %v2268_v43 = vld [vmem:[%s11862_s8 + $0x30] sm:$0xff] }
 0x5e4   :  { %v2042_v48 = vpop.xlane.xlu1 %2041 }
 0x5e5   :  { %7942 = vrcp.f32 %v2042_v48 }
 0x5e6   :  { %v2048_v6 = vpop.xlane.xlu0 %2047 }
 0x5e7   :  { %7944 = vrcp.f32 %v2048_v6 }
 0x5e8   :  { %v2046_v19 = vpop.xlane.xlu1 %2045 }
 0x5e9   :  { %7946 = vrcp.f32 %v2046_v19 }
 0x5ea   :  { %v2052_v31 = vpop.xlane.xlu0 %2051 }
 0x5eb   :  { %7948 = vrcp.f32 %v2052_v31 }
 0x5ec   :  { %v2050_v26 = vpop.xlane.xlu1 %2049  ;;  %v7937_v5 = vpop.eup %7936 }
 0x5ed   :  { %7950 = vrcp.f32 %v2050_v26  ;;  %v2086_v13 = vmul.f32 %v7937_v5, %v9770_v51  ;;  %v2266_v5 = vld [vmem:[%s11862_s8 + $0x20] sm:$0xff] }
 0x5ee   :  { %v7939_v57 = vpop.eup %7938  ;;  %v2056_v30 = vpop.xlane.xlu0 %2055 }
 0x5ef   :  { %v2085_v36 = vmul.f32 %v7939_v57, %v9774_v38  ;;  %7952 = vrcp.f32 %v2056_v30  ;;  %v2267_v38 = vld [vmem:[%s11862_s8 + $0x28] sm:$0xff] }
 0x5f0   :  { %v2054_v42 = vpop.xlane.xlu1 %2053  ;;  %v7941_v18 = vpop.eup %7940 }
 0x5f1   :  { %7954 = vrcp.f32 %v2054_v42  ;;  %7353 = vmatprep.mubr.f32.mxu0 %v2085_v36  ;;  %v2088_v51 = vmul.f32 %v7941_v18, %v9778_v60  ;;  %v2265_v60 = vld [vmem:[%s11862_s8 + $0x18] sm:$0xff] }
 0x5f2   :  { %v7943_v48 = vpop.eup %7942  ;;  %v2060_v6 = vpop.xlane.xlu0 %2059  ;;  %7354 = vmatmul.mubr.f32.vlgmr.msra.gmra.mxu0 %v2086_v13  ;;  %v2264_v13 = vld [vmem:[%s11862_s8 + $0x10] sm:$0xff] }
 0x5f3   :  { %v2087_v19 = vmul.f32 %v7943_v48, %v9782_v46  ;;  %7378 = vmatpush3.msra.mxu0 %v2269_v56  ;;  %7956 = vrcp.f32 %v2060_v6 }
 0x5f4   :  { %v2058_v31 = vpop.xlane.xlu1 %2057  ;;  %7379 = vmatprep.subr.mxu0 %v2268_v43  ;;  %v7945_v26 = vpop.eup %7944 }
 0x5f5   :  { %7958 = vrcp.f32 %v2058_v31  ;;  %7356 = vmatprep.mubr.f32.mxu0 %v2087_v19  ;;  %7380 = vmatpush3.msra.mxu0 %v2268_v43  ;;  %v2090_v36 = vmul.f32 %v7945_v26, %v9786_v17  ;;  %v2263_v17 = vld [vmem:[%s11862_s8 + $0x8] sm:$0xff] }
 0x5f6   :  { %v7947_v57 = vpop.eup %7946  ;;  %v2064_v46 = vpop.xlane.xlu0 %2063  ;;  %7357 = vmatmul.mubr.f32.gmra.mxu0 %v2088_v51  ;;  %7381 = vmatprep.subr.mxu0 %v2267_v38 }
 0x5f7   :  { %v2089_v56 = vmul.f32 %v7947_v57, %v9790_v8  ;;  %7382 = vmatpush3.msra.mxu0 %v2267_v38  ;;  %7960 = vrcp.f32 %v2064_v46 }
 0x5f8   :  { %v2062_v30 = vpop.xlane.xlu1 %2061  ;;  %7383 = vmatprep.subr.mxu0 %v2266_v5  ;;  %v7949_v42 = vpop.eup %7948 }
 0x5f9   :  { %7962 = vrcp.f32 %v2062_v30  ;;  %7359 = vmatprep.mubr.f32.mxu0 %v2089_v56  ;;  %7384 = vmatpush3.msra.mxu0 %v2266_v5  ;;  %v2092_v6 = vmul.f32 %v7949_v42, %v9794_v28 }
 0x5fa   :  { %v7951_v18 = vpop.eup %7950  ;;  %v2068_v8 = vpop.xlane.xlu0 %2067  ;;  %7360 = vmatmul.mubr.f32.gmra.mxu0 %v2090_v36  ;;  %7385 = vmatprep.subr.mxu0 %v2265_v60 }
 0x5fb   :  { %v2091_v43 = vmul.f32 %v7951_v18, %v9798_v4  ;;  %7386 = vmatpush3.msra.mxu0 %v2265_v60  ;;  %7964 = vrcp.f32 %v2068_v8 }
 0x5fc   :  { %v2066_v48 = vpop.xlane.xlu1 %2065  ;;  %7387 = vmatprep.subr.mxu0 %v2264_v13  ;;  %v7953_v19 = vpop.eup %7952 }
 0x5fd   :  { %7966 = vrcp.f32 %v2066_v48  ;;  %7362 = vmatprep.mubr.f32.mxu0 %v2091_v43  ;;  %7388 = vmatpush3.msra.mxu0 %v2264_v13  ;;  %v2094_v4 = vmul.f32 %v7953_v19, %v9801_v25 }
 0x5fe   :  { %v7955_v38 = vpop.eup %7954  ;;  %7363 = vmatmul.mubr.f32.gmra.mxu0 %v2092_v6  ;;  %7389 = vmatprep.subr.mxu0 %v2263_v17 }
 0x5ff   :  { %v2093_v31 = vmul.f32 %v7955_v38, %v9804_v39  ;;  %7390 = vmatpush3.msra.mxu0 %v2263_v17 }
 0x600   :  { %v7957_v51 = vpop.eup %7956 }
 0x601   :  { %7365 = vmatprep.mubr.f32.mxu0 %v2093_v31  ;;  %v2096_v28 = vmul.f32 %v7957_v51, %v9807_v53  ;;  %v2262_v53 = vld [vmem:[%s11862_s8] sm:$0xff] }
 0x602   :  { %v7959_v26 = vpop.eup %7958  ;;  %7366 = vmatmul.mubr.f32.gmra.mxu0 %v2094_v4  ;;  %7391 = vmatprep.subr.mxu0 %v2262_v53 }
 0x603   :  { %v2095_v5 = vmul.f32 %v7959_v26, %v9810_v32  ;;  %7392 = vmatpush3.msra.mxu0 %v2262_v53 }
 0x604   :  { %v7961_v57 = vpop.eup %7960 }
 0x605   :  { %7368 = vmatprep.mubr.f32.mxu0 %v2095_v5  ;;  %v2098_v60 = vmul.f32 %v7961_v57, %v9813_v58 }
 0x606   :  { %v7963_v46 = vpop.eup %7962  ;;  %7369 = vmatmul.mubr.f32.gmra.mxu0 %v2096_v28 }
 0x607   :  { %v2097_v56 = vmul.f32 %v7963_v46, %v9816_v47 }
 0x608   :  { %v7965_v39 = vpop.eup %7964 }
 0x609   :  { %7371 = vmatprep.mubr.f32.mxu0 %v2097_v56  ;;  %v2100_v36 = vmul.f32 %v7965_v39, %v9819_v22 }
 0x60a   :  { %v7967_v30 = vpop.eup %7966  ;;  %7372 = vmatmul.mubr.f32.gmra.mxu0 %v2098_v60 }
 0x60b   :  { %v2099_v25 = vmul.f32 %v7967_v30, %v9822_v54 }
 0x60d   :  { %7374 = vmatprep.mubr.f32.mxu0 %v2099_v25 }
 0x60e   :  { %7375 = vmatmul.mubr.f32.gmra.mxu0 %v2100_v36 }
 0x6b2   :  { %v7355_v32 = vpop.f32.mrf.mxu0 }
 0x6b3   :  { %v2247_v42 = vmul.f32 %v7355_v32, %v9266_v44 }
 0x6b4   :  { %v2167_v47 = vpop.f32.mrf.mxu0 }
 0x6b5   :  { %v2246_v58 = vmul.f32 %v9162_v12, %v2167_v47 }
 0x6b6   :  { %v7358_v13 = vpop.f32.mrf.mxu0 }
 0x6b7   :  { %7393 = vmatprep.mubr.msk.f32.mxu0 %vm11934_vm2, %v2246_v58  ;;  %v2249_v18 = vmul.f32 %v7358_v13, %v9284_v35  ;;  %v259_v58 = vand.u32 31, %v8433_v2  ;;  %v12106_v13 = vmov 0 }
 0x6b8   :  { %v2177_v54 = vpop.f32.mrf.mxu0  ;;  %7394 = vmatmul.mubr.msk.f32.vlgmr.msra.gmra.mxu0 %vm11934_vm2, %v2247_v42  ;;  %v9900_v42 = vand.u32 31, %v8435_v3 }
 0x6b9   :  { %v2248_v22 = vmul.f32 %v9271_v49, %v2177_v54  ;;  %v12109_v54 = vmov 1.0  }
 0x6ba   :  { %v7361_v8 = vpop.f32.mrf.mxu0  ;;  %vm9903_vm6 = vcmp.eq.s32.totalorder %v259_v58, %v9900_v42  ;;  %v12137_v58 = vmov 0 }
 0x6bb   :  { %7396 = vmatprep.mubr.msk.f32.mxu0 %vm11934_vm2, %v2248_v22  ;;  %v2251_v48 = vmul.f32 %v7361_v8, %v9301_v11  ;;  %v12107_v13 = vsel %vm9903_vm6, 4294967295, %v12106_v13  ;;  %7449 = vmatprep.mubr.msk.f32.mxu1 %vm9903_vm6, %v12109_v54 }
 0x6bc   :  { %v2187_v43 = vpop.f32.mrf.mxu0  ;;  %7397 = vmatmul.mubr.msk.f32.gmra.mxu0 %vm11934_vm2, %v2249_v18  ;;  %12108 = vst [vmem:[#allocation56_spill] sm:$0xff] %v12107_v13 }
 0x6bd   :  { %v2250_v17 = vmul.f32 %v9291_v40, %v2187_v43 }
 0x6be   :  { %v7364_v6 = vpop.f32.mrf.mxu0 }
 0x6bf   :  { %7399 = vmatprep.mubr.msk.f32.mxu0 %vm11934_vm2, %v2250_v17  ;;  %v2253_v31 = vmul.f32 %v7364_v6, %v9317_v24 }
 0x6c0   :  { %v2197_v19 = vpop.f32.mrf.mxu0  ;;  %7400 = vmatmul.mubr.msk.f32.gmra.mxu0 %vm11934_vm2, %v2251_v48 }
 0x6c1   :  { %v2252_v38 = vmul.f32 %v9307_v0, %v2197_v19 }
 0x6c2   :  { %v7367_v4 = vpop.f32.mrf.mxu0 }
 0x6c3   :  { %7402 = vmatprep.mubr.msk.f32.mxu0 %vm11934_vm2, %v2252_v38  ;;  %v2255_v5 = vmul.f32 %v7367_v4, %v9333_v27 }
 0x6c4   :  { %v2207_v51 = vpop.f32.mrf.mxu0  ;;  %7403 = vmatmul.mubr.msk.f32.gmra.mxu0 %vm11934_vm2, %v2253_v31 }
 0x6c5   :  { %v2254_v26 = vmul.f32 %v9323_v37, %v2207_v51 }
 0x6c6   :  { %v7370_v28 = vpop.f32.mrf.mxu0 }
 0x6c7   :  { %7405 = vmatprep.mubr.msk.f32.mxu0 %vm11934_vm2, %v2254_v26  ;;  %v2257_v56 = vmul.f32 %v7370_v28, %v9349_v23 }
 0x6c8   :  { %v2217_v57 = vpop.f32.mrf.mxu0  ;;  %7406 = vmatmul.mubr.msk.f32.gmra.mxu0 %vm11934_vm2, %v2255_v5 }
 0x6c9   :  { %v2256_v46 = vmul.f32 %v9339_v59, %v2217_v57  ;;  %v260_v57 = vand.u32 31, %v8449_v9  ;;  %v263_v9 = vand.u32 31, %v8516_v29  ;;  %v265_v29 = vand.u32 31, %v8559_v41 }
 0x6ca   :  { %v7373_v60 = vpop.f32.mrf.mxu0  ;;  %v267_v41 = vand.u32 31, %v8604_v52  ;;  %v269_v52 = vand.u32 31, %v8643_v61  ;;  %v271_v61 = vand.u32 31, %v8657_v1  ;;  %v273_v1 = vand.u32 31, %v8682_v14 }
 0x6cb   :  { %7408 = vmatprep.mubr.msk.f32.mxu0 %vm11934_vm2, %v2256_v46  ;;  %v2259_v25 = vmul.f32 %v7373_v60, %v9364_v63  ;;  %v261_v46 = vand.u32 31, %v8466_v15  ;;  %vm9913_vm7 = vcmp.eq.s32.totalorder %v260_v57, %v9900_v42  ;;  %v262_v60 = vand.u32 31, %v8489_v21 }
 0x6cc   :  { %v2227_v39 = vpop.f32.mrf.mxu0  ;;  %7409 = vmatmul.mubr.msk.f32.gmra.mxu0 %vm11934_vm2, %v2257_v56  ;;  %v12110_v56 = vmov 0  ;;  %v12116_v15 = vmov 0  ;;  %v264_v21 = vand.u32 31, %v8538_v34  ;;  %vm9937_vm10 = vcmp.eq.s32.totalorder %v263_v9, %v9900_v42 }
 0x6cd   :  { %v2258_v30 = vmul.f32 %v9355_v50, %v2227_v39  ;;  %v12111_v56 = vsel %vm9913_vm7, 4294967295, %v12110_v56  ;;  %vm9919_vm8 = vcmp.eq.s32.totalorder %v261_v46, %v9900_v42  ;;  %v12113_v39 = vmov 0 }
 0x6ce   :  { %v7376_v36 = vpop.f32.mrf.mxu0  ;;  %12112 = vst [vmem:[#allocation57_spill] sm:$0xff] %v12111_v56  ;;  %v12114_v39 = vsel %vm9919_vm8, 4294967295, %v12113_v39  ;;  %vm9931_vm9 = vcmp.eq.s32.totalorder %v262_v60, %v9900_v42  ;;  %vm9949_vm11 = vcmp.eq.s32.totalorder %v264_v21, %v9900_v42  ;;  %v266_v34 = vand.u32 31, %v8578_v45  ;;  %v12160_v21 = vld [vmem:[#allocation22_spill] sm:$0xff] }
 0x6cf   :  { %7411 = vmatprep.mubr.msk.f32.mxu0 %vm11934_vm2, %v2258_v30  ;;  %v2261_v47 = vmul.f32 %v7376_v36, %v9377_v7  ;;  %12115 = vst [vmem:[#allocation58_spill] sm:$0xff] %v12114_v39  ;;  %v12117_v15 = vsel %vm9931_vm9, 4294967295, %v12116_v15  ;;  %v12119_v30 = vmov 0  ;;  %vm9955_vm12 = vcmp.eq.s32.totalorder %v265_v29, %v9900_v42 }
 0x6d0   :  { %v2237_v53 = vpop.f32.mrf.mxu0  ;;  %7412 = vmatmul.mubr.msk.f32.gmra.mxu0 %vm11934_vm2, %v2259_v25  ;;  %12118 = vst [vmem:[#allocation59_spill] sm:$0xff] %v12117_v15  ;;  %v12120_v30 = vsel %vm9937_vm10, 4294967295, %v12119_v30  ;;  %v12122_v25 = vmov 0  ;;  %v12125_v36 = vmov 0  ;;  %vm9967_vm13 = vcmp.eq.s32.totalorder %v266_v34, %v9900_v42 }
 0x6d1   :  { %v2260_v32 = vmul.f32 %v9370_v33, %v2237_v53  ;;  %12121 = vst [vmem:[#allocation60_spill] sm:$0xff] %v12120_v30  ;;  %v12123_v25 = vsel %vm9949_vm11, 4294967295, %v12122_v25  ;;  %v12126_v36 = vsel %vm9955_vm12, 4294967295, %v12125_v36  ;;  %v12128_v53 = vmov 0 }
 0x6d2   :  { %12124 = vst [vmem:[#allocation61_spill] sm:$0xff] %v12123_v25  ;;  %12127 = vst [vmem:[#allocation62_spill] sm:$0xff] %v12126_v36  ;;  %v12129_v53 = vsel %vm9967_vm13, 4294967295, %v12128_v53  ;;  %v268_v45 = vand.u32 31, %v8615_v55  ;;  %vm9973_vm14 = vcmp.eq.s32.totalorder %v267_v41, %v9900_v42  ;;  %v270_v55 = vand.u32 31, %v8648_v62 }
 0x6d3   :  { %7414 = vmatprep.mubr.msk.f32.mxu0 %vm11934_vm2, %v2260_v32  ;;  %12130 = vst [vmem:[#allocation63_spill] sm:$0xff] %v12129_v53  ;;  %v12131_v32 = vmov 0  ;;  %vm9991_vm0 = vcmp.eq.s32.totalorder %v269_v52, %v9900_v42  ;;  %v272_v62 = vand.u32 31, %v8676_v10  ;;  %vm10009_vm4 = vcmp.eq.s32.totalorder %v271_v61, %v9900_v42  ;;  %v12162_v52 = vld [vmem:[#allocation25_spill] sm:$0xff] }
 0x6d4   :  { %7415 = vmatmul.mubr.msk.f32.gmra.mxu0 %vm11934_vm2, %v2261_v47  ;;  %v12132_v32 = vsel %vm9973_vm14, 4294967295, %v12131_v32  ;;  %vm9985_vm15 = vcmp.eq.s32.totalorder %v268_v45, %v9900_v42  ;;  %v12134_v47 = vmov 0  ;;  %v12138_v58 = vsel %vm9991_vm0, 4294967295, %v12137_v58 }
 0x6d5   :  { %3025 = vmatprep.mubr.f32.mxu0 %v12008_v16  ;;  %12133 = vst [vmem:[#allocation64_spill] sm:$0xff] %v12132_v32  ;;  %v12135_v47 = vsel %vm9985_vm15, 4294967295, %v12134_v47  ;;  %12139 = vst [vmem:[#allocation66_spill] sm:$0xff] %v12138_v58  ;;  %vm10003_vm3 = vcmp.eq.s32.totalorder %v270_v55, %v9900_v42  ;;  %vm10021_vm1 = vcmp.eq.s32.totalorder %v272_v62, %v9900_v42  ;;  %v274_v10 = vand.u32 31, %v8703_v20  ;;  %v10048_v20 = vld [vmem:[%s11863_s9] ss:$0 sm:$0xff] }
 0x6d6   :  { %12136 = vst [vmem:[#allocation65_spill] sm:$0xff] %v12135_v47  ;;  %vm10027_vm5 = vcmp.eq.s32.totalorder %v273_v1, %v9900_v42  ;;  %v12152_v14 = vmov 0 }
 0x6d7   :  { %vm10038_vm2 = vcmp.eq.s32.totalorder %v274_v10, %v9900_v42  ;;  %v12164_v10 = vld [vmem:[#allocation24_spill] sm:$0xff] }
 0x6d8   :  { %v12153_v14 = vsel %vm10038_vm2, 4294967295, %v12152_v14 }
 0x6d9   :  { %12154 = vst [vmem:[#allocation71_spill] sm:$0xff] %v12153_v14 }
 0x778   :  { %v7395_v22 = vpop.f32.mrf.mxu0 }
 0x77a   :  { %v2384_v18 = vpop.f32.mrf.mxu0 }
 0x77c   :  { %v7398_v8 = vpop.f32.mrf.mxu0 }
 0x77e   :  { %v2394_v43 = vpop.f32.mrf.mxu0 }
 0x780   :  { %v7401_v17 = vpop.f32.mrf.mxu0 }
 0x782   :  { %v2404_v48 = vpop.f32.mrf.mxu0 }
 0x784   :  { %v7404_v6 = vpop.f32.mrf.mxu0 }
 0x786   :  { %v2414_v19 = vpop.f32.mrf.mxu0 }
 0x788   :  { %v7407_v38 = vpop.f32.mrf.mxu0 }
 0x78a   :  { %v2424_v3 = vpop.f32.mrf.mxu0 }
 0x78c   :  { %v7410_v31 = vpop.f32.mrf.mxu0 }
 0x78e   :  { %v2434_v4 = vpop.f32.mrf.mxu0 }
 0x790   :  { %v7413_v51 = vpop.f32.mrf.mxu0 }
 0x792   :  { %v2444_v26 = vpop.f32.mrf.mxu0 }
 0x794   :  { %v7416_v5 = vpop.f32.mrf.mxu0 }
 0x795   :  { %7417 = vmatprep.subr.mxu1 %v7416_v5 }
 0x796   :  { %v2454_v28 = vpop.f32.mrf.mxu0  ;;  %7418 = vmatpush3.msra.mxu1 %v7416_v5 }
 0x797   :  { %7419 = vmatprep.subr.mxu1 %v2454_v28 }
 0x798   :  { %7420 = vmatpush3.msra.mxu1 %v2454_v28  ;;  %v12158_v28 = vld [vmem:[#allocation23_spill] sm:$0xff] }
 0x799   :  { %7421 = vmatprep.subr.mxu1 %v7413_v51 }
 0x79a   :  { %7422 = vmatpush3.msra.mxu1 %v7413_v51 }
 0x79b   :  { %7423 = vmatprep.subr.mxu1 %v2444_v26 }
 0x79c   :  { %7424 = vmatpush3.msra.mxu1 %v2444_v26 }
 0x79d   :  { %7425 = vmatprep.subr.mxu1 %v7410_v31 }
 0x79e   :  { %7426 = vmatpush3.msra.mxu1 %v7410_v31  ;;  %v12156_v31 = vld [vmem:[#allocation21_spill] sm:$0xff] }
 0x79f   :  { %7427 = vmatprep.subr.mxu1 %v2434_v4 }
 0x7a0   :  { %7428 = vmatpush3.msra.mxu1 %v2434_v4 }
 0x7a1   :  { %7429 = vmatprep.subr.mxu1 %v7407_v38 }
 0x7a2   :  { %7430 = vmatpush3.msra.mxu1 %v7407_v38 }
 0x7a3   :  { %7431 = vmatprep.subr.mxu1 %v2424_v3 }
 0x7a4   :  { %7432 = vmatpush3.msra.mxu1 %v2424_v3 }
 0x7a5   :  { %7433 = vmatprep.subr.mxu1 %v7404_v6 }
 0x7a6   :  { %7434 = vmatpush3.msra.mxu1 %v7404_v6 }
 0x7a7   :  { %7435 = vmatprep.subr.mxu1 %v2414_v19 }
 0x7a8   :  { %7436 = vmatpush3.msra.mxu1 %v2414_v19  ;;  %v12155_v19 = vld [vmem:[#allocation20_spill] sm:$0xff] }
 0x7a9   :  { %7437 = vmatprep.subr.mxu1 %v7401_v17 }
 0x7aa   :  { %7438 = vmatpush3.msra.mxu1 %v7401_v17 }
 0x7ab   :  { %7439 = vmatprep.subr.mxu1 %v2404_v48 }
 0x7ac   :  { %7440 = vmatpush3.msra.mxu1 %v2404_v48 }
 0x7ad   :  { %7441 = vmatprep.subr.mxu1 %v7398_v8 }
 0x7ae   :  { %7442 = vmatpush3.msra.mxu1 %v7398_v8  ;;  %v12146_v8 = vmov 0 }
 0x7af   :  { %7443 = vmatprep.subr.mxu1 %v2394_v43  ;;  %v12147_v8 = vsel %vm10021_vm1, 4294967295, %v12146_v8 }
 0x7b0   :  { %7444 = vmatpush3.msra.mxu1 %v2394_v43  ;;  %12148 = vst [vmem:[#allocation69_spill] sm:$0xff] %v12147_v8  ;;  %v12149_v43 = vmov 0 }
 0x7b1   :  { %7445 = vmatprep.subr.mxu1 %v7395_v22  ;;  %v12150_v43 = vsel %vm10027_vm5, 4294967295, %v12149_v43 }
 0x7b2   :  { %7446 = vmatpush3.msra.mxu1 %v7395_v22  ;;  %v12140_v22 = vmov 0  ;;  %12151 = vst [vmem:[#allocation70_spill] sm:$0xff] %v12150_v43 }
 0x7b3   :  { %7447 = vmatprep.subr.mxu1 %v2384_v18  ;;  %v12141_v22 = vsel %vm10003_vm3, 4294967295, %v12140_v22 }
 0x7b4   :  { %7448 = vmatpush3.msra.mxu1 %v2384_v18  ;;  %12142 = vst [vmem:[#allocation67_spill] sm:$0xff] %v12141_v22  ;;  %v12143_v18 = vmov 0 }
 0x7b5   :  { %7450 = vmatmul.mubr.msk.f32.vlgmr.msra.gmra.mxu1 %vm9913_vm7, %v12109_v54  ;;  %v12144_v18 = vsel %vm10009_vm4, 4294967295, %v12143_v18 }
 0x7b6   :  { %7452 = vmatprep.mubr.msk.f32.mxu1 %vm9919_vm8, %v12109_v54  ;;  %12145 = vst [vmem:[#allocation68_spill] sm:$0xff] %v12144_v18 }
 0x7b9   :  { %7453 = vmatmul.mubr.msk.f32.gmra.mxu1 %vm9931_vm9, %v12109_v54 }
 0x7ba   :  { %7455 = vmatprep.mubr.msk.f32.mxu1 %vm9937_vm10, %v12109_v54 }
 0x7bd   :  { %7456 = vmatmul.mubr.msk.f32.gmra.mxu1 %vm9949_vm11, %v12109_v54 }
 0x7be   :  { %7458 = vmatprep.mubr.msk.f32.mxu1 %vm9955_vm12, %v12109_v54 }
 0x7c1   :  { %7459 = vmatmul.mubr.msk.f32.gmra.mxu1 %vm9967_vm13, %v12109_v54 }
 0x7c2   :  { %7461 = vmatprep.mubr.msk.f32.mxu1 %vm9973_vm14, %v12109_v54 }
 0x7c5   :  { %7462 = vmatmul.mubr.msk.f32.gmra.mxu1 %vm9985_vm15, %v12109_v54 }
 0x7c6   :  { %7464 = vmatprep.mubr.msk.f32.mxu1 %vm9991_vm0, %v12109_v54 }
 0x7c9   :  { %7465 = vmatmul.mubr.msk.f32.gmra.mxu1 %vm10003_vm3, %v12109_v54 }
 0x7ca   :  { %7467 = vmatprep.mubr.msk.f32.mxu1 %vm10009_vm4, %v12109_v54 }
 0x7cd   :  { %7468 = vmatmul.mubr.msk.f32.gmra.mxu1 %vm10021_vm1, %v12109_v54 }
 0x7ce   :  { %7470 = vmatprep.mubr.msk.f32.mxu1 %vm10027_vm5, %v12109_v54 }
 0x7d1   :  { %7471 = vmatmul.mubr.msk.f32.gmra.mxu1 %vm10038_vm2, %v12109_v54  ;;  %vm12157_vm2 = vcmask 523264  }
 0x7d2   :  { %vm12159_vm5 = vmmov %vm12157_vm2 }
 0x7d3   :  { %vm12161_vm1 = vmmov %vm12157_vm2 }
 0x7d4   :  { %vm12244_vm4 = vmmov %vm12161_vm1 }
 0x7d5   :  { %vm12254_vm3 = vmmov %vm12161_vm1 }
 0x7d6   :  { %vm12256_vm0 = vmmov %vm12161_vm1 }
 0x7d7   :  { %vm12257_vm15 = vmmov %vm12256_vm0 }
 0x7d8   :  { %vm12260_vm14 = vmmov %vm12256_vm0 }
 0x7d9   :  { %vm12265_vm13 = vmmov %vm12256_vm0 }
 0x7da   :  { %vm12268_vm12 = vmmov %vm12256_vm0 }
 0x875   :  { %v7451_v17 = vpop.f32.mrf.mxu1 }
 0x876   :  { %v2542_v48 = vadd.f32 %v7451_v17, %v10048_v20 }
 0x877   :  { %v2536_v6 = vpop.f32.mrf.mxu1 }
 0x878   :  { %v10052_v38 = vadd.f32 %v2542_v48, %v12155_v19  ;;  %v2537_v42 = vadd.f32 %v10048_v20, %v2536_v6 }
 0x879   :  { %v7454_v3 = vpop.f32.mrf.mxu1 }
 0x87a   :  { %v10056_v4 = vadd.f32 %v2537_v42, %v12156_v31  ;;  %v2552_v51 = vadd.f32 %v7454_v3, %v10048_v20  ;;  %v2636_v26 = vsel %vm12157_vm2, %v10052_v38, 0.0  ;;  %vm12163_vm2 = vmmov %vm12161_vm1  ;;  %v12166_v42 = vld [vmem:[#allocation27_spill] sm:$0xff] }
 0x87b   :  { %2637 = vadd.xlane.f32.xlu0 %v2636_v26  ;;  %v2546_v5 = vpop.f32.mrf.mxu1 }
 0x87c   :  { %v10062_v57 = vadd.f32 %v2552_v51, %v12158_v28  ;;  %v2547_v46 = vadd.f32 %v10048_v20, %v2546_v5  ;;  %v2633_v60 = vsel %vm12159_vm5, %v10056_v4, 0.0  ;;  %vm12165_vm5 = vmmov %vm12161_vm1  ;;  %v12167_v5 = vld [vmem:[#allocation26_spill] sm:$0xff] }
 0x87d   :  { %v7457_v9 = vpop.f32.mrf.mxu1  ;;  %2634 = vadd.xlane.f32.xlu1 %v2633_v60 }
 0x87e   :  { %v10068_v29 = vadd.f32 %v2547_v46, %v12160_v21  ;;  %v2562_v34 = vadd.f32 %v7457_v9, %v10048_v20  ;;  %v2642_v41 = vsel %vm12161_vm1, %v10062_v57, 0.0  ;;  %v12169_v21 = vld [vmem:[#allocation29_spill] sm:$0xff] }
 0x87f   :  { %2643 = vadd.xlane.f32.xlu0 %v2642_v41  ;;  %v2556_v45 = vpop.f32.mrf.mxu1 }
 0x880   :  { %v10074_v55 = vadd.f32 %v2562_v34, %v12162_v52  ;;  %v2557_v61 = vadd.f32 %v10048_v20, %v2556_v45  ;;  %v2639_v62 = vsel %vm12163_vm2, %v10068_v29, 0.0  ;;  %vm12168_vm2 = vmmov %vm12161_vm1 }
 0x881   :  { %v7460_v1 = vpop.f32.mrf.mxu1  ;;  %2640 = vadd.xlane.f32.xlu1 %v2639_v62 }
 0x882   :  { %v10080_v17 = vadd.f32 %v2557_v61, %v12164_v10  ;;  %v2572_v48 = vadd.f32 %v7460_v1, %v10048_v20  ;;  %v2648_v6 = vsel %vm12165_vm5, %v10074_v55, 0.0  ;;  %vm12170_vm5 = vmmov %vm12161_vm1  ;;  %v12171_v61 = vld [vmem:[#allocation28_spill] sm:$0xff] }
 0x883   :  { %2649 = vadd.xlane.f32.xlu0 %v2648_v6  ;;  %v2566_v19 = vpop.f32.mrf.mxu1  ;;  %v12172_v6 = vld [vmem:[#allocation31_spill] sm:$0xff] }
 0x884   :  { %v10086_v3 = vadd.f32 %v2572_v48, %v12166_v42  ;;  %v2567_v31 = vadd.f32 %v10048_v20, %v2566_v19  ;;  %v2645_v51 = vsel %vm12161_vm1, %v10080_v17, 0.0 }
 0x885   :  { %v7463_v26 = vpop.f32.mrf.mxu1  ;;  %2646 = vadd.xlane.f32.xlu1 %v2645_v51 }
 0x886   :  { %v10092_v28 = vadd.f32 %v2567_v31, %v12167_v5  ;;  %v2582_v46 = vadd.f32 %v7463_v26, %v10048_v20  ;;  %v2654_v60 = vsel %vm12168_vm2, %v10086_v3, 0.0  ;;  %vm12173_vm2 = vmmov %vm12161_vm1  ;;  %v12174_v26 = vld [vmem:[#allocation30_spill] sm:$0xff] }
 0x887   :  { %2655 = vadd.xlane.f32.xlu0 %v2654_v60  ;;  %v2576_v9 = vpop.f32.mrf.mxu1 }
 0x888   :  { %v10098_v34 = vadd.f32 %v2582_v46, %v12169_v21  ;;  %v2577_v41 = vadd.f32 %v10048_v20, %v2576_v9  ;;  %v2651_v45 = vsel %vm12170_vm5, %v10092_v28, 0.0  ;;  %vm12175_vm5 = vmmov %vm12161_vm1  ;;  %v12176_v21 = vld [vmem:[#allocation33_spill] sm:$0xff] }
 0x889   :  { %v7466_v52 = vpop.f32.mrf.mxu1  ;;  %2652 = vadd.xlane.f32.xlu1 %v2651_v45 }
 0x88a   :  { %v10104_v62 = vadd.f32 %v2577_v41, %v12171_v61  ;;  %v2592_v1 = vadd.f32 %v7466_v52, %v10048_v20  ;;  %v2660_v10 = vsel %vm12161_vm1, %v10098_v34, 0.0 }
 0x88b   :  { %2661 = vadd.xlane.f32.xlu0 %v2660_v10  ;;  %v2586_v48 = vpop.f32.mrf.mxu1 }
 0x88c   :  { %v10110_v19 = vadd.f32 %v2592_v1, %v12172_v6  ;;  %v2587_v42 = vadd.f32 %v10048_v20, %v2586_v48  ;;  %v2657_v31 = vsel %vm12173_vm2, %v10104_v62, 0.0  ;;  %v12177_v1 = vld [vmem:[#allocation32_spill] sm:$0xff]  ;;  %vm12178_vm2 = vmmov %vm12161_vm1 }
 0x88d   :  { %v7469_v51 = vpop.f32.mrf.mxu1  ;;  %2658 = vadd.xlane.f32.xlu1 %v2657_v31  ;;  %v12179_v31 = vld [vmem:[#allocation35_spill] sm:$0xff] }
 0x88e   :  { %v10116_v5 = vadd.f32 %v2587_v42, %v12174_v26  ;;  %v2602_v46 = vadd.f32 %v7469_v51, %v10048_v20  ;;  %v2666_v60 = vsel %vm12175_vm5, %v10110_v19, 0.0  ;;  %vm12180_vm5 = vmmov %vm12161_vm1 }
 0x88f   :  { %2667 = vadd.xlane.f32.xlu0 %v2666_v60  ;;  %v2596_v9 = vpop.f32.mrf.mxu1  ;;  %v12181_v60 = vld [vmem:[#allocation34_spill] sm:$0xff] }
 0x890   :  { %v10122_v41 = vadd.f32 %v2602_v46, %v12176_v21  ;;  %v2597_v45 = vadd.f32 %v10048_v20, %v2596_v9  ;;  %v2663_v52 = vsel %vm12161_vm1, %v10116_v5, 0.0 }
 0x891   :  { %v7472_v61 = vpop.f32.mrf.mxu1  ;;  %2664 = vadd.xlane.f32.xlu1 %v2663_v52  ;;  %v2900_v52 = vld [vmem:[%s11866_s12 + $0x78] sm:$0xff] }
 0x892   :  { %v10128_v10 = vadd.f32 %v2597_v45, %v12177_v1  ;;  %v2612_v48 = vadd.f32 %v7472_v61, %v10048_v20  ;;  %v2672_v6 = vsel %vm12178_vm2, %v10122_v41, 0.0  ;;  %vm12182_vm2 = vmmov %vm12161_vm1  ;;  %v2898_v61 = vld [vmem:[%s11866_s12 + $0x68] sm:$0xff]  ;;  %2977 = vmatprep.subr.mxu0 %v2900_v52  ;;  %v2897_v1 = vld [vmem:[%s11866_s12 + $0x60] sm:$0xff] }
 0x893   :  { %2673 = vadd.xlane.f32.xlu0 %v2672_v6  ;;  %v2606_v42 = vpop.f32.mrf.mxu1 }
 0x894   :  { %v10134_v51 = vadd.f32 %v2612_v48, %v12179_v31  ;;  %v2607_v26 = vadd.f32 %v10048_v20, %v2606_v42  ;;  %v2669_v46 = vsel %vm12180_vm5, %v10128_v10, 0.0  ;;  %v2899_v20 = vld [vmem:[%s11866_s12 + $0x70] sm:$0xff]  ;;  %vm12183_vm5 = vmmov %vm12161_vm1 }
 0x895   :  { %2670 = vadd.xlane.f32.xlu1 %v2669_v46  ;;  %2978 = vmatpush1.msra.mxu0 %v2899_v20 }
 0x896   :  { %v10140_v9 = vadd.f32 %v2607_v26, %v12181_v60  ;;  %v2678_v21 = vsel %vm12161_vm1, %v10134_v51, 0.0  ;;  %2979 = vmatprep.subr.mxu0 %v2898_v61 }
 0x897   :  { %2679 = vadd.xlane.f32.xlu0 %v2678_v21  ;;  %2980 = vmatpush1.msra.mxu0 %v2897_v1 }
 0x898   :  { %v2675_v45 = vsel %vm12182_vm2, %v10140_v9, 0.0  ;;  %vm12184_vm2 = vmmov %vm12161_vm1 }
 0x899   :  { %2676 = vadd.xlane.f32.xlu1 %v2675_v45 }
 0x904   :  { %v2638_v48 = vpop.xlane.xlu0 %2637 }
 0x905   :  { %v2682_v6 = vmul.f32 0.015625, %v2638_v48 }
 0x906   :  { %v2635_v42 = vpop.xlane.xlu1 %2634 }
 0x907   :  { %v10159_v31 = vsub.f32 %v10052_v38, %v2682_v6  ;;  %v2681_v26 = vmul.f32 0.015625, %v2635_v42 }
 0x908   :  { %v2644_v46 = vpop.xlane.xlu0 %2643 }
 0x909   :  { %v10162_v60 = vsub.f32 %v10056_v4, %v2681_v26  ;;  %v2684_v21 = vmul.f32 0.015625, %v2644_v46  ;;  %v2714_v45 = vmul.f32 %v10159_v31, %v10159_v31 }
 0x90a   :  { %v2641_v52 = vpop.xlane.xlu1 %2640 }
 0x90b   :  { %v10167_v20 = vsub.f32 %v10062_v57, %v2684_v21  ;;  %v2683_v61 = vmul.f32 0.015625, %v2641_v52  ;;  %v2732_v1 = vsel %vm12183_vm5, %v2714_v45, 0.0  ;;  %v2713_v48 = vmul.f32 %v10162_v60, %v10162_v60  ;;  %vm12185_vm5 = vmmov %vm12161_vm1 }
 0x90c   :  { %v2650_v6 = vpop.xlane.xlu0 %2649  ;;  %2733 = vadd.xlane.f32.xlu0 %v2732_v1 }
 0x90d   :  { %v10173_v42 = vsub.f32 %v10068_v29, %v2683_v61  ;;  %v2686_v26 = vmul.f32 0.015625, %v2650_v6  ;;  %v2729_v46 = vsel %vm12161_vm1, %v2713_v48, 0.0  ;;  %v2716_v14 = vmul.f32 %v10167_v20, %v10167_v20 }
 0x90e   :  { %2730 = vadd.xlane.f32.xlu1 %v2729_v46  ;;  %v2647_v21 = vpop.xlane.xlu1 %2646 }
 0x90f   :  { %v10179_v52 = vsub.f32 %v10074_v55, %v2686_v26  ;;  %v2685_v45 = vmul.f32 0.015625, %v2647_v21  ;;  %v2738_v43 = vsel %vm12184_vm2, %v2716_v14, 0.0  ;;  %v2715_v1 = vmul.f32 %v10173_v42, %v10173_v42  ;;  %vm12186_vm2 = vmmov %vm12161_vm1 }
 0x910   :  { %v2656_v8 = vpop.xlane.xlu0 %2655  ;;  %2739 = vadd.xlane.f32.xlu0 %v2738_v43 }
 0x911   :  { %v10185_v61 = vsub.f32 %v10080_v17, %v2685_v45  ;;  %v2688_v48 = vmul.f32 0.015625, %v2656_v8  ;;  %v2735_v6 = vsel %vm12185_vm5, %v2715_v1, 0.0  ;;  %v2718_v46 = vmul.f32 %v10179_v52, %v10179_v52  ;;  %vm12187_vm5 = vmmov %vm12161_vm1 }
 0x912   :  { %2736 = vadd.xlane.f32.xlu1 %v2735_v6  ;;  %v2653_v26 = vpop.xlane.xlu1 %2652 }
 0x913   :  { %v10191_v21 = vsub.f32 %v10086_v3, %v2688_v48  ;;  %v2687_v14 = vmul.f32 0.015625, %v2653_v26  ;;  %v2744_v18 = vsel %vm12161_vm1, %v2718_v46, 0.0  ;;  %v2717_v43 = vmul.f32 %v10185_v61, %v10185_v61 }
 0x914   :  { %v2662_v22 = vpop.xlane.xlu0 %2661  ;;  %2745 = vadd.xlane.f32.xlu0 %v2744_v18 }
 0x915   :  { %v10197_v8 = vsub.f32 %v10092_v28, %v2687_v14  ;;  %v2690_v45 = vmul.f32 0.015625, %v2662_v22  ;;  %v2741_v1 = vsel %vm12186_vm2, %v2717_v43, 0.0  ;;  %v2720_v6 = vmul.f32 %v10191_v21, %v10191_v21  ;;  %vm12188_vm2 = vmmov %vm12161_vm1 }
 0x916   :  { %2742 = vadd.xlane.f32.xlu1 %v2741_v1  ;;  %v2659_v48 = vpop.xlane.xlu1 %2658 }
 0x917   :  { %v10203_v26 = vsub.f32 %v10098_v34, %v2690_v45  ;;  %v2689_v46 = vmul.f32 0.015625, %v2659_v48  ;;  %v2750_v58 = vsel %vm12187_vm5, %v2720_v6, 0.0  ;;  %v2719_v18 = vmul.f32 %v10197_v8, %v10197_v8  ;;  %vm12189_vm5 = vmmov %vm12161_vm1 }
 0x918   :  { %v2668_v47 = vpop.xlane.xlu0 %2667  ;;  %2751 = vadd.xlane.f32.xlu0 %v2750_v58 }
 0x919   :  { %v10209_v22 = vsub.f32 %v10104_v62, %v2689_v46  ;;  %v2692_v14 = vmul.f32 0.015625, %v2668_v47  ;;  %v2747_v43 = vsel %vm12161_vm1, %v2719_v18, 0.0  ;;  %v2722_v1 = vmul.f32 %v10203_v26, %v10203_v26 }
 0x91a   :  { %2748 = vadd.xlane.f32.xlu1 %v2747_v43  ;;  %v2665_v45 = vpop.xlane.xlu1 %2664 }
 0x91b   :  { %v10215_v48 = vsub.f32 %v10110_v19, %v2692_v14  ;;  %v2691_v6 = vmul.f32 0.015625, %v2665_v45  ;;  %v2756_v32 = vsel %vm12188_vm2, %v2722_v1, 0.0  ;;  %v2721_v58 = vmul.f32 %v10209_v22, %v10209_v22  ;;  %vm12190_vm2 = vmmov %vm12161_vm1 }
 0x91c   :  { %v2674_v53 = vpop.xlane.xlu0 %2673  ;;  %2757 = vadd.xlane.f32.xlu0 %v2756_v32 }
 0x91d   :  { %v10221_v47 = vsub.f32 %v10116_v5, %v2691_v6  ;;  %v2694_v46 = vmul.f32 0.015625, %v2674_v53  ;;  %v2753_v18 = vsel %vm12189_vm5, %v2721_v58, 0.0  ;;  %v2724_v43 = vmul.f32 %v10215_v48, %v10215_v48  ;;  %vm12191_vm5 = vmmov %vm12161_vm1 }
 0x91e   :  { %2754 = vadd.xlane.f32.xlu1 %v2753_v18  ;;  %v2671_v14 = vpop.xlane.xlu1 %2670 }
 0x91f   :  { %v10227_v45 = vsub.f32 %v10122_v41, %v2694_v46  ;;  %v2693_v1 = vmul.f32 0.015625, %v2671_v14  ;;  %v2762_v36 = vsel %vm12161_vm1, %v2724_v43, 0.0  ;;  %v2723_v32 = vmul.f32 %v10221_v47, %v10221_v47 }
 0x920   :  { %2763 = vadd.xlane.f32.xlu0 %v2762_v36  ;;  %v2680_v6 = vpop.xlane.xlu0 %2679 }
 0x921   :  { %v10233_v53 = vsub.f32 %v10128_v10, %v2693_v1  ;;  %v2696_v58 = vmul.f32 0.015625, %v2680_v6  ;;  %v2759_v25 = vsel %vm12190_vm2, %v2723_v32, 0.0  ;;  %v2726_v18 = vmul.f32 %v10227_v45, %v10227_v45  ;;  %v2896_v1 = vld [vmem:[%s11866_s12 + $0x58] sm:$0xff]  ;;  %vm12192_vm2 = vmmov %vm12161_vm1 }
 0x922   :  { %2760 = vadd.xlane.f32.xlu1 %v2759_v25  ;;  %v2677_v46 = vpop.xlane.xlu1 %2676  ;;  %2981 = vmatprep.subr.mxu0 %v2896_v1  ;;  %v2895_v25 = vld [vmem:[%s11866_s12 + $0x50] sm:$0xff] }
 0x923   :  { %v10239_v14 = vsub.f32 %v10134_v51, %v2696_v58  ;;  %v2695_v43 = vmul.f32 0.015625, %v2677_v46  ;;  %v2768_v30 = vsel %vm12191_vm5, %v2726_v18, 0.0  ;;  %v2725_v36 = vmul.f32 %v10233_v53, %v10233_v53  ;;  %2982 = vmatpush1.msra.mxu0 %v2895_v25  ;;  %v2894_v18 = vld [vmem:[%s11866_s12 + $0x48] sm:$0xff]  ;;  %v2891_v1 = vld [vmem:[%s11866_s12 + $0x30] sm:$0xff]  ;;  %vm12193_vm5 = vmmov %vm12161_vm1 }
 0x924   :  { %2769 = vadd.xlane.f32.xlu0 %v2768_v30  ;;  %2983 = vmatprep.subr.mxu0 %v2894_v18  ;;  %v2893_v30 = vld [vmem:[%s11866_s12 + $0x40] sm:$0xff]  ;;  %v2888_v18 = vld [vmem:[%s11866_s12 + $0x18] sm:$0xff] }
 0x925   :  { %v10251_v32 = vsub.f32 %v10140_v9, %v2695_v43  ;;  %v2765_v6 = vsel %vm12161_vm1, %v2725_v36, 0.0  ;;  %v2728_v58 = vmul.f32 %v10239_v14, %v10239_v14  ;;  %2984 = vmatpush1.msra.mxu0 %v2893_v30  ;;  %v2892_v36 = vld [vmem:[%s11866_s12 + $0x38] sm:$0xff]  ;;  %v2887_v30 = vld [vmem:[%s11866_s12 + $0x10] sm:$0xff] }
 0x926   :  { %2766 = vadd.xlane.f32.xlu1 %v2765_v6  ;;  %2985 = vmatprep.subr.mxu0 %v2892_v36  ;;  %v2890_v6 = vld [vmem:[%s11866_s12 + $0x28] sm:$0xff]  ;;  %v3185_v36 = vld [vmem:[%s11868_s14 + $0xf8] sm:$0xff] }
 0x927   :  { %v2774_v46 = vsel %vm12192_vm2, %v2728_v58, 0.0  ;;  %v2727_v43 = vmul.f32 %v10251_v32, %v10251_v32  ;;  %2986 = vmatpush1.msra.mxu0 %v2891_v1  ;;  %v2889_v58 = vld [vmem:[%s11866_s12 + $0x20] sm:$0xff]  ;;  %v3169_v1 = vld [vmem:[%s11868_s14 + $0x78] sm:$0xff]  ;;  %6697 = vmatprep.subr.mxu1 %v3185_v36  ;;  %vm12194_vm2 = vmmov %vm12161_vm1 }
 0x928   :  { %2775 = vadd.xlane.f32.xlu0 %v2774_v46  ;;  %2987 = vmatprep.subr.mxu0 %v2890_v6  ;;  %v2886_v46 = vld [vmem:[%s11866_s12 + $0x8] sm:$0xff]  ;;  %v3168_v6 = vld [vmem:[%s11868_s14 + $0x70] sm:$0xff]  ;;  %v3165_v36 = vld [vmem:[%s11868_s14 + $0x58] sm:$0xff] }
 0x929   :  { %v2771_v25 = vsel %vm12193_vm5, %v2727_v43, 0.0  ;;  %2988 = vmatpush1.msra.mxu0 %v2889_v58  ;;  %v2885_v43 = vld [vmem:[%s11866_s12] sm:$0xff]  ;;  %6698 = vmatpush3.msra.mxu1 %v3169_v1  ;;  %v3183_v58 = vld [vmem:[%s11868_s14 + $0xe8] sm:$0xff]  ;;  %v3180_v1 = vld [vmem:[%s11868_s14 + $0xd0] sm:$0xff] }
 0x92a   :  { %2772 = vadd.xlane.f32.xlu1 %v2771_v25  ;;  %2989 = vmatprep.subr.mxu0 %v2888_v18  ;;  %v3184_v25 = vld [vmem:[%s11868_s14 + $0xf0] sm:$0xff]  ;;  %v3167_v18 = vld [vmem:[%s11868_s14 + $0x68] sm:$0xff]  ;;  %vm12195_vm5 = vmmov %vm12161_vm1 }
 0x92b   :  { %2990 = vmatpush1.msra.mxu0 %v2887_v30  ;;  %6699 = vmatprep.subr.mxu1 %v3184_v25  ;;  %v3182_v30 = vld [vmem:[%s11868_s14 + $0xe0] sm:$0xff]  ;;  %v3164_v25 = vld [vmem:[%s11868_s14 + $0x50] sm:$0xff] }
 0x92c   :  { %2991 = vmatprep.subr.mxu0 %v2886_v46  ;;  %6700 = vmatpush3.msra.mxu1 %v3168_v6  ;;  %v3166_v46 = vld [vmem:[%s11868_s14 + $0x60] sm:$0xff]  ;;  %v3179_v6 = vld [vmem:[%s11868_s14 + $0xc8] sm:$0xff] }
 0x92d   :  { %2992 = vmatpush1.msra.mxu0 %v2885_v43  ;;  %6701 = vmatprep.subr.mxu1 %v3183_v58  ;;  %v3181_v43 = vld [vmem:[%s11868_s14 + $0xd8] sm:$0xff]  ;;  %v3163_v58 = vld [vmem:[%s11868_s14 + $0x48] sm:$0xff] }
 0x92e   :  { %6702 = vmatpush3.msra.mxu1 %v3167_v18  ;;  %v3178_v18 = vld [vmem:[%s11868_s14 + $0xc0] sm:$0xff] }
 0x92f   :  { %6703 = vmatprep.subr.mxu1 %v3182_v30  ;;  %v3162_v30 = vld [vmem:[%s11868_s14 + $0x40] sm:$0xff] }
 0x930   :  { %6704 = vmatpush3.msra.mxu1 %v3166_v46  ;;  %v3177_v46 = vld [vmem:[%s11868_s14 + $0xb8] sm:$0xff] }
 0x931   :  { %6705 = vmatprep.subr.mxu1 %v3181_v43  ;;  %v3161_v43 = vld [vmem:[%s11868_s14 + $0x38] sm:$0xff] }
 0x932   :  { %6706 = vmatpush3.msra.mxu1 %v3165_v36  ;;  %v3176_v36 = vld [vmem:[%s11868_s14 + $0xb0] sm:$0xff] }
 0x933   :  { %6707 = vmatprep.subr.mxu1 %v3180_v1  ;;  %v3160_v1 = vld [vmem:[%s11868_s14 + $0x30] sm:$0xff] }
 0x934   :  { %6708 = vmatpush3.msra.mxu1 %v3164_v25  ;;  %v3175_v25 = vld [vmem:[%s11868_s14 + $0xa8] sm:$0xff] }
 0x935   :  { %6709 = vmatprep.subr.mxu1 %v3179_v6  ;;  %v3159_v6 = vld [vmem:[%s11868_s14 + $0x28] sm:$0xff] }
 0x936   :  { %6710 = vmatpush3.msra.mxu1 %v3163_v58  ;;  %v3174_v58 = vld [vmem:[%s11868_s14 + $0xa0] sm:$0xff] }
 0x937   :  { %6711 = vmatprep.subr.mxu1 %v3178_v18  ;;  %v3158_v18 = vld [vmem:[%s11868_s14 + $0x20] sm:$0xff] }
 0x938   :  { %6712 = vmatpush3.msra.mxu1 %v3162_v30 }
 0x939   :  { %6713 = vmatprep.subr.mxu1 %v3177_v46 }
 0x93a   :  { %6714 = vmatpush3.msra.mxu1 %v3161_v43 }
 0x93b   :  { %6715 = vmatprep.subr.mxu1 %v3176_v36 }
 0x93c   :  { %6716 = vmatpush3.msra.mxu1 %v3160_v1 }
 0x93d   :  { %6717 = vmatprep.subr.mxu1 %v3175_v25 }
 0x93e   :  { %6718 = vmatpush3.msra.mxu1 %v3159_v6 }
 0x93f   :  { %6719 = vmatprep.subr.mxu1 %v3174_v58 }
 0x940   :  { %6720 = vmatpush3.msra.mxu1 %v3158_v18 }
 0x995   :  { %v2734_v30 = vpop.xlane.xlu0 %2733 }
 0x996   :  { %v2778_v46 = vmul.f32 0.015625, %v2734_v30 }
 0x997   :  { %v2731_v43 = vpop.xlane.xlu1 %2730 }
 0x998   :  { %v2794_v36 = vadd.f32 1e-05, %v2778_v46  ;;  %v2777_v15 = vmul.f32 0.015625, %v2731_v43 }
 0x999   :  { %v2740_v39 = vpop.xlane.xlu0 %2739 }
 0x99a   :  { %7968 = vrsqrt.f32 %v2794_v36  ;;  %v2793_v1 = vadd.f32 1e-05, %v2777_v15  ;;  %v2780_v56 = vmul.f32 0.015625, %v2740_v39 }
 0x99b   :  { %v2737_v13 = vpop.xlane.xlu1 %2736 }
 0x99c   :  { %7970 = vrsqrt.f32 %v2793_v1  ;;  %v2779_v54 = vmul.f32 0.015625, %v2737_v13  ;;  %v2796_v25 = vadd.f32 1e-05, %v2780_v56 }
 0x99d   :  { %v2746_v33 = vpop.xlane.xlu0 %2745 }
 0x99e   :  { %v2795_v7 = vadd.f32 1e-05, %v2779_v54  ;;  %v2782_v58 = vmul.f32 0.015625, %v2746_v33 }
 0x99f   :  { %v2743_v63 = vpop.xlane.xlu1 %2742 }
 0x9a0   :  { %7972 = vrsqrt.f32 %v2795_v7  ;;  %v2781_v6 = vmul.f32 0.015625, %v2743_v63  ;;  %v2798_v50 = vadd.f32 1e-05, %v2782_v58  ;;  %v10364_v7 = vld [vmem:[#allocation2] ss:$0 sm:$0xff] }
 0x9a1   :  { %7974 = vrsqrt.f32 %v2796_v25  ;;  %v2752_v36 = vpop.xlane.xlu0 %2751 }
 0x9a2   :  { %v2797_v18 = vadd.f32 1e-05, %v2781_v6  ;;  %v2784_v13 = vmul.f32 0.015625, %v2752_v36  ;;  %v10367_v6 = vld [vmem:[#allocation5] ss:$0 sm:$0xff] }
 0x9a3   :  { %v2749_v30 = vpop.xlane.xlu1 %2748 }
 0x9a4   :  { %7976 = vrsqrt.f32 %v2797_v18  ;;  %v2783_v46 = vmul.f32 0.015625, %v2749_v30  ;;  %v2800_v58 = vadd.f32 1e-05, %v2784_v13 }
 0x9a5   :  { %7978 = vrsqrt.f32 %v2798_v50  ;;  %v2758_v18 = vpop.xlane.xlu0 %2757 }
 0x9a6   :  { %v2799_v56 = vadd.f32 1e-05, %v2783_v46 }
 0x9a7   :  { %v7969_v43 = vpop.eup %7968  ;;  %v2755_v54 = vpop.xlane.xlu1 %2754 }
 0x9a8   :  { %v2826_v1 = vmul.f32 %v7969_v43, %v10159_v31  ;;  %v2785_v25 = vmul.f32 0.015625, %v2755_v54  ;;  %7980 = vrsqrt.f32 %v2799_v56  ;;  %v2786_v31 = vmul.f32 0.015625, %v2758_v18 }
 0x9a9   :  { %v7971_v15 = vpop.eup %7970  ;;  %7982 = vrsqrt.f32 %v2800_v58 }
 0x9aa   :  { %v2825_v39 = vmul.f32 %v7971_v15, %v10162_v60  ;;  %v2848_v60 = vmul.f32 %v10364_v7, %v2826_v1  ;;  %v2801_v43 = vadd.f32 1e-05, %v2785_v25  ;;  %v2802_v54 = vadd.f32 1e-05, %v2786_v31  ;;  %v2764_v1 = vpop.xlane.xlu0 %2763 }
 0x9ab   :  { %v2761_v56 = vpop.xlane.xlu1 %2760 }
 0x9ac   :  { %v2847_v63 = vmul.f32 %v10364_v7, %v2825_v39  ;;  %v2870_v36 = vadd.f32 %v10367_v6, %v2848_v60  ;;  %7984 = vrsqrt.f32 %v2801_v43 }
 0x9ad   :  { %v7973_v33 = vpop.eup %7972  ;;  %7986 = vrsqrt.f32 %v2802_v54 }
 0x9ae   :  { %v2869_v50 = vadd.f32 %v10367_v6, %v2847_v63  ;;  %v7975_v30 = vpop.eup %7974  ;;  %v2827_v46 = vmul.f32 %v7973_v33, %v10173_v42  ;;  %v2787_v63 = vmul.f32 0.015625, %v2761_v56 }
 0x9af   :  { %v2828_v39 = vmul.f32 %v7975_v30, %v10167_v20  ;;  %v2788_v20 = vmul.f32 0.015625, %v2764_v1 }
 0x9b0   :  { %6213 = vmatmul.mubr.msk.f32.vlgmr.msra.gmra.mxu0 %vm12161_vm1, %v2869_v50  ;;  %v2849_v15 = vmul.f32 %v10364_v7, %v2827_v46  ;;  %v2803_v18 = vadd.f32 1e-05, %v2787_v63  ;;  %v2767_v50 = vpop.xlane.xlu1 %2766 }
 0x9b1   :  { %3031 = vmatprep.mubr.f32.mxu0 %v12008_v16  ;;  %v7977_v13 = vpop.eup %7976  ;;  %v2850_v25 = vmul.f32 %v10364_v7, %v2828_v39  ;;  %v2804_v43 = vadd.f32 1e-05, %v2788_v20 }
 0x9b2   :  { %v7979_v42 = vpop.eup %7978  ;;  %v2871_v33 = vadd.f32 %v10367_v6, %v2849_v15  ;;  %v2829_v58 = vmul.f32 %v7977_v13, %v10185_v61  ;;  %7988 = vrsqrt.f32 %v2803_v18  ;;  %v2770_v61 = vpop.xlane.xlu0 %2769 }
 0x9b3   :  { %v2872_v60 = vadd.f32 %v10367_v6, %v2850_v25  ;;  %v2830_v46 = vmul.f32 %v7979_v42, %v10179_v52  ;;  %v2790_v54 = vmul.f32 0.015625, %v2770_v61  ;;  %7990 = vrsqrt.f32 %v2804_v43 }
 0x9b4   :  { %6214 = vmatmul.mubr.msk.f32.gmra.mxu0 %vm12194_vm2, %v2870_v36  ;;  %v2851_v30 = vmul.f32 %v10364_v7, %v2829_v58  ;;  %v2789_v36 = vmul.f32 0.015625, %v2767_v50  ;;  %vm12196_vm2 = vmmov %vm12161_vm1  ;;  %v2773_v25 = vpop.xlane.xlu1 %2772 }
 0x9b5   :  { %3037 = vmatprep.mubr.f32.mxu0 %v12008_v16  ;;  %v7981_v31 = vpop.eup %7980  ;;  %v2852_v39 = vmul.f32 %v10364_v7, %v2830_v46  ;;  %v2806_v58 = vadd.f32 1e-05, %v2790_v54  ;;  %v2791_v18 = vmul.f32 0.015625, %v2773_v25 }
 0x9b6   :  { %v2873_v15 = vadd.f32 %v10367_v6, %v2851_v30  ;;  %v2831_v13 = vmul.f32 %v7981_v31, %v10197_v8  ;;  %v7983_v56 = vpop.eup %7982  ;;  %v2805_v52 = vadd.f32 1e-05, %v2789_v36  ;;  %v2776_v20 = vpop.xlane.xlu0 %2775 }
 0x9b7   :  { %v2874_v1 = vadd.f32 %v10367_v6, %v2852_v39  ;;  %v2807_v46 = vadd.f32 1e-05, %v2791_v18 }
 0x9b8   :  { %6215 = vmatmul.mubr.msk.f32.gmra.mxu0 %vm12195_vm5, %v2871_v33  ;;  %v2853_v63 = vmul.f32 %v10364_v7, %v2831_v13  ;;  %v2832_v33 = vmul.f32 %v7983_v56, %v10191_v21  ;;  %vm12197_vm5 = vmmov %vm12161_vm1  ;;  %7992 = vrsqrt.f32 %v2805_v52  ;;  %v2792_v21 = vmul.f32 0.015625, %v2776_v20 }
 0x9b9   :  { %3043 = vmatprep.mubr.f32.mxu0 %v12008_v16  ;;  %v7985_v42 = vpop.eup %7984  ;;  %7994 = vrsqrt.f32 %v2806_v58 }
 0x9ba   :  { %v7987_v8 = vpop.eup %7986  ;;  %v2875_v50 = vadd.f32 %v10367_v6, %v2853_v63  ;;  %v2833_v30 = vmul.f32 %v7985_v42, %v10209_v22  ;;  %7996 = vrsqrt.f32 %v2807_v46 }
 0x9bb   :  { %v2834_v36 = vmul.f32 %v7987_v8, %v10203_v26 }
 0x9bc   :  { %6216 = vmatmul.mubr.msk.f32.gmra.mxu0 %vm12161_vm1, %v2872_v60  ;;  %v2854_v60 = vmul.f32 %v10364_v7, %v2832_v33  ;;  %v2855_v43 = vmul.f32 %v10364_v7, %v2833_v30 }
 0x9bd   :  { %3049 = vmatprep.mubr.f32.mxu0 %v12008_v16  ;;  %v2856_v39 = vmul.f32 %v10364_v7, %v2834_v36  ;;  %v3155_v36 = vld [vmem:[%s11868_s14 + $0x8] sm:$0xff] }
 0x9be   :  { %v2876_v31 = vadd.f32 %v10367_v6, %v2854_v60  ;;  %v2877_v22 = vadd.f32 %v10367_v6, %v2855_v43  ;;  %v3171_v43 = vld [vmem:[%s11868_s14 + $0x88] sm:$0xff] }
 0x9bf   :  { %v7989_v61 = vpop.eup %7988  ;;  %v2878_v26 = vadd.f32 %v10367_v6, %v2856_v39  ;;  %v2901_v39 = vld [vmem:[%s11867_s13] sm:$0x3] }
 0x9c0   :  { %6217 = vmatmul.mubr.msk.f32.gmra.mxu0 %vm12196_vm2, %v2873_v15  ;;  %vm12198_vm2 = vmmov %vm12161_vm1  ;;  %v2808_v15 = vadd.f32 1e-05, %v2792_v21  ;;  %v2835_v13 = vmul.f32 %v7989_v61, %v10221_v47  ;;  %v7991_v56 = vpop.eup %7990  ;;  %v3170_v61 = vld [vmem:[%s11868_s14 + $0x80] sm:$0xff] }
 0x9c1   :  { %3055 = vmatprep.mubr.f32.mxu0 %v12008_v16  ;;  %v2836_v42 = vmul.f32 %v7991_v56, %v10215_v48 }
 0x9c2   :  { %7998 = vrsqrt.f32 %v2808_v15  ;;  %v2857_v52 = vmul.f32 %v10364_v7, %v2835_v13  ;;  %v3154_v15 = vld [vmem:[%s11868_s14] sm:$0xff]  ;;  %v11970_v13 = vsub.s32 1, %v8433_v2 }
 0x9c3   :  { %v2858_v63 = vmul.f32 %v10364_v7, %v2836_v42 }
 0x9c4   :  { %6218 = vmatmul.mubr.msk.f32.gmra.mxu0 %vm12197_vm5, %v2874_v1  ;;  %vm12199_vm5 = vmmov %vm12161_vm1  ;;  %v2879_v47 = vadd.f32 %v10367_v6, %v2857_v52 }
 0x9c5   :  { %3061 = vmatprep.mubr.f32.mxu0 %v12008_v16  ;;  %v7993_v54 = vpop.eup %7992  ;;  %v2880_v25 = vadd.f32 %v10367_v6, %v2858_v63 }
 0x9c6   :  { %v7995_v1 = vpop.eup %7994  ;;  %v2837_v33 = vmul.f32 %v7993_v54, %v10233_v53  ;;  %v10480_v54 = vrot.slane %v2901_v39, %v11970_v13 }
 0x9c7   :  { %v2838_v48 = vmul.f32 %v7995_v1, %v10227_v45  ;;  %v7997_v8 = vpop.eup %7996 }
 0x9c8   :  { %6219 = vmatmul.mubr.msk.f32.gmra.mxu0 %vm12161_vm1, %v2875_v50  ;;  %v2859_v58 = vmul.f32 %v10364_v7, %v2837_v33  ;;  %v2839_v53 = vmul.f32 %v7997_v8, %v10251_v32 }
 0x9c9   :  { %3067 = vmatprep.mubr.f32.mxu0 %v12008_v16  ;;  %v2860_v18 = vmul.f32 %v10364_v7, %v2838_v48 }
 0x9ca   :  { %v2881_v20 = vadd.f32 %v10367_v6, %v2859_v58  ;;  %v2861_v45 = vmul.f32 %v10364_v7, %v2839_v53 }
 0x9cb   :  { %v2882_v60 = vadd.f32 %v10367_v6, %v2860_v18 }
 0x9cc   :  { %6220 = vmatmul.mubr.msk.f32.gmra.mxu0 %vm12198_vm2, %v2876_v31  ;;  %vm12200_vm2 = vmmov %vm12161_vm1  ;;  %v2883_v21 = vadd.f32 %v10367_v6, %v2861_v45  ;;  %v3157_v31 = vld [vmem:[%s11868_s14 + $0x18] sm:$0xff] }
 0x9cd   :  { %3073 = vmatprep.mubr.f32.mxu0 %v12008_v16 }
 0x9cf   :  { %v7999_v50 = vpop.eup %7998 }
 0x9d0   :  { %6221 = vmatmul.mubr.msk.f32.gmra.mxu0 %vm12199_vm5, %v2877_v22  ;;  %vm12201_vm5 = vmmov %vm12161_vm1  ;;  %v2840_v30 = vmul.f32 %v7999_v50, %v10239_v14  ;;  %v3173_v14 = vld [vmem:[%s11868_s14 + $0x98] sm:$0xff]  ;;  %v11971_v22 = vsub.s32 0, %v8433_v2 }
 0x9d1   :  { %3079 = vmatprep.mubr.f32.mxu0 %v12008_v16  ;;  %6721 = vmatprep.subr.mxu1 %v3173_v14 }
 0x9d2   :  { %v2862_v46 = vmul.f32 %v10364_v7, %v2840_v30  ;;  %6722 = vmatpush3.msra.mxu1 %v3157_v31  ;;  %v3172_v7 = vld [vmem:[%s11868_s14 + $0x90] sm:$0xff]  ;;  %v10476_v56 = vrot.slane %v2901_v39, %v11971_v22 }
 0x9d3   :  { %6723 = vmatprep.subr.mxu1 %v3172_v7 }
 0x9d4   :  { %6222 = vmatmul.mubr.msk.f32.gmra.mxu0 %vm12161_vm1, %v2878_v26  ;;  %v2884_v32 = vadd.f32 %v10367_v6, %v2862_v46  ;;  %v3156_v6 = vld [vmem:[%s11868_s14 + $0x10] sm:$0xff] }
 0x9d5   :  { %3085 = vmatprep.mubr.f32.mxu0 %v12008_v16  ;;  %6724 = vmatpush3.msra.mxu1 %v3156_v6 }
 0x9d6   :  { %6725 = vmatprep.subr.mxu1 %v3171_v43 }
 0x9d7   :  { %6726 = vmatpush3.msra.mxu1 %v3155_v36 }
 0x9d8   :  { %6223 = vmatmul.mubr.msk.f32.gmra.mxu0 %vm12200_vm2, %v2879_v47  ;;  %vm12202_vm2 = vmmov %vm12161_vm1  ;;  %6727 = vmatprep.subr.mxu1 %v3170_v61 }
 0x9d9   :  { %3091 = vmatprep.mubr.f32.mxu0 %v12008_v16  ;;  %6728 = vmatpush3.msra.mxu1 %v3154_v15 }
 0x9dc   :  { %6224 = vmatmul.mubr.msk.f32.gmra.mxu0 %vm12201_vm5, %v2880_v25  ;;  %vm12203_vm5 = vmmov %vm12161_vm1 }
 0x9dd   :  { %3097 = vmatprep.mubr.f32.mxu0 %v12008_v16 }
 0x9e0   :  { %6225 = vmatmul.mubr.msk.f32.gmra.mxu0 %vm12161_vm1, %v2881_v20 }
 0x9e1   :  { %3103 = vmatprep.mubr.f32.mxu0 %v12008_v16 }
 0x9e4   :  { %6226 = vmatmul.mubr.msk.f32.gmra.mxu0 %vm12202_vm2, %v2882_v60  ;;  %vm12204_vm2 = vmmov %vm12161_vm1 }
 0x9e5   :  { %3109 = vmatprep.mubr.f32.mxu0 %v12008_v16 }
 0x9e8   :  { %6227 = vmatmul.mubr.msk.f32.gmra.mxu0 %vm12203_vm5, %v2883_v21  ;;  %vm12205_vm5 = vmmov %vm12161_vm1 }
 0x9e9   :  { %3115 = vmatprep.mubr.f32.mxu0 %v12008_v16 }
 0x9ec   :  { %6228 = vmatmul.mubr.msk.f32.gmra.mxu0 %vm12161_vm1, %v2884_v32 }
 0xa70   :  { %v3027_v26 = vpop.f32.mrf.mxu0 }
 0xa71   :  { %v3028_v52 = vadd.f32 %v3027_v26, %v10476_v56 }
 0xa72   :  { %v3029_v42 = vpop.f32.mrf.mxu0 }
 0xa73   :  { %v3030_v1 = vadd.f32 %v3029_v42, %v10480_v54  ;;  %v3122_v33 = vmax.f32 %v3028_v52, 0.0 }
 0xa74   :  { %v3033_v47 = vpop.f32.mrf.mxu0 }
 0xa75   :  { %v3123_v63 = vmax.f32 %v3030_v1, 0.0  ;;  %v3034_v25 = vadd.f32 %v3033_v47, %v10476_v56 }
 0xa76   :  { %v3035_v58 = vpop.f32.mrf.mxu0 }
 0xa77   :  { %v3036_v48 = vadd.f32 %v3035_v58, %v10480_v54  ;;  %3257 = vmatprep.mubr.f32.mxu1 %v3123_v63  ;;  %v3124_v18 = vmax.f32 %v3034_v25, 0.0 }
 0xa78   :  { %v3039_v8 = vpop.f32.mrf.mxu0  ;;  %3258 = vmatmul.mubr.f32.vlgmr.msra.gmra.mxu1 %v3122_v33 }
 0xa79   :  { %v3125_v20 = vmax.f32 %v3036_v48, 0.0  ;;  %v3040_v53 = vadd.f32 %v3039_v8, %v10476_v56 }
 0xa7a   :  { %v3041_v50 = vpop.f32.mrf.mxu0 }
 0xa7b   :  { %v3042_v60 = vadd.f32 %v3041_v50, %v10480_v54  ;;  %3262 = vmatprep.mubr.f32.mxu1 %v3125_v20  ;;  %v3126_v21 = vmax.f32 %v3040_v53, 0.0 }
 0xa7c   :  { %v3045_v45 = vpop.f32.mrf.mxu0  ;;  %3263 = vmatmul.mubr.f32.gmra.mxu1 %v3124_v18 }
 0xa7d   :  { %v3127_v30 = vmax.f32 %v3042_v60, 0.0  ;;  %v3046_v46 = vadd.f32 %v3045_v45, %v10476_v56 }
 0xa7e   :  { %v3047_v32 = vpop.f32.mrf.mxu0 }
 0xa7f   :  { %v3048_v14 = vadd.f32 %v3047_v32, %v10480_v54  ;;  %3267 = vmatprep.mubr.f32.mxu1 %v3127_v30  ;;  %v3128_v6 = vmax.f32 %v3046_v46, 0.0 }
 0xa80   :  { %v3051_v31 = vpop.f32.mrf.mxu0  ;;  %3268 = vmatmul.mubr.f32.gmra.mxu1 %v3126_v21 }
 0xa81   :  { %v3129_v7 = vmax.f32 %v3048_v14, 0.0  ;;  %v3052_v43 = vadd.f32 %v3051_v31, %v10476_v56 }
 0xa82   :  { %v3053_v36 = vpop.f32.mrf.mxu0 }
 0xa83   :  { %v3054_v61 = vadd.f32 %v3053_v36, %v10480_v54  ;;  %3272 = vmatprep.mubr.f32.mxu1 %v3129_v7  ;;  %v3130_v26 = vmax.f32 %v3052_v43, 0.0 }
 0xa84   :  { %v3057_v15 = vpop.f32.mrf.mxu0  ;;  %3273 = vmatmul.mubr.f32.gmra.mxu1 %v3128_v6 }
 0xa85   :  { %v3131_v39 = vmax.f32 %v3054_v61, 0.0  ;;  %v3058_v52 = vadd.f32 %v3057_v15, %v10476_v56 }
 0xa86   :  { %v3059_v42 = vpop.f32.mrf.mxu0 }
 0xa87   :  { %v3060_v1 = vadd.f32 %v3059_v42, %v10480_v54  ;;  %3277 = vmatprep.mubr.f32.mxu1 %v3131_v39  ;;  %v3132_v33 = vmax.f32 %v3058_v52, 0.0 }
 0xa88   :  { %v3063_v47 = vpop.f32.mrf.mxu0  ;;  %3278 = vmatmul.mubr.f32.gmra.mxu1 %v3130_v26 }
 0xa89   :  { %v3133_v63 = vmax.f32 %v3060_v1, 0.0  ;;  %v3064_v25 = vadd.f32 %v3063_v47, %v10476_v56 }
 0xa8a   :  { %v3065_v58 = vpop.f32.mrf.mxu0 }
 0xa8b   :  { %v3066_v48 = vadd.f32 %v3065_v58, %v10480_v54  ;;  %3282 = vmatprep.mubr.f32.mxu1 %v3133_v63  ;;  %v3134_v18 = vmax.f32 %v3064_v25, 0.0 }
 0xa8c   :  { %v3069_v8 = vpop.f32.mrf.mxu0  ;;  %3283 = vmatmul.mubr.f32.gmra.mxu1 %v3132_v33 }
 0xa8d   :  { %v3135_v20 = vmax.f32 %v3066_v48, 0.0  ;;  %v3070_v53 = vadd.f32 %v3069_v8, %v10476_v56 }
 0xa8e   :  { %v3071_v50 = vpop.f32.mrf.mxu0 }
 0xa8f   :  { %v3072_v60 = vadd.f32 %v3071_v50, %v10480_v54  ;;  %3287 = vmatprep.mubr.f32.mxu1 %v3135_v20  ;;  %v3136_v21 = vmax.f32 %v3070_v53, 0.0 }
 0xa90   :  { %v3075_v45 = vpop.f32.mrf.mxu0  ;;  %3288 = vmatmul.mubr.f32.gmra.mxu1 %v3134_v18 }
 0xa91   :  { %v3137_v30 = vmax.f32 %v3072_v60, 0.0  ;;  %v3076_v46 = vadd.f32 %v3075_v45, %v10476_v56 }
 0xa92   :  { %v3077_v32 = vpop.f32.mrf.mxu0 }
 0xa93   :  { %v3078_v14 = vadd.f32 %v3077_v32, %v10480_v54  ;;  %3292 = vmatprep.mubr.f32.mxu1 %v3137_v30  ;;  %v3138_v6 = vmax.f32 %v3076_v46, 0.0 }
 0xa94   :  { %v3081_v31 = vpop.f32.mrf.mxu0  ;;  %3293 = vmatmul.mubr.f32.gmra.mxu1 %v3136_v21 }
 0xa95   :  { %v3139_v7 = vmax.f32 %v3078_v14, 0.0  ;;  %v3082_v43 = vadd.f32 %v3081_v31, %v10476_v56 }
 0xa96   :  { %v3083_v36 = vpop.f32.mrf.mxu0 }
 0xa97   :  { %v3084_v61 = vadd.f32 %v3083_v36, %v10480_v54  ;;  %3297 = vmatprep.mubr.f32.mxu1 %v3139_v7  ;;  %v3140_v26 = vmax.f32 %v3082_v43, 0.0 }
 0xa98   :  { %v3087_v15 = vpop.f32.mrf.mxu0  ;;  %3298 = vmatmul.mubr.f32.gmra.mxu1 %v3138_v6 }
 0xa99   :  { %v3141_v39 = vmax.f32 %v3084_v61, 0.0  ;;  %v3088_v52 = vadd.f32 %v3087_v15, %v10476_v56 }
 0xa9a   :  { %v3089_v42 = vpop.f32.mrf.mxu0 }
 0xa9b   :  { %v3090_v1 = vadd.f32 %v3089_v42, %v10480_v54  ;;  %3302 = vmatprep.mubr.f32.mxu1 %v3141_v39  ;;  %v3142_v33 = vmax.f32 %v3088_v52, 0.0 }
 0xa9c   :  { %v3093_v47 = vpop.f32.mrf.mxu0  ;;  %3303 = vmatmul.mubr.f32.gmra.mxu1 %v3140_v26 }
 0xa9d   :  { %v3143_v63 = vmax.f32 %v3090_v1, 0.0  ;;  %v3094_v25 = vadd.f32 %v3093_v47, %v10476_v56 }
 0xa9e   :  { %v3095_v58 = vpop.f32.mrf.mxu0 }
 0xa9f   :  { %v3096_v48 = vadd.f32 %v3095_v58, %v10480_v54  ;;  %3307 = vmatprep.mubr.f32.mxu1 %v3143_v63  ;;  %v3144_v18 = vmax.f32 %v3094_v25, 0.0  ;;  %v10514_v25 = vld [vmem:[#allocation7] ss:$0 sm:$0xff] }
 0xaa0   :  { %v3099_v8 = vpop.f32.mrf.mxu0  ;;  %3308 = vmatmul.mubr.f32.gmra.mxu1 %v3142_v33 }
 0xaa1   :  { %v3145_v20 = vmax.f32 %v3096_v48, 0.0  ;;  %v3100_v53 = vadd.f32 %v3099_v8, %v10476_v56 }
 0xaa2   :  { %v3101_v50 = vpop.f32.mrf.mxu0 }
 0xaa3   :  { %v3102_v60 = vadd.f32 %v3101_v50, %v10480_v54  ;;  %3312 = vmatprep.mubr.f32.mxu1 %v3145_v20  ;;  %v3146_v21 = vmax.f32 %v3100_v53, 0.0 }
 0xaa4   :  { %v3105_v45 = vpop.f32.mrf.mxu0  ;;  %3313 = vmatmul.mubr.f32.gmra.mxu1 %v3144_v18 }
 0xaa5   :  { %v3147_v30 = vmax.f32 %v3102_v60, 0.0  ;;  %v3106_v46 = vadd.f32 %v3105_v45, %v10476_v56 }
 0xaa6   :  { %v3107_v32 = vpop.f32.mrf.mxu0 }
 0xaa7   :  { %v3108_v14 = vadd.f32 %v3107_v32, %v10480_v54  ;;  %3317 = vmatprep.mubr.f32.mxu1 %v3147_v30  ;;  %v3148_v6 = vmax.f32 %v3106_v46, 0.0 }
 0xaa8   :  { %v3111_v31 = vpop.f32.mrf.mxu0  ;;  %3318 = vmatmul.mubr.f32.gmra.mxu1 %v3146_v21 }
 0xaa9   :  { %v3149_v7 = vmax.f32 %v3108_v14, 0.0  ;;  %v3112_v43 = vadd.f32 %v3111_v31, %v10476_v56 }
 0xaaa   :  { %v3113_v36 = vpop.f32.mrf.mxu0 }
 0xaab   :  { %v3114_v61 = vadd.f32 %v3113_v36, %v10480_v54  ;;  %3322 = vmatprep.mubr.f32.mxu1 %v3149_v7  ;;  %v3150_v26 = vmax.f32 %v3112_v43, 0.0 }
 0xaac   :  { %v3117_v15 = vpop.f32.mrf.mxu0  ;;  %3323 = vmatmul.mubr.f32.gmra.mxu1 %v3148_v6 }
 0xaad   :  { %v3151_v39 = vmax.f32 %v3114_v61, 0.0  ;;  %v3118_v52 = vadd.f32 %v3117_v15, %v10476_v56 }
 0xaae   :  { %v3119_v42 = vpop.f32.mrf.mxu0 }
 0xaaf   :  { %v3120_v1 = vadd.f32 %v3119_v42, %v10480_v54  ;;  %3327 = vmatprep.mubr.f32.mxu1 %v3151_v39  ;;  %v3152_v63 = vmax.f32 %v3118_v52, 0.0 }
 0xab0   :  { %3328 = vmatmul.mubr.f32.gmra.mxu1 %v3150_v26 }
 0xab1   :  { %v3153_v47 = vmax.f32 %v3120_v1, 0.0 }
 0xab3   :  { %3332 = vmatprep.mubr.f32.mxu1 %v3153_v47 }
 0xab4   :  { %3333 = vmatmul.mubr.f32.gmra.mxu1 %v3152_v63 }
 0xb38   :  { %v6729_v33 = vpop.f32.mrf.mxu1 }
 0xb3a   :  { %v6730_v58 = vpop.f32.mrf.mxu1 }
 0xb3b   :  { %v6731_v48 = vadd.f32 %v6730_v58, %v6729_v33 }
 0xb3c   :  { %v6732_v8 = vpop.f32.mrf.mxu1 }
 0xb3d   :  { %v3260_v20 = vadd.f32 %v6731_v48, %v10514_v25 }
 0xb3e   :  { %v6733_v18 = vpop.f32.mrf.mxu1 }
 0xb3f   :  { %v10518_v56 = vadd.f32 %v3260_v20, %v10056_v4  ;;  %v6734_v53 = vadd.f32 %v6733_v18, %v6732_v8 }
 0xb40   :  { %v6735_v54 = vpop.f32.mrf.mxu1 }
 0xb41   :  { %v3265_v50 = vadd.f32 %v6734_v53, %v10514_v25  ;;  %v3358_v60 = vsel %vm12204_vm2, %v10518_v56, 0.0  ;;  %vm12206_vm2 = vmmov %vm12161_vm1 }
 0xb42   :  { %3359 = vadd.xlane.f32.xlu1 %v3358_v60  ;;  %v6736_v45 = vpop.f32.mrf.mxu1 }
 0xb43   :  { %v10524_v30 = vadd.f32 %v3265_v50, %v10052_v38  ;;  %v6737_v21 = vadd.f32 %v6736_v45, %v6735_v54 }
 0xb44   :  { %v6738_v46 = vpop.f32.mrf.mxu1 }
 0xb45   :  { %v3270_v32 = vadd.f32 %v6737_v21, %v10514_v25  ;;  %v3361_v4 = vsel %vm12205_vm5, %v10524_v30, 0.0  ;;  %vm12207_vm5 = vmmov %vm12161_vm1 }
 0xb46   :  { %3362 = vadd.xlane.f32.xlu0 %v3361_v4  ;;  %v6739_v14 = vpop.f32.mrf.mxu1 }
 0xb47   :  { %v10530_v31 = vadd.f32 %v3270_v32, %v10068_v29  ;;  %v6740_v7 = vadd.f32 %v6739_v14, %v6738_v46 }
 0xb48   :  { %v6741_v6 = vpop.f32.mrf.mxu1 }
 0xb49   :  { %v3275_v43 = vadd.f32 %v6740_v7, %v10514_v25  ;;  %v3364_v38 = vsel %vm12161_vm1, %v10530_v31, 0.0 }
 0xb4a   :  { %3365 = vadd.xlane.f32.xlu1 %v3364_v38  ;;  %v6742_v36 = vpop.f32.mrf.mxu1 }
 0xb4b   :  { %v10536_v61 = vadd.f32 %v3275_v43, %v10062_v57  ;;  %v6743_v15 = vadd.f32 %v6742_v36, %v6741_v6 }
 0xb4c   :  { %v6744_v39 = vpop.f32.mrf.mxu1 }
 0xb4d   :  { %v3280_v26 = vadd.f32 %v6743_v15, %v10514_v25  ;;  %v3367_v29 = vsel %vm12206_vm2, %v10536_v61, 0.0  ;;  %vm12208_vm2 = vmmov %vm12161_vm1 }
 0xb4e   :  { %3368 = vadd.xlane.f32.xlu0 %v3367_v29  ;;  %v6745_v52 = vpop.f32.mrf.mxu1 }
 0xb4f   :  { %v10542_v42 = vadd.f32 %v3280_v26, %v10080_v17  ;;  %v6746_v1 = vadd.f32 %v6745_v52, %v6744_v39 }
 0xb50   :  { %v6747_v47 = vpop.f32.mrf.mxu1 }
 0xb51   :  { %v3285_v63 = vadd.f32 %v6746_v1, %v10514_v25  ;;  %v3370_v57 = vsel %vm12207_vm5, %v10542_v42, 0.0  ;;  %vm12209_vm5 = vmmov %vm12161_vm1 }
 0xb52   :  { %3371 = vadd.xlane.f32.xlu1 %v3370_v57  ;;  %v6748_v33 = vpop.f32.mrf.mxu1 }
 0xb53   :  { %v10548_v58 = vadd.f32 %v3285_v63, %v10074_v55  ;;  %v6749_v48 = vadd.f32 %v6748_v33, %v6747_v47 }
 0xb54   :  { %v6750_v8 = vpop.f32.mrf.mxu1 }
 0xb55   :  { %v3290_v20 = vadd.f32 %v6749_v48, %v10514_v25  ;;  %v3373_v17 = vsel %vm12161_vm1, %v10548_v58, 0.0 }
 0xb56   :  { %3374 = vadd.xlane.f32.xlu0 %v3373_v17  ;;  %v6751_v18 = vpop.f32.mrf.mxu1 }
 0xb57   :  { %v10554_v53 = vadd.f32 %v3290_v20, %v10092_v28  ;;  %v6752_v54 = vadd.f32 %v6751_v18, %v6750_v8 }
 0xb58   :  { %v6753_v50 = vpop.f32.mrf.mxu1 }
 0xb59   :  { %v3295_v60 = vadd.f32 %v6752_v54, %v10514_v25  ;;  %v3376_v55 = vsel %vm12208_vm2, %v10554_v53, 0.0  ;;  %vm12211_vm2 = vmmov %vm12161_vm1 }
 0xb5a   :  { %3377 = vadd.xlane.f32.xlu1 %v3376_v55  ;;  %v6754_v45 = vpop.f32.mrf.mxu1 }
 0xb5b   :  { %v10560_v21 = vadd.f32 %v3295_v60, %v10086_v3  ;;  %v6755_v46 = vadd.f32 %v6754_v45, %v6753_v50 }
 0xb5c   :  { %v6756_v32 = vpop.f32.mrf.mxu1 }
 0xb5d   :  { %v3300_v4 = vadd.f32 %v6755_v46, %v10514_v25  ;;  %v3379_v28 = vsel %vm12209_vm5, %v10560_v21, 0.0  ;;  %vm12213_vm5 = vmmov %vm12161_vm1 }
 0xb5e   :  { %3380 = vadd.xlane.f32.xlu0 %v3379_v28  ;;  %v6757_v14 = vpop.f32.mrf.mxu1 }
 0xb5f   :  { %v10566_v7 = vadd.f32 %v3300_v4, %v10104_v62  ;;  %v6758_v6 = vadd.f32 %v6757_v14, %v6756_v32 }
 0xb60   :  { %v6759_v43 = vpop.f32.mrf.mxu1 }
 0xb61   :  { %12210 = vst [vmem:[#allocation20_spill] sm:$0xff] %v10566_v7  ;;  %v3305_v38 = vadd.f32 %v6758_v6, %v10514_v25  ;;  %v3382_v3 = vsel %vm12161_vm1, %v10566_v7, 0.0 }
 0xb62   :  { %3383 = vadd.xlane.f32.xlu1 %v3382_v3  ;;  %v6760_v36 = vpop.f32.mrf.mxu1 }
 0xb63   :  { %v10572_v15 = vadd.f32 %v3305_v38, %v10098_v34  ;;  %v6761_v39 = vadd.f32 %v6760_v36, %v6759_v43 }
 0xb64   :  { %v6762_v26 = vpop.f32.mrf.mxu1 }
 0xb65   :  { %v3310_v29 = vadd.f32 %v6761_v39, %v10514_v25  ;;  %v3385_v62 = vsel %vm12211_vm2, %v10572_v15, 0.0  ;;  %vm12216_vm2 = vmmov %vm12161_vm1  ;;  %v6265_v39 = vld [vmem:[%s11860_s6 + $0x78] sm:$0xff] }
 0xb66   :  { %3386 = vadd.xlane.f32.xlu0 %v3385_v62  ;;  %v6763_v52 = vpop.f32.mrf.mxu1  ;;  %7513 = vmatprep.subr.mxu1 %v6265_v39 }
 0xb67   :  { %v10578_v1 = vadd.f32 %v3310_v29, %v10116_v5  ;;  %v6764_v47 = vadd.f32 %v6763_v52, %v6762_v26  ;;  %7514 = vmatpush3.msra.mxu1 %v6265_v39 }
 0xb68   :  { %v6765_v63 = vpop.f32.mrf.mxu1 }
 0xb69   :  { %12212 = vst [vmem:[#allocation21_spill] sm:$0xff] %v10578_v1  ;;  %v3315_v57 = vadd.f32 %v6764_v47, %v10514_v25  ;;  %v3388_v34 = vsel %vm12213_vm5, %v10578_v1, 0.0  ;;  %vm12218_vm5 = vmmov %vm12161_vm1 }
 0xb6a   :  { %3389 = vadd.xlane.f32.xlu1 %v3388_v34  ;;  %v6766_v33 = vpop.f32.mrf.mxu1 }
 0xb6b   :  { %v10584_v48 = vadd.f32 %v3315_v57, %v10110_v19  ;;  %v6767_v8 = vadd.f32 %v6766_v33, %v6765_v63 }
 0xb6c   :  { %v6768_v20 = vpop.f32.mrf.mxu1 }
 0xb6d   :  { %12214 = vst [vmem:[#allocation23_spill] sm:$0xff] %v10584_v48  ;;  %v3320_v17 = vadd.f32 %v6767_v8, %v10514_v25  ;;  %v3391_v5 = vsel %vm12161_vm1, %v10584_v48, 0.0 }
 0xb6e   :  { %3392 = vadd.xlane.f32.xlu0 %v3391_v5  ;;  %v6769_v18 = vpop.f32.mrf.mxu1 }
 0xb6f   :  { %v10590_v54 = vadd.f32 %v3320_v17, %v10128_v10  ;;  %v6770_v50 = vadd.f32 %v6769_v18, %v6768_v20 }
 0xb70   :  { %v6771_v60 = vpop.f32.mrf.mxu1 }
 0xb71   :  { %12215 = vst [vmem:[#allocation22_spill] sm:$0xff] %v10590_v54  ;;  %v3325_v55 = vadd.f32 %v6770_v50, %v10514_v25  ;;  %v3394_v19 = vsel %vm12216_vm2, %v10590_v54, 0.0  ;;  %vm12221_vm2 = vmmov %vm12161_vm1 }
 0xb72   :  { %3395 = vadd.xlane.f32.xlu1 %v3394_v19  ;;  %v6772_v45 = vpop.f32.mrf.mxu1 }
 0xb73   :  { %v10596_v46 = vadd.f32 %v3325_v55, %v10122_v41  ;;  %v6773_v32 = vadd.f32 %v6772_v45, %v6771_v60 }
 0xb74   :  { %v6774_v4 = vpop.f32.mrf.mxu1 }
 0xb75   :  { %12217 = vst [vmem:[#allocation25_spill] sm:$0xff] %v10596_v46  ;;  %v3330_v28 = vadd.f32 %v6773_v32, %v10514_v25  ;;  %v3397_v10 = vsel %vm12218_vm5, %v10596_v46, 0.0  ;;  %vm12222_vm5 = vmmov %vm12161_vm1 }
 0xb76   :  { %3398 = vadd.xlane.f32.xlu0 %v3397_v10  ;;  %v6775_v14 = vpop.f32.mrf.mxu1 }
 0xb77   :  { %v10602_v6 = vadd.f32 %v3330_v28, %v10140_v9  ;;  %v6776_v43 = vadd.f32 %v6775_v14, %v6774_v4  ;;  %v6264_v14 = vld [vmem:[%s11860_s6 + $0x70] sm:$0xff] }
 0xb78   :  { %7515 = vmatprep.subr.mxu1 %v6264_v14 }
 0xb79   :  { %12219 = vst [vmem:[#allocation24_spill] sm:$0xff] %v10602_v6  ;;  %v3335_v38 = vadd.f32 %v6776_v43, %v10514_v25  ;;  %v3400_v3 = vsel %vm12161_vm1, %v10602_v6, 0.0  ;;  %7516 = vmatpush3.msra.mxu1 %v6264_v14  ;;  %v6237_v14 = vld [vmem:[%s11859_s5 + $0x58] sm:$0xff] }
 0xb7a   :  { %3401 = vadd.xlane.f32.xlu1 %v3400_v3 }
 0xb7b   :  { %v10608_v41 = vadd.f32 %v3335_v38, %v10134_v51 }
 0xb7d   :  { %12220 = vst [vmem:[#allocation27_spill] sm:$0xff] %v10608_v41  ;;  %v3403_v36 = vsel %vm12221_vm2, %v10608_v41, 0.0  ;;  %vm12223_vm2 = vmmov %vm12161_vm1 }
 0xb7e   :  { %3404 = vadd.xlane.f32.xlu0 %v3403_v36 }
 0xbcb   :  { %v3360_v9 = vpop.xlane.xlu1 %3359 }
 0xbcc   :  { %v3406_v26 = vmul.f32 0.015625, %v3360_v9 }
 0xbce   :  { %v10616_v25 = vsub.f32 %v10518_v56, %v3406_v26 }
 0xbcf   :  { %v3363_v29 = vpop.xlane.xlu0 %3362 }
 0xbd0   :  { %v3407_v62 = vmul.f32 0.015625, %v3363_v29  ;;  %v3438_v51 = vmul.f32 %v10616_v25, %v10616_v25 }
 0xbd2   :  { %v10621_v52 = vsub.f32 %v10524_v30, %v3407_v62  ;;  %v3454_v47 = vsel %vm12222_vm5, %v3438_v51, 0.0  ;;  %vm12224_vm5 = vmmov %vm12161_vm1 }
 0xbd3   :  { %3455 = vadd.xlane.f32.xlu1 %v3454_v47  ;;  %v3366_v63 = vpop.xlane.xlu1 %3365  ;;  %v6241_v47 = vld [vmem:[%s11859_s5 + $0x78] sm:$0xff] }
 0xbd4   :  { %v3408_v57 = vmul.f32 0.015625, %v3366_v63  ;;  %v3439_v34 = vmul.f32 %v10621_v52, %v10621_v52  ;;  %7473 = vmatprep.subr.mxu0 %v6241_v47 }
 0xbd5   :  { %7474 = vmatpush3.msra.mxu0 %v6241_v47  ;;  %v6235_v47 = vld [vmem:[%s11859_s5 + $0x48] sm:$0xff] }
 0xbd6   :  { %v10627_v33 = vsub.f32 %v10530_v31, %v3408_v57  ;;  %v3457_v8 = vsel %vm12161_vm1, %v3439_v34, 0.0 }
 0xbd7   :  { %v3369_v20 = vpop.xlane.xlu0 %3368  ;;  %3458 = vadd.xlane.f32.xlu0 %v3457_v8  ;;  %v6240_v8 = vld [vmem:[%s11859_s5 + $0x70] sm:$0xff] }
 0xbd8   :  { %v3409_v17 = vmul.f32 0.015625, %v3369_v20  ;;  %v3440_v5 = vmul.f32 %v10627_v33, %v10627_v33  ;;  %7475 = vmatprep.subr.mxu0 %v6240_v8 }
 0xbd9   :  { %7476 = vmatpush3.msra.mxu0 %v6240_v8 }
 0xbda   :  { %v10633_v18 = vsub.f32 %v10536_v61, %v3409_v17  ;;  %v3460_v50 = vsel %vm12223_vm2, %v3440_v5, 0.0  ;;  %vm12225_vm2 = vmmov %vm12161_vm1  ;;  %v6263_v5 = vld [vmem:[%s11860_s6 + $0x68] sm:$0xff] }
 0xbdb   :  { %3461 = vadd.xlane.f32.xlu1 %v3460_v50  ;;  %v3372_v60 = vpop.xlane.xlu1 %3371  ;;  %v6239_v50 = vld [vmem:[%s11859_s5 + $0x68] sm:$0xff]  ;;  %7517 = vmatprep.subr.mxu1 %v6263_v5 }
 0xbdc   :  { %v3410_v55 = vmul.f32 0.015625, %v3372_v60  ;;  %v3441_v19 = vmul.f32 %v10633_v18, %v10633_v18  ;;  %7477 = vmatprep.subr.mxu0 %v6239_v50  ;;  %7518 = vmatpush3.msra.mxu1 %v6263_v5  ;;  %v6258_v5 = vld [vmem:[%s11860_s6 + $0x40] sm:$0xff] }
 0xbdd   :  { %7478 = vmatpush3.msra.mxu0 %v6239_v50 }
 0xbde   :  { %v10639_v45 = vsub.f32 %v10542_v42, %v3410_v55  ;;  %v3463_v32 = vsel %vm12224_vm5, %v3441_v19, 0.0  ;;  %vm12226_vm5 = vmmov %vm12161_vm1 }
 0xbdf   :  { %v3375_v4 = vpop.xlane.xlu0 %3374  ;;  %3464 = vadd.xlane.f32.xlu0 %v3463_v32  ;;  %v6262_v32 = vld [vmem:[%s11860_s6 + $0x60] sm:$0xff] }
 0xbe0   :  { %v3411_v28 = vmul.f32 0.015625, %v3375_v4  ;;  %v3442_v10 = vmul.f32 %v10639_v45, %v10639_v45  ;;  %v6238_v4 = vld [vmem:[%s11859_s5 + $0x60] sm:$0xff]  ;;  %7519 = vmatprep.subr.mxu1 %v6262_v32 }
 0xbe1   :  { %7520 = vmatpush3.msra.mxu1 %v6262_v32  ;;  %7479 = vmatprep.subr.mxu0 %v6238_v4 }
 0xbe2   :  { %v10648_v43 = vsub.f32 %v10548_v58, %v3411_v28  ;;  %v3466_v38 = vsel %vm12161_vm1, %v3442_v10, 0.0  ;;  %7480 = vmatpush3.msra.mxu0 %v6238_v4 }
 0xbe3   :  { %3467 = vadd.xlane.f32.xlu1 %v3466_v38  ;;  %v3378_v3 = vpop.xlane.xlu1 %3377  ;;  %v6261_v38 = vld [vmem:[%s11860_s6 + $0x58] sm:$0xff]  ;;  %7481 = vmatprep.subr.mxu0 %v6237_v14 }
 0xbe4   :  { %v3412_v36 = vmul.f32 0.015625, %v3378_v3  ;;  %v3443_v39 = vmul.f32 %v10648_v43, %v10648_v43  ;;  %7521 = vmatprep.subr.mxu1 %v6261_v38  ;;  %7482 = vmatpush3.msra.mxu0 %v6237_v14 }
 0xbe5   :  { %7522 = vmatpush3.msra.mxu1 %v6261_v38 }
 0xbe6   :  { %v10654_v9 = vsub.f32 %v10554_v53, %v3412_v36  ;;  %v3469_v26 = vsel %vm12225_vm2, %v3443_v39, 0.0  ;;  %vm12227_vm2 = vmmov %vm12161_vm1 }
 0xbe7   :  { %v3381_v29 = vpop.xlane.xlu0 %3380  ;;  %3470 = vadd.xlane.f32.xlu0 %v3469_v26  ;;  %v6236_v26 = vld [vmem:[%s11859_s5 + $0x50] sm:$0xff] }
 0xbe8   :  { %v3413_v62 = vmul.f32 0.015625, %v3381_v29  ;;  %v3444_v51 = vmul.f32 %v10654_v9, %v10654_v9  ;;  %v6260_v29 = vld [vmem:[%s11860_s6 + $0x50] sm:$0xff]  ;;  %7483 = vmatprep.subr.mxu0 %v6236_v26 }
 0xbe9   :  { %7523 = vmatprep.subr.mxu1 %v6260_v29  ;;  %7484 = vmatpush3.msra.mxu0 %v6236_v26 }
 0xbea   :  { %v10663_v63 = vsub.f32 %v10560_v21, %v3413_v62  ;;  %v3472_v57 = vsel %vm12226_vm5, %v3444_v51, 0.0  ;;  %vm12228_vm5 = vmmov %vm12161_vm1  ;;  %7524 = vmatpush3.msra.mxu1 %v6260_v29  ;;  %7485 = vmatprep.subr.mxu0 %v6235_v47 }
 0xbeb   :  { %3473 = vadd.xlane.f32.xlu1 %v3472_v57  ;;  %v3384_v34 = vpop.xlane.xlu1 %3383  ;;  %v6259_v57 = vld [vmem:[%s11860_s6 + $0x48] sm:$0xff]  ;;  %7486 = vmatpush3.msra.mxu0 %v6235_v47 }
 0xbec   :  { %v3414_v20 = vmul.f32 0.015625, %v3384_v34  ;;  %v3445_v17 = vmul.f32 %v10663_v63, %v10663_v63  ;;  %7525 = vmatprep.subr.mxu1 %v6259_v57 }
 0xbed   :  { %7526 = vmatpush3.msra.mxu1 %v6259_v57 }
 0xbee   :  { %v10678_v60 = vsub.f32 %v10566_v7, %v3414_v20  ;;  %v3475_v55 = vsel %vm12161_vm1, %v3445_v17, 0.0  ;;  %v6234_v17 = vld [vmem:[%s11859_s5 + $0x40] sm:$0xff]  ;;  %7527 = vmatprep.subr.mxu1 %v6258_v5 }
 0xbef   :  { %v3387_v19 = vpop.xlane.xlu0 %3386  ;;  %3476 = vadd.xlane.f32.xlu0 %v3475_v55  ;;  %7487 = vmatprep.subr.mxu0 %v6234_v17 }
 0xbf0   :  { %v3415_v28 = vmul.f32 0.015625, %v3387_v19  ;;  %v3446_v10 = vmul.f32 %v10678_v60, %v10678_v60  ;;  %7488 = vmatpush3.msra.mxu0 %v6234_v17  ;;  %7528 = vmatpush3.msra.mxu1 %v6258_v5 }
 0xbf2   :  { %v10696_v3 = vsub.f32 %v10572_v15, %v3415_v28  ;;  %v3478_v36 = vsel %vm12227_vm2, %v3446_v10, 0.0  ;;  %vm12229_vm2 = vmmov %vm12161_vm1 }
 0xbf3   :  { %3479 = vadd.xlane.f32.xlu1 %v3478_v36  ;;  %v3390_v39 = vpop.xlane.xlu1 %3389 }
 0xbf4   :  { %v3416_v62 = vmul.f32 0.015625, %v3390_v39  ;;  %v3447_v51 = vmul.f32 %v10696_v3, %v10696_v3 }
 0xbf6   :  { %v10714_v34 = vsub.f32 %v10578_v1, %v3416_v62  ;;  %v3481_v8 = vsel %vm12228_vm5, %v3447_v51, 0.0  ;;  %vm12230_vm5 = vmmov %vm12161_vm1 }
 0xbf7   :  { %v3393_v20 = vpop.xlane.xlu0 %3392  ;;  %3482 = vadd.xlane.f32.xlu0 %v3481_v8 }
 0xbf8   :  { %v3417_v50 = vmul.f32 0.015625, %v3393_v20  ;;  %v3448_v55 = vmul.f32 %v10714_v34, %v10714_v34 }
 0xbfa   :  { %v10726_v19 = vsub.f32 %v10584_v48, %v3417_v50  ;;  %v3484_v32 = vsel %vm12161_vm1, %v3448_v55, 0.0 }
 0xbfb   :  { %3485 = vadd.xlane.f32.xlu1 %v3484_v32  ;;  %v3396_v4 = vpop.xlane.xlu1 %3395 }
 0xbfc   :  { %v3418_v28 = vmul.f32 0.015625, %v3396_v4  ;;  %v3449_v10 = vmul.f32 %v10726_v19, %v10726_v19 }
 0xbfe   :  { %v10732_v14 = vsub.f32 %v10590_v54, %v3418_v28  ;;  %v3487_v38 = vsel %vm12229_vm2, %v3449_v10, 0.0  ;;  %vm12231_vm2 = vmmov %vm12161_vm1  ;;  %v6289_v10 = vld [vmem:[%s11861_s7 + $0x78] sm:$0xff] }
 0xbff   :  { %v3399_v36 = vpop.xlane.xlu0 %3398  ;;  %3488 = vadd.xlane.f32.xlu0 %v3487_v38  ;;  %7553 = vmatprep.subr.mxu0 %v6289_v10 }
 0xc00   :  { %v3419_v39 = vmul.f32 0.015625, %v3399_v36  ;;  %v3450_v26 = vmul.f32 %v10732_v14, %v10732_v14 }
 0xc02   :  { %v10738_v29 = vsub.f32 %v10596_v46, %v3419_v39  ;;  %v3490_v62 = vsel %vm12230_vm5, %v3450_v26, 0.0  ;;  %vm12232_vm5 = vmmov %vm12161_vm1 }
 0xc03   :  { %3491 = vadd.xlane.f32.xlu1 %v3490_v62  ;;  %v3402_v51 = vpop.xlane.xlu1 %3401 }
 0xc04   :  { %v3420_v47 = vmul.f32 0.015625, %v3402_v51  ;;  %v3451_v57 = vmul.f32 %v10738_v29, %v10738_v29 }
 0xc06   :  { %v10744_v8 = vsub.f32 %v10602_v6, %v3420_v47  ;;  %v3493_v20 = vsel %vm12161_vm1, %v3451_v57, 0.0 }
 0xc07   :  { %3494 = vadd.xlane.f32.xlu0 %v3493_v20  ;;  %v3405_v17 = vpop.xlane.xlu0 %3404 }
 0xc08   :  { %v3421_v5 = vmul.f32 0.015625, %v3405_v17  ;;  %v3452_v50 = vmul.f32 %v10744_v8, %v10744_v8 }
 0xc0a   :  { %v10750_v55 = vsub.f32 %v10608_v41, %v3421_v5  ;;  %v3496_v32 = vsel %vm12231_vm2, %v3452_v50, 0.0  ;;  %vm12233_vm2 = vmmov %vm12161_vm1 }
 0xc0b   :  { %3497 = vadd.xlane.f32.xlu1 %v3496_v32 }
 0xc0c   :  { %v3453_v4 = vmul.f32 %v10750_v55, %v10750_v55 }
 0xc0e   :  { %v3499_v28 = vsel %vm12232_vm5, %v3453_v4, 0.0  ;;  %vm12234_vm5 = vmmov %vm12161_vm1 }
 0xc0f   :  { %3500 = vadd.xlane.f32.xlu0 %v3499_v28 }
 0xc5c   :  { %v3456_v38 = vpop.xlane.xlu1 %3455 }
 0xc5d   :  { %v3502_v36 = vmul.f32 0.015625, %v3456_v38  ;;  %v10762_v38 = vld [vmem:[%s12006_s16 + $0x1] ss:$0 sm:$0xff] }
 0xc5f   :  { %v3518_v39 = vadd.f32 1e-05, %v3502_v36 }
 0xc60   :  { %v3459_v26 = vpop.xlane.xlu0 %3458 }
 0xc61   :  { %8000 = vrsqrt.f32 %v3518_v39  ;;  %v3503_v62 = vmul.f32 0.015625, %v3459_v26 }
 0xc63   :  { %v3519_v51 = vadd.f32 1e-05, %v3503_v62  ;;  %v10768_v62 = vld [vmem:[%s12007_s27 + $0x1] ss:$0 sm:$0xff] }
 0xc64   :  { %v3462_v47 = vpop.xlane.xlu1 %3461 }
 0xc65   :  { %8002 = vrsqrt.f32 %v3519_v51  ;;  %v3504_v57 = vmul.f32 0.015625, %v3462_v47 }
 0xc67   :  { %v3520_v20 = vadd.f32 1e-05, %v3504_v57 }
 0xc68   :  { %v3465_v17 = vpop.xlane.xlu0 %3464 }
 0xc69   :  { %8004 = vrsqrt.f32 %v3520_v20  ;;  %v3505_v5 = vmul.f32 0.015625, %v3465_v17 }
 0xc6b   :  { %v3521_v50 = vadd.f32 1e-05, %v3505_v5 }
 0xc6c   :  { %v3468_v32 = vpop.xlane.xlu1 %3467 }
 0xc6d   :  { %8006 = vrsqrt.f32 %v3521_v50  ;;  %v3506_v4 = vmul.f32 0.015625, %v3468_v32 }
 0xc6e   :  { %v8001_v28 = vpop.eup %8000 }
 0xc6f   :  { %v3522_v36 = vadd.f32 1e-05, %v3506_v4  ;;  %v3550_v39 = vmul.f32 %v8001_v28, %v10616_v25 }
 0xc70   :  { %v3471_v26 = vpop.xlane.xlu0 %3470 }
 0xc71   :  { %8008 = vrsqrt.f32 %v3522_v36  ;;  %v3507_v51 = vmul.f32 0.015625, %v3471_v26  ;;  %v3572_v47 = vmul.f32 %v10762_v38, %v3550_v39  ;;  %v6288_v26 = vld [vmem:[%s11861_s7 + $0x70] sm:$0xff] }
 0xc72   :  { %v8003_v57 = vpop.eup %8002 }
 0xc73   :  { %v3551_v20 = vmul.f32 %v8003_v57, %v10621_v52  ;;  %v3523_v17 = vadd.f32 1e-05, %v3507_v51  ;;  %v10773_v5 = vadd.f32 %v10768_v62, %v3572_v47 }
 0xc74   :  { %v3474_v50 = vpop.xlane.xlu1 %3473 }
 0xc75   :  { %v3573_v25 = vmul.f32 %v10762_v38, %v3551_v20  ;;  %8010 = vrsqrt.f32 %v3523_v17  ;;  %v3508_v32 = vmul.f32 0.015625, %v3474_v50  ;;  %7489 = vmatprep.mubr.msk.f32.mxu0 %vm12161_vm1, %v10773_v5  ;;  %7529 = vmatprep.mubr.msk.f32.mxu1 %vm12233_vm2, %v10773_v5  ;;  %v6287_v50 = vld [vmem:[%s11861_s7 + $0x68] sm:$0xff]  ;;  %vm12235_vm2 = vmmov %vm12161_vm1 }
 0xc76   :  { %v8005_v4 = vpop.eup %8004 }
 0xc77   :  { %v3524_v28 = vadd.f32 1e-05, %v3508_v32  ;;  %v10781_v36 = vadd.f32 %v10768_v62, %v3573_v25  ;;  %v3552_v52 = vmul.f32 %v8005_v4, %v10627_v33 }
 0xc78   :  { %v3477_v39 = vpop.xlane.xlu0 %3476 }
 0xc79   :  { %8012 = vrsqrt.f32 %v3524_v28  ;;  %v3509_v51 = vmul.f32 0.015625, %v3477_v39  ;;  %7490 = vmatmul.mubr.msk.f32.vlgmr.msra.gmra.mxu0 %vm12234_vm5, %v10781_v36  ;;  %7530 = vmatmul.mubr.msk.f32.vlgmr.msra.gmra.mxu1 %vm12161_vm1, %v10781_v36  ;;  %v3574_v47 = vmul.f32 %v10762_v38, %v3552_v52  ;;  %vm12236_vm5 = vmmov %vm12161_vm1 }
 0xc7a   :  { %v8007_v57 = vpop.eup %8006  ;;  %7554 = vmatpush3.msra.mxu0 %v6289_v10 }
 0xc7b   :  { %v3525_v20 = vadd.f32 1e-05, %v3509_v51  ;;  %v10793_v33 = vadd.f32 %v10768_v62, %v3574_v47  ;;  %v3553_v17 = vmul.f32 %v8007_v57, %v10633_v18  ;;  %7555 = vmatprep.subr.mxu0 %v6288_v26  ;;  %v6286_v18 = vld [vmem:[%s11861_s7 + $0x60] sm:$0xff]  ;;  %v6285_v51 = vld [vmem:[%s11861_s7 + $0x58] sm:$0xff] }
 0xc7c   :  { %v3480_v25 = vpop.xlane.xlu1 %3479  ;;  %7556 = vmatpush3.msra.mxu0 %v6288_v26 }
 0xc7d   :  { %8014 = vrsqrt.f32 %v3525_v20  ;;  %v3510_v32 = vmul.f32 0.015625, %v3480_v25  ;;  %7492 = vmatprep.mubr.msk.f32.mxu0 %vm12235_vm2, %v10793_v33  ;;  %7532 = vmatprep.mubr.msk.f32.mxu1 %vm12236_vm5, %v10793_v33  ;;  %v3575_v10 = vmul.f32 %v10762_v38, %v3553_v17  ;;  %vm12237_vm2 = vmmov %vm12161_vm1  ;;  %v6284_v25 = vld [vmem:[%s11861_s7 + $0x50] sm:$0xff] }
 0xc7e   :  { %v8009_v4 = vpop.eup %8008  ;;  %7557 = vmatprep.subr.mxu0 %v6287_v50  ;;  %vm12238_vm5 = vmmov %vm12161_vm1 }
 0xc7f   :  { %v3526_v28 = vadd.f32 1e-05, %v3510_v32  ;;  %v10808_v52 = vadd.f32 %v10768_v62, %v3575_v10  ;;  %v3554_v39 = vmul.f32 %v8009_v4, %v10639_v45  ;;  %7558 = vmatpush3.msra.mxu0 %v6287_v50 }
 0xc80   :  { %v3483_v26 = vpop.xlane.xlu0 %3482  ;;  %7559 = vmatprep.subr.mxu0 %v6286_v18 }
 0xc81   :  { %8016 = vrsqrt.f32 %v3526_v28  ;;  %v3511_v47 = vmul.f32 0.015625, %v3483_v26  ;;  %7493 = vmatmul.mubr.msk.f32.gmra.mxu0 %vm12161_vm1, %v10808_v52  ;;  %7533 = vmatmul.mubr.msk.f32.gmra.mxu1 %vm12237_vm2, %v10808_v52  ;;  %v3576_v57 = vmul.f32 %v10762_v38, %v3554_v39  ;;  %vm12239_vm2 = vmmov %vm12161_vm1 }
 0xc82   :  { %v8011_v20 = vpop.eup %8010  ;;  %7560 = vmatpush3.msra.mxu0 %v6286_v18 }
 0xc83   :  { %v3527_v45 = vadd.f32 1e-05, %v3511_v47  ;;  %v10820_v17 = vadd.f32 %v10768_v62, %v3576_v57  ;;  %v3555_v50 = vmul.f32 %v8011_v20, %v10648_v43  ;;  %7561 = vmatprep.subr.mxu0 %v6285_v51  ;;  %v6283_v43 = vld [vmem:[%s11861_s7 + $0x48] sm:$0xff]  ;;  %v6282_v47 = vld [vmem:[%s11861_s7 + $0x40] sm:$0xff] }
 0xc84   :  { %v3486_v32 = vpop.xlane.xlu1 %3485  ;;  %7562 = vmatpush3.msra.mxu0 %v6285_v51 }
 0xc85   :  { %8018 = vrsqrt.f32 %v3527_v45  ;;  %v3512_v10 = vmul.f32 0.015625, %v3486_v32  ;;  %7495 = vmatprep.mubr.msk.f32.mxu0 %vm12238_vm5, %v10820_v17  ;;  %7535 = vmatprep.mubr.msk.f32.mxu1 %vm12161_vm1, %v10820_v17  ;;  %v3577_v18 = vmul.f32 %v10762_v38, %v3555_v50  ;;  %vm12240_vm5 = vmmov %vm12161_vm1 }
 0xc86   :  { %v8013_v4 = vpop.eup %8012  ;;  %7563 = vmatprep.subr.mxu0 %v6284_v25 }
 0xc87   :  { %v3528_v28 = vadd.f32 1e-05, %v3512_v10  ;;  %v10835_v39 = vadd.f32 %v10768_v62, %v3577_v18  ;;  %v3556_v26 = vmul.f32 %v8013_v4, %v10654_v9  ;;  %7564 = vmatpush3.msra.mxu0 %v6284_v25 }
 0xc88   :  { %v3489_v51 = vpop.xlane.xlu0 %3488  ;;  %7565 = vmatprep.subr.mxu0 %v6283_v43 }
 0xc89   :  { %8020 = vrsqrt.f32 %v3528_v28  ;;  %v3513_v57 = vmul.f32 0.015625, %v3489_v51  ;;  %7496 = vmatmul.mubr.msk.f32.gmra.mxu0 %vm12239_vm2, %v10835_v39  ;;  %7536 = vmatmul.mubr.msk.f32.gmra.mxu1 %vm12240_vm5, %v10835_v39  ;;  %v3578_v20 = vmul.f32 %v10762_v38, %v3556_v26  ;;  %vm12241_vm2 = vmmov %vm12161_vm1 }
 0xc8a   :  { %v8015_v45 = vpop.eup %8014  ;;  %7566 = vmatpush3.msra.mxu0 %v6283_v43  ;;  %vm12242_vm5 = vmmov %vm12161_vm1 }
 0xc8b   :  { %v3529_v9 = vadd.f32 1e-05, %v3513_v57  ;;  %v10847_v50 = vadd.f32 %v10768_v62, %v3578_v20  ;;  %v3557_v25 = vmul.f32 %v8015_v45, %v10663_v63  ;;  %7567 = vmatprep.subr.mxu0 %v6282_v47 }
 0xc8c   :  { %v3492_v32 = vpop.xlane.xlu1 %3491  ;;  %7568 = vmatpush3.msra.mxu0 %v6282_v47 }
 0xc8d   :  { %8022 = vrsqrt.f32 %v3529_v9  ;;  %v3514_v10 = vmul.f32 0.015625, %v3492_v32  ;;  %7498 = vmatprep.mubr.msk.f32.mxu0 %vm12161_vm1, %v10847_v50  ;;  %7538 = vmatprep.mubr.msk.f32.mxu1 %vm12241_vm2, %v10847_v50  ;;  %v3579_v18 = vmul.f32 %v10762_v38, %v3557_v25  ;;  %vm12243_vm2 = vmmov %vm12161_vm1 }
 0xc8e   :  { %v8017_v43 = vpop.eup %8016 }
 0xc8f   :  { %v3530_v4 = vadd.f32 1e-05, %v3514_v10  ;;  %v10856_v28 = vadd.f32 %v10768_v62, %v3579_v18  ;;  %v3558_v63 = vmul.f32 %v8017_v43, %v10678_v60 }
 0xc90   :  { %v3495_v26 = vpop.xlane.xlu0 %3494 }
 0xc91   :  { %8024 = vrsqrt.f32 %v3530_v4  ;;  %v3515_v51 = vmul.f32 0.015625, %v3495_v26  ;;  %7499 = vmatmul.mubr.msk.f32.gmra.mxu0 %vm12242_vm5, %v10856_v28  ;;  %7539 = vmatmul.mubr.msk.f32.gmra.mxu1 %vm12161_vm1, %v10856_v28  ;;  %v3580_v47 = vmul.f32 %v10762_v38, %v3558_v63  ;;  %vm12245_vm5 = vmmov %vm12161_vm1 }
 0xc92   :  { %v8019_v57 = vpop.eup %8018 }
 0xc93   :  { %v3559_v20 = vmul.f32 %v8019_v57, %v10696_v3  ;;  %v3531_v45 = vadd.f32 1e-05, %v3515_v51  ;;  %v3602_v9 = vadd.f32 %v10768_v62, %v3580_v47 }
 0xc94   :  { %v3498_v25 = vpop.xlane.xlu1 %3497 }
 0xc95   :  { %8026 = vrsqrt.f32 %v3531_v45  ;;  %v3516_v60 = vmul.f32 0.015625, %v3498_v25  ;;  %7501 = vmatprep.mubr.msk.f32.mxu0 %vm12243_vm2, %v3602_v9  ;;  %7541 = vmatprep.mubr.msk.f32.mxu1 %vm12244_vm4, %v3602_v9  ;;  %v3581_v32 = vmul.f32 %v10762_v38, %v3559_v20  ;;  %vm12246_vm4 = vmmov %vm12161_vm1 }
 0xc96   :  { %v8021_v10 = vpop.eup %8020  ;;  %vm12247_vm2 = vmmov %vm12161_vm1 }
 0xc97   :  { %v3532_v18 = vadd.f32 1e-05, %v3516_v60  ;;  %v3603_v43 = vadd.f32 %v10768_v62, %v3581_v32  ;;  %v3560_v4 = vmul.f32 %v8021_v10, %v10714_v34 }
 0xc98   :  { %v3501_v63 = vpop.xlane.xlu0 %3500 }
 0xc99   :  { %8028 = vrsqrt.f32 %v3532_v18  ;;  %v3517_v3 = vmul.f32 0.015625, %v3501_v63  ;;  %7502 = vmatmul.mubr.msk.f32.gmra.mxu0 %vm12245_vm5, %v3603_v43  ;;  %7542 = vmatmul.mubr.msk.f32.gmra.mxu1 %vm12161_vm1, %v3603_v43  ;;  %v3582_v26 = vmul.f32 %v10762_v38, %v3560_v4  ;;  %vm12248_vm5 = vmmov %vm12161_vm1 }
 0xc9a   :  { %v8023_v51 = vpop.eup %8022 }
 0xc9b   :  { %v3561_v47 = vmul.f32 %v8023_v51, %v10726_v19  ;;  %v3533_v57 = vadd.f32 1e-05, %v3517_v3  ;;  %v3604_v20 = vadd.f32 %v10768_v62, %v3582_v26 }
 0xc9d   :  { %8030 = vrsqrt.f32 %v3533_v57  ;;  %7504 = vmatprep.mubr.msk.f32.mxu0 %vm12246_vm4, %v3604_v20  ;;  %7544 = vmatprep.mubr.msk.f32.mxu1 %vm12247_vm2, %v3604_v20  ;;  %v3583_v34 = vmul.f32 %v10762_v38, %v3561_v47  ;;  %vm12249_vm4 = vmmov %vm12161_vm1 }
 0xc9e   :  { %v8025_v45 = vpop.eup %8024  ;;  %vm12250_vm2 = vmmov %vm12161_vm1 }
 0xc9f   :  { %v3605_v25 = vadd.f32 %v10768_v62, %v3583_v34  ;;  %v3562_v60 = vmul.f32 %v8025_v45, %v10732_v14 }
 0xca1   :  { %7505 = vmatmul.mubr.msk.f32.gmra.mxu0 %vm12248_vm5, %v3605_v25  ;;  %7545 = vmatmul.mubr.msk.f32.gmra.mxu1 %vm12161_vm1, %v3605_v25  ;;  %v3584_v19 = vmul.f32 %v10762_v38, %v3562_v60  ;;  %vm12251_vm5 = vmmov %vm12161_vm1 }
 0xca2   :  { %v8027_v32 = vpop.eup %8026 }
 0xca3   :  { %v3563_v10 = vmul.f32 %v8027_v32, %v10738_v29  ;;  %v3606_v18 = vadd.f32 %v10768_v62, %v3584_v19 }
 0xca5   :  { %7507 = vmatprep.mubr.msk.f32.mxu0 %vm12249_vm4, %v3606_v18  ;;  %7547 = vmatprep.mubr.msk.f32.mxu1 %vm12250_vm2, %v3606_v18  ;;  %v3585_v4 = vmul.f32 %v10762_v38, %v3563_v10  ;;  %vm12252_vm4 = vmmov %vm12161_vm1 }
 0xca6   :  { %v8029_v63 = vpop.eup %8028  ;;  %vm12253_vm2 = vmmov %vm12161_vm1 }
 0xca7   :  { %v3607_v14 = vadd.f32 %v10768_v62, %v3585_v4  ;;  %v3564_v3 = vmul.f32 %v8029_v63, %v10744_v8 }
 0xca9   :  { %7508 = vmatmul.mubr.msk.f32.gmra.mxu0 %vm12251_vm5, %v3607_v14  ;;  %7548 = vmatmul.mubr.msk.f32.gmra.mxu1 %vm12161_vm1, %v3607_v14  ;;  %v3586_v26 = vmul.f32 %v10762_v38, %v3564_v3  ;;  %vm12255_vm5 = vmmov %vm12161_vm1 }
 0xcaa   :  { %v8031_v29 = vpop.eup %8030 }
 0xcab   :  { %v3565_v51 = vmul.f32 %v8031_v29, %v10750_v55  ;;  %v3608_v47 = vadd.f32 %v10768_v62, %v3586_v26 }
 0xcad   :  { %7510 = vmatprep.mubr.msk.f32.mxu0 %vm12252_vm4, %v3608_v47  ;;  %7550 = vmatprep.mubr.msk.f32.mxu1 %vm12253_vm2, %v3608_v47  ;;  %v3587_v57 = vmul.f32 %v10762_v38, %v3565_v51  ;;  %vm12258_vm4 = vmmov %vm12256_vm0 }
 0xcae   :  { %vm12259_vm2 = vmmov %vm12256_vm0 }
 0xcaf   :  { %v3609_v34 = vadd.f32 %v10768_v62, %v3587_v57 }
 0xcb1   :  { %7511 = vmatmul.mubr.msk.f32.gmra.mxu0 %vm12254_vm3, %v3609_v34  ;;  %7551 = vmatmul.mubr.msk.f32.gmra.mxu1 %vm12255_vm5, %v3609_v34  ;;  %vm12261_vm3 = vmmov %vm12256_vm0 }
 0xcb2   :  { %7569 = vmatprep.mubr.msk.f32.mxu0 %vm12161_vm1, %v10773_v5  ;;  %vm12262_vm5 = vmmov %vm12256_vm0 }
 0xcb3   :  { %vm12263_vm1 = vmmov %vm12256_vm0 }
 0xcb5   :  { %7570 = vmatmul.mubr.msk.f32.vlgmr.msra.gmra.mxu0 %vm12256_vm0, %v10781_v36 }
 0xcb6   :  { %7572 = vmatprep.mubr.msk.f32.mxu0 %vm12257_vm15, %v10793_v33  ;;  %vm12264_vm15 = vmmov %vm12256_vm0 }
 0xcb9   :  { %7573 = vmatmul.mubr.msk.f32.gmra.mxu0 %vm12258_vm4, %v10808_v52  ;;  %vm12266_vm4 = vmmov %vm12256_vm0 }
 0xcba   :  { %7575 = vmatprep.mubr.msk.f32.mxu0 %vm12259_vm2, %v10820_v17  ;;  %vm12267_vm2 = vmmov %vm12256_vm0 }
 0xcbd   :  { %7576 = vmatmul.mubr.msk.f32.gmra.mxu0 %vm12260_vm14, %v10835_v39  ;;  %vm12269_vm14 = vmmov %vm12256_vm0 }
 0xcbe   :  { %7578 = vmatprep.mubr.msk.f32.mxu0 %vm12261_vm3, %v10847_v50  ;;  %vm12270_vm3 = vmmov %vm12256_vm0 }
 0xcc1   :  { %7579 = vmatmul.mubr.msk.f32.gmra.mxu0 %vm12262_vm5, %v10856_v28  ;;  %vm12273_vm5 = vmmov %vm12256_vm0 }
 0xcc2   :  { %7581 = vmatprep.mubr.msk.f32.mxu0 %vm12263_vm1, %v3602_v9  ;;  %vm12274_vm1 = vmmov %vm12256_vm0 }
 0xcc5   :  { %7582 = vmatmul.mubr.msk.f32.gmra.mxu0 %vm12256_vm0, %v3603_v43 }
 0xcc6   :  { %7584 = vmatprep.mubr.msk.f32.mxu0 %vm12264_vm15, %v3604_v20  ;;  %vm12275_vm15 = vmmov %vm12256_vm0 }
 0xcc9   :  { %7585 = vmatmul.mubr.msk.f32.gmra.mxu0 %vm12265_vm13, %v3605_v25  ;;  %vm12272_vm13 = vmmov %vm12256_vm0 }
 0xcca   :  { %7587 = vmatprep.mubr.msk.f32.mxu0 %vm12266_vm4, %v3606_v18  ;;  %vm12276_vm4 = vmmov %vm12256_vm0 }
 0xccd   :  { %7588 = vmatmul.mubr.msk.f32.gmra.mxu0 %vm12267_vm2, %v3607_v14  ;;  %vm12277_vm2 = vmmov %vm12256_vm0 }
 0xcce   :  { %7590 = vmatprep.mubr.msk.f32.mxu0 %vm12268_vm12, %v3608_v47  ;;  %vm12271_vm12 = vmmov %vm12256_vm0 }
 0xcd1   :  { %7591 = vmatmul.mubr.msk.f32.gmra.mxu0 %vm12269_vm14, %v3609_v34  ;;  %vm12278_vm14 = vmmov %vm12256_vm0 }
 0xd39   :  { %v10926_v8 = vpop.f32.mrf.mxu0  ;;  %v10930_v62 = vpop.f32.mrf.mxu1 }
 0xd3b   :  { %v3733_v55 = vpop.f32.mrf.mxu0  ;;  %v10932_v5 = vpop.f32.mrf.mxu1 }
 0xd3c   :  { %v3812_v38 = vmul.f32 %v9162_v12, %v3733_v55 }
 0xd3e   :  { %7625 = vmatprep.mubr.msk.f32.mxu1 %vm12270_vm3, %v3812_v38  ;;  %vm12279_vm3 = vmmov %vm12256_vm0 }
 0xd41   :  { %v10934_v36 = vpop.f32.mrf.mxu0  ;;  %v10936_v33 = vpop.f32.mrf.mxu1 }
 0xd43   :  { %v10938_v52 = vpop.f32.mrf.mxu0  ;;  %v10940_v17 = vpop.f32.mrf.mxu1 }
 0xd49   :  { %v10942_v39 = vpop.f32.mrf.mxu0  ;;  %v10944_v50 = vpop.f32.mrf.mxu1 }
 0xd4b   :  { %v10946_v28 = vpop.f32.mrf.mxu0  ;;  %v10948_v9 = vpop.f32.mrf.mxu1 }
 0xd51   :  { %v10950_v43 = vpop.f32.mrf.mxu0  ;;  %v7540_v20 = vpop.f32.mrf.mxu1 }
 0xd53   :  { %v10952_v45 = vpop.f32.mrf.mxu0  ;;  %v3933_v25 = vpop.f32.mrf.mxu1 }
 0xd59   :  { %v10954_v60 = vpop.f32.mrf.mxu0  ;;  %v7543_v19 = vpop.f32.mrf.mxu1 }
 0xd5b   :  { %v10956_v32 = vpop.f32.mrf.mxu0  ;;  %v3943_v10 = vpop.f32.mrf.mxu1 }
 0xd61   :  { %v10958_v18 = vpop.f32.mrf.mxu0  ;;  %v7546_v4 = vpop.f32.mrf.mxu1 }
 0xd63   :  { %v10960_v63 = vpop.f32.mrf.mxu0  ;;  %v3953_v14 = vpop.f32.mrf.mxu1 }
 0xd69   :  { %v10962_v3 = vpop.f32.mrf.mxu0  ;;  %v7549_v26 = vpop.f32.mrf.mxu1 }
 0xd6b   :  { %v10964_v29 = vpop.f32.mrf.mxu0  ;;  %v3963_v51 = vpop.f32.mrf.mxu1 }
 0xd71   :  { %v10966_v47 = vpop.f32.mrf.mxu0  ;;  %v7552_v57 = vpop.f32.mrf.mxu1 }
 0xd72   :  { %7593 = vmatprep.subr.msk.mxu1 %vm12271_vm12, %v7552_v57  ;;  %vm12280_vm12 = vmmov %vm12256_vm0 }
 0xd73   :  { %v10969_v34 = vpop.f32.mrf.mxu0  ;;  %v3973_v55 = vpop.f32.mrf.mxu1  ;;  %7594 = vmatpush3.xpose.msk.msra.mxu1 %vm12272_vm13, %v7552_v57  ;;  %vm12281_vm13 = vmmov %vm12256_vm0 }
 0xd74   :  { %7595 = vmatprep.subr.msk.mxu1 %vm12273_vm5, %v3973_v55  ;;  %vm12282_vm5 = vmmov %vm12256_vm0 }
 0xd75   :  { %v10973_v38 = vpop.f32.mrf.mxu0 }
 0xd77   :  { %v10975_v13 = vpop.f32.mrf.mxu0  ;;  %7596 = vmatpush3.xpose.msk.msra.mxu1 %vm12274_vm1, %v3973_v55  ;;  %vm12283_vm1 = vmmov %vm12256_vm0 }
 0xd78   :  { %7597 = vmatprep.subr.msk.mxu1 %vm12256_vm0, %v7549_v26 }
 0xd79   :  { %v10979_v22 = vpop.f32.mrf.mxu0 }
 0xd7b   :  { %v10981_v2 = vpop.f32.mrf.mxu0  ;;  %7598 = vmatpush3.xpose.msk.msra.mxu1 %vm12275_vm15, %v7549_v26  ;;  %vm12284_vm15 = vmmov %vm12256_vm0 }
 0xd7c   :  { %7599 = vmatprep.subr.msk.mxu1 %vm12276_vm4, %v3963_v51  ;;  %vm12285_vm4 = vmmov %vm12256_vm0 }
 0xd7d   :  { %v7577_v6 = vpop.f32.mrf.mxu0 }
 0xd7f   :  { %v4077_v57 = vpop.f32.mrf.mxu0  ;;  %7600 = vmatpush3.xpose.msk.msra.mxu1 %vm12277_vm2, %v3963_v51  ;;  %vm12286_vm2 = vmmov %vm12256_vm0 }
 0xd80   :  { %7601 = vmatprep.subr.msk.mxu1 %vm12278_vm14, %v7546_v4  ;;  %vm12287_vm14 = vmmov %vm12256_vm0 }
 0xd81   :  { %v7580_v41 = vpop.f32.mrf.mxu0 }
 0xd83   :  { %v4087_v54 = vpop.f32.mrf.mxu0  ;;  %7602 = vmatpush3.xpose.msk.msra.mxu1 %vm12279_vm3, %v7546_v4  ;;  %vm12288_vm3 = vmmov %vm12256_vm0 }
 0xd84   :  { %7603 = vmatprep.subr.msk.mxu1 %vm12280_vm12, %v3953_v14  ;;  %vm12289_vm12 = vmmov %vm12256_vm0 }
 0xd85   :  { %v7583_v55 = vpop.f32.mrf.mxu0 }
 0xd87   :  { %v4097_v46 = vpop.f32.mrf.mxu0  ;;  %7604 = vmatpush3.xpose.msk.msra.mxu1 %vm12281_vm13, %v3953_v14  ;;  %vm12290_vm13 = vmmov %vm12256_vm0 }
 0xd88   :  { %7605 = vmatprep.subr.msk.mxu1 %vm12282_vm5, %v7543_v19  ;;  %vm12291_vm5 = vmmov %vm12256_vm0 }
 0xd89   :  { %v7586_v26 = vpop.f32.mrf.mxu0 }
 0xd8b   :  { %v4107_v1 = vpop.f32.mrf.mxu0  ;;  %7606 = vmatpush3.xpose.msk.msra.mxu1 %vm12283_vm1, %v7543_v19  ;;  %vm12292_vm1 = vmmov %vm12256_vm0 }
 0xd8c   :  { %7607 = vmatprep.subr.msk.mxu1 %vm12256_vm0, %v3943_v10 }
 0xd8d   :  { %v7589_v51 = vpop.f32.mrf.mxu0 }
 0xd8f   :  { %v4117_v48 = vpop.f32.mrf.mxu0  ;;  %7608 = vmatpush3.xpose.msk.msra.mxu1 %vm12284_vm15, %v3943_v10  ;;  %vm12293_vm15 = vmmov %vm12256_vm0  ;;  %v12320_v10 = vld [vmem:[#allocation41_spill] sm:$0xff] }
 0xd90   :  { %7609 = vmatprep.subr.msk.mxu1 %vm12285_vm4, %v7540_v20  ;;  %vm12294_vm4 = vmmov %vm12256_vm0 }
 0xd91   :  { %v7592_v4 = vpop.f32.mrf.mxu0 }
 0xd92   :  { %7649 = vmatprep.subr.mxu0 %v7592_v4 }
 0xd93   :  { %v4127_v7 = vpop.f32.mrf.mxu0  ;;  %7610 = vmatpush3.xpose.msk.msra.mxu1 %vm12286_vm2, %v7540_v20  ;;  %7650 = vmatpush3.msra.mxu0 %v7592_v4  ;;  %vm12295_vm2 = vmmov %vm12256_vm0 }
 0xd94   :  { %7611 = vmatprep.subr.msk.mxu1 %vm12287_vm14, %v3933_v25  ;;  %7651 = vmatprep.subr.mxu0 %v4127_v7  ;;  %vm12296_vm14 = vmmov %vm12256_vm0 }
 0xd95   :  { %7652 = vmatpush3.msra.mxu0 %v4127_v7  ;;  %v3813_v7 = vmul.f32 %v10926_v8, %v9266_v44  ;;  %v3823_v8 = vmul.f32 %v10958_v18, %v9349_v23 }
 0xd96   :  { %7653 = vmatprep.subr.mxu0 %v7589_v51 }
 0xd97   :  { %7612 = vmatpush3.xpose.msk.msra.mxu1 %vm12288_vm3, %v3933_v25  ;;  %7654 = vmatpush3.msra.mxu0 %v7589_v51  ;;  %vm12297_vm3 = vmmov %vm12256_vm0  ;;  %v12319_v25 = vld [vmem:[#allocation40_spill] sm:$0xff] }
 0xd98   :  { %7613 = vmatprep.subr.msk.mxu1 %vm12289_vm12, %v10944_v50  ;;  %7655 = vmatprep.subr.mxu0 %v4117_v48  ;;  %vm12298_vm12 = vmmov %vm12256_vm0  ;;  %v12323_v51 = vld [vmem:[#allocation44_spill] sm:$0xff] }
 0xd99   :  { %7656 = vmatpush3.msra.mxu0 %v4117_v48  ;;  %v3817_v48 = vmul.f32 %v10942_v39, %v9301_v11  ;;  %v12315_v39 = vld [vmem:[#allocation39_spill] sm:$0xff] }
 0xd9a   :  { %7657 = vmatprep.subr.mxu0 %v7586_v26 }
 0xd9b   :  { %7614 = vmatpush3.xpose.msk.msra.mxu1 %vm12290_vm13, %v10944_v50  ;;  %7658 = vmatpush3.msra.mxu0 %v7586_v26  ;;  %vm12299_vm13 = vmmov %vm12256_vm0  ;;  %v3827_v50 = vmul.f32 %v10966_v47, %v12315_v39 }
 0xd9c   :  { %7615 = vmatprep.subr.msk.mxu1 %vm12291_vm5, %v10948_v9  ;;  %7659 = vmatprep.subr.mxu0 %v4107_v1  ;;  %vm12300_vm5 = vmmov %vm12256_vm0 }
 0xd9d   :  { %7660 = vmatpush3.msra.mxu0 %v4107_v1  ;;  %v3816_v1 = vmul.f32 %v9291_v40, %v10946_v28  ;;  %v12317_v28 = vmov 1.0  }
 0xd9e   :  { %7661 = vmatprep.subr.mxu0 %v7583_v55 }
 0xd9f   :  { %7616 = vmatpush3.xpose.msk.msra.mxu1 %vm12292_vm1, %v10948_v9  ;;  %7662 = vmatpush3.msra.mxu0 %v7583_v55  ;;  %vm12301_vm1 = vmmov %vm12256_vm0 }
 0xda0   :  { %7617 = vmatprep.subr.msk.mxu1 %vm12256_vm0, %v10936_v33  ;;  %7663 = vmatprep.subr.mxu0 %v4097_v46 }
 0xda1   :  { %7664 = vmatpush3.msra.mxu0 %v4097_v46  ;;  %v3820_v46 = vmul.f32 %v9323_v37, %v10956_v32 }
 0xda2   :  { %7665 = vmatprep.subr.mxu0 %v7580_v41 }
 0xda3   :  { %7618 = vmatpush3.xpose.msk.msra.mxu1 %vm12293_vm15, %v10936_v33  ;;  %7666 = vmatpush3.msra.mxu0 %v7580_v41  ;;  %vm12302_vm15 = vmmov %vm12256_vm0  ;;  %v3822_v41 = vmul.f32 %v9339_v59, %v10960_v63 }
 0xda4   :  { %7619 = vmatprep.subr.msk.mxu1 %vm12294_vm4, %v10940_v17  ;;  %7667 = vmatprep.subr.mxu0 %v4087_v54  ;;  %vm12303_vm4 = vmmov %vm12256_vm0 }
 0xda5   :  { %7668 = vmatpush3.msra.mxu0 %v4087_v54  ;;  %v3819_v54 = vmul.f32 %v10950_v43, %v9317_v24 }
 0xda6   :  { %7669 = vmatprep.subr.mxu0 %v7577_v6 }
 0xda7   :  { %7620 = vmatpush3.xpose.msk.msra.mxu1 %vm12295_vm2, %v10940_v17  ;;  %7670 = vmatpush3.msra.mxu0 %v7577_v6  ;;  %vm12304_vm2 = vmmov %vm12256_vm0  ;;  %v3821_v6 = vmul.f32 %v10954_v60, %v9333_v27 }
 0xda8   :  { %7621 = vmatprep.subr.msk.mxu1 %vm12296_vm14, %v10930_v62  ;;  %7671 = vmatprep.subr.mxu0 %v4077_v57  ;;  %vm12305_vm14 = vmmov %vm12256_vm0 }
 0xda9   :  { %7672 = vmatpush3.msra.mxu0 %v4077_v57 }
 0xdaa   :  { %7673 = vmatprep.subr.mxu0 %v10979_v22 }
 0xdab   :  { %7622 = vmatpush3.xpose.msk.msra.mxu1 %vm12297_vm3, %v10930_v62  ;;  %7674 = vmatpush3.msra.mxu0 %v10979_v22  ;;  %v3814_v22 = vmul.f32 %v9271_v49, %v10938_v52  ;;  %vm12306_vm3 = vmmov %vm12256_vm0  ;;  %v12309_v62 = vld [vmem:[#allocation36_spill] sm:$0xff]  ;;  %v12313_v52 = vld [vmem:[#allocation38_spill] sm:$0xff] }
 0xdac   :  { %7623 = vmatprep.subr.msk.mxu1 %vm12298_vm12, %v10932_v5  ;;  %7675 = vmatprep.subr.mxu0 %v10981_v2  ;;  %vm12307_vm12 = vmmov %vm12256_vm0  ;;  %v3826_v17 = vmul.f32 %v12313_v52, %v10969_v34 }
 0xdad   :  { %7676 = vmatpush3.msra.mxu0 %v10981_v2  ;;  %v3815_v2 = vmul.f32 %v10934_v36, %v9284_v35  ;;  %v12312_v36 = vld [vmem:[#allocation37_spill] sm:$0xff] }
 0xdae   :  { %7677 = vmatprep.subr.mxu0 %v10973_v38  ;;  %v3825_v33 = vmul.f32 %v10962_v3, %v12312_v36  ;;  %v12321_v3 = vld [vmem:[#allocation42_spill] sm:$0xff] }
 0xdaf   :  { %7624 = vmatpush3.xpose.msk.msra.mxu1 %vm12299_vm13, %v10932_v5  ;;  %7678 = vmatpush3.msra.mxu0 %v10973_v38  ;;  %vm12308_vm13 = vmmov %vm12256_vm0  ;;  %v3824_v5 = vmul.f32 %v12309_v62, %v10964_v29  ;;  %v12322_v38 = vld [vmem:[#allocation43_spill] sm:$0xff] }
 0xdb0   :  { %7679 = vmatprep.subr.mxu0 %v10975_v13 }
 0xdb1   :  { %7680 = vmatpush3.msra.mxu0 %v10975_v13  ;;  %v3818_v13 = vmul.f32 %v9307_v0, %v10952_v45 }
 0xdb2   :  { %7626 = vmatmul.mubr.msk.f32.vlgmr.msra.gmra.mxu1 %vm12300_vm5, %v3813_v7  ;;  %vm12310_vm5 = vmmov %vm12256_vm0 }
 0xdb3   :  { %7628 = vmatprep.mubr.msk.f32.mxu1 %vm12301_vm1, %v3814_v22  ;;  %vm12311_vm1 = vmmov %vm12256_vm0 }
 0xdb6   :  { %7629 = vmatmul.mubr.msk.f32.gmra.mxu1 %vm12256_vm0, %v3815_v2  ;;  %v12324_v2 = vld [vmem:[#allocation45_spill] sm:$0xff] }
 0xdb7   :  { %7631 = vmatprep.mubr.msk.f32.mxu1 %vm12302_vm15, %v3816_v1  ;;  %vm12314_vm15 = vmmov %vm12256_vm0 }
 0xdba   :  { %7632 = vmatmul.mubr.msk.f32.gmra.mxu1 %vm12303_vm4, %v3817_v48  ;;  %vm12316_vm4 = vmmov %vm12256_vm0 }
 0xdbb   :  { %7634 = vmatprep.mubr.msk.f32.mxu1 %vm12304_vm2, %v3818_v13  ;;  %vm12336_vm2 = vmmov %vm12256_vm0 }
 0xdbe   :  { %7635 = vmatmul.mubr.msk.f32.gmra.mxu1 %vm12305_vm14, %v3819_v54  ;;  %v12325_v54 = vld [vmem:[#allocation46_spill] sm:$0xff]  ;;  %vm12337_vm14 = vmmov %vm12256_vm0 }
 0xdbf   :  { %7637 = vmatprep.mubr.msk.f32.mxu1 %vm12306_vm3, %v3820_v46  ;;  %vm12338_vm3 = vmmov %vm12256_vm0 }
 0xdc2   :  { %7638 = vmatmul.mubr.msk.f32.gmra.mxu1 %vm12307_vm12, %v3821_v6  ;;  %vm12339_vm12 = vmmov %vm12256_vm0 }
 0xdc3   :  { %7640 = vmatprep.mubr.msk.f32.mxu1 %vm12308_vm13, %v3822_v41  ;;  %vm12340_vm13 = vmmov %vm12256_vm0 }
 0xdc6   :  { %7641 = vmatmul.mubr.msk.f32.gmra.mxu1 %vm12310_vm5, %v3823_v8  ;;  %v12326_v8 = vld [vmem:[#allocation47_spill] sm:$0xff]  ;;  %vm12341_vm5 = vmmov %vm12256_vm0 }
 0xdc7   :  { %7643 = vmatprep.mubr.msk.f32.mxu1 %vm12311_vm1, %v3824_v5  ;;  %vm12342_vm1 = vmmov %vm12256_vm0 }
 0xdca   :  { %7644 = vmatmul.mubr.msk.f32.gmra.mxu1 %vm12256_vm0, %v3825_v33 }
 0xdcb   :  { %7646 = vmatprep.mubr.msk.f32.mxu1 %vm12314_vm15, %v3826_v17  ;;  %vm12343_vm15 = vmmov %vm12256_vm0 }
 0xdce   :  { %7647 = vmatmul.mubr.msk.f32.gmra.mxu1 %vm12316_vm4, %v3827_v50  ;;  %v12327_v50 = vld [vmem:[#allocation48_spill] sm:$0xff]  ;;  %vm12344_vm4 = vmmov %vm12256_vm0 }
 0xdcf   :  { %7777 = vmatprep.mubr.msk.f32.mxu1 %vm9903_vm6, %v12317_v28  ;;  %vm12335_vm6 = vmmov %vm12256_vm0 }
 0xe72   :  { %v7627_v43 = vpop.f32.mrf.mxu1 }
 0xe73   :  { %v4378_v20 = vmul.f32 0.125, %v7627_v43 }
 0xe74   :  { %v4298_v45 = vpop.f32.mrf.mxu1 }
 0xe75   :  { %v11079_v60 = vadd.f32 %v4378_v20, %v12319_v25  ;;  %v4377_v19 = vmul.f32 0.125, %v4298_v45  ;;  %v12328_v45 = vld [vmem:[#allocation49_spill] sm:$0xff] }
 0xe76   :  { %v7630_v32 = vpop.f32.mrf.mxu1 }
 0xe77   :  { %v11082_v18 = vadd.f32 %v4377_v19, %v12320_v10  ;;  %v4380_v63 = vmul.f32 0.125, %v7630_v32  ;;  %4411 = vmax.xlane.f32.xlu0 %v11079_v60  ;;  %v12329_v10 = vld [vmem:[#allocation50_spill] sm:$0xff] }
 0xe78   :  { %v4308_v14 = vpop.f32.mrf.mxu1 }
 0xe79   :  { %v11086_v29 = vadd.f32 %v4380_v63, %v12321_v3  ;;  %v4379_v47 = vmul.f32 0.125, %v4308_v14  ;;  %4409 = vmax.xlane.f32.xlu1 %v11082_v18 }
 0xe7a   :  { %v7633_v34 = vpop.f32.mrf.mxu1 }
 0xe7b   :  { %v11090_v57 = vadd.f32 %v4379_v47, %v12322_v38  ;;  %v4382_v55 = vmul.f32 0.125, %v7633_v34  ;;  %4415 = vmax.xlane.f32.xlu0 %v11086_v29  ;;  %v12330_v47 = vld [vmem:[#allocation51_spill] sm:$0xff] }
 0xe7c   :  { %v4318_v26 = vpop.f32.mrf.mxu1 }
 0xe7d   :  { %v11094_v4 = vadd.f32 %v4382_v55, %v12323_v51  ;;  %v4381_v7 = vmul.f32 0.125, %v4318_v26  ;;  %4413 = vmax.xlane.f32.xlu1 %v11090_v57  ;;  %v12331_v26 = vld [vmem:[#allocation52_spill] sm:$0xff] }
 0xe7e   :  { %v7636_v22 = vpop.f32.mrf.mxu1 }
 0xe7f   :  { %v11098_v1 = vadd.f32 %v4381_v7, %v12324_v2  ;;  %v4384_v48 = vmul.f32 0.125, %v7636_v22  ;;  %4419 = vmax.xlane.f32.xlu0 %v11094_v4  ;;  %v12332_v2 = vld [vmem:[#allocation53_spill] sm:$0xff] }
 0xe80   :  { %v4328_v13 = vpop.f32.mrf.mxu1 }
 0xe81   :  { %v11102_v46 = vadd.f32 %v4384_v48, %v12325_v54  ;;  %v4383_v6 = vmul.f32 0.125, %v4328_v13  ;;  %4417 = vmax.xlane.f32.xlu1 %v11098_v1 }
 0xe82   :  { %v7639_v41 = vpop.f32.mrf.mxu1 }
 0xe83   :  { %v11106_v5 = vadd.f32 %v4383_v6, %v12326_v8  ;;  %v4386_v33 = vmul.f32 0.125, %v7639_v41  ;;  %4423 = vmax.xlane.f32.xlu0 %v11102_v46  ;;  %v12333_v6 = vld [vmem:[#allocation54_spill] sm:$0xff] }
 0xe84   :  { %v4338_v17 = vpop.f32.mrf.mxu1 }
 0xe85   :  { %v11110_v9 = vadd.f32 %v4386_v33, %v12327_v50  ;;  %v4385_v43 = vmul.f32 0.125, %v4338_v17  ;;  %4421 = vmax.xlane.f32.xlu1 %v11106_v5  ;;  %v12334_v33 = vld [vmem:[#allocation55_spill] sm:$0xff] }
 0xe86   :  { %v7642_v20 = vpop.f32.mrf.mxu1 }
 0xe87   :  { %v11114_v25 = vadd.f32 %v4385_v43, %v12328_v45  ;;  %v4388_v19 = vmul.f32 0.125, %v7642_v20  ;;  %4427 = vmax.xlane.f32.xlu0 %v11110_v9 }
 0xe88   :  { %v4348_v32 = vpop.f32.mrf.mxu1 }
 0xe89   :  { %v11118_v63 = vadd.f32 %v4388_v19, %v12329_v10  ;;  %v4387_v14 = vmul.f32 0.125, %v4348_v32  ;;  %4425 = vmax.xlane.f32.xlu1 %v11114_v25 }
 0xe8a   :  { %v7645_v3 = vpop.f32.mrf.mxu1 }
 0xe8b   :  { %v11122_v34 = vadd.f32 %v4387_v14, %v12330_v47  ;;  %v4390_v38 = vmul.f32 0.125, %v7645_v3  ;;  %4431 = vmax.xlane.f32.xlu0 %v11118_v63 }
 0xe8c   :  { %v4358_v55 = vpop.f32.mrf.mxu1 }
 0xe8d   :  { %v11126_v51 = vadd.f32 %v4390_v38, %v12331_v26  ;;  %v4389_v7 = vmul.f32 0.125, %v4358_v55  ;;  %4429 = vmax.xlane.f32.xlu1 %v11122_v34 }
 0xe8e   :  { %v7648_v22 = vpop.f32.mrf.mxu1 }
 0xe8f   :  { %v11130_v48 = vadd.f32 %v4389_v7, %v12332_v2  ;;  %v4392_v13 = vmul.f32 0.125, %v7648_v22  ;;  %4435 = vmax.xlane.f32.xlu0 %v11126_v51 }
 0xe90   :  { %v4368_v54 = vpop.f32.mrf.mxu1 }
 0xe91   :  { %v11134_v41 = vadd.f32 %v4392_v13, %v12333_v6  ;;  %v4391_v8 = vmul.f32 0.125, %v4368_v54  ;;  %4433 = vmax.xlane.f32.xlu1 %v11130_v48 }
 0xe93   :  { %v11138_v17 = vadd.f32 %v4391_v8, %v12334_v33  ;;  %4439 = vmax.xlane.f32.xlu0 %v11134_v41 }
 0xe95   :  { %4437 = vmax.xlane.f32.xlu1 %v11138_v17 }
 0xf00   :  { %v4412_v50 = vpop.xlane.xlu0 %4411 }
 0xf01   :  { %v4442_v43 = vsub.f32 %v11079_v60, %v4412_v50 }
 0xf02   :  { %v4410_v20 = vpop.xlane.xlu1 %4409 }
 0xf03   :  { %v4459_v45 = vmul.f32 1.442695, %v4442_v43  ;;  %v4441_v19 = vsub.f32 %v11082_v18, %v4410_v20 }
 0xf04   :  { %v4416_v32 = vpop.xlane.xlu0 %4415 }
 0xf05   :  { %8032 = vpow2.f32 %v4459_v45  ;;  %v4457_v10 = vmul.f32 1.442695, %v4441_v19  ;;  %v4444_v14 = vsub.f32 %v11086_v29, %v4416_v32 }
 0xf06   :  { %v4414_v3 = vpop.xlane.xlu1 %4413 }
 0xf07   :  { %8034 = vpow2.f32 %v4457_v10  ;;  %v4463_v47 = vmul.f32 1.442695, %v4444_v14  ;;  %v4443_v38 = vsub.f32 %v11090_v57, %v4414_v3 }
 0xf08   :  { %v4420_v55 = vpop.xlane.xlu0 %4419 }
 0xf09   :  { %8036 = vpow2.f32 %v4463_v47  ;;  %v4461_v26 = vmul.f32 1.442695, %v4443_v38  ;;  %v4446_v7 = vsub.f32 %v11094_v4, %v4420_v55 }
 0xf0a   :  { %v4418_v60 = vpop.xlane.xlu1 %4417 }
 0xf0b   :  { %8038 = vpow2.f32 %v4461_v26  ;;  %v4467_v22 = vmul.f32 1.442695, %v4446_v7  ;;  %v4445_v18 = vsub.f32 %v11098_v1, %v4418_v60 }
 0xf0c   :  { %v4424_v2 = vpop.xlane.xlu0 %4423 }
 0xf0d   :  { %8040 = vpow2.f32 %v4467_v22  ;;  %v4465_v13 = vmul.f32 1.442695, %v4445_v18  ;;  %v4448_v29 = vsub.f32 %v11102_v46, %v4424_v2 }
 0xf0e   :  { %v4422_v54 = vpop.xlane.xlu1 %4421 }
 0xf0f   :  { %8042 = vpow2.f32 %v4465_v13  ;;  %v4471_v6 = vmul.f32 1.442695, %v4448_v29  ;;  %v4447_v57 = vsub.f32 %v11106_v5, %v4422_v54 }
 0xf10   :  { %v4428_v8 = vpop.xlane.xlu0 %4427 }
 0xf11   :  { %8044 = vpow2.f32 %v4471_v6  ;;  %v4469_v33 = vmul.f32 1.442695, %v4447_v57  ;;  %v4450_v4 = vsub.f32 %v11110_v9, %v4428_v8 }
 0xf12   :  { %v11151_v50 = vpop.eup %8032  ;;  %v4426_v43 = vpop.xlane.xlu1 %4425 }
 0xf13   :  { %8046 = vpow2.f32 %v4469_v33  ;;  %v4475_v1 = vmul.f32 1.442695, %v4450_v4  ;;  %v4449_v20 = vsub.f32 %v11114_v25, %v4426_v43  ;;  %4491 = vadd.xlane.f32.xlu0 %v11151_v50 }
 0xf14   :  { %v11155_v46 = vpop.eup %8034  ;;  %v4432_v45 = vpop.xlane.xlu0 %4431 }
 0xf15   :  { %8048 = vpow2.f32 %v4475_v1  ;;  %v4473_v19 = vmul.f32 1.442695, %v4449_v20  ;;  %v4452_v5 = vsub.f32 %v11118_v63, %v4432_v45  ;;  %4489 = vadd.xlane.f32.xlu1 %v11155_v46  ;;  %v6345_v1 = vld [vmem:[%s11862_s8 + $0x78] sm:$0xff] }
 0xf16   :  { %v11159_v32 = vpop.eup %8036  ;;  %v4430_v9 = vpop.xlane.xlu1 %4429  ;;  %7705 = vmatprep.subr.mxu0 %v6345_v1 }
 0xf17   :  { %8050 = vpow2.f32 %v4473_v19  ;;  %v4479_v10 = vmul.f32 1.442695, %v4452_v5  ;;  %v4451_v14 = vsub.f32 %v11122_v34, %v4430_v9  ;;  %4495 = vadd.xlane.f32.xlu0 %v11159_v32 }
 0xf18   :  { %v11163_v25 = vpop.eup %8038  ;;  %v4436_v3 = vpop.xlane.xlu0 %4435 }
 0xf19   :  { %8052 = vpow2.f32 %v4479_v10  ;;  %v4477_v47 = vmul.f32 1.442695, %v4451_v14  ;;  %v4454_v38 = vsub.f32 %v11126_v51, %v4436_v3  ;;  %4493 = vadd.xlane.f32.xlu1 %v11163_v25 }
 0xf1a   :  { %v11167_v63 = vpop.eup %8040  ;;  %v4434_v55 = vpop.xlane.xlu1 %4433 }
 0xf1b   :  { %8054 = vpow2.f32 %v4477_v47  ;;  %v4483_v26 = vmul.f32 1.442695, %v4454_v38  ;;  %v4453_v7 = vsub.f32 %v11130_v48, %v4434_v55  ;;  %4499 = vadd.xlane.f32.xlu0 %v11167_v63 }
 0xf1c   :  { %v11171_v34 = vpop.eup %8042  ;;  %v4440_v60 = vpop.xlane.xlu0 %4439 }
 0xf1d   :  { %8056 = vpow2.f32 %v4483_v26  ;;  %v4481_v22 = vmul.f32 1.442695, %v4453_v7  ;;  %v4456_v18 = vsub.f32 %v11134_v41, %v4440_v60  ;;  %4497 = vadd.xlane.f32.xlu1 %v11171_v34 }
 0xf1e   :  { %v11175_v51 = vpop.eup %8044  ;;  %v4438_v2 = vpop.xlane.xlu1 %4437 }
 0xf1f   :  { %8058 = vpow2.f32 %v4481_v22  ;;  %v4487_v13 = vmul.f32 1.442695, %v4456_v18  ;;  %v4455_v29 = vsub.f32 %v11138_v17, %v4438_v2  ;;  %4503 = vadd.xlane.f32.xlu0 %v11175_v51  ;;  %v6344_v18 = vld [vmem:[%s11862_s8 + $0x70] sm:$0xff] }
 0xf20   :  { %v11179_v48 = vpop.eup %8046 }
 0xf21   :  { %8060 = vpow2.f32 %v4487_v13  ;;  %v4485_v54 = vmul.f32 1.442695, %v4455_v29  ;;  %4501 = vadd.xlane.f32.xlu1 %v11179_v48 }
 0xf22   :  { %v11182_v6 = vpop.eup %8048 }
 0xf23   :  { %8062 = vpow2.f32 %v4485_v54  ;;  %4507 = vadd.xlane.f32.xlu0 %v11182_v6 }
 0xf24   :  { %v11185_v41 = vpop.eup %8050 }
 0xf25   :  { %4505 = vadd.xlane.f32.xlu1 %v11185_v41 }
 0xf26   :  { %v11188_v57 = vpop.eup %8052 }
 0xf27   :  { %4511 = vadd.xlane.f32.xlu0 %v11188_v57 }
 0xf28   :  { %v11191_v17 = vpop.eup %8054 }
 0xf29   :  { %4509 = vadd.xlane.f32.xlu1 %v11191_v17 }
 0xf2a   :  { %v11194_v8 = vpop.eup %8056 }
 0xf2b   :  { %4515 = vadd.xlane.f32.xlu0 %v11194_v8 }
 0xf2c   :  { %v11197_v33 = vpop.eup %8058 }
 0xf2d   :  { %4513 = vadd.xlane.f32.xlu1 %v11197_v33 }
 0xf2e   :  { %v11200_v4 = vpop.eup %8060 }
 0xf2f   :  { %4519 = vadd.xlane.f32.xlu0 %v11200_v4 }
 0xf30   :  { %v11203_v43 = vpop.eup %8062 }
 0xf31   :  { %4517 = vadd.xlane.f32.xlu1 %v11203_v43 }
 0xf9c   :  { %v4492_v20 = vpop.xlane.xlu0 %4491 }
 0xf9d   :  { %8064 = vrcp.f32 %v4492_v20 }
 0xf9e   :  { %v4490_v45 = vpop.xlane.xlu1 %4489 }
 0xf9f   :  { %8066 = vrcp.f32 %v4490_v45  ;;  %v6342_v45 = vld [vmem:[%s11862_s8 + $0x60] sm:$0xff] }
 0xfa0   :  { %v4496_v19 = vpop.xlane.xlu0 %4495 }
 0xfa1   :  { %8068 = vrcp.f32 %v4496_v19 }
 0xfa2   :  { %v4494_v5 = vpop.xlane.xlu1 %4493 }
 0xfa3   :  { %8070 = vrcp.f32 %v4494_v5 }
 0xfa4   :  { %v4500_v9 = vpop.xlane.xlu0 %4499 }
 0xfa5   :  { %8072 = vrcp.f32 %v4500_v9 }
 0xfa6   :  { %v4498_v10 = vpop.xlane.xlu1 %4497 }
 0xfa7   :  { %8074 = vrcp.f32 %v4498_v10 }
 0xfa8   :  { %v4504_v14 = vpop.xlane.xlu0 %4503 }
 0xfa9   :  { %8076 = vrcp.f32 %v4504_v14  ;;  %v6340_v14 = vld [vmem:[%s11862_s8 + $0x50] sm:$0xff] }
 0xfaa   :  { %v4502_v3 = vpop.xlane.xlu1 %4501  ;;  %v8065_v47 = vpop.eup %8064 }
 0xfab   :  { %8078 = vrcp.f32 %v4502_v3  ;;  %v4538_v7 = vmul.f32 %v8065_v47, %v11151_v50 }
 0xfac   :  { %v8067_v38 = vpop.eup %8066  ;;  %v4508_v55 = vpop.xlane.xlu0 %4507 }
 0xfad   :  { %v4537_v26 = vmul.f32 %v8067_v38, %v11155_v46  ;;  %8080 = vrcp.f32 %v4508_v55  ;;  %v6343_v46 = vld [vmem:[%s11862_s8 + $0x68] sm:$0xff] }
 0xfae   :  { %v4506_v60 = vpop.xlane.xlu1 %4505  ;;  %v8069_v22 = vpop.eup %8068 }
 0xfaf   :  { %8082 = vrcp.f32 %v4506_v60  ;;  %7681 = vmatprep.mubr.f32.mxu0 %v4537_v26  ;;  %v4540_v54 = vmul.f32 %v8069_v22, %v11159_v32  ;;  %v6341_v32 = vld [vmem:[%s11862_s8 + $0x58] sm:$0xff] }
 0xfb0   :  { %v8071_v2 = vpop.eup %8070  ;;  %v4512_v13 = vpop.xlane.xlu0 %4511  ;;  %7682 = vmatmul.mubr.f32.vlgmr.msra.gmra.mxu0 %v4538_v7 }
 0xfb1   :  { %v4539_v29 = vmul.f32 %v8071_v2, %v11163_v25  ;;  %7706 = vmatpush3.msra.mxu0 %v6345_v1  ;;  %8084 = vrcp.f32 %v4512_v13 }
 0xfb2   :  { %v4510_v50 = vpop.xlane.xlu1 %4509  ;;  %7707 = vmatprep.subr.mxu0 %v6344_v18  ;;  %v8073_v20 = vpop.eup %8072 }
 0xfb3   :  { %8086 = vrcp.f32 %v4510_v50  ;;  %7684 = vmatprep.mubr.f32.mxu0 %v4539_v29  ;;  %7708 = vmatpush3.msra.mxu0 %v6344_v18  ;;  %v4542_v9 = vmul.f32 %v8073_v20, %v11167_v63  ;;  %v6339_v63 = vld [vmem:[%s11862_s8 + $0x48] sm:$0xff] }
 0xfb4   :  { %v8075_v19 = vpop.eup %8074  ;;  %v4516_v25 = vpop.xlane.xlu0 %4515  ;;  %7685 = vmatmul.mubr.f32.gmra.mxu0 %v4540_v54  ;;  %7709 = vmatprep.subr.mxu0 %v6343_v46 }
 0xfb5   :  { %v4541_v1 = vmul.f32 %v8075_v19, %v11171_v34  ;;  %7710 = vmatpush3.msra.mxu0 %v6343_v46  ;;  %8088 = vrcp.f32 %v4516_v25 }
 0xfb6   :  { %v4514_v5 = vpop.xlane.xlu1 %4513  ;;  %7711 = vmatprep.subr.mxu0 %v6342_v45  ;;  %v8077_v10 = vpop.eup %8076 }
 0xfb7   :  { %8090 = vrcp.f32 %v4514_v5  ;;  %7687 = vmatprep.mubr.f32.mxu0 %v4541_v1  ;;  %7712 = vmatpush3.msra.mxu0 %v6342_v45  ;;  %v4544_v55 = vmul.f32 %v8077_v10, %v11175_v51 }
 0xfb8   :  { %v8079_v3 = vpop.eup %8078  ;;  %v4520_v34 = vpop.xlane.xlu0 %4519  ;;  %7688 = vmatmul.mubr.f32.gmra.mxu0 %v4542_v9  ;;  %7713 = vmatprep.subr.mxu0 %v6341_v32 }
 0xfb9   :  { %v4543_v47 = vmul.f32 %v8079_v3, %v11179_v48  ;;  %7714 = vmatpush3.msra.mxu0 %v6341_v32  ;;  %8092 = vrcp.f32 %v4520_v34 }
 0xfba   :  { %v4518_v38 = vpop.xlane.xlu1 %4517  ;;  %7715 = vmatprep.subr.mxu0 %v6340_v14  ;;  %v8081_v26 = vpop.eup %8080 }
 0xfbb   :  { %8094 = vrcp.f32 %v4518_v38  ;;  %7690 = vmatprep.mubr.f32.mxu0 %v4543_v47  ;;  %7716 = vmatpush3.msra.mxu0 %v6340_v14  ;;  %v4546_v48 = vmul.f32 %v8081_v26, %v11182_v6 }
 0xfbc   :  { %v8083_v7 = vpop.eup %8082  ;;  %7691 = vmatmul.mubr.f32.gmra.mxu0 %v4544_v55  ;;  %7717 = vmatprep.subr.mxu0 %v6339_v63 }
 0xfbd   :  { %v4545_v60 = vmul.f32 %v8083_v7, %v11185_v41  ;;  %7718 = vmatpush3.msra.mxu0 %v6339_v63 }
 0xfbe   :  { %v8085_v22 = vpop.eup %8084 }
 0xfbf   :  { %7693 = vmatprep.mubr.f32.mxu0 %v4545_v60  ;;  %v4548_v51 = vmul.f32 %v8085_v22, %v11188_v57  ;;  %v6338_v57 = vld [vmem:[%s11862_s8 + $0x40] sm:$0xff] }
 0xfc0   :  { %v8087_v18 = vpop.eup %8086  ;;  %7694 = vmatmul.mubr.f32.gmra.mxu0 %v4546_v48  ;;  %7719 = vmatprep.subr.mxu0 %v6338_v57 }
 0xfc1   :  { %v4547_v2 = vmul.f32 %v8087_v18, %v11191_v17  ;;  %7720 = vmatpush3.msra.mxu0 %v6338_v57 }
 0xfc2   :  { %v8089_v13 = vpop.eup %8088 }
 0xfc3   :  { %7696 = vmatprep.mubr.f32.mxu0 %v4547_v2  ;;  %v4550_v50 = vmul.f32 %v8089_v13, %v11194_v8 }
 0xfc4   :  { %v8091_v29 = vpop.eup %8090  ;;  %7697 = vmatmul.mubr.f32.gmra.mxu0 %v4548_v51 }
 0xfc5   :  { %v4549_v46 = vmul.f32 %v8091_v29, %v11197_v33 }
 0xfc6   :  { %v8093_v41 = vpop.eup %8092 }
 0xfc7   :  { %7699 = vmatprep.mubr.f32.mxu0 %v4549_v46  ;;  %v4552_v20 = vmul.f32 %v8093_v41, %v11200_v4 }
 0xfc8   :  { %v8095_v54 = vpop.eup %8094  ;;  %7700 = vmatmul.mubr.f32.gmra.mxu0 %v4550_v50 }
 0xfc9   :  { %v4551_v6 = vmul.f32 %v8095_v54, %v11203_v43 }
 0xfcb   :  { %7702 = vmatprep.mubr.f32.mxu0 %v4551_v6 }
 0xfcc   :  { %7703 = vmatmul.mubr.f32.gmra.mxu0 %v4552_v20 }
0x1070   :  { %v7683_v17 = vpop.f32.mrf.mxu0 }
0x1071   :  { %v4699_v45 = vmul.f32 %v7683_v17, %v9266_v44  ;;  %v12355_v17 = vld [vmem:[#allocation62_spill] sm:$0xff] }
0x1072   :  { %v4619_v33 = vpop.f32.mrf.mxu0 }
0x1073   :  { %v4698_v8 = vmul.f32 %v9162_v12, %v4619_v33  ;;  %v12357_v33 = vld [vmem:[#allocation63_spill] sm:$0xff] }
0x1074   :  { %v7686_v19 = vpop.f32.mrf.mxu0 }
0x1075   :  { %7721 = vmatprep.mubr.msk.f32.mxu0 %vm12335_vm6, %v4698_v8  ;;  %v4701_v25 = vmul.f32 %v7686_v19, %v9284_v35  ;;  %vm12345_vm6 = vmmov %vm12256_vm0  ;;  %v12359_v8 = vld [vmem:[#allocation64_spill] sm:$0xff]  ;;  %v12363_v19 = vld [vmem:[#allocation66_spill] sm:$0xff] }
0x1076   :  { %v4629_v43 = vpop.f32.mrf.mxu0  ;;  %7722 = vmatmul.mubr.msk.f32.vlgmr.msra.gmra.mxu0 %vm12336_vm2, %v4699_v45  ;;  %vm12346_vm2 = vmmov %vm12256_vm0  ;;  %v12361_v45 = vld [vmem:[#allocation65_spill] sm:$0xff] }
0x1077   :  { %v4700_v4 = vmul.f32 %v9271_v49, %v4629_v43  ;;  %v12365_v43 = vld [vmem:[#allocation67_spill] sm:$0xff] }
0x1078   :  { %v7689_v1 = vpop.f32.mrf.mxu0 }
0x1079   :  { %7724 = vmatprep.mubr.msk.f32.mxu0 %vm12337_vm14, %v4700_v4  ;;  %v4703_v44 = vmul.f32 %v7689_v1, %v9301_v11  ;;  %vm12347_vm14 = vmmov %vm12256_vm0  ;;  %v12367_v4 = vld [vmem:[#allocation68_spill] sm:$0xff]  ;;  %v12371_v1 = vld [vmem:[#allocation70_spill] sm:$0xff] }
0x107a   :  { %v4639_v32 = vpop.f32.mrf.mxu0  ;;  %7725 = vmatmul.mubr.msk.f32.gmra.mxu0 %vm12338_vm3, %v4701_v25  ;;  %vm12348_vm3 = vmmov %vm12256_vm0  ;;  %v12369_v25 = vld [vmem:[#allocation69_spill] sm:$0xff] }
0x107b   :  { %v4702_v12 = vmul.f32 %v9291_v40, %v4639_v32  ;;  %v12373_v32 = vld [vmem:[#allocation71_spill] sm:$0xff] }
0x107c   :  { %v7692_v5 = vpop.f32.mrf.mxu0 }
0x107d   :  { %7727 = vmatprep.mubr.msk.f32.mxu0 %vm12339_vm12, %v4702_v12  ;;  %v4705_v35 = vmul.f32 %v7692_v5, %v9317_v24  ;;  %vm12349_vm12 = vmmov %vm12256_vm0  ;;  %v11327_v12 = vld [vmem:[%s11863_s9 + $0x1] ss:$0 sm:$0xff] }
0x107e   :  { %v4649_v9 = vpop.f32.mrf.mxu0  ;;  %7728 = vmatmul.mubr.msk.f32.gmra.mxu0 %vm12340_vm13, %v4703_v44  ;;  %vm12356_vm13 = vnez %v12355_v17 }
0x107f   :  { %v4704_v49 = vmul.f32 %v9307_v0, %v4649_v9 }
0x1080   :  { %v7695_v10 = vpop.f32.mrf.mxu0 }
0x1081   :  { %7730 = vmatprep.mubr.msk.f32.mxu0 %vm12341_vm5, %v4704_v49  ;;  %v4707_v11 = vmul.f32 %v7695_v10, %v9333_v27  ;;  %vm12368_vm5 = vnez %v12367_v4 }
0x1082   :  { %v4659_v14 = vpop.f32.mrf.mxu0  ;;  %7731 = vmatmul.mubr.msk.f32.gmra.mxu0 %vm12342_vm1, %v4705_v35  ;;  %vm12370_vm1 = vnez %v12369_v25 }
0x1083   :  { %v4706_v40 = vmul.f32 %v9323_v37, %v4659_v14 }
0x1084   :  { %v7698_v3 = vpop.f32.mrf.mxu0 }
0x1085   :  { %7733 = vmatprep.mubr.msk.f32.mxu0 %vm12256_vm0, %v4706_v40  ;;  %v4709_v24 = vmul.f32 %v7698_v3, %v9349_v23  ;;  %vm12372_vm0 = vnez %v12371_v1 }
0x1086   :  { %v4669_v34 = vpop.f32.mrf.mxu0  ;;  %7734 = vmatmul.mubr.msk.f32.gmra.mxu0 %vm12343_vm15, %v4707_v11  ;;  %vm12374_vm15 = vnez %v12373_v32 }
0x1087   :  { %v4708_v0 = vmul.f32 %v9339_v59, %v4669_v34 }
0x1088   :  { %v7701_v47 = vpop.f32.mrf.mxu0 }
0x1089   :  { %7736 = vmatprep.mubr.msk.f32.mxu0 %vm12344_vm4, %v4708_v0  ;;  %v4711_v27 = vmul.f32 %v7701_v47, %v12312_v36  ;;  %vm12375_vm4 = vmmov %vm12346_vm2  ;;  %v6396_v47 = vld [vmem:[%s11866_s12 + $0xf0] sm:$0xff] }
0x108a   :  { %v4679_v63 = vpop.f32.mrf.mxu0  ;;  %7737 = vmatmul.mubr.msk.f32.gmra.mxu0 %vm12345_vm6, %v4709_v24  ;;  %vm12376_vm6 = vmmov %vm12346_vm2 }
0x108b   :  { %v4710_v37 = vmul.f32 %v12309_v62, %v4679_v63  ;;  %v6394_v63 = vld [vmem:[%s11866_s12 + $0xe0] sm:$0xff] }
0x108c   :  { %v7704_v38 = vpop.f32.mrf.mxu0 }
0x108d   :  { %7739 = vmatprep.mubr.msk.f32.mxu0 %vm12346_vm2, %v4710_v37  ;;  %v4713_v23 = vmul.f32 %v7704_v38, %v12315_v39 }
0x108e   :  { %v4689_v55 = vpop.f32.mrf.mxu0  ;;  %7740 = vmatmul.mubr.msk.f32.gmra.mxu0 %vm12347_vm14, %v4711_v27  ;;  %vm12377_vm14 = vmmov %vm12346_vm2 }
0x108f   :  { %v4712_v59 = vmul.f32 %v12313_v52, %v4689_v55 }
0x1091   :  { %7742 = vmatprep.mubr.msk.f32.mxu0 %vm12348_vm3, %v4712_v59  ;;  %vm12378_vm3 = vmmov %vm12346_vm2 }
0x1092   :  { %7743 = vmatmul.mubr.msk.f32.gmra.mxu0 %vm12349_vm12, %v4713_v23  ;;  %vm12379_vm12 = vmmov %vm12346_vm2 }
0x1093   :  { %5483 = vmatprep.mubr.f32.mxu0 %v12008_v16 }
0x1136   :  { %v7723_v26 = vpop.f32.mrf.mxu0 }
0x1138   :  { %v4837_v62 = vpop.f32.mrf.mxu0 }
0x113a   :  { %v7726_v7 = vpop.f32.mrf.mxu0 }
0x113c   :  { %v4847_v36 = vpop.f32.mrf.mxu0 }
0x113e   :  { %v7729_v60 = vpop.f32.mrf.mxu0 }
0x1140   :  { %v4857_v48 = vpop.f32.mrf.mxu0 }
0x1142   :  { %v7732_v22 = vpop.f32.mrf.mxu0 }
0x1144   :  { %v4867_v18 = vpop.f32.mrf.mxu0 }
0x1146   :  { %v7735_v2 = vpop.f32.mrf.mxu0 }
0x1148   :  { %v4877_v51 = vpop.f32.mrf.mxu0 }
0x114a   :  { %v7738_v13 = vpop.f32.mrf.mxu0 }
0x114c   :  { %v4887_v52 = vpop.f32.mrf.mxu0 }
0x114e   :  { %v7741_v29 = vpop.f32.mrf.mxu0 }
0x1150   :  { %v4897_v39 = vpop.f32.mrf.mxu0 }
0x1152   :  { %v7744_v46 = vpop.f32.mrf.mxu0 }
0x1153   :  { %7745 = vmatprep.subr.mxu1 %v7744_v46 }
0x1154   :  { %v4907_v50 = vpop.f32.mrf.mxu0  ;;  %7746 = vmatpush3.msra.mxu1 %v7744_v46 }
0x1155   :  { %7747 = vmatprep.subr.mxu1 %v4907_v50 }
0x1156   :  { %7748 = vmatpush3.msra.mxu1 %v4907_v50 }
0x1157   :  { %7749 = vmatprep.subr.mxu1 %v7741_v29 }
0x1158   :  { %7750 = vmatpush3.msra.mxu1 %v7741_v29 }
0x1159   :  { %7751 = vmatprep.subr.mxu1 %v4897_v39 }
0x115a   :  { %7752 = vmatpush3.msra.mxu1 %v4897_v39 }
0x115b   :  { %7753 = vmatprep.subr.mxu1 %v7738_v13 }
0x115c   :  { %7754 = vmatpush3.msra.mxu1 %v7738_v13 }
0x115d   :  { %7755 = vmatprep.subr.mxu1 %v4887_v52 }
0x115e   :  { %7756 = vmatpush3.msra.mxu1 %v4887_v52 }
0x115f   :  { %7757 = vmatprep.subr.mxu1 %v7735_v2 }
0x1160   :  { %7758 = vmatpush3.msra.mxu1 %v7735_v2 }
0x1161   :  { %7759 = vmatprep.subr.mxu1 %v4877_v51 }
0x1162   :  { %7760 = vmatpush3.msra.mxu1 %v4877_v51 }
0x1163   :  { %7761 = vmatprep.subr.mxu1 %v7732_v22 }
0x1164   :  { %7762 = vmatpush3.msra.mxu1 %v7732_v22 }
0x1165   :  { %7763 = vmatprep.subr.mxu1 %v4867_v18 }
0x1166   :  { %7764 = vmatpush3.msra.mxu1 %v4867_v18 }
0x1167   :  { %7765 = vmatprep.subr.mxu1 %v7729_v60 }
0x1168   :  { %7766 = vmatpush3.msra.mxu1 %v7729_v60 }
0x1169   :  { %7767 = vmatprep.subr.mxu1 %v4857_v48 }
0x116a   :  { %7768 = vmatpush3.msra.mxu1 %v4857_v48 }
0x116b   :  { %7769 = vmatprep.subr.mxu1 %v7726_v7 }
0x116c   :  { %7770 = vmatpush3.msra.mxu1 %v7726_v7 }
0x116d   :  { %7771 = vmatprep.subr.mxu1 %v4847_v36 }
0x116e   :  { %7772 = vmatpush3.msra.mxu1 %v4847_v36 }
0x116f   :  { %7773 = vmatprep.subr.mxu1 %v7723_v26 }
0x1170   :  { %7774 = vmatpush3.msra.mxu1 %v7723_v26 }
0x1171   :  { %7775 = vmatprep.subr.mxu1 %v4837_v62 }
0x1172   :  { %7776 = vmatpush3.msra.mxu1 %v4837_v62 }
0x1173   :  { %7778 = vmatmul.mubr.msk.f32.vlgmr.msra.gmra.mxu1 %vm9913_vm7, %v12317_v28  ;;  %vm12358_vm7 = vnez %v12357_v33 }
0x1174   :  { %7780 = vmatprep.mubr.msk.f32.mxu1 %vm9919_vm8, %v12317_v28  ;;  %vm12360_vm8 = vnez %v12359_v8 }
0x1177   :  { %7781 = vmatmul.mubr.msk.f32.gmra.mxu1 %vm9931_vm9, %v12317_v28  ;;  %vm12362_vm9 = vnez %v12361_v45 }
0x1178   :  { %7783 = vmatprep.mubr.msk.f32.mxu1 %vm9937_vm10, %v12317_v28  ;;  %vm12364_vm10 = vnez %v12363_v19 }
0x117b   :  { %7784 = vmatmul.mubr.msk.f32.gmra.mxu1 %vm9949_vm11, %v12317_v28  ;;  %vm12366_vm11 = vnez %v12365_v43 }
0x117c   :  { %7786 = vmatprep.mubr.msk.f32.mxu1 %vm12356_vm13, %v12317_v28  ;;  %vm12380_vm13 = vmmov %vm12346_vm2 }
0x117f   :  { %7787 = vmatmul.mubr.msk.f32.gmra.mxu1 %vm12358_vm7, %v12317_v28  ;;  %vm12381_vm7 = vmmov %vm12346_vm2 }
0x1180   :  { %7789 = vmatprep.mubr.msk.f32.mxu1 %vm12360_vm8, %v12317_v28  ;;  %vm12382_vm8 = vmmov %vm12346_vm2 }
0x1183   :  { %7790 = vmatmul.mubr.msk.f32.gmra.mxu1 %vm12362_vm9, %v12317_v28  ;;  %vm12383_vm9 = vmmov %vm12346_vm2 }
0x1184   :  { %7792 = vmatprep.mubr.msk.f32.mxu1 %vm12364_vm10, %v12317_v28  ;;  %vm12384_vm10 = vmmov %vm12346_vm2 }
0x1187   :  { %7793 = vmatmul.mubr.msk.f32.gmra.mxu1 %vm12366_vm11, %v12317_v28  ;;  %vm12386_vm11 = vmmov %vm12346_vm2 }
0x1188   :  { %7795 = vmatprep.mubr.msk.f32.mxu1 %vm12368_vm5, %v12317_v28  ;;  %vm12388_vm5 = vmmov %vm12346_vm2 }
0x118b   :  { %7796 = vmatmul.mubr.msk.f32.gmra.mxu1 %vm12370_vm1, %v12317_v28  ;;  %vm12390_vm1 = vmmov %vm12346_vm2 }
0x118c   :  { %7798 = vmatprep.mubr.msk.f32.mxu1 %vm12372_vm0, %v12317_v28  ;;  %vm12392_vm0 = vmmov %vm12390_vm1 }
0x118f   :  { %7799 = vmatmul.mubr.msk.f32.gmra.mxu1 %vm12374_vm15, %v12317_v28  ;;  %vm12394_vm15 = vmmov %vm12392_vm0 }
0x1233   :  { %v7779_v44 = vpop.f32.mrf.mxu1 }
0x1234   :  { %v4996_v5 = vadd.f32 %v7779_v44, %v11327_v12 }
0x1235   :  { %v4990_v9 = vpop.f32.mrf.mxu1 }
0x1236   :  { %v11331_v49 = vadd.f32 %v4996_v5, %v10524_v30  ;;  %v4991_v35 = vadd.f32 %v11327_v12, %v4990_v9 }
0x1237   :  { %v7782_v10 = vpop.f32.mrf.mxu1 }
0x1238   :  { %v11335_v14 = vadd.f32 %v4991_v35, %v10518_v56  ;;  %v5006_v28 = vadd.f32 %v7782_v10, %v11327_v12  ;;  %v5092_v40 = vsel %vm12375_vm4, %v11331_v49, 0.0  ;;  %vm12396_vm4 = vmmov %vm12392_vm0 }
0x1239   :  { %5093 = vadd.xlane.f32.xlu0 %v5092_v40  ;;  %v5000_v11 = vpop.f32.mrf.mxu1 }
0x123a   :  { %v11341_v3 = vadd.f32 %v5006_v28, %v10536_v61  ;;  %v5001_v34 = vadd.f32 %v11327_v12, %v5000_v11  ;;  %v5089_v30 = vsel %vm12376_vm6, %v11335_v14, 0.0  ;;  %v6397_v61 = vld [vmem:[%s11866_s12 + $0xf8] sm:$0xff]  ;;  %vm12398_vm6 = vmmov %vm12392_vm0 }
0x123b   :  { %5090 = vadd.xlane.f32.xlu1 %v5089_v30  ;;  %5435 = vmatprep.subr.mxu0 %v6397_v61  ;;  %v7785_v37 = vpop.f32.mrf.mxu1  ;;  %v12385_v28 = vld [vmem:[#allocation20_spill] sm:$0xff]  ;;  %v12387_v30 = vld [vmem:[#allocation23_spill] sm:$0xff]  ;;  %v12389_v61 = vld [vmem:[#allocation21_spill] sm:$0xff] }
0x123c   :  { %v11347_v0 = vadd.f32 %v5001_v34, %v10530_v31  ;;  %v5098_v56 = vsel %vm12346_vm2, %v11341_v3, 0.0  ;;  %v6395_v31 = vld [vmem:[%s11866_s12 + $0xe8] sm:$0xff]  ;;  %5436 = vmatpush1.msra.mxu0 %v6396_v47  ;;  %v5016_v51 = vadd.f32 %v7785_v37, %v11327_v12  ;;  %vm12399_vm2 = vmmov %vm12392_vm0 }
0x123d   :  { %5099 = vadd.xlane.f32.xlu0 %v5098_v56  ;;  %5437 = vmatprep.subr.mxu0 %v6395_v31  ;;  %v5010_v27 = vpop.f32.mrf.mxu1 }
0x123e   :  { %v5095_v24 = vsel %vm12377_vm14, %v11347_v0, 0.0  ;;  %5438 = vmatpush1.msra.mxu0 %v6394_v63  ;;  %v5011_v41 = vadd.f32 %v11327_v12, %v5010_v27  ;;  %v11388_v17 = vadd.f32 %v5016_v51, %v10548_v58  ;;  %v12391_v27 = vld [vmem:[#allocation25_spill] sm:$0xff]  ;;  %v12397_v51 = vld [vmem:[#allocation24_spill] sm:$0xff]  ;;  %vm12400_vm14 = vmmov %vm12392_vm0 }
0x123f   :  { %5096 = vadd.xlane.f32.xlu1 %v5095_v24  ;;  %v7788_v38 = vpop.f32.mrf.mxu1 }
0x1240   :  { %v5026_v33 = vadd.f32 %v7788_v38, %v11327_v12  ;;  %v11395_v19 = vadd.f32 %v5011_v41, %v10542_v42  ;;  %v5104_v32 = vsel %vm12382_vm8, %v11388_v17, 0.0  ;;  %v6389_v41 = vld [vmem:[%s11866_s12 + $0xb8] sm:$0xff]  ;;  %vm12405_vm8 = vmmov %vm12392_vm0 }
0x1241   :  { %v5020_v55 = vpop.f32.mrf.mxu1 }
0x1242   :  { %v5021_v43 = vadd.f32 %v11327_v12, %v5020_v55  ;;  %v11400_v58 = vadd.f32 %v5026_v33, %v10560_v21  ;;  %v5101_v5 = vsel %vm12383_vm9, %v11395_v19, 0.0  ;;  %v6386_v33 = vld [vmem:[%s11866_s12 + $0xa0] sm:$0xff]  ;;  %vm12406_vm9 = vmmov %vm12392_vm0 }
0x1243   :  { %v7791_v59 = vpop.f32.mrf.mxu1 }
0x1244   :  { %v5036_v1 = vadd.f32 %v7791_v59, %v11327_v12  ;;  %v11406_v44 = vadd.f32 %v5021_v43, %v10554_v53  ;;  %v5110_v10 = vsel %vm12384_vm10, %v11400_v58, 0.0  ;;  %v6383_v43 = vld [vmem:[%s11866_s12 + $0x88] sm:$0xff]  ;;  %vm12407_vm10 = vmmov %vm12392_vm0 }
0x1245   :  { %v5030_v62 = vpop.f32.mrf.mxu1 }
0x1246   :  { %v5031_v42 = vadd.f32 %v11327_v12, %v5030_v62  ;;  %v11412_v35 = vadd.f32 %v5036_v1, %v10572_v15  ;;  %v5107_v11 = vsel %vm12386_vm11, %v11406_v44, 0.0  ;;  %vm12408_vm11 = vmmov %vm12392_vm0 }
0x1247   :  { %v7794_v13 = vpop.f32.mrf.mxu1 }
0x1248   :  { %v5046_v21 = vadd.f32 %v7794_v13, %v11327_v12  ;;  %v11418_v40 = vadd.f32 %v5031_v42, %v12385_v28  ;;  %v5116_v24 = vsel %vm12388_vm5, %v11412_v35, 0.0  ;;  %vm12409_vm5 = vmmov %vm12392_vm0 }
0x1249   :  { %v5040_v57 = vpop.f32.mrf.mxu1 }
0x124a   :  { %v5041_v53 = vadd.f32 %v11327_v12, %v5040_v57  ;;  %v11424_v56 = vadd.f32 %v5046_v21, %v12387_v30  ;;  %v5113_v63 = vsel %vm12390_vm1, %v11418_v40, 0.0  ;;  %v6387_v57 = vld [vmem:[%s11866_s12 + $0xa8] sm:$0xff]  ;;  %vm12410_vm1 = vmmov %vm12392_vm0 }
0x124b   :  { %v7797_v25 = vpop.f32.mrf.mxu1 }
0x124c   :  { %v5056_v15 = vadd.f32 %v7797_v25, %v11327_v12  ;;  %v11430_v47 = vadd.f32 %v5041_v53, %v12389_v61  ;;  %v5122_v59 = vsel %vm12392_vm0, %v11424_v56, 0.0 }
0x124d   :  { %v5050_v9 = vpop.f32.mrf.mxu1 }
0x124e   :  { %v5051_v31 = vadd.f32 %v11327_v12, %v5050_v9  ;;  %v11436_v38 = vadd.f32 %v5056_v15, %v12391_v27 }
0x124f   :  { %v7800_v34 = vpop.f32.mrf.mxu1 }
0x1250   :  { %v5066_v55 = vadd.f32 %v7800_v34, %v11327_v12 }
0x1251   :  { %v5060_v37 = vpop.f32.mrf.mxu1 }
0x1252   :  { %v5061_v62 = vadd.f32 %v11327_v12, %v5060_v37 }
0x1254   :  { %v11456_v13 = vadd.f32 %v5061_v62, %v12397_v51 }
0x12c2   :  { %v5094_v23 = vpop.xlane.xlu0 %5093 }
0x12c3   :  { %v5138_v26 = vmul.f32 0.015625, %v5094_v23  ;;  %v12393_v23 = vld [vmem:[#allocation22_spill] sm:$0xff] }
0x12c4   :  { %v5091_v7 = vpop.xlane.xlu1 %5090 }
0x12c5   :  { %v11366_v36 = vsub.f32 %v11331_v49, %v5138_v26  ;;  %v5137_v60 = vmul.f32 0.015625, %v5091_v7  ;;  %v11442_v26 = vadd.f32 %v5051_v31, %v12393_v23  ;;  %v5119_v7 = vsel %vm12394_vm15, %v11430_v47, 0.0  ;;  %vm12411_vm15 = vmmov %vm12392_vm0 }
0x12c6   :  { %v5100_v48 = vpop.xlane.xlu0 %5099 }
0x12c7   :  { %v11369_v22 = vsub.f32 %v11335_v14, %v5137_v60  ;;  %v5140_v18 = vmul.f32 0.015625, %v5100_v48  ;;  %v5170_v2 = vmul.f32 %v11366_v36, %v11366_v36  ;;  %v12395_v60 = vld [vmem:[#allocation27_spill] sm:$0xff]  ;;  %v5125_v12 = vsel %vm12398_vm6, %v11442_v26, 0.0  ;;  %vm12413_vm6 = vmmov %vm12392_vm0 }
0x12c8   :  { %v5097_v52 = vpop.xlane.xlu1 %5096  ;;  %v11448_v48 = vadd.f32 %v5066_v55, %v12395_v60 }
0x12c9   :  { %v11375_v29 = vsub.f32 %v11341_v3, %v5140_v18  ;;  %v5139_v39 = vmul.f32 0.015625, %v5097_v52  ;;  %v5188_v46 = vsel %vm12378_vm3, %v5170_v2, 0.0  ;;  %v5169_v50 = vmul.f32 %v11369_v22, %v11369_v22  ;;  %v6393_v2 = vld [vmem:[%s11866_s12 + $0xd8] sm:$0xff]  ;;  %v6392_v52 = vld [vmem:[%s11866_s12 + $0xd0] sm:$0xff]  ;;  %vm12401_vm3 = vmmov %vm12392_vm0 }
0x12ca   :  { %5189 = vadd.xlane.f32.xlu0 %v5188_v46  ;;  %v5128_v18 = vsel %vm12396_vm4, %v11436_v38, 0.0  ;;  %5439 = vmatprep.subr.mxu0 %v6393_v2  ;;  %v5134_v46 = vsel %vm12399_vm2, %v11448_v48, 0.0  ;;  %vm12412_vm4 = vmmov %vm12392_vm0 }
0x12cb   :  { %v11382_v54 = vsub.f32 %v11347_v0, %v5139_v39  ;;  %v5185_v6 = vsel %vm12379_vm12, %v5169_v50, 0.0  ;;  %v5172_v20 = vmul.f32 %v11375_v29, %v11375_v29  ;;  %5440 = vmatpush1.msra.mxu0 %v6392_v52  ;;  %v6391_v39 = vld [vmem:[%s11866_s12 + $0xc8] sm:$0xff]  ;;  %v6390_v50 = vld [vmem:[%s11866_s12 + $0xc0] sm:$0xff]  ;;  %vm12402_vm12 = vmmov %vm12392_vm0 }
0x12cc   :  { %5186 = vadd.xlane.f32.xlu1 %v5185_v6  ;;  %5441 = vmatprep.subr.mxu0 %v6391_v39  ;;  %v5131_v6 = vsel %vm12400_vm14, %v11456_v13, 0.0  ;;  %vm12414_vm2 = vmmov %vm12392_vm0 }
0x12cd   :  { %v5194_v8 = vsel %vm12380_vm13, %v5172_v20, 0.0  ;;  %v5171_v45 = vmul.f32 %v11382_v54, %v11382_v54  ;;  %5442 = vmatpush1.msra.mxu0 %v6390_v50  ;;  %v6388_v20 = vld [vmem:[%s11866_s12 + $0xb0] sm:$0xff]  ;;  %vm12403_vm13 = vmmov %vm12392_vm0 }
0x12ce   :  { %5195 = vadd.xlane.f32.xlu0 %v5194_v8  ;;  %5443 = vmatprep.subr.mxu0 %v6389_v41  ;;  %v6385_v8 = vld [vmem:[%s11866_s12 + $0x98] sm:$0xff]  ;;  %vm12415_vm14 = vmmov %vm12392_vm0 }
0x12cf   :  { %v5191_v4 = vsel %vm12381_vm7, %v5171_v45, 0.0  ;;  %5444 = vmatpush1.msra.mxu0 %v6388_v20  ;;  %v6384_v45 = vld [vmem:[%s11866_s12 + $0x90] sm:$0xff]  ;;  %v11524_v20 = vld [vmem:[#allocation2 + $0x1] ss:$0 sm:$0xff]  ;;  %vm12404_vm7 = vmmov %vm12392_vm0 }
0x12d0   :  { %5192 = vadd.xlane.f32.xlu1 %v5191_v4  ;;  %5445 = vmatprep.subr.mxu0 %v6387_v57  ;;  %v6382_v4 = vld [vmem:[%s11866_s12 + $0x80] sm:$0xff] }
0x12d1   :  { %5446 = vmatpush1.msra.mxu0 %v6386_v33 }
0x12d2   :  { %5105 = vadd.xlane.f32.xlu0 %v5104_v32  ;;  %5447 = vmatprep.subr.mxu0 %v6385_v8 }
0x12d3   :  { %5448 = vmatpush1.msra.mxu0 %v6384_v45 }
0x12d4   :  { %5102 = vadd.xlane.f32.xlu1 %v5101_v5  ;;  %5449 = vmatprep.subr.mxu0 %v6383_v43 }
0x12d5   :  { %5450 = vmatpush1.msra.mxu0 %v6382_v4 }
0x12d6   :  { %5111 = vadd.xlane.f32.xlu0 %v5110_v10 }
0x12d8   :  { %5108 = vadd.xlane.f32.xlu1 %v5107_v11 }
0x12da   :  { %5117 = vadd.xlane.f32.xlu0 %v5116_v24 }
0x12dc   :  { %5114 = vadd.xlane.f32.xlu1 %v5113_v63 }
0x12de   :  { %5123 = vadd.xlane.f32.xlu0 %v5122_v59 }
0x12e0   :  { %5120 = vadd.xlane.f32.xlu1 %v5119_v7 }
0x12e2   :  { %5129 = vadd.xlane.f32.xlu0 %v5128_v18 }
0x12e4   :  { %5126 = vadd.xlane.f32.xlu1 %v5125_v12 }
0x12e6   :  { %5135 = vadd.xlane.f32.xlu0 %v5134_v46 }
0x12e8   :  { %5132 = vadd.xlane.f32.xlu1 %v5131_v6 }
0x1353   :  { %v5190_v25 = vpop.xlane.xlu0 %5189 }
0x1354   :  { %v5234_v1 = vmul.f32 0.015625, %v5190_v25 }
0x1355   :  { %v5187_v32 = vpop.xlane.xlu1 %5186 }
0x1356   :  { %v5250_v42 = vadd.f32 1e-05, %v5234_v1  ;;  %v5233_v5 = vmul.f32 0.015625, %v5187_v32  ;;  %v11537_v32 = vld [vmem:[#allocation5 + $0x1] ss:$0 sm:$0xff] }
0x1357   :  { %v5196_v9 = vpop.xlane.xlu0 %5195 }
0x1358   :  { %8096 = vrsqrt.f32 %v5250_v42  ;;  %v5249_v21 = vadd.f32 1e-05, %v5233_v5  ;;  %v5236_v10 = vmul.f32 0.015625, %v5196_v9 }
0x1359   :  { %v5193_v28 = vpop.xlane.xlu1 %5192 }
0x135a   :  { %8098 = vrsqrt.f32 %v5249_v21  ;;  %v5235_v53 = vmul.f32 0.015625, %v5193_v28  ;;  %v5252_v11 = vadd.f32 1e-05, %v5236_v10 }
0x135b   :  { %v5106_v34 = vpop.xlane.xlu0 %5105 }
0x135c   :  { %v5251_v30 = vadd.f32 1e-05, %v5235_v53  ;;  %v5142_v15 = vmul.f32 0.015625, %v5106_v34 }
0x135d   :  { %v5103_v24 = vpop.xlane.xlu1 %5102 }
0x135e   :  { %8100 = vrsqrt.f32 %v5251_v30  ;;  %v11498_v61 = vsub.f32 %v11388_v17, %v5142_v15  ;;  %v5141_v31 = vmul.f32 0.015625, %v5103_v24 }
0x135f   :  { %8102 = vrsqrt.f32 %v5252_v11  ;;  %v5112_v63 = vpop.xlane.xlu0 %5111 }
0x1360   :  { %v11501_v37 = vsub.f32 %v11395_v19, %v5141_v31  ;;  %v5144_v27 = vmul.f32 0.015625, %v5112_v63  ;;  %v5174_v55 = vmul.f32 %v11498_v61, %v11498_v61 }
0x1361   :  { %v5109_v59 = vpop.xlane.xlu1 %5108 }
0x1362   :  { %v11506_v23 = vsub.f32 %v11400_v58, %v5144_v27  ;;  %v5143_v62 = vmul.f32 0.015625, %v5109_v59  ;;  %v5200_v7 = vsel %vm12401_vm3, %v5174_v55, 0.0  ;;  %v5173_v17 = vmul.f32 %v11501_v37, %v11501_v37  ;;  %vm12416_vm3 = vmmov %vm12392_vm0 }
0x1363   :  { %v5118_v60 = vpop.xlane.xlu0 %5117  ;;  %5201 = vadd.xlane.f32.xlu0 %v5200_v7 }
0x1364   :  { %v11512_v18 = vsub.f32 %v11406_v44, %v5143_v62  ;;  %v5146_v19 = vmul.f32 0.015625, %v5118_v60  ;;  %v5197_v2 = vsel %vm12402_vm12, %v5173_v17, 0.0  ;;  %v5176_v51 = vmul.f32 %v11506_v23, %v11506_v23  ;;  %vm12417_vm12 = vmmov %vm12392_vm0 }
0x1365   :  { %v8097_v12 = vpop.eup %8096  ;;  %5198 = vadd.xlane.f32.xlu1 %v5197_v2  ;;  %v5115_v58 = vpop.xlane.xlu1 %5114 }
0x1366   :  { %v11518_v52 = vsub.f32 %v11412_v35, %v5146_v19  ;;  %v5145_v39 = vmul.f32 0.015625, %v5115_v58  ;;  %v5206_v46 = vsel %vm12403_vm13, %v5176_v51, 0.0  ;;  %v5282_v41 = vmul.f32 %v8097_v12, %v11366_v36  ;;  %vm12418_vm13 = vmmov %vm12392_vm0 }
0x1367   :  { %v8099_v50 = vpop.eup %8098  ;;  %v5124_v44 = vpop.xlane.xlu0 %5123  ;;  %5207 = vadd.xlane.f32.xlu0 %v5206_v46  ;;  %v5175_v6 = vmul.f32 %v11512_v18, %v11512_v18 }
0x1368   :  { %v5281_v57 = vmul.f32 %v8099_v50, %v11369_v22  ;;  %v11528_v33 = vsub.f32 %v11418_v40, %v5145_v39  ;;  %v5148_v35 = vmul.f32 0.015625, %v5124_v44  ;;  %v5178_v8 = vmul.f32 %v11518_v52, %v11518_v52  ;;  %v6446_v50 = vld [vmem:[%s11868_s14 + $0x1f8] sm:$0xff]  ;;  %v6445_v44 = vld [vmem:[%s11868_s14 + $0x1f0] sm:$0xff] }
0x1369   :  { %v5203_v45 = vsel %vm12404_vm7, %v5175_v6, 0.0  ;;  %v5121_v43 = vpop.xlane.xlu1 %5120  ;;  %v5304_v5 = vmul.f32 %v11524_v20, %v5282_v41  ;;  %6969 = vmatprep.subr.mxu1 %v6446_v50  ;;  %v6430_v41 = vld [vmem:[%s11868_s14 + $0x178] sm:$0xff]  ;;  %v6429_v6 = vld [vmem:[%s11868_s14 + $0x170] sm:$0xff]  ;;  %vm12419_vm7 = vmmov %vm12392_vm0 }
0x136a   :  { %v5303_v36 = vmul.f32 %v11524_v20, %v5281_v57  ;;  %v11535_v4 = vsub.f32 %v11424_v56, %v5148_v35  ;;  %5204 = vadd.xlane.f32.xlu1 %v5203_v45  ;;  %v5147_v25 = vmul.f32 0.015625, %v5121_v43  ;;  %v5212_v40 = vsel %vm12405_vm8, %v5178_v8, 0.0  ;;  %6970 = vmatpush3.msra.mxu1 %v6430_v41  ;;  %v6444_v57 = vld [vmem:[%s11868_s14 + $0x1e8] sm:$0xff]  ;;  %v6443_v8 = vld [vmem:[%s11868_s14 + $0x1e0] sm:$0xff]  ;;  %v6442_v43 = vld [vmem:[%s11868_s14 + $0x1d8] sm:$0xff] }
0x136b   :  { %v8101_v1 = vpop.eup %8100  ;;  %v5130_v22 = vpop.xlane.xlu0 %5129  ;;  %v5177_v42 = vmul.f32 %v11528_v33, %v11528_v33  ;;  %5213 = vadd.xlane.f32.xlu0 %v5212_v40  ;;  %v5326_v63 = vadd.f32 %v11537_v32, %v5304_v5  ;;  %6971 = vmatprep.subr.mxu1 %v6445_v44  ;;  %v6428_v35 = vld [vmem:[%s11868_s14 + $0x168] sm:$0xff]  ;;  %v6427_v45 = vld [vmem:[%s11868_s14 + $0x160] sm:$0xff]  ;;  %vm12420_vm8 = vmmov %vm12392_vm0 }
0x136c   :  { %v8103_v9 = vpop.eup %8102  ;;  %v5325_v21 = vadd.f32 %v11537_v32, %v5303_v36  ;;  %v5283_v10 = vmul.f32 %v8101_v1, %v11382_v54  ;;  %v11546_v56 = vsub.f32 %v11430_v47, %v5147_v25  ;;  %v5150_v28 = vmul.f32 0.015625, %v5130_v22  ;;  %6972 = vmatpush3.msra.mxu1 %v6429_v6  ;;  %v6426_v36 = vld [vmem:[%s11868_s14 + $0x158] sm:$0xff]  ;;  %v6441_v25 = vld [vmem:[%s11868_s14 + $0x1d0] sm:$0xff]  ;;  %v6440_v22 = vld [vmem:[%s11868_s14 + $0x1c8] sm:$0xff] }
0x136d   :  { %v5209_v53 = vsel %vm12406_vm9, %v5177_v42, 0.0  ;;  %v5127_v11 = vpop.xlane.xlu1 %5126  ;;  %v5180_v34 = vmul.f32 %v11535_v4, %v11535_v4  ;;  %v5284_v47 = vmul.f32 %v8103_v9, %v11375_v29  ;;  %6973 = vmatprep.subr.mxu1 %v6444_v57  ;;  %v6425_v1 = vld [vmem:[%s11868_s14 + $0x150] sm:$0xff]  ;;  %v6424_v40 = vld [vmem:[%s11868_s14 + $0x148] sm:$0xff]  ;;  %v6439_v42 = vld [vmem:[%s11868_s14 + $0x1c0] sm:$0xff] }
0x136e   :  { %v11552_v30 = vsub.f32 %v11436_v38, %v5150_v28  ;;  %5210 = vadd.xlane.f32.xlu1 %v5209_v53  ;;  %v5149_v15 = vmul.f32 0.015625, %v5127_v11  ;;  %6399 = vmatmul.mubr.msk.f32.vlgmr.msra.gmra.mxu0 %vm12407_vm10, %v5325_v21  ;;  %v5179_v54 = vmul.f32 %v11546_v56, %v11546_v56  ;;  %v5305_v27 = vmul.f32 %v11524_v20, %v5283_v10  ;;  %v6423_v5 = vld [vmem:[%s11868_s14 + $0x140] sm:$0xff]  ;;  %v6438_v9 = vld [vmem:[%s11868_s14 + $0x1b8] sm:$0xff]  ;;  %v6437_v10 = vld [vmem:[%s11868_s14 + $0x1b0] sm:$0xff] }
0x136f   :  { %v5218_v24 = vsel %vm12408_vm11, %v5180_v34, 0.0  ;;  %v5136_v31 = vpop.xlane.xlu0 %5135  ;;  %5489 = vmatprep.mubr.f32.mxu0 %v12008_v16  ;;  %v5306_v19 = vmul.f32 %v11524_v20, %v5284_v47  ;;  %6974 = vmatpush3.msra.mxu1 %v6428_v35  ;;  %v6422_v21 = vld [vmem:[%s11868_s14 + $0x138] sm:$0xff]  ;;  %v6421_v28 = vld [vmem:[%s11868_s14 + $0x130] sm:$0xff]  ;;  %v6436_v53 = vld [vmem:[%s11868_s14 + $0x1a8] sm:$0xff] }
0x1370   :  { %v11563_v38 = vsub.f32 %v11442_v26, %v5149_v15  ;;  %5219 = vadd.xlane.f32.xlu0 %v5218_v24  ;;  %v5152_v55 = vmul.f32 0.015625, %v5136_v31  ;;  %v5215_v59 = vsel %vm12409_vm5, %v5179_v54, 0.0  ;;  %v5182_v62 = vmul.f32 %v11552_v30, %v11552_v30  ;;  %6975 = vmatprep.subr.mxu1 %v6443_v8  ;;  %v6420_v11 = vld [vmem:[%s11868_s14 + $0x128] sm:$0xff]  ;;  %v6435_v34 = vld [vmem:[%s11868_s14 + $0x1a0] sm:$0xff]  ;;  %v6434_v54 = vld [vmem:[%s11868_s14 + $0x198] sm:$0xff] }
0x1371   :  { %v5133_v29 = vpop.xlane.xlu1 %5132  ;;  %v5327_v51 = vadd.f32 %v11537_v32, %v5305_v27  ;;  %v5328_v46 = vadd.f32 %v11537_v32, %v5306_v19  ;;  %6976 = vmatpush3.msra.mxu1 %v6427_v45  ;;  %v6419_v15 = vld [vmem:[%s11868_s14 + $0x120] sm:$0xff]  ;;  %v6418_v47 = vld [vmem:[%s11868_s14 + $0x118] sm:$0xff]  ;;  %v6433_v24 = vld [vmem:[%s11868_s14 + $0x190] sm:$0xff] }
0x1372   :  { %v11569_v7 = vsub.f32 %v11448_v48, %v5152_v55  ;;  %5216 = vadd.xlane.f32.xlu1 %v5215_v59  ;;  %v5151_v17 = vmul.f32 0.015625, %v5133_v29  ;;  %6400 = vmatmul.mubr.msk.f32.gmra.mxu0 %vm12410_vm1, %v5326_v63  ;;  %v5224_v60 = vsel %vm12392_vm0, %v5182_v62, 0.0  ;;  %v5181_v26 = vmul.f32 %v11563_v38, %v11563_v38  ;;  %v6417_v31 = vld [vmem:[%s11868_s14 + $0x110] sm:$0xff]  ;;  %v6432_v63 = vld [vmem:[%s11868_s14 + $0x188] sm:$0xff]  ;;  %v6431_v55 = vld [vmem:[%s11868_s14 + $0x180] sm:$0xff] }
0x1373   :  { %5495 = vmatprep.mubr.f32.mxu0 %v12008_v16  ;;  %6977 = vmatprep.subr.mxu1 %v6442_v43  ;;  %v6416_v27 = vld [vmem:[%s11868_s14 + $0x108] sm:$0xff]  ;;  %v6415_v59 = vld [vmem:[%s11868_s14 + $0x100] sm:$0xff]  ;;  %vm12421_vm9 = vmmov %vm12392_vm0 }
0x1374   :  { %v11578_v2 = vsub.f32 %v11456_v13, %v5151_v17  ;;  %5225 = vadd.xlane.f32.xlu0 %v5224_v60  ;;  %v5221_v48 = vsel %vm12411_vm15, %v5181_v26, 0.0  ;;  %v5184_v12 = vmul.f32 %v11569_v7, %v11569_v7  ;;  %6978 = vmatpush3.msra.mxu1 %v6426_v36  ;;  %vm12422_vm10 = vmmov %vm12392_vm0 }
0x1375   :  { %6979 = vmatprep.subr.mxu1 %v6441_v25  ;;  %vm12423_vm11 = vmmov %vm12392_vm0 }
0x1376   :  { %5222 = vadd.xlane.f32.xlu1 %v5221_v48  ;;  %6401 = vmatmul.mubr.msk.f32.gmra.mxu0 %vm12412_vm4, %v5327_v51  ;;  %v5230_v58 = vsel %vm12413_vm6, %v5184_v12, 0.0  ;;  %v5183_v39 = vmul.f32 %v11578_v2, %v11578_v2  ;;  %vm12424_vm5 = vmmov %vm12392_vm0 }
0x1377   :  { %5501 = vmatprep.mubr.f32.mxu0 %v12008_v16  ;;  %6980 = vmatpush3.msra.mxu1 %v6425_v1  ;;  %vm12425_vm1 = vmmov %vm12392_vm0 }
0x1378   :  { %5231 = vadd.xlane.f32.xlu0 %v5230_v58  ;;  %v5227_v13 = vsel %vm12414_vm2, %v5183_v39, 0.0  ;;  %6981 = vmatprep.subr.mxu1 %v6440_v22  ;;  %vm12429_vm15 = vmmov %vm12392_vm0 }
0x1379   :  { %6982 = vmatpush3.msra.mxu1 %v6424_v40  ;;  %vm12430_vm4 = vmmov %vm12392_vm0 }
0x137a   :  { %5228 = vadd.xlane.f32.xlu1 %v5227_v13  ;;  %6402 = vmatmul.mubr.msk.f32.gmra.mxu0 %vm12415_vm14, %v5328_v46  ;;  %vm12431_vm6 = vmmov %vm12392_vm0 }
0x137b   :  { %5507 = vmatprep.mubr.f32.mxu0 %v12008_v16  ;;  %6983 = vmatprep.subr.mxu1 %v6439_v42  ;;  %vm12432_vm2 = vmmov %vm12392_vm0 }
0x137c   :  { %6984 = vmatpush3.msra.mxu1 %v6423_v5  ;;  %vm12433_vm14 = vmmov %vm12392_vm0 }
0x137d   :  { %6985 = vmatprep.subr.mxu1 %v6438_v9 }
0x137e   :  { %6986 = vmatpush3.msra.mxu1 %v6422_v21 }
0x137f   :  { %6987 = vmatprep.subr.mxu1 %v6437_v10 }
0x1380   :  { %6988 = vmatpush3.msra.mxu1 %v6421_v28 }
0x1381   :  { %6989 = vmatprep.subr.mxu1 %v6436_v53 }
0x1382   :  { %6990 = vmatpush3.msra.mxu1 %v6420_v11 }
0x1383   :  { %6991 = vmatprep.subr.mxu1 %v6435_v34 }
0x1384   :  { %6992 = vmatpush3.msra.mxu1 %v6419_v15 }
0x1385   :  { %6993 = vmatprep.subr.mxu1 %v6434_v54 }
0x1386   :  { %6994 = vmatpush3.msra.mxu1 %v6418_v47 }
0x1387   :  { %6995 = vmatprep.subr.mxu1 %v6433_v24 }
0x1388   :  { %6996 = vmatpush3.msra.mxu1 %v6417_v31 }
0x1389   :  { %6997 = vmatprep.subr.mxu1 %v6432_v63 }
0x138a   :  { %6998 = vmatpush3.msra.mxu1 %v6416_v27 }
0x138b   :  { %6999 = vmatprep.subr.mxu1 %v6431_v55 }
0x138c   :  { %7000 = vmatpush3.msra.mxu1 %v6415_v59 }
0x13ec   :  { %v5202_v62 = vpop.xlane.xlu0 %5201 }
0x13ed   :  { %v5238_v29 = vmul.f32 0.015625, %v5202_v62 }
0x13ee   :  { %v5199_v17 = vpop.xlane.xlu1 %5198 }
0x13ef   :  { %v5254_v60 = vadd.f32 1e-05, %v5238_v29  ;;  %v5237_v26 = vmul.f32 0.015625, %v5199_v17 }
0x13f0   :  { %v5208_v19 = vpop.xlane.xlu0 %5207 }
0x13f1   :  { %8104 = vrsqrt.f32 %v5254_v60  ;;  %v5253_v48 = vadd.f32 1e-05, %v5237_v26  ;;  %v5240_v51 = vmul.f32 0.015625, %v5208_v19 }
0x13f3   :  { %8106 = vrsqrt.f32 %v5253_v48  ;;  %v5205_v12 = vpop.xlane.xlu1 %5204  ;;  %v5256_v39 = vadd.f32 1e-05, %v5240_v51 }
0x13f4   :  { %v5239_v58 = vmul.f32 0.015625, %v5205_v12  ;;  %v5214_v13 = vpop.xlane.xlu0 %5213 }
0x13f5   :  { %v5242_v41 = vmul.f32 0.015625, %v5214_v13 }
0x13f6   :  { %v5255_v46 = vadd.f32 1e-05, %v5239_v58 }
0x13f7   :  { %v5211_v50 = vpop.xlane.xlu1 %5210  ;;  %v5258_v35 = vadd.f32 1e-05, %v5242_v41 }
0x13f8   :  { %8108 = vrsqrt.f32 %v5255_v46  ;;  %v5241_v44 = vmul.f32 0.015625, %v5211_v50 }
0x13f9   :  { %8110 = vrsqrt.f32 %v5256_v39  ;;  %v5220_v43 = vpop.xlane.xlu0 %5219 }
0x13fa   :  { %v5257_v6 = vadd.f32 1e-05, %v5241_v44  ;;  %v5244_v22 = vmul.f32 0.015625, %v5220_v43 }
0x13fb   :  { %v5217_v57 = vpop.xlane.xlu1 %5216 }
0x13fc   :  { %8112 = vrsqrt.f32 %v5257_v6  ;;  %v5243_v8 = vmul.f32 0.015625, %v5217_v57  ;;  %v5260_v10 = vadd.f32 1e-05, %v5244_v22  ;;  %v6398_v22 = vld [vmem:[%s11867_s13 + $0x2] sm:$0x3] }
0x13fd   :  { %8114 = vrsqrt.f32 %v5258_v35  ;;  %v5226_v28 = vpop.xlane.xlu0 %5225 }
0x13fe   :  { %v8105_v45 = vpop.eup %8104  ;;  %v5259_v40 = vadd.f32 1e-05, %v5243_v8 }
0x13ff   :  { %v5286_v25 = vmul.f32 %v8105_v45, %v11498_v61  ;;  %v5223_v42 = vpop.xlane.xlu1 %5222  ;;  %v5246_v61 = vmul.f32 0.015625, %v5226_v28 }
0x1400   :  { %v8107_v36 = vpop.eup %8106  ;;  %v5245_v9 = vmul.f32 0.015625, %v5223_v42  ;;  %8116 = vrsqrt.f32 %v5259_v40 }
0x1401   :  { %v5285_v1 = vmul.f32 %v8107_v36, %v11501_v37  ;;  %v5308_v11 = vmul.f32 %v11524_v20, %v5286_v25  ;;  %8118 = vrsqrt.f32 %v5260_v10  ;;  %v5262_v27 = vadd.f32 1e-05, %v5246_v61  ;;  %v5232_v59 = vpop.xlane.xlu0 %5231 }
0x1402   :  { %v5261_v37 = vadd.f32 1e-05, %v5245_v9  ;;  %v5248_v17 = vmul.f32 0.015625, %v5232_v59 }
0x1403   :  { %v5307_v5 = vmul.f32 %v11524_v20, %v5285_v1  ;;  %v5330_v47 = vadd.f32 %v11537_v32, %v5308_v11  ;;  %v5229_v63 = vpop.xlane.xlu1 %5228 }
0x1404   :  { %8120 = vrsqrt.f32 %v5261_v37  ;;  %v5247_v62 = vmul.f32 0.015625, %v5229_v63  ;;  %v5264_v51 = vadd.f32 1e-05, %v5248_v17 }
0x1405   :  { %v8109_v21 = vpop.eup %8108  ;;  %v5329_v53 = vadd.f32 %v11537_v32, %v5307_v5  ;;  %8122 = vrsqrt.f32 %v5262_v27 }
0x1406   :  { %v8111_v34 = vpop.eup %8110  ;;  %v5287_v15 = vmul.f32 %v8109_v21, %v11512_v18  ;;  %v5263_v26 = vadd.f32 1e-05, %v5247_v62 }
0x1407   :  { %6403 = vmatmul.mubr.msk.f32.gmra.mxu0 %vm12416_vm3, %v5329_v53  ;;  %v5288_v54 = vmul.f32 %v8111_v34, %v11506_v23  ;;  %vm12434_vm3 = vmmov %vm12392_vm0 }
0x1408   :  { %5513 = vmatprep.mubr.f32.mxu0 %v12008_v16  ;;  %v5309_v24 = vmul.f32 %v11524_v20, %v5287_v15  ;;  %8124 = vrsqrt.f32 %v5263_v26 }
0x1409   :  { %v8113_v31 = vpop.eup %8112  ;;  %v5310_v29 = vmul.f32 %v11524_v20, %v5288_v54  ;;  %8126 = vrsqrt.f32 %v5264_v51 }
0x140a   :  { %v8115_v18 = vpop.eup %8114  ;;  %v5289_v55 = vmul.f32 %v8113_v31, %v11528_v33  ;;  %v5331_v23 = vadd.f32 %v11537_v32, %v5309_v24 }
0x140b   :  { %6404 = vmatmul.mubr.msk.f32.gmra.mxu0 %vm12417_vm12, %v5330_v47  ;;  %v5290_v60 = vmul.f32 %v8115_v18, %v11518_v52  ;;  %v5332_v19 = vadd.f32 %v11537_v32, %v5310_v29  ;;  %vm12435_vm12 = vmmov %vm12392_vm0 }
0x140c   :  { %5519 = vmatprep.mubr.f32.mxu0 %v12008_v16  ;;  %v5311_v48 = vmul.f32 %v11524_v20, %v5289_v55 }
0x140d   :  { %v8117_v33 = vpop.eup %8116  ;;  %v5312_v39 = vmul.f32 %v11524_v20, %v5290_v60 }
0x140e   :  { %v5291_v12 = vmul.f32 %v8117_v33, %v11546_v56  ;;  %v5333_v58 = vadd.f32 %v11537_v32, %v5311_v48  ;;  %v8119_v13 = vpop.eup %8118 }
0x140f   :  { %6405 = vmatmul.mubr.msk.f32.gmra.mxu0 %vm12418_vm13, %v5331_v23  ;;  %v5292_v46 = vmul.f32 %v8119_v13, %v11535_v4  ;;  %v5334_v50 = vadd.f32 %v11537_v32, %v5312_v39  ;;  %vm12436_vm13 = vmmov %vm12392_vm0 }
0x1410   :  { %5525 = vmatprep.mubr.f32.mxu0 %v12008_v16  ;;  %v5313_v41 = vmul.f32 %v11524_v20, %v5291_v12 }
0x1411   :  { %v8121_v52 = vpop.eup %8120  ;;  %v5314_v57 = vmul.f32 %v11524_v20, %v5292_v46 }
0x1412   :  { %v8123_v56 = vpop.eup %8122  ;;  %v5293_v44 = vmul.f32 %v8121_v52, %v11563_v38  ;;  %v5335_v6 = vadd.f32 %v11537_v32, %v5313_v41 }
0x1413   :  { %6406 = vmatmul.mubr.msk.f32.gmra.mxu0 %vm12419_vm7, %v5332_v19  ;;  %v5294_v4 = vmul.f32 %v8123_v56, %v11552_v30  ;;  %v5336_v35 = vadd.f32 %v11537_v32, %v5314_v57  ;;  %vm12437_vm7 = vmmov %vm12392_vm0 }
0x1414   :  { %5531 = vmatprep.mubr.f32.mxu0 %v12008_v16  ;;  %v5315_v8 = vmul.f32 %v11524_v20, %v5293_v44 }
0x1415   :  { %v8125_v45 = vpop.eup %8124  ;;  %v5316_v36 = vmul.f32 %v11524_v20, %v5294_v4 }
0x1416   :  { %v5295_v38 = vmul.f32 %v8125_v45, %v11578_v2  ;;  %v5337_v43 = vadd.f32 %v11537_v32, %v5315_v8  ;;  %v8127_v25 = vpop.eup %8126  ;;  %v12426_v2 = vld [vmem:[#allocation19_spill] sm:$0xff] }
0x1417   :  { %6407 = vmatmul.mubr.msk.f32.gmra.mxu0 %vm12420_vm8, %v5333_v58  ;;  %v5296_v30 = vmul.f32 %v8127_v25, %v11569_v7  ;;  %v5338_v1 = vadd.f32 %v11537_v32, %v5316_v36  ;;  %v12427_v42 = vsub.s32 0, %v12426_v2  ;;  %v12428_v7 = vsub.s32 1, %v12426_v2  ;;  %vm12438_vm8 = vmmov %vm12392_vm0 }
0x1418   :  { %5537 = vmatprep.mubr.f32.mxu0 %v12008_v16  ;;  %v5317_v40 = vmul.f32 %v11524_v20, %v5295_v38 }
0x1419   :  { %v11746_v5 = vrot.slane %v6398_v22, %v12427_v42  ;;  %v11752_v21 = vrot.slane %v6398_v22, %v12428_v7  ;;  %v5318_v10 = vmul.f32 %v11524_v20, %v5296_v30 }
0x141a   :  { %v5339_v9 = vadd.f32 %v11537_v32, %v5317_v40 }
0x141b   :  { %6408 = vmatmul.mubr.msk.f32.gmra.mxu0 %vm12421_vm9, %v5334_v50  ;;  %v5340_v15 = vadd.f32 %v11537_v32, %v5318_v10  ;;  %vm12439_vm9 = vmmov %vm12392_vm0 }
0x141c   :  { %5543 = vmatprep.mubr.f32.mxu0 %v12008_v16 }
0x141f   :  { %6409 = vmatmul.mubr.msk.f32.gmra.mxu0 %vm12422_vm10, %v5335_v6  ;;  %vm12440_vm10 = vmmov %vm12392_vm0 }
0x1420   :  { %5549 = vmatprep.mubr.f32.mxu0 %v12008_v16 }
0x1423   :  { %6410 = vmatmul.mubr.msk.f32.gmra.mxu0 %vm12423_vm11, %v5336_v35  ;;  %vm12441_vm11 = vmmov %vm12392_vm0 }
0x1424   :  { %5555 = vmatprep.mubr.f32.mxu0 %v12008_v16 }
0x1427   :  { %6411 = vmatmul.mubr.msk.f32.gmra.mxu0 %vm12424_vm5, %v5337_v43 }
0x1428   :  { %5561 = vmatprep.mubr.f32.mxu0 %v12008_v16 }
0x142b   :  { %6412 = vmatmul.mubr.msk.f32.gmra.mxu0 %vm12425_vm1, %v5338_v1 }
0x142c   :  { %5567 = vmatprep.mubr.f32.mxu0 %v12008_v16 }
0x142e   :  { %v5485_v28 = vpop.f32.mrf.mxu0 }
0x142f   :  { %6413 = vmatmul.mubr.msk.f32.gmra.mxu0 %vm12392_vm0, %v5339_v9  ;;  %v5486_v53 = vadd.f32 %v5485_v28, %v11746_v5 }
0x1430   :  { %v5487_v11 = vpop.f32.mrf.mxu0  ;;  %5573 = vmatprep.mubr.f32.mxu0 %v12008_v16 }
0x1431   :  { %v5488_v34 = vadd.f32 %v5487_v11, %v11752_v21  ;;  %v5580_v54 = vmax.f32 %v5486_v53, 0.0 }
0x1432   :  { %v5491_v61 = vpop.f32.mrf.mxu0 }
0x1433   :  { %v5581_v37 = vmax.f32 %v5488_v34, 0.0  ;;  %6414 = vmatmul.mubr.msk.f32.gmra.mxu0 %vm12429_vm15, %v5340_v15  ;;  %v5492_v47 = vadd.f32 %v5491_v61, %v11746_v5 }
0x1434   :  { %v5493_v20 = vpop.f32.mrf.mxu0 }
0x1435   :  { %v5494_v24 = vadd.f32 %v5493_v20, %v11752_v21  ;;  %5717 = vmatprep.mubr.f32.mxu1 %v5581_v37  ;;  %v5582_v27 = vmax.f32 %v5492_v47, 0.0 }
0x1436   :  { %v5497_v31 = vpop.f32.mrf.mxu0  ;;  %5718 = vmatmul.mubr.f32.vlgmr.msra.gmra.mxu1 %v5580_v54 }
0x1437   :  { %v5583_v63 = vmax.f32 %v5494_v24, 0.0  ;;  %v5498_v16 = vadd.f32 %v5497_v31, %v11746_v5 }
0x1438   :  { %v5499_v18 = vpop.f32.mrf.mxu0 }
0x1439   :  { %v5500_v32 = vadd.f32 %v5499_v18, %v11752_v21  ;;  %5722 = vmatprep.mubr.f32.mxu1 %v5583_v63  ;;  %v5584_v62 = vmax.f32 %v5498_v16, 0.0 }
0x143a   :  { %v5503_v55 = vpop.f32.mrf.mxu0  ;;  %5723 = vmatmul.mubr.f32.gmra.mxu1 %v5582_v27 }
0x143b   :  { %v5585_v59 = vmax.f32 %v5500_v32, 0.0  ;;  %v5504_v23 = vadd.f32 %v5503_v55, %v11746_v5 }
0x143c   :  { %v5505_v29 = vpop.f32.mrf.mxu0 }
0x143d   :  { %v5506_v17 = vadd.f32 %v5505_v29, %v11752_v21  ;;  %5727 = vmatprep.mubr.f32.mxu1 %v5585_v59  ;;  %v5586_v26 = vmax.f32 %v5504_v23, 0.0 }
0x143e   :  { %5728 = vmatmul.mubr.f32.gmra.mxu1 %v5584_v62 }
0x143f   :  { %v5587_v60 = vmax.f32 %v5506_v17, 0.0 }
0x1441   :  { %5732 = vmatprep.mubr.f32.mxu1 %v5587_v60 }
0x1442   :  { %5733 = vmatmul.mubr.f32.gmra.mxu1 %v5586_v26 }
0x14c7   :  { %v5509_v19 = vpop.f32.mrf.mxu0 }
0x14c8   :  { %v5510_v48 = vadd.f32 %v5509_v19, %v11746_v5 }
0x14c9   :  { %v5511_v33 = vpop.f32.mrf.mxu0 }
0x14ca   :  { %v5512_v51 = vadd.f32 %v5511_v33, %v11752_v21  ;;  %v5588_v39 = vmax.f32 %v5510_v48, 0.0 }
0x14cb   :  { %v5515_v12 = vpop.f32.mrf.mxu0 }
0x14cc   :  { %v5589_v58 = vmax.f32 %v5512_v51, 0.0  ;;  %v5516_v13 = vadd.f32 %v5515_v12, %v11746_v5 }
0x14cd   :  { %v5517_v52 = vpop.f32.mrf.mxu0 }
0x14ce   :  { %v5518_v46 = vadd.f32 %v5517_v52, %v11752_v21  ;;  %5737 = vmatprep.mubr.f32.mxu1 %v5589_v58  ;;  %v5590_v56 = vmax.f32 %v5516_v13, 0.0 }
0x14cf   :  { %v5521_v50 = vpop.f32.mrf.mxu0  ;;  %5738 = vmatmul.mubr.f32.gmra.mxu1 %v5588_v39 }
0x14d0   :  { %v5591_v41 = vmax.f32 %v5518_v46, 0.0  ;;  %v5522_v44 = vadd.f32 %v5521_v50, %v11746_v5 }
0x14d1   :  { %v5523_v6 = vpop.f32.mrf.mxu0 }
0x14d2   :  { %v5524_v57 = vadd.f32 %v5523_v6, %v11752_v21  ;;  %5741 = vmatprep.mubr.f32.mxu1 %v5591_v41  ;;  %v5592_v8 = vmax.f32 %v5522_v44, 0.0  ;;  %v6447_v6 = vld [vmem:[#allocation7 + $0x1] ss:$0 sm:$0xff] }
0x14d3   :  { %v5527_v4 = vpop.f32.mrf.mxu0  ;;  %5742 = vmatmul.mubr.f32.gmra.mxu1 %v5590_v56 }
0x14d4   :  { %v5593_v35 = vmax.f32 %v5524_v57, 0.0  ;;  %v5528_v45 = vadd.f32 %v5527_v4, %v11746_v5 }
0x14d5   :  { %v5529_v38 = vpop.f32.mrf.mxu0 }
0x14d6   :  { %v5530_v43 = vadd.f32 %v5529_v38, %v11752_v21  ;;  %5745 = vmatprep.mubr.f32.mxu1 %v5593_v35  ;;  %v5594_v30 = vmax.f32 %v5528_v45, 0.0 }
0x14d7   :  { %v5533_v36 = vpop.f32.mrf.mxu0  ;;  %5746 = vmatmul.mubr.f32.gmra.mxu1 %v5592_v8 }
0x14d8   :  { %v5595_v25 = vmax.f32 %v5530_v43, 0.0  ;;  %v5534_v1 = vadd.f32 %v5533_v36, %v11746_v5 }
0x14d9   :  { %v5535_v22 = vpop.f32.mrf.mxu0 }
0x14da   :  { %v5536_v40 = vadd.f32 %v5535_v22, %v11752_v21  ;;  %5749 = vmatprep.mubr.f32.mxu1 %v5595_v25  ;;  %v5596_v9 = vmax.f32 %v5534_v1, 0.0 }
0x14db   :  { %v5539_v2 = vpop.f32.mrf.mxu0  ;;  %5750 = vmatmul.mubr.f32.gmra.mxu1 %v5594_v30 }
0x14dc   :  { %v5597_v42 = vmax.f32 %v5536_v40, 0.0  ;;  %v5540_v7 = vadd.f32 %v5539_v2, %v11746_v5 }
0x14dd   :  { %v5541_v10 = vpop.f32.mrf.mxu0 }
0x14de   :  { %v5542_v28 = vadd.f32 %v5541_v10, %v11752_v21  ;;  %5753 = vmatprep.mubr.f32.mxu1 %v5597_v42  ;;  %v5598_v34 = vmax.f32 %v5540_v7, 0.0 }
0x14df   :  { %v5545_v53 = vpop.f32.mrf.mxu0  ;;  %5754 = vmatmul.mubr.f32.gmra.mxu1 %v5596_v9 }
0x14e0   :  { %v5599_v11 = vmax.f32 %v5542_v28, 0.0  ;;  %v5546_v15 = vadd.f32 %v5545_v53, %v11746_v5 }
0x14e1   :  { %v5547_v61 = vpop.f32.mrf.mxu0 }
0x14e2   :  { %v5548_v37 = vadd.f32 %v5547_v61, %v11752_v21  ;;  %5757 = vmatprep.mubr.f32.mxu1 %v5599_v11  ;;  %v5600_v20 = vmax.f32 %v5546_v15, 0.0 }
0x14e3   :  { %v5551_v54 = vpop.f32.mrf.mxu0  ;;  %5758 = vmatmul.mubr.f32.gmra.mxu1 %v5598_v34  ;;  %v5870_v34 = vld [vmem:[%s11872_s18 + $0x30] sm:$0xff] }
0x14e4   :  { %v5601_v47 = vmax.f32 %v5548_v37, 0.0  ;;  %v5552_v24 = vadd.f32 %v5551_v54, %v11746_v5 }
0x14e5   :  { %v5553_v31 = vpop.f32.mrf.mxu0 }
0x14e6   :  { %v5554_v63 = vadd.f32 %v5553_v31, %v11752_v21  ;;  %5761 = vmatprep.mubr.f32.mxu1 %v5601_v47  ;;  %v5602_v18 = vmax.f32 %v5552_v24, 0.0 }
0x14e7   :  { %v5557_v27 = vpop.f32.mrf.mxu0  ;;  %5762 = vmatmul.mubr.f32.gmra.mxu1 %v5600_v20 }
0x14e8   :  { %v5603_v16 = vmax.f32 %v5554_v63, 0.0  ;;  %v5558_v32 = vadd.f32 %v5557_v27, %v11746_v5 }
0x14e9   :  { %v5559_v55 = vpop.f32.mrf.mxu0 }
0x14ea   :  { %v5560_v59 = vadd.f32 %v5559_v55, %v11752_v21  ;;  %5765 = vmatprep.mubr.f32.mxu1 %v5603_v16  ;;  %v5604_v29 = vmax.f32 %v5558_v32, 0.0 }
0x14eb   :  { %v5563_v62 = vpop.f32.mrf.mxu0  ;;  %5766 = vmatmul.mubr.f32.gmra.mxu1 %v5602_v18 }
0x14ec   :  { %v5605_v23 = vmax.f32 %v5560_v59, 0.0  ;;  %v5564_v17 = vadd.f32 %v5563_v62, %v11746_v5 }
0x14ed   :  { %v5565_v60 = vpop.f32.mrf.mxu0 }
0x14ee   :  { %v5566_v26 = vadd.f32 %v5565_v60, %v11752_v21  ;;  %5769 = vmatprep.mubr.f32.mxu1 %v5605_v23  ;;  %v5606_v33 = vmax.f32 %v5564_v17, 0.0 }
0x14ef   :  { %v5569_v19 = vpop.f32.mrf.mxu0  ;;  %5770 = vmatmul.mubr.f32.gmra.mxu1 %v5604_v29 }
0x14f0   :  { %v5607_v48 = vmax.f32 %v5566_v26, 0.0  ;;  %v5570_v51 = vadd.f32 %v5569_v19, %v11746_v5 }
0x14f1   :  { %v5571_v12 = vpop.f32.mrf.mxu0 }
0x14f2   :  { %v5572_v58 = vadd.f32 %v5571_v12, %v11752_v21  ;;  %5773 = vmatprep.mubr.f32.mxu1 %v5607_v48  ;;  %v5608_v52 = vmax.f32 %v5570_v51, 0.0 }
0x14f3   :  { %v5575_v39 = vpop.f32.mrf.mxu0  ;;  %5774 = vmatmul.mubr.f32.gmra.mxu1 %v5606_v33 }
0x14f4   :  { %v5609_v13 = vmax.f32 %v5572_v58, 0.0  ;;  %v5576_v46 = vadd.f32 %v5575_v39, %v11746_v5 }
0x14f5   :  { %v5577_v50 = vpop.f32.mrf.mxu0 }
0x14f6   :  { %v5578_v41 = vadd.f32 %v5577_v50, %v11752_v21  ;;  %v7001_v56 = vpop.f32.mrf.mxu1  ;;  %5777 = vmatprep.mubr.f32.mxu1 %v5609_v13  ;;  %v5610_v4 = vmax.f32 %v5576_v46, 0.0 }
0x14f7   :  { %5778 = vmatmul.mubr.f32.gmra.mxu1 %v5608_v52  ;;  %v5867_v52 = vld [vmem:[%s11872_s18 + $0x18] sm:$0xff] }
0x14f8   :  { %v5611_v44 = vmax.f32 %v5578_v41, 0.0  ;;  %v7002_v57 = vpop.f32.mrf.mxu1 }
0x14f9   :  { %v7003_v35 = vadd.f32 %v7002_v57, %v7001_v56 }
0x14fa   :  { %v7004_v8 = vpop.f32.mrf.mxu1  ;;  %5781 = vmatprep.mubr.f32.mxu1 %v5611_v44 }
0x14fb   :  { %v5720_v45 = vadd.f32 %v7003_v35, %v6447_v6  ;;  %5782 = vmatmul.mubr.f32.gmra.mxu1 %v5610_v4 }
0x14fc   :  { %v7005_v38 = vpop.f32.mrf.mxu1 }
0x14fd   :  { %v7006_v43 = vadd.f32 %v7005_v38, %v7004_v8  ;;  %v5786_v36 = vadd.f32 %v5720_v45, %v11335_v14  ;;  %v5866_v8 = vld [vmem:[%s11872_s18 + $0x10] sm:$0xff]  ;;  %v5865_v38 = vld [vmem:[%s11872_s18 + $0x8] sm:$0xff] }
0x14fe   :  { %v7007_v5 = vpop.f32.mrf.mxu1 }
0x14ff   :  { %v5725_v25 = vadd.f32 %v7006_v43, %v6447_v6  ;;  %v5792_v21 = vsel %vm12430_vm4, %v5786_v36, 0.0 }
0x1500   :  { %v7008_v30 = vpop.f32.mrf.mxu1  ;;  %5793 = vadd.xlane.f32.xlu1 %v5792_v21 }
0x1501   :  { %v7009_v1 = vadd.f32 %v7008_v30, %v7007_v5  ;;  %v5787_v22 = vadd.f32 %v5725_v25, %v11331_v49  ;;  %v5871_v49 = vld [vmem:[%s11872_s18 + $0x38] sm:$0xff] }
0x1502   :  { %v7010_v40 = vpop.f32.mrf.mxu1  ;;  %7801 = vmatprep.subr.mxu0 %v5871_v49 }
0x1503   :  { %v5730_v2 = vadd.f32 %v7009_v1, %v6447_v6  ;;  %v5795_v42 = vsel %vm12431_vm6, %v5787_v22, 0.0  ;;  %7802 = vmatpush3.msra.mxu0 %v5871_v49 }
0x1504   :  { %5796 = vadd.xlane.f32.xlu0 %v5795_v42  ;;  %v7011_v9 = vpop.f32.mrf.mxu1  ;;  %7803 = vmatprep.subr.mxu0 %v5870_v34 }
0x1505   :  { %v7012_v7 = vadd.f32 %v7011_v9, %v7010_v40  ;;  %v5788_v10 = vadd.f32 %v5730_v2, %v11347_v0  ;;  %v5869_v0 = vld [vmem:[%s11872_s18 + $0x28] sm:$0xff]  ;;  %7804 = vmatpush3.msra.mxu0 %v5870_v34  ;;  %v6448_v34 = vld [vmem:[#allocation8] ss:$0 sm:$0xff] }
0x1506   :  { %7805 = vmatprep.subr.mxu0 %v5869_v0 }
0x1507   :  { %v5735_v28 = vadd.f32 %v7012_v7, %v6447_v6  ;;  %v5798_v14 = vsel %vm12432_vm2, %v5788_v10, 0.0  ;;  %7806 = vmatpush3.msra.mxu0 %v5869_v0 }
0x1508   :  { %5799 = vadd.xlane.f32.xlu1 %v5798_v14 }
0x1509   :  { %v5789_v53 = vadd.f32 %v5735_v28, %v11341_v3  ;;  %v5868_v3 = vld [vmem:[%s11872_s18 + $0x20] sm:$0xff] }
0x150a   :  { %7807 = vmatprep.subr.mxu0 %v5868_v3 }
0x150b   :  { %v5801_v11 = vsel %vm12433_vm14, %v5789_v53, 0.0  ;;  %7808 = vmatpush3.msra.mxu0 %v5868_v3  ;;  %v6449_v3 = vld [vmem:[#allocation10] ss:$0 sm:$0xff] }
0x150c   :  { %5802 = vadd.xlane.f32.xlu0 %v5801_v11  ;;  %7809 = vmatprep.subr.mxu0 %v5867_v52 }
0x150d   :  { %7810 = vmatpush3.msra.mxu0 %v5867_v52 }
0x150e   :  { %7811 = vmatprep.subr.mxu0 %v5866_v8 }
0x150f   :  { %7812 = vmatpush3.msra.mxu0 %v5866_v8 }
0x1510   :  { %7813 = vmatprep.subr.mxu0 %v5865_v38 }
0x1511   :  { %7814 = vmatpush3.msra.mxu0 %v5865_v38 }
0x1589   :  { %v5794_v15 = vpop.xlane.xlu1 %5793 }
0x158a   :  { %v5804_v61 = vmul.f32 0.015625, %v5794_v15 }
0x158c   :  { %v11811_v37 = vsub.f32 %v5786_v36, %v5804_v61  ;;  %v5864_v36 = vld [vmem:[%s11872_s18] sm:$0xff]  ;;  %s8298_s18 = smov [#allocation13]  }
0x158d   :  { %v5797_v54 = vpop.xlane.xlu0 %5796  ;;  %7815 = vmatprep.subr.mxu0 %v5864_v36  ;;  %s5985_s30 = sshll.u32 %s8298_s18, 4  ;;  %s5986_s30 = int_to_ptr.vmem [resolvable:$true] %s5985_s30 }
0x158e   :  { %v5805_v47 = vmul.f32 0.015625, %v5797_v54  ;;  %v5812_v20 = vmul.f32 %v11811_v37, %v11811_v37  ;;  %7816 = vmatpush3.msra.mxu0 %v5864_v36  ;;  %s8256_s12 = scalar_lea.vmem %s5986_s30, 512  ;;  %p8261_p3 = scmp.lt.s32.totalorder %s5986_s30, %s5986_s30 }
0x158f   :  { %v7013_v24 = vpop.f32.mrf.mxu1  ;;  %p8257_p2 = scmp.ne.s32.totalorder %s5986_s30, %s8256_s12  ;;  %p8262_p4 = scmp.lt.s32.totalorder %s8256_s12, %s8256_s12 }
0x1590   :  { %v11815_v31 = vsub.f32 %v5787_v22, %v5805_v47  ;;  %v5816_v63 = vsel %vm12434_vm3, %v5812_v20, 0.0 }
0x1591   :  { %v7014_v27 = vpop.f32.mrf.mxu1  ;;  %5817 = vadd.xlane.f32.xlu1 %v5816_v63  ;;  %v5800_v16 = vpop.xlane.xlu1 %5799  ;;  %p8263_p5 = por %p8262_p4, %p8261_p3 }
0x1592   :  { %v5806_v18 = vmul.f32 0.015625, %v5800_v16  ;;  %v5813_v32 = vmul.f32 %v11815_v31, %v11815_v31 }
0x1593   :  { %v7016_v55 = vpop.f32.mrf.mxu1  ;;  %p8264_p6 = pnand %p8263_p5, %p8257_p2 }
0x1594   :  { %v11820_v59 = vsub.f32 %v5788_v10, %v5806_v18  ;;  %v5819_v62 = vsel %vm12435_vm12, %v5813_v32, 0.0 }
0x1595   :  { %5820 = vadd.xlane.f32.xlu0 %v5819_v62  ;;  %v5803_v23 = vpop.xlane.xlu0 %5802  ;;  %v7017_v29 = vpop.f32.mrf.mxu1 }
0x1596   :  { %v5807_v17 = vmul.f32 0.015625, %v5803_v23  ;;  %v5814_v60 = vmul.f32 %v11820_v59, %v11820_v59 }
0x1597   :  { %v7019_v26 = vpop.f32.mrf.mxu1 }
0x1598   :  { %v11825_v19 = vsub.f32 %v5789_v53, %v5807_v17  ;;  %v5822_v48 = vsel %vm12436_vm13, %v5814_v60, 0.0 }
0x1599   :  { %v7020_v33 = vpop.f32.mrf.mxu1  ;;  %5823 = vadd.xlane.f32.xlu1 %v5822_v48 }
0x159a   :  { %v5815_v51 = vmul.f32 %v11825_v19, %v11825_v19 }
0x159b   :  { %v7022_v12 = vpop.f32.mrf.mxu1 }
0x159c   :  { %v5825_v58 = vsel %vm12437_vm7, %v5815_v51, 0.0 }
0x159d   :  { %5826 = vadd.xlane.f32.xlu0 %v5825_v58  ;;  %v7023_v39 = vpop.f32.mrf.mxu1 }
0x159f   :  { %v7025_v13 = vpop.f32.mrf.mxu1 }
0x15a1   :  { %v7026_v46 = vpop.f32.mrf.mxu1 }
0x15a3   :  { %v7028_v50 = vpop.f32.mrf.mxu1 }
0x15a5   :  { %v7029_v41 = vpop.f32.mrf.mxu1 }
0x15a7   :  { %v7031_v56 = vpop.f32.mrf.mxu1 }
0x15a9   :  { %v7032_v44 = vpop.f32.mrf.mxu1 }
0x15ab   :  { %v7034_v6 = vpop.f32.mrf.mxu1 }
0x15ad   :  { %v7035_v57 = vpop.f32.mrf.mxu1 }
0x15af   :  { %v7037_v4 = vpop.f32.mrf.mxu1 }
0x15b1   :  { %v7038_v35 = vpop.f32.mrf.mxu1 }
0x15b3   :  { %v7040_v45 = vpop.f32.mrf.mxu1 }
0x15b5   :  { %v7041_v43 = vpop.f32.mrf.mxu1 }
0x15b7   :  { %v7043_v5 = vpop.f32.mrf.mxu1 }
0x15b9   :  { %v7044_v25 = vpop.f32.mrf.mxu1 }
0x15bb   :  { %v7046_v21 = vpop.f32.mrf.mxu1 }
0x15bd   :  { %v7047_v30 = vpop.f32.mrf.mxu1 }
0x161a   :  { %v5818_v1 = vpop.xlane.xlu1 %5817 }
0x161b   :  { %v5828_v22 = vmul.f32 0.015625, %v5818_v1 }
0x161d   :  { %v5832_v40 = vadd.f32 1e-05, %v5828_v22 }
0x161e   :  { %v5821_v2 = vpop.xlane.xlu0 %5820 }
0x161f   :  { %8128 = vrsqrt.f32 %v5832_v40  ;;  %v5829_v42 = vmul.f32 0.015625, %v5821_v2 }
0x1621   :  { %v5833_v9 = vadd.f32 1e-05, %v5829_v42 }
0x1622   :  { %v5824_v7 = vpop.xlane.xlu1 %5823 }
0x1623   :  { %8130 = vrsqrt.f32 %v5833_v9  ;;  %v5830_v10 = vmul.f32 0.015625, %v5824_v7 }
0x1625   :  { %v5834_v28 = vadd.f32 1e-05, %v5830_v10 }
0x1626   :  { %v5827_v14 = vpop.xlane.xlu0 %5826 }
0x1627   :  { %8132 = vrsqrt.f32 %v5834_v28  ;;  %v5831_v53 = vmul.f32 0.015625, %v5827_v14 }
0x1629   :  { %v5835_v11 = vadd.f32 1e-05, %v5831_v53 }
0x162b   :  { %8134 = vrsqrt.f32 %v5835_v11 }
0x162c   :  { %v8129_v49 = vpop.eup %8128 }
0x162d   :  { %v5840_v0 = vmul.f32 %v8129_v49, %v11811_v37 }
0x162f   :  { %v5850_v15 = vmul.f32 %v6448_v34, %v5840_v0 }
0x1630   :  { %v8131_v61 = vpop.eup %8130 }
0x1631   :  { %v5841_v54 = vmul.f32 %v8131_v61, %v11815_v31  ;;  %v5860_v47 = vadd.f32 %v6449_v3, %v5850_v15  ;;  %v6450_v31 = vld [vmem:[#allocation11] ss:$0 sm:$0xff] }
0x1633   :  { %v5851_v20 = vmul.f32 %v6448_v34, %v5841_v54  ;;  %7817 = vmatprep.mubr.msk.f32.mxu0 %vm12438_vm8, %v5860_v47 }
0x1634   :  { %v8133_v24 = vpop.eup %8132 }
0x1635   :  { %v5861_v63 = vadd.f32 %v6449_v3, %v5851_v20  ;;  %v5842_v27 = vmul.f32 %v8133_v24, %v11820_v59 }
0x1637   :  { %7818 = vmatmul.mubr.msk.f32.vlgmr.msra.gmra.mxu0 %vm12439_vm9, %v5861_v63  ;;  %v5852_v16 = vmul.f32 %v6448_v34, %v5842_v27 }
0x1638   :  { %v8135_v18 = vpop.eup %8134 }
0x1639   :  { %v5843_v32 = vmul.f32 %v8135_v18, %v11825_v19  ;;  %v5862_v37 = vadd.f32 %v6449_v3, %v5852_v16 }
0x163b   :  { %7820 = vmatprep.mubr.msk.f32.mxu0 %vm12440_vm10, %v5862_v37  ;;  %v5853_v55 = vmul.f32 %v6448_v34, %v5843_v32 }
0x163d   :  { %v5863_v62 = vadd.f32 %v6449_v3, %v5853_v55 }
0x163f   :  { %7821 = vmatmul.mubr.msk.f32.gmra.mxu0 %vm12441_vm11, %v5863_v62 }
0x16f7   :  { %v7819_v23 = vpop.f32.mrf.mxu0 }
0x16f8   :  { %v5963_v29 = vadd.f32 %v7819_v23, %v6450_v31 }
0x16f9   :  { %v5957_v17 = vpop.f32.mrf.mxu0 }
0x16fa   :  { %5977 = vst [vmem:[#allocation13 + $0x8] sm:$0xff] %v5963_v29  ;;  %v5958_v60 = vadd.f32 %v6450_v31, %v5957_v17 }
0x16fc   :  { %5976 = vst [vmem:[#allocation13] sm:$0xff] %v5958_v60 }
0x16ff   :  { %v7822_v59 = vpop.f32.mrf.mxu0 }
0x1700   :  { %v5973_v26 = vadd.f32 %v7822_v59, %v6450_v31 }
0x1701   :  { %v5967_v48 = vpop.f32.mrf.mxu0 }
0x1702   :  { %5979 = vst [vmem:[#allocation13 + $0x18] sm:$0xff] %v5973_v26  ;;  %v5968_v19 = vadd.f32 %v6450_v31, %v5967_v48 }
0x1704   :  { %5978 = vst [vmem:[#allocation13 + $0x10] sm:$0xff] %v5968_v19 }
0x1705   :  { %8267 = shalt.err (!%p8264_p6)
}
0x1706   :  { %s8299_s0 = smov 128   ;;  %s8300_s21 = smov 8  }
0x1707   :  { %5991 = dma.vmem_to_hbm [thread:$0]  %s5986_s30, 512, %s11874_s20, [#allocation4], %s8299_s0, %s8299_s0, %s8300_s21  }
0x1708   :  { %8284 = dma.done.wait [#allocation4], 512  }
0x1709   :  { %8285 = vsyncadd [#allocation4], 4294966784 }
0x170a   :  { %5995 = vsyncpa [#allocation3], 1 }
0x170b   :  { %5996 = vsyncpa [#allocation6], 1 }
0x170c   :  { %5997 = vsyncpa [#allocation9], 1 }
0x170d   :  { %5998 = vsyncpa [#allocation12], 1 }
0x170e   :  { %5999 = vsyncpa [#allocation4], 1 }

</bundles_post_ra>
